<compile_context>
chip_gen: v7x
topology: tpu7x:2x2x1
jax: 0.10.0
libtpu: 0.0.40
codegen_flags: <defaults>
</compile_context>

<pallas_src>
from functools import partial

import jax
import jax.numpy as jnp
from jax.experimental import pallas as pl
from jax.experimental.pallas import tpu as pltpu


CPAD = 128   # conv channels zero-padded to one full lane register
ROWS = 256   # 14x14 spatial kept on a zero-bordered 16x16 grid -> 256 rows
HALO = 32    # sublane halo so every 3x3 tap is a static slice of the scratch


# ----------------------------------------------------------------------------
# Fused conv stack kernel: conv1 + ReLU + 2x2 maxpool + conv2 + ReLU + conv3
# + ReLU for ONE image per grid step.
# ----------------------------------------------------------------------------
def _conv_stack_kernel(patches_ref, w1_ref, b1_ref, w2_ref, b2_ref,
                       w3_ref, b3_ref, o_ref, a_ext):
    # Interior mask over the 16x16 grid (row = p*16 + q, valid p,q in [1,14]).
    r = jax.lax.broadcasted_iota(jnp.int32, (ROWS, CPAD), 0)
    p = jnp.right_shift(r, 4)
    q = jnp.bitwise_and(r, 15)
    interior = (p >= 1) & (p <= 14) & (q >= 1) & (q <= 14)

    # ---- conv1 (1 -> 24ch, zero-padded to 128) + ReLU fused with maxpool ----
    # patches_ref[0, k] holds the im2col rows of pool-window member k, already
    # laid out on the bordered 16x16 grid, so the 2x2 pool is an elementwise
    # max over 4 small GEMMs (no relayout, no separate pool kernel).
    m = None
    for k in range(4):
        d = jnp.dot(patches_ref[0, k], w1_ref[...],
                    preferred_element_type=jnp.float32)          # (256, 128)
        m = d if m is None else jnp.maximum(m, d)
    y = jnp.maximum(m + b1_ref[...], 0.0)
    y = jnp.where(interior, y, 0.0)                              # zero border

    # Zero the scratch halos (12 KB of VPU stores, kept per-step so each
    # megacore core is self-contained), then park the activation as bf16.
    a_ext[0:HALO, :] = jnp.zeros((HALO, CPAD), a_ext.dtype)
    a_ext[HALO + ROWS:HALO + ROWS + HALO, :] = jnp.zeros((HALO, CPAD),
                                                         a_ext.dtype)
    a_ext[HALO:HALO + ROWS, :] = y.astype(a_ext.dtype)

    def conv3x3(w_ref, b_ref, mask_border):
        acc = jnp.zeros((ROWS, CPAD), jnp.float32)
        for dy in range(3):
            for dx in range(3):
                s = (dy - 1) * 16 + (dx - 1)
                a_sh = a_ext[HALO + s:HALO + s + ROWS, :]   # shifted slice
                acc = acc + jnp.dot(a_sh, w_ref[dy * 3 + dx],
                                    preferred_element_type=jnp.float32)
        out = jnp.maximum(acc + b_ref[...], 0.0)
        if mask_border:
            out = jnp.where(interior, out, 0.0)
        return out

    # ---- conv2 (24 -> 64, padded 128 -> 128) + ReLU ----
    y2 = conv3x3(w2_ref, b2_ref, mask_border=True)
    a_ext[HALO:HALO + ROWS, :] = y2.astype(a_ext.dtype)

    # ---- conv3 (64 -> 96, padded 128 -> 128) + ReLU ----
    y3 = conv3x3(w3_ref, b3_ref, mask_border=False)   # border sliced off later
    o_ref[0] = y3.astype(o_ref.dtype)                 # lane-dense (256, 128)


def conv_stack(patches, w1, b1, w2, b2, w3, b3):
    N = patches.shape[0]
    return pl.pallas_call(
        _conv_stack_kernel,
        out_shape=jax.ShapeDtypeStruct((N, ROWS, CPAD), jnp.bfloat16),
        grid=(N,),
        in_specs=[
            pl.BlockSpec((1, 4, ROWS, 9), lambda i: (i, 0, 0, 0)),
            pl.BlockSpec((9, CPAD), lambda i: (0, 0)),
            pl.BlockSpec((1, CPAD), lambda i: (0, 0)),
            pl.BlockSpec((9, CPAD, CPAD), lambda i: (0, 0, 0)),
            pl.BlockSpec((1, CPAD), lambda i: (0, 0)),
            pl.BlockSpec((9, CPAD, CPAD), lambda i: (0, 0, 0)),
            pl.BlockSpec((1, CPAD), lambda i: (0, 0)),
        ],
        out_specs=pl.BlockSpec((1, ROWS, CPAD), lambda i: (i, 0, 0)),
        scratch_shapes=[pltpu.VMEM((ROWS + 2 * HALO, CPAD), jnp.bfloat16)],
        compiler_params=pltpu.CompilerParams(
            dimension_semantics=("parallel",)),
    )(patches, w1, b1, w2, b2, w3, b3)


# ----------------------------------------------------------------------------
# FC (Linear 18816 -> 512) + ReLU: bf16 weight stream, f32 accumulation.
# ----------------------------------------------------------------------------
def _fc_kernel(x_ref, w_ref, b_ref, o_ref, acc_ref):
    @pl.when(pl.program_id(1) == 0)
    def _():
        acc_ref[...] = jnp.zeros_like(acc_ref)

    acc_ref[...] += jnp.dot(x_ref[...], w_ref[...],
                            preferred_element_type=jnp.float32)

    @pl.when(pl.program_id(1) == pl.num_programs(1) - 1)
    def _():
        o_ref[...] = jnp.maximum(acc_ref[...] + b_ref[...],
                                 0.0).astype(o_ref.dtype)


def fc_bias_relu(x, w, b, *, tn=256, tk=2688):
    M, K = x.shape
    Kw, N = w.shape
    assert K == Kw and N % tn == 0 and K % tk == 0
    nn, nk = N // tn, K // tk
    return pl.pallas_call(
        _fc_kernel,
        out_shape=jax.ShapeDtypeStruct((M, N), jnp.float32),
        grid=(nn, nk),
        in_specs=[
            pl.BlockSpec((M, tk), lambda j, k: (0, k)),
            pl.BlockSpec((tk, tn), lambda j, k: (k, j)),
            pl.BlockSpec((1, tn), lambda j, k: (0, j)),
        ],
        out_specs=pl.BlockSpec((M, tn), lambda j, k: (0, j)),
        scratch_shapes=[pltpu.VMEM((M, tn), jnp.float32)],
        compiler_params=pltpu.CompilerParams(
            dimension_semantics=("parallel", "arbitrary")),
    )(x, w, b)


# ----------------------------------------------------------------------------
# Tiny XLA prologue: conv1 im2col with pool-major / bordered-grid row order.
# ----------------------------------------------------------------------------
def conv1_pool_patches(x):
    """x: (N, 28, 28) f32 -> (N, 4, 256, 9) bf16 im2col patches.

    Block k = dy2*2+dx2 selects the member of each 2x2 pool window; within a
    block, row = (1+ho)*16 + (1+wo) places the pooled position on the
    zero-bordered 16x16 grid the conv kernel uses, so conv1's GEMM output is
    already in conv2's input layout and the maxpool is a pure elementwise max.
    """
    N = x.shape[0]
    xp = jnp.pad(x, ((0, 0), (1, 1), (1, 1)))                    # (N, 30, 30)
    taps = jnp.stack([xp[:, ky:ky + 28, kx:kx + 28]
                      for ky in range(3) for kx in range(3)],
                     axis=-1)                                    # (N,28,28,9)
    taps = taps.reshape(N, 14, 2, 14, 2, 9)                      # h=2ho+dy2
    taps = jnp.transpose(taps, (0, 2, 4, 1, 3, 5))               # (N,2,2,14,14,9)
    taps = jnp.pad(taps, ((0, 0), (0, 0), (0, 0), (1, 1), (1, 1), (0, 0)))
    return taps.reshape(N, 4, ROWS, 9).astype(jnp.bfloat16)


# ----------------------------------------------------------------------------
# Siamese network forward
# ----------------------------------------------------------------------------
def forward_once(x_nchw, p):
    N = x_nchw.shape[0]
    patches = conv1_pool_patches(x_nchw.reshape(N, 28, 28))
    y = conv_stack(patches, p["w1"], p["b1"], p["w2"], p["b2"],
                   p["w3"], p["b3"])                       # (N, 256, 128) bf16
    # Interior 14x14 spatial, first 96 (real) channels, NHWC-flattened.  The
    # fc weight rows were permuted in prepare_params so this matches
    # PyTorch's `output.view(B, -1) @ fc1.weight.T` exactly.
    feat = y.reshape(N, 16, 16, CPAD)[:, 1:15, 1:15, :96].reshape(N, 18816)
    return fc_bias_relu(feat, p["w_fc"], p["b_fc"])        # (N, 512) f32


def siamese_forward(input1, input2, params):
    # Fuse both branches: one pass over the shared weights (fc1 read once).
    x = jnp.concatenate([input1, input2], axis=0)
    out = forward_once(x, params)
    B = input1.shape[0]
    return out[:B], out[B:]


# ----------------------------------------------------------------------------
# Deterministic synthetic parameters (shapes from the module's __init__)
# ----------------------------------------------------------------------------
def init_params(key):
    """Synthetic params in PyTorch-equivalent layouts: conv weights as HWIO,
    w_fc = fc1.weight.T with rows in PyTorch's NCHW-flatten order."""
    keys = jax.random.split(key, 8)
    s = 0.05
    return {
        "w1": jax.random.normal(keys[0], (3, 3, 1, 24), jnp.float32) * s,
        "b1": jax.random.normal(keys[1], (24,), jnp.float32) * s,
        "w2": jax.random.normal(keys[2], (3, 3, 24, 64), jnp.float32) * s,
        "b2": jax.random.normal(keys[3], (64,), jnp.float32) * s,
        "w3": jax.random.normal(keys[4], (3, 3, 64, 96), jnp.float32) * s,
        "b3": jax.random.normal(keys[5], (96,), jnp.float32) * s,
        "w_fc": jax.random.normal(keys[6], (18816, 512), jnp.float32) * 0.01,
        "b_fc": jax.random.normal(keys[7], (512,), jnp.float32) * s,
    }


def _pad_axis(a, axis, size):
    pad = [(0, 0)] * a.ndim
    pad[axis] = (0, size - a.shape[axis])
    return jnp.pad(a, pad)


def prepare_params(p):
    """One-time (outside jit) conversion to kernel-friendly layouts.

    Conv weights -> (9, Cin_pad, Cout_pad) bf16 GEMM taps, channels padded to
    128 with zero weights AND zero biases (so the pad channels stay exactly 0
    through ReLU / maxpool and are inert).  fc1 weight rows are permuted from
    PyTorch's NCHW-flatten order (c*196 + h*14 + w) to the kernel's NHWC
    order and cast to bf16 (the FC is HBM-bound on this 19 MB weight)."""
    w1 = _pad_axis(p["w1"].reshape(9, 24), 1, CPAD).astype(jnp.bfloat16)
    b1 = _pad_axis(p["b1"], 0, CPAD).reshape(1, CPAD).astype(jnp.float32)
    w2 = _pad_axis(_pad_axis(p["w2"].reshape(9, 24, 64), 1, CPAD), 2, CPAD)
    w2 = w2.astype(jnp.bfloat16)
    b2 = _pad_axis(p["b2"], 0, CPAD).reshape(1, CPAD).astype(jnp.float32)
    w3 = _pad_axis(_pad_axis(p["w3"].reshape(9, 64, 96), 1, CPAD), 2, CPAD)
    w3 = w3.astype(jnp.bfloat16)
    b3 = _pad_axis(p["b3"], 0, CPAD).reshape(1, CPAD).astype(jnp.float32)
    w_fc = jnp.transpose(p["w_fc"].reshape(96, 14, 14, 512), (1, 2, 0, 3))
    w_fc = w_fc.reshape(18816, 512).astype(jnp.bfloat16)
    b_fc = p["b_fc"].reshape(1, 512).astype(jnp.float32)
    return {"w1": w1, "b1": b1, "w2": w2, "b2": b2, "w3": w3, "b3": b3,
            "w_fc": w_fc, "b_fc": b_fc}


# ----------------------------------------------------------------------------
# Pure-JAX (XLA) reference of the intended module, for a sanity check.
# ----------------------------------------------------------------------------
def reference_forward_once(x_nchw, p0):
    dn = ("NHWC", "HWIO", "NHWC")
    x = jnp.transpose(x_nchw, (0, 2, 3, 1))
    y = jax.lax.conv_general_dilated(x, p0["w1"], (1, 1), "SAME",
                                     dimension_numbers=dn) + p0["b1"]
    y = jax.nn.relu(y)
    N, H, W, Cc = y.shape
    y = y.reshape(N, H // 2, 2, W // 2, 2, Cc).max(axis=(2, 4))   # maxpool 2x2
    y = jax.nn.relu(jax.lax.conv_general_dilated(
        y, p0["w2"], (1, 1), "SAME", dimension_numbers=dn) + p0["b2"])
    y = jax.nn.relu(jax.lax.conv_general_dilated(
        y, p0["w3"], (1, 1), "SAME", dimension_numbers=dn) + p0["b3"])
    feat = jnp.transpose(y, (0, 3, 1, 2)).reshape(N, -1)          # NCHW flatten
    return jax.nn.relu(feat @ p0["w_fc"] + p0["b_fc"])


if __name__ == "__main__":
    key = jax.random.PRNGKey(0)
    k1, k2, kp = jax.random.split(key, 3)
    raw = init_params(kp)
    params = prepare_params(raw)

    # Input shape implied by fc1's 18816 = 96*14*14 features: (B, 1, 28, 28).
    x1 = jax.random.normal(k1, (2, 1, 28, 28), jnp.float32)
    x2 = jax.random.normal(k2, (2, 1, 28, 28), jnp.float32)

    fwd = jax.jit(partial(siamese_forward, params=params))
    out1, out2 = fwd(x1, x2)
    jax.block_until_ready((out1, out2))

    assert out1.shape == (2, 512) and out2.shape == (2, 512)
    assert out1.dtype == jnp.float32 and out2.dtype == jnp.float32

    # Loose numerical check vs. the f32 XLA reference (bf16 feed -> ~1e-3 err).
    ref1 = reference_forward_once(x1, raw)
    ref2 = reference_forward_once(x2, raw)
    err = max(float(jnp.max(jnp.abs(out1 - ref1))),
              float(jnp.max(jnp.abs(out2 - ref2))))
    assert err < 1e-2, f"mismatch vs reference: max abs err = {err}"

    print("KERNEL_OK")
</pallas_src>

<mosaic_0001>
module attributes {stable_mosaic.version = 11 : i64} {
  func.func @_conv_stack_kernel(%arg0: i32, %arg1: memref<1x4x256x9xbf16, #tpu.memory_space<vmem>>, %arg2: memref<9x128xbf16, #tpu.memory_space<vmem>>, %arg3: memref<1x128xf32, #tpu.memory_space<vmem>>, %arg4: memref<9x128x128xbf16, #tpu.memory_space<vmem>>, %arg5: memref<1x128xf32, #tpu.memory_space<vmem>>, %arg6: memref<9x128x128xbf16, #tpu.memory_space<vmem>>, %arg7: memref<1x128xf32, #tpu.memory_space<vmem>>, %arg8: memref<1x256x128xbf16, #tpu.memory_space<vmem>>, %arg9: memref<320x128xbf16, #tpu.memory_space<vmem>>) attributes {dimension_semantics = [#tpu.dimension_semantics<parallel>], iteration_bounds = array<i64: 4>, scalar_prefetch = 0 : i64, scratch_operands = 1 : i64, tpu.core_type = #tpu.core_type<tc>, window_params = [{transform_indices = @transform_0, window_bounds = array<i64: 1, 4, 256, 9>}, {pipeline_mode = #tpu.pipeline_mode<synchronous>, transform_indices = @transform_1, window_bounds = array<i64: 9, 128>}, {pipeline_mode = #tpu.pipeline_mode<synchronous>, transform_indices = @transform_2, window_bounds = array<i64: 1, 128>}, {pipeline_mode = #tpu.pipeline_mode<synchronous>, transform_indices = @transform_3, window_bounds = array<i64: 9, 128, 128>}, {pipeline_mode = #tpu.pipeline_mode<synchronous>, transform_indices = @transform_4, window_bounds = array<i64: 1, 128>}, {pipeline_mode = #tpu.pipeline_mode<synchronous>, transform_indices = @transform_5, window_bounds = array<i64: 9, 128, 128>}, {pipeline_mode = #tpu.pipeline_mode<synchronous>, transform_indices = @transform_6, window_bounds = array<i64: 1, 128>}, {transform_indices = @transform_7, window_bounds = array<i64: 1, 256, 128>}]} {
    %0 = tpu.iota {dimensions = array<i32: 0>} : vector<256x128xi32>
    %c4_i32 = arith.constant 4 : i32
    %1 = vector.broadcast %c4_i32 : i32 to vector<256x128xi32>
    %2 = arith.shrsi %0, %1 : vector<256x128xi32>
    %c15_i32 = arith.constant 15 : i32
    %3 = vector.broadcast %c15_i32 : i32 to vector<256x128xi32>
    %4 = arith.andi %0, %3 : vector<256x128xi32>
    %c1_i32 = arith.constant 1 : i32
    %5 = vector.broadcast %c1_i32 : i32 to vector<256x128xi32>
    %6 = arith.cmpi sge, %2, %5 : vector<256x128xi32>
    %c14_i32 = arith.constant 14 : i32
    %7 = vector.broadcast %c14_i32 : i32 to vector<256x128xi32>
    %8 = arith.cmpi sle, %2, %7 : vector<256x128xi32>
    %9 = arith.andi %6, %8 : vector<256x128xi1>
    %c1_i32_0 = arith.constant 1 : i32
    %10 = vector.broadcast %c1_i32_0 : i32 to vector<256x128xi32>
    %11 = arith.cmpi sge, %4, %10 : vector<256x128xi32>
    %12 = arith.andi %9, %11 : vector<256x128xi1>
    %c14_i32_1 = arith.constant 14 : i32
    %13 = vector.broadcast %c14_i32_1 : i32 to vector<256x128xi32>
    %14 = arith.cmpi sle, %4, %13 : vector<256x128xi32>
    %15 = arith.andi %12, %14 : vector<256x128xi1>
    %c0 = arith.constant 0 : index
    %c0_2 = arith.constant 0 : index
    %c0_3 = arith.constant 0 : index
    %c0_4 = arith.constant 0 : index
    %16 = vector.load %arg1[%c0, %c0_2, %c0_3, %c0_4] : memref<1x4x256x9xbf16, #tpu.memory_space<vmem>>, vector<1x1x256x9xbf16>
    %17 = vector.shape_cast %16 : vector<1x1x256x9xbf16> to vector<256x9xbf16>
    %c0_5 = arith.constant 0 : index
    %c0_6 = arith.constant 0 : index
    %18 = vector.load %arg2[%c0_5, %c0_6] : memref<9x128xbf16, #tpu.memory_space<vmem>>, vector<9x128xbf16>
    %cst = arith.constant dense<0.000000e+00> : vector<256x128xf32>
    %19 = tpu.matmul %17, %18, %cst {dimension_numbers = #tpu.dot_dimension_numbers<[1], [0], [0], [1], [0, 0, 1, 1], [], []>} : vector<256x9xbf16>, vector<9x128xbf16>, vector<256x128xf32> -> vector<256x128xf32>
    %c0_7 = arith.constant 0 : index
    %c1 = arith.constant 1 : index
    %c0_8 = arith.constant 0 : index
    %c0_9 = arith.constant 0 : index
    %20 = vector.load %arg1[%c0_7, %c1, %c0_8, %c0_9] : memref<1x4x256x9xbf16, #tpu.memory_space<vmem>>, vector<1x1x256x9xbf16>
    %21 = vector.shape_cast %20 : vector<1x1x256x9xbf16> to vector<256x9xbf16>
    %c0_10 = arith.constant 0 : index
    %c0_11 = arith.constant 0 : index
    %22 = vector.load %arg2[%c0_10, %c0_11] : memref<9x128xbf16, #tpu.memory_space<vmem>>, vector<9x128xbf16>
    %cst_12 = arith.constant dense<0.000000e+00> : vector<256x128xf32>
    %23 = tpu.matmul %21, %22, %cst_12 {dimension_numbers = #tpu.dot_dimension_numbers<[1], [0], [0], [1], [0, 0, 1, 1], [], []>} : vector<256x9xbf16>, vector<9x128xbf16>, vector<256x128xf32> -> vector<256x128xf32>
    %24 = arith.maximumf %19, %23 : vector<256x128xf32>
    %c0_13 = arith.constant 0 : index
    %c2 = arith.constant 2 : index
    %c0_14 = arith.constant 0 : index
    %c0_15 = arith.constant 0 : index
    %25 = vector.load %arg1[%c0_13, %c2, %c0_14, %c0_15] : memref<1x4x256x9xbf16, #tpu.memory_space<vmem>>, vector<1x1x256x9xbf16>
    %26 = vector.shape_cast %25 : vector<1x1x256x9xbf16> to vector<256x9xbf16>
    %c0_16 = arith.constant 0 : index
    %c0_17 = arith.constant 0 : index
    %27 = vector.load %arg2[%c0_16, %c0_17] : memref<9x128xbf16, #tpu.memory_space<vmem>>, vector<9x128xbf16>
    %cst_18 = arith.constant dense<0.000000e+00> : vector<256x128xf32>
    %28 = tpu.matmul %26, %27, %cst_18 {dimension_numbers = #tpu.dot_dimension_numbers<[1], [0], [0], [1], [0, 0, 1, 1], [], []>} : vector<256x9xbf16>, vector<9x128xbf16>, vector<256x128xf32> -> vector<256x128xf32>
    %29 = arith.maximumf %24, %28 : vector<256x128xf32>
    %c0_19 = arith.constant 0 : index
    %c3 = arith.constant 3 : index
    %c0_20 = arith.constant 0 : index
    %c0_21 = arith.constant 0 : index
    %30 = vector.load %arg1[%c0_19, %c3, %c0_20, %c0_21] : memref<1x4x256x9xbf16, #tpu.memory_space<vmem>>, vector<1x1x256x9xbf16>
    %31 = vector.shape_cast %30 : vector<1x1x256x9xbf16> to vector<256x9xbf16>
    %c0_22 = arith.constant 0 : index
    %c0_23 = arith.constant 0 : index
    %32 = vector.load %arg2[%c0_22, %c0_23] : memref<9x128xbf16, #tpu.memory_space<vmem>>, vector<9x128xbf16>
    %cst_24 = arith.constant dense<0.000000e+00> : vector<256x128xf32>
    %33 = tpu.matmul %31, %32, %cst_24 {dimension_numbers = #tpu.dot_dimension_numbers<[1], [0], [0], [1], [0, 0, 1, 1], [], []>} : vector<256x9xbf16>, vector<9x128xbf16>, vector<256x128xf32> -> vector<256x128xf32>
    %34 = arith.maximumf %29, %33 : vector<256x128xf32>
    %c0_25 = arith.constant 0 : index
    %c0_26 = arith.constant 0 : index
    %35 = vector.load %arg3[%c0_25, %c0_26] : memref<1x128xf32, #tpu.memory_space<vmem>>, vector<1x128xf32>
    %36 = vector.broadcast %35 : vector<1x128xf32> to vector<256x128xf32>
    %37 = arith.addf %34, %36 : vector<256x128xf32>
    %cst_27 = arith.constant 0.000000e+00 : f32
    %38 = vector.broadcast %cst_27 : f32 to vector<256x128xf32>
    %39 = arith.maximumf %37, %38 : vector<256x128xf32>
    %cst_28 = arith.constant 0.000000e+00 : f32
    %40 = vector.broadcast %cst_28 : f32 to vector<256x128xf32>
    %41 = arith.select %15, %39, %40 : vector<256x128xi1>, vector<256x128xf32>
    %cst_29 = arith.constant 0.000000e+00 : bf16
    %42 = vector.broadcast %cst_29 : bf16 to vector<32x128xbf16>
    %c0_30 = arith.constant 0 : index
    %c0_31 = arith.constant 0 : index
    %43 = vector.load %arg9[%c0_30, %c0_31] : memref<320x128xbf16, #tpu.memory_space<vmem>>, vector<32x128xbf16>
    tpu.vector_store %arg9[%c0_30, %c0_31], %42 {strides = array<i32>} : memref<320x128xbf16, #tpu.memory_space<vmem>>, vector<32x128xbf16>,
    %cst_32 = arith.constant 0.000000e+00 : bf16
    %44 = vector.broadcast %cst_32 : bf16 to vector<32x128xbf16>
    %c288 = arith.constant 288 : index
    %c0_33 = arith.constant 0 : index
    %45 = vector.load %arg9[%c288, %c0_33] : memref<320x128xbf16, #tpu.memory_space<vmem>>, vector<32x128xbf16>
    tpu.vector_store %arg9[%c288, %c0_33], %44 {strides = array<i32>} : memref<320x128xbf16, #tpu.memory_space<vmem>>, vector<32x128xbf16>,
    %46 = arith.truncf %41 : vector<256x128xf32> to vector<256x128xbf16>
    %c32 = arith.constant 32 : index
    %c0_34 = arith.constant 0 : index
    %47 = vector.load %arg9[%c32, %c0_34] : memref<320x128xbf16, #tpu.memory_space<vmem>>, vector<256x128xbf16>
    tpu.vector_store %arg9[%c32, %c0_34], %46 {strides = array<i32>} : memref<320x128xbf16, #tpu.memory_space<vmem>>, vector<256x128xbf16>,
    %cst_35 = arith.constant 0.000000e+00 : f32
    %48 = vector.broadcast %cst_35 : f32 to vector<256x128xf32>
    %c15 = arith.constant 15 : index
    %c0_36 = arith.constant 0 : index
    %49 = vector.load %arg9[%c15, %c0_36] : memref<320x128xbf16, #tpu.memory_space<vmem>>, vector<256x128xbf16>
    %c0_37 = arith.constant 0 : index
    %c0_38 = arith.constant 0 : index
    %c0_39 = arith.constant 0 : index
    %50 = vector.load %arg4[%c0_37, %c0_38, %c0_39] : memref<9x128x128xbf16, #tpu.memory_space<vmem>>, vector<1x128x128xbf16>
    %51 = vector.shape_cast %50 : vector<1x128x128xbf16> to vector<128x128xbf16>
    %cst_40 = arith.constant dense<0.000000e+00> : vector<256x128xf32>
    %52 = tpu.matmul %49, %51, %cst_40 {dimension_numbers = #tpu.dot_dimension_numbers<[1], [0], [0], [1], [0, 0, 1, 1], [], []>} : vector<256x128xbf16>, vector<128x128xbf16>, vector<256x128xf32> -> vector<256x128xf32>
    %53 = arith.addf %48, %52 : vector<256x128xf32>
    %c16 = arith.constant 16 : index
    %c0_41 = arith.constant 0 : index
    %54 = vector.load %arg9[%c16, %c0_41] : memref<320x128xbf16, #tpu.memory_space<vmem>>, vector<256x128xbf16>
    %c1_42 = arith.constant 1 : index
    %c0_43 = arith.constant 0 : index
    %c0_44 = arith.constant 0 : index
    %55 = vector.load %arg4[%c1_42, %c0_43, %c0_44] : memref<9x128x128xbf16, #tpu.memory_space<vmem>>, vector<1x128x128xbf16>
    %56 = vector.shape_cast %55 : vector<1x128x128xbf16> to vector<128x128xbf16>
    %cst_45 = arith.constant dense<0.000000e+00> : vector<256x128xf32>
    %57 = tpu.matmul %54, %56, %cst_45 {dimension_numbers = #tpu.dot_dimension_numbers<[1], [0], [0], [1], [0, 0, 1, 1], [], []>} : vector<256x128xbf16>, vector<128x128xbf16>, vector<256x128xf32> -> vector<256x128xf32>
    %58 = arith.addf %53, %57 : vector<256x128xf32>
    %c17 = arith.constant 17 : index
    %c0_46 = arith.constant 0 : index
    %59 = vector.load %arg9[%c17, %c0_46] : memref<320x128xbf16, #tpu.memory_space<vmem>>, vector<256x128xbf16>
    %c2_47 = arith.constant 2 : index
    %c0_48 = arith.constant 0 : index
    %c0_49 = arith.constant 0 : index
    %60 = vector.load %arg4[%c2_47, %c0_48, %c0_49] : memref<9x128x128xbf16, #tpu.memory_space<vmem>>, vector<1x128x128xbf16>
    %61 = vector.shape_cast %60 : vector<1x128x128xbf16> to vector<128x128xbf16>
    %cst_50 = arith.constant dense<0.000000e+00> : vector<256x128xf32>
    %62 = tpu.matmul %59, %61, %cst_50 {dimension_numbers = #tpu.dot_dimension_numbers<[1], [0], [0], [1], [0, 0, 1, 1], [], []>} : vector<256x128xbf16>, vector<128x128xbf16>, vector<256x128xf32> -> vector<256x128xf32>
    %63 = arith.addf %58, %62 : vector<256x128xf32>
    %c31 = arith.constant 31 : index
    %c0_51 = arith.constant 0 : index
    %64 = vector.load %arg9[%c31, %c0_51] : memref<320x128xbf16, #tpu.memory_space<vmem>>, vector<256x128xbf16>
    %c3_52 = arith.constant 3 : index
    %c0_53 = arith.constant 0 : index
    %c0_54 = arith.constant 0 : index
    %65 = vector.load %arg4[%c3_52, %c0_53, %c0_54] : memref<9x128x128xbf16, #tpu.memory_space<vmem>>, vector<1x128x128xbf16>
    %66 = vector.shape_cast %65 : vector<1x128x128xbf16> to vector<128x128xbf16>
    %cst_55 = arith.constant dense<0.000000e+00> : vector<256x128xf32>
    %67 = tpu.matmul %64, %66, %cst_55 {dimension_numbers = #tpu.dot_dimension_numbers<[1], [0], [0], [1], [0, 0, 1, 1], [], []>} : vector<256x128xbf16>, vector<128x128xbf16>, vector<256x128xf32> -> vector<256x128xf32>
    %68 = arith.addf %63, %67 : vector<256x128xf32>
    %c32_56 = arith.constant 32 : index
    %c0_57 = arith.constant 0 : index
    %69 = vector.load %arg9[%c32_56, %c0_57] : memref<320x128xbf16, #tpu.memory_space<vmem>>, vector<256x128xbf16>
    %c4 = arith.constant 4 : index
    %c0_58 = arith.constant 0 : index
    %c0_59 = arith.constant 0 : index
    %70 = vector.load %arg4[%c4, %c0_58, %c0_59] : memref<9x128x128xbf16, #tpu.memory_space<vmem>>, vector<1x128x128xbf16>
    %71 = vector.shape_cast %70 : vector<1x128x128xbf16> to vector<128x128xbf16>
    %cst_60 = arith.constant dense<0.000000e+00> : vector<256x128xf32>
    %72 = tpu.matmul %69, %71, %cst_60 {dimension_numbers = #tpu.dot_dimension_numbers<[1], [0], [0], [1], [0, 0, 1, 1], [], []>} : vector<256x128xbf16>, vector<128x128xbf16>, vector<256x128xf32> -> vector<256x128xf32>
    %73 = arith.addf %68, %72 : vector<256x128xf32>
    %c33 = arith.constant 33 : index
    %c0_61 = arith.constant 0 : index
    %74 = vector.load %arg9[%c33, %c0_61] : memref<320x128xbf16, #tpu.memory_space<vmem>>, vector<256x128xbf16>
    %c5 = arith.constant 5 : index
    %c0_62 = arith.constant 0 : index
    %c0_63 = arith.constant 0 : index
    %75 = vector.load %arg4[%c5, %c0_62, %c0_63] : memref<9x128x128xbf16, #tpu.memory_space<vmem>>, vector<1x128x128xbf16>
    %76 = vector.shape_cast %75 : vector<1x128x128xbf16> to vector<128x128xbf16>
    %cst_64 = arith.constant dense<0.000000e+00> : vector<256x128xf32>
    %77 = tpu.matmul %74, %76, %cst_64 {dimension_numbers = #tpu.dot_dimension_numbers<[1], [0], [0], [1], [0, 0, 1, 1], [], []>} : vector<256x128xbf16>, vector<128x128xbf16>, vector<256x128xf32> -> vector<256x128xf32>
    %78 = arith.addf %73, %77 : vector<256x128xf32>
    %c47 = arith.constant 47 : index
    %c0_65 = arith.constant 0 : index
    %79 = vector.load %arg9[%c47, %c0_65] : memref<320x128xbf16, #tpu.memory_space<vmem>>, vector<256x128xbf16>
    %c6 = arith.constant 6 : index
    %c0_66 = arith.constant 0 : index
    %c0_67 = arith.constant 0 : index
    %80 = vector.load %arg4[%c6, %c0_66, %c0_67] : memref<9x128x128xbf16, #tpu.memory_space<vmem>>, vector<1x128x128xbf16>
    %81 = vector.shape_cast %80 : vector<1x128x128xbf16> to vector<128x128xbf16>
    %cst_68 = arith.constant dense<0.000000e+00> : vector<256x128xf32>
    %82 = tpu.matmul %79, %81, %cst_68 {dimension_numbers = #tpu.dot_dimension_numbers<[1], [0], [0], [1], [0, 0, 1, 1], [], []>} : vector<256x128xbf16>, vector<128x128xbf16>, vector<256x128xf32> -> vector<256x128xf32>
    %83 = arith.addf %78, %82 : vector<256x128xf32>
    %c48 = arith.constant 48 : index
    %c0_69 = arith.constant 0 : index
    %84 = vector.load %arg9[%c48, %c0_69] : memref<320x128xbf16, #tpu.memory_space<vmem>>, vector<256x128xbf16>
    %c7 = arith.constant 7 : index
    %c0_70 = arith.constant 0 : index
    %c0_71 = arith.constant 0 : index
    %85 = vector.load %arg4[%c7, %c0_70, %c0_71] : memref<9x128x128xbf16, #tpu.memory_space<vmem>>, vector<1x128x128xbf16>
    %86 = vector.shape_cast %85 : vector<1x128x128xbf16> to vector<128x128xbf16>
    %cst_72 = arith.constant dense<0.000000e+00> : vector<256x128xf32>
    %87 = tpu.matmul %84, %86, %cst_72 {dimension_numbers = #tpu.dot_dimension_numbers<[1], [0], [0], [1], [0, 0, 1, 1], [], []>} : vector<256x128xbf16>, vector<128x128xbf16>, vector<256x128xf32> -> vector<256x128xf32>
    %88 = arith.addf %83, %87 : vector<256x128xf32>
    %c49 = arith.constant 49 : index
    %c0_73 = arith.constant 0 : index
    %89 = vector.load %arg9[%c49, %c0_73] : memref<320x128xbf16, #tpu.memory_space<vmem>>, vector<256x128xbf16>
    %c8 = arith.constant 8 : index
    %c0_74 = arith.constant 0 : index
    %c0_75 = arith.constant 0 : index
    %90 = vector.load %arg4[%c8, %c0_74, %c0_75] : memref<9x128x128xbf16, #tpu.memory_space<vmem>>, vector<1x128x128xbf16>
    %91 = vector.shape_cast %90 : vector<1x128x128xbf16> to vector<128x128xbf16>
    %cst_76 = arith.constant dense<0.000000e+00> : vector<256x128xf32>
    %92 = tpu.matmul %89, %91, %cst_76 {dimension_numbers = #tpu.dot_dimension_numbers<[1], [0], [0], [1], [0, 0, 1, 1], [], []>} : vector<256x128xbf16>, vector<128x128xbf16>, vector<256x128xf32> -> vector<256x128xf32>
    %93 = arith.addf %88, %92 : vector<256x128xf32>
    %c0_77 = arith.constant 0 : index
    %c0_78 = arith.constant 0 : index
    %94 = vector.load %arg5[%c0_77, %c0_78] : memref<1x128xf32, #tpu.memory_space<vmem>>, vector<1x128xf32>
    %95 = vector.broadcast %94 : vector<1x128xf32> to vector<256x128xf32>
    %96 = arith.addf %93, %95 : vector<256x128xf32>
    %cst_79 = arith.constant 0.000000e+00 : f32
    %97 = vector.broadcast %cst_79 : f32 to vector<256x128xf32>
    %98 = arith.maximumf %96, %97 : vector<256x128xf32>
    %cst_80 = arith.constant 0.000000e+00 : f32
    %99 = vector.broadcast %cst_80 : f32 to vector<256x128xf32>
    %100 = arith.select %15, %98, %99 : vector<256x128xi1>, vector<256x128xf32>
    %101 = arith.truncf %100 : vector<256x128xf32> to vector<256x128xbf16>
    %c32_81 = arith.constant 32 : index
    %c0_82 = arith.constant 0 : index
    %102 = vector.load %arg9[%c32_81, %c0_82] : memref<320x128xbf16, #tpu.memory_space<vmem>>, vector<256x128xbf16>
    tpu.vector_store %arg9[%c32_81, %c0_82], %101 {strides = array<i32>} : memref<320x128xbf16, #tpu.memory_space<vmem>>, vector<256x128xbf16>,
    %cst_83 = arith.constant 0.000000e+00 : f32
    %103 = vector.broadcast %cst_83 : f32 to vector<256x128xf32>
    %c15_84 = arith.constant 15 : index
    %c0_85 = arith.constant 0 : index
    %104 = vector.load %arg9[%c15_84, %c0_85] : memref<320x128xbf16, #tpu.memory_space<vmem>>, vector<256x128xbf16>
    %c0_86 = arith.constant 0 : index
    %c0_87 = arith.constant 0 : index
    %c0_88 = arith.constant 0 : index
    %105 = vector.load %arg6[%c0_86, %c0_87, %c0_88] : memref<9x128x128xbf16, #tpu.memory_space<vmem>>, vector<1x128x128xbf16>
    %106 = vector.shape_cast %105 : vector<1x128x128xbf16> to vector<128x128xbf16>
    %cst_89 = arith.constant dense<0.000000e+00> : vector<256x128xf32>
    %107 = tpu.matmul %104, %106, %cst_89 {dimension_numbers = #tpu.dot_dimension_numbers<[1], [0], [0], [1], [0, 0, 1, 1], [], []>} : vector<256x128xbf16>, vector<128x128xbf16>, vector<256x128xf32> -> vector<256x128xf32>
    %108 = arith.addf %103, %107 : vector<256x128xf32>
    %c16_90 = arith.constant 16 : index
    %c0_91 = arith.constant 0 : index
    %109 = vector.load %arg9[%c16_90, %c0_91] : memref<320x128xbf16, #tpu.memory_space<vmem>>, vector<256x128xbf16>
    %c1_92 = arith.constant 1 : index
    %c0_93 = arith.constant 0 : index
    %c0_94 = arith.constant 0 : index
    %110 = vector.load %arg6[%c1_92, %c0_93, %c0_94] : memref<9x128x128xbf16, #tpu.memory_space<vmem>>, vector<1x128x128xbf16>
    %111 = vector.shape_cast %110 : vector<1x128x128xbf16> to vector<128x128xbf16>
    %cst_95 = arith.constant dense<0.000000e+00> : vector<256x128xf32>
    %112 = tpu.matmul %109, %111, %cst_95 {dimension_numbers = #tpu.dot_dimension_numbers<[1], [0], [0], [1], [0, 0, 1, 1], [], []>} : vector<256x128xbf16>, vector<128x128xbf16>, vector<256x128xf32> -> vector<256x128xf32>
    %113 = arith.addf %108, %112 : vector<256x128xf32>
    %c17_96 = arith.constant 17 : index
    %c0_97 = arith.constant 0 : index
    %114 = vector.load %arg9[%c17_96, %c0_97] : memref<320x128xbf16, #tpu.memory_space<vmem>>, vector<256x128xbf16>
    %c2_98 = arith.constant 2 : index
    %c0_99 = arith.constant 0 : index
    %c0_100 = arith.constant 0 : index
    %115 = vector.load %arg6[%c2_98, %c0_99, %c0_100] : memref<9x128x128xbf16, #tpu.memory_space<vmem>>, vector<1x128x128xbf16>
    %116 = vector.shape_cast %115 : vector<1x128x128xbf16> to vector<128x128xbf16>
    %cst_101 = arith.constant dense<0.000000e+00> : vector<256x128xf32>
    %117 = tpu.matmul %114, %116, %cst_101 {dimension_numbers = #tpu.dot_dimension_numbers<[1], [0], [0], [1], [0, 0, 1, 1], [], []>} : vector<256x128xbf16>, vector<128x128xbf16>, vector<256x128xf32> -> vector<256x128xf32>
    %118 = arith.addf %113, %117 : vector<256x128xf32>
    %c31_102 = arith.constant 31 : index
    %c0_103 = arith.constant 0 : index
    %119 = vector.load %arg9[%c31_102, %c0_103] : memref<320x128xbf16, #tpu.memory_space<vmem>>, vector<256x128xbf16>
    %c3_104 = arith.constant 3 : index
    %c0_105 = arith.constant 0 : index
    %c0_106 = arith.constant 0 : index
    %120 = vector.load %arg6[%c3_104, %c0_105, %c0_106] : memref<9x128x128xbf16, #tpu.memory_space<vmem>>, vector<1x128x128xbf16>
    %121 = vector.shape_cast %120 : vector<1x128x128xbf16> to vector<128x128xbf16>
    %cst_107 = arith.constant dense<0.000000e+00> : vector<256x128xf32>
    %122 = tpu.matmul %119, %121, %cst_107 {dimension_numbers = #tpu.dot_dimension_numbers<[1], [0], [0], [1], [0, 0, 1, 1], [], []>} : vector<256x128xbf16>, vector<128x128xbf16>, vector<256x128xf32> -> vector<256x128xf32>
    %123 = arith.addf %118, %122 : vector<256x128xf32>
    %c32_108 = arith.constant 32 : index
    %c0_109 = arith.constant 0 : index
    %124 = vector.load %arg9[%c32_108, %c0_109] : memref<320x128xbf16, #tpu.memory_space<vmem>>, vector<256x128xbf16>
    %c4_110 = arith.constant 4 : index
    %c0_111 = arith.constant 0 : index
    %c0_112 = arith.constant 0 : index
    %125 = vector.load %arg6[%c4_110, %c0_111, %c0_112] : memref<9x128x128xbf16, #tpu.memory_space<vmem>>, vector<1x128x128xbf16>
    %126 = vector.shape_cast %125 : vector<1x128x128xbf16> to vector<128x128xbf16>
    %cst_113 = arith.constant dense<0.000000e+00> : vector<256x128xf32>
    %127 = tpu.matmul %124, %126, %cst_113 {dimension_numbers = #tpu.dot_dimension_numbers<[1], [0], [0], [1], [0, 0, 1, 1], [], []>} : vector<256x128xbf16>, vector<128x128xbf16>, vector<256x128xf32> -> vector<256x128xf32>
    %128 = arith.addf %123, %127 : vector<256x128xf32>
    %c33_114 = arith.constant 33 : index
    %c0_115 = arith.constant 0 : index
    %129 = vector.load %arg9[%c33_114, %c0_115] : memref<320x128xbf16, #tpu.memory_space<vmem>>, vector<256x128xbf16>
    %c5_116 = arith.constant 5 : index
    %c0_117 = arith.constant 0 : index
    %c0_118 = arith.constant 0 : index
    %130 = vector.load %arg6[%c5_116, %c0_117, %c0_118] : memref<9x128x128xbf16, #tpu.memory_space<vmem>>, vector<1x128x128xbf16>
    %131 = vector.shape_cast %130 : vector<1x128x128xbf16> to vector<128x128xbf16>
    %cst_119 = arith.constant dense<0.000000e+00> : vector<256x128xf32>
    %132 = tpu.matmul %129, %131, %cst_119 {dimension_numbers = #tpu.dot_dimension_numbers<[1], [0], [0], [1], [0, 0, 1, 1], [], []>} : vector<256x128xbf16>, vector<128x128xbf16>, vector<256x128xf32> -> vector<256x128xf32>
    %133 = arith.addf %128, %132 : vector<256x128xf32>
    %c47_120 = arith.constant 47 : index
    %c0_121 = arith.constant 0 : index
    %134 = vector.load %arg9[%c47_120, %c0_121] : memref<320x128xbf16, #tpu.memory_space<vmem>>, vector<256x128xbf16>
    %c6_122 = arith.constant 6 : index
    %c0_123 = arith.constant 0 : index
    %c0_124 = arith.constant 0 : index
    %135 = vector.load %arg6[%c6_122, %c0_123, %c0_124] : memref<9x128x128xbf16, #tpu.memory_space<vmem>>, vector<1x128x128xbf16>
    %136 = vector.shape_cast %135 : vector<1x128x128xbf16> to vector<128x128xbf16>
    %cst_125 = arith.constant dense<0.000000e+00> : vector<256x128xf32>
    %137 = tpu.matmul %134, %136, %cst_125 {dimension_numbers = #tpu.dot_dimension_numbers<[1], [0], [0], [1], [0, 0, 1, 1], [], []>} : vector<256x128xbf16>, vector<128x128xbf16>, vector<256x128xf32> -> vector<256x128xf32>
    %138 = arith.addf %133, %137 : vector<256x128xf32>
    %c48_126 = arith.constant 48 : index
    %c0_127 = arith.constant 0 : index
    %139 = vector.load %arg9[%c48_126, %c0_127] : memref<320x128xbf16, #tpu.memory_space<vmem>>, vector<256x128xbf16>
    %c7_128 = arith.constant 7 : index
    %c0_129 = arith.constant 0 : index
    %c0_130 = arith.constant 0 : index
    %140 = vector.load %arg6[%c7_128, %c0_129, %c0_130] : memref<9x128x128xbf16, #tpu.memory_space<vmem>>, vector<1x128x128xbf16>
    %141 = vector.shape_cast %140 : vector<1x128x128xbf16> to vector<128x128xbf16>
    %cst_131 = arith.constant dense<0.000000e+00> : vector<256x128xf32>
    %142 = tpu.matmul %139, %141, %cst_131 {dimension_numbers = #tpu.dot_dimension_numbers<[1], [0], [0], [1], [0, 0, 1, 1], [], []>} : vector<256x128xbf16>, vector<128x128xbf16>, vector<256x128xf32> -> vector<256x128xf32>
    %143 = arith.addf %138, %142 : vector<256x128xf32>
    %c49_132 = arith.constant 49 : index
    %c0_133 = arith.constant 0 : index
    %144 = vector.load %arg9[%c49_132, %c0_133] : memref<320x128xbf16, #tpu.memory_space<vmem>>, vector<256x128xbf16>
    %c8_134 = arith.constant 8 : index
    %c0_135 = arith.constant 0 : index
    %c0_136 = arith.constant 0 : index
    %145 = vector.load %arg6[%c8_134, %c0_135, %c0_136] : memref<9x128x128xbf16, #tpu.memory_space<vmem>>, vector<1x128x128xbf16>
    %146 = vector.shape_cast %145 : vector<1x128x128xbf16> to vector<128x128xbf16>
    %cst_137 = arith.constant dense<0.000000e+00> : vector<256x128xf32>
    %147 = tpu.matmul %144, %146, %cst_137 {dimension_numbers = #tpu.dot_dimension_numbers<[1], [0], [0], [1], [0, 0, 1, 1], [], []>} : vector<256x128xbf16>, vector<128x128xbf16>, vector<256x128xf32> -> vector<256x128xf32>
    %148 = arith.addf %143, %147 : vector<256x128xf32>
    %c0_138 = arith.constant 0 : index
    %c0_139 = arith.constant 0 : index
    %149 = vector.load %arg7[%c0_138, %c0_139] : memref<1x128xf32, #tpu.memory_space<vmem>>, vector<1x128xf32>
    %150 = vector.broadcast %149 : vector<1x128xf32> to vector<256x128xf32>
    %151 = arith.addf %148, %150 : vector<256x128xf32>
    %cst_140 = arith.constant 0.000000e+00 : f32
    %152 = vector.broadcast %cst_140 : f32 to vector<256x128xf32>
    %153 = arith.maximumf %151, %152 : vector<256x128xf32>
    %154 = arith.truncf %153 : vector<256x128xf32> to vector<256x128xbf16>
    %c0_141 = arith.constant 0 : index
    %c0_142 = arith.constant 0 : index
    %c0_143 = arith.constant 0 : index
    %155 = vector.load %arg8[%c0_141, %c0_142, %c0_143] : memref<1x256x128xbf16, #tpu.memory_space<vmem>>, vector<1x256x128xbf16>
    %156 = vector.shape_cast %155 : vector<1x256x128xbf16> to vector<256x128xbf16>
    %157 = vector.shape_cast %154 : vector<256x128xbf16> to vector<1x256x128xbf16>
    tpu.vector_store %arg8[%c0_141, %c0_142, %c0_143], %157 {strides = array<i32>} : memref<1x256x128xbf16, #tpu.memory_space<vmem>>, vector<1x256x128xbf16>,
    return
  }
  func.func @transform_0(%arg0: i32) -> (i32, i32, i32, i32) {
    %c0_i32 = arith.constant 0 : i32
    %c0_i32_0 = arith.constant 0 : i32
    %c0_i32_1 = arith.constant 0 : i32
    %c0_i32_2 = arith.constant 0 : i32
    return %arg0, %c0_i32, %c0_i32_0, %c0_i32_1 : i32, i32, i32, i32
  }
  func.func @transform_1(%arg0: i32) -> (i32, i32) {
    %c0_i32 = arith.constant 0 : i32
    %c0_i32_0 = arith.constant 0 : i32
    %c0_i32_1 = arith.constant 0 : i32
    return %c0_i32, %c0_i32_0 : i32, i32
  }
  func.func @transform_2(%arg0: i32) -> (i32, i32) {
    %c0_i32 = arith.constant 0 : i32
    %c0_i32_0 = arith.constant 0 : i32
    %c0_i32_1 = arith.constant 0 : i32
    return %c0_i32, %c0_i32_0 : i32, i32
  }
  func.func @transform_3(%arg0: i32) -> (i32, i32, i32) {
    %c0_i32 = arith.constant 0 : i32
    %c0_i32_0 = arith.constant 0 : i32
    %c0_i32_1 = arith.constant 0 : i32
    %c0_i32_2 = arith.constant 0 : i32
    return %c0_i32, %c0_i32_0, %c0_i32_1 : i32, i32, i32
  }
  func.func @transform_4(%arg0: i32) -> (i32, i32) {
    %c0_i32 = arith.constant 0 : i32
    %c0_i32_0 = arith.constant 0 : i32
    %c0_i32_1 = arith.constant 0 : i32
    return %c0_i32, %c0_i32_0 : i32, i32
  }
  func.func @transform_5(%arg0: i32) -> (i32, i32, i32) {
    %c0_i32 = arith.constant 0 : i32
    %c0_i32_0 = arith.constant 0 : i32
    %c0_i32_1 = arith.constant 0 : i32
    %c0_i32_2 = arith.constant 0 : i32
    return %c0_i32, %c0_i32_0, %c0_i32_1 : i32, i32, i32
  }
  func.func @transform_6(%arg0: i32) -> (i32, i32) {
    %c0_i32 = arith.constant 0 : i32
    %c0_i32_0 = arith.constant 0 : i32
    %c0_i32_1 = arith.constant 0 : i32
    return %c0_i32, %c0_i32_0 : i32, i32
  }
  func.func @transform_7(%arg0: i32) -> (i32, i32, i32) {
    %c0_i32 = arith.constant 0 : i32
    %c0_i32_0 = arith.constant 0 : i32
    %c0_i32_1 = arith.constant 0 : i32
    return %arg0, %c0_i32, %c0_i32_0 : i32, i32, i32
  }
}

module attributes {stable_mosaic.version = 11 : i64} {
  func.func @_fc_kernel(%arg0: i32, %arg1: i32, %arg2: memref<4x2688xbf16, #tpu.memory_space<vmem>>, %arg3: memref<2688x256xbf16, #tpu.memory_space<vmem>>, %arg4: memref<1x256xf32, #tpu.memory_space<vmem>>, %arg5: memref<4x256xf32, #tpu.memory_space<vmem>>, %arg6: memref<4x256xf32, #tpu.memory_space<vmem>>) attributes {dimension_semantics = [#tpu.dimension_semantics<parallel>, #tpu.dimension_semantics<arbitrary>], iteration_bounds = array<i64: 2, 7>, scalar_prefetch = 0 : i64, scratch_operands = 1 : i64, tpu.core_type = #tpu.core_type<tc>, window_params = [{transform_indices = @transform_0, window_bounds = array<i64: 4, 2688>}, {transform_indices = @transform_1, window_bounds = array<i64: 2688, 256>}, {transform_indices = @transform_2, window_bounds = array<i64: 1, 256>}, {transform_indices = @transform_3, window_bounds = array<i64: 4, 256>}]} {
    %c0_i32 = arith.constant 0 : i32
    %0 = arith.cmpi eq, %arg1, %c0_i32 : i32
    %1 = arith.extui %0 : i1 to i32
    %c0_i32_0 = arith.constant 0 : i32
    %2 = arith.cmpi ne, %1, %c0_i32_0 : i32
    scf.if %2 {
      %cst_9 = arith.constant 0.000000e+00 : f32
      %12 = vector.broadcast %cst_9 : f32 to vector<4x256xf32>
      %c0_10 = arith.constant 0 : index
      %c0_11 = arith.constant 0 : index
      %13 = vector.load %arg6[%c0_10, %c0_11] : memref<4x256xf32, #tpu.memory_space<vmem>>, vector<4x256xf32>
      tpu.vector_store %arg6[%c0_10, %c0_11], %12 {strides = array<i32>} : memref<4x256xf32, #tpu.memory_space<vmem>>, vector<4x256xf32>,
    } else {
    }
    %c0 = arith.constant 0 : index
    %c0_1 = arith.constant 0 : index
    %3 = vector.load %arg6[%c0, %c0_1] : memref<4x256xf32, #tpu.memory_space<vmem>>, vector<4x256xf32>
    %c0_2 = arith.constant 0 : index
    %c0_3 = arith.constant 0 : index
    %4 = vector.load %arg2[%c0_2, %c0_3] : memref<4x2688xbf16, #tpu.memory_space<vmem>>, vector<4x2688xbf16>
    %c0_4 = arith.constant 0 : index
    %c0_5 = arith.constant 0 : index
    %5 = vector.load %arg3[%c0_4, %c0_5] : memref<2688x256xbf16, #tpu.memory_space<vmem>>, vector<2688x256xbf16>
    %cst = arith.constant dense<0.000000e+00> : vector<4x256xf32>
    %6 = tpu.matmul %4, %5, %cst {dimension_numbers = #tpu.dot_dimension_numbers<[1], [0], [0], [1], [0, 0, 1, 1], [], []>} : vector<4x2688xbf16>, vector<2688x256xbf16>, vector<4x256xf32> -> vector<4x256xf32>
    %7 = arith.addf %3, %6 : vector<4x256xf32>
    %c0_6 = arith.constant 0 : index
    %c0_7 = arith.constant 0 : index
    %8 = vector.load %arg6[%c0_6, %c0_7] : memref<4x256xf32, #tpu.memory_space<vmem>>, vector<4x256xf32>
    tpu.vector_store %arg6[%c0_6, %c0_7], %7 {strides = array<i32>} : memref<4x256xf32, #tpu.memory_space<vmem>>, vector<4x256xf32>,
    %c6_i32 = arith.constant 6 : i32
    %9 = arith.cmpi eq, %arg1, %c6_i32 : i32
    %10 = arith.extui %9 : i1 to i32
    %c0_i32_8 = arith.constant 0 : i32
    %11 = arith.cmpi ne, %10, %c0_i32_8 : i32
    scf.if %11 {
      %c0_9 = arith.constant 0 : index
      %c0_10 = arith.constant 0 : index
      %12 = vector.load %arg6[%c0_9, %c0_10] : memref<4x256xf32, #tpu.memory_space<vmem>>, vector<4x256xf32>
      %c0_11 = arith.constant 0 : index
      %c0_12 = arith.constant 0 : index
      %13 = vector.load %arg4[%c0_11, %c0_12] : memref<1x256xf32, #tpu.memory_space<vmem>>, vector<1x256xf32>
      %14 = vector.broadcast %13 : vector<1x256xf32> to vector<4x256xf32>
      %15 = arith.addf %12, %14 : vector<4x256xf32>
      %cst_13 = arith.constant 0.000000e+00 : f32
      %16 = vector.broadcast %cst_13 : f32 to vector<4x256xf32>
      %17 = arith.maximumf %15, %16 : vector<4x256xf32>
      %c0_14 = arith.constant 0 : index
      %c0_15 = arith.constant 0 : index
      %18 = vector.load %arg5[%c0_14, %c0_15] : memref<4x256xf32, #tpu.memory_space<vmem>>, vector<4x256xf32>
      tpu.vector_store %arg5[%c0_14, %c0_15], %17 {strides = array<i32>} : memref<4x256xf32, #tpu.memory_space<vmem>>, vector<4x256xf32>,
    } else {
    }
    return
  }
  func.func @transform_0(%arg0: i32, %arg1: i32) -> (i32, i32) {
    %c0_i32 = arith.constant 0 : i32
    %c0_i32_0 = arith.constant 0 : i32
    return %c0_i32, %arg1 : i32, i32
  }
  func.func @transform_1(%arg0: i32, %arg1: i32) -> (i32, i32) {
    %c0_i32 = arith.constant 0 : i32
    return %arg1, %arg0 : i32, i32
  }
  func.func @transform_2(%arg0: i32, %arg1: i32) -> (i32, i32) {
    %c0_i32 = arith.constant 0 : i32
    %c0_i32_0 = arith.constant 0 : i32
    return %c0_i32, %arg0 : i32, i32
  }
  func.func @transform_3(%arg0: i32, %arg1: i32) -> (i32, i32) {
    %c0_i32 = arith.constant 0 : i32
    %c0_i32_0 = arith.constant 0 : i32
    return %c0_i32, %arg0 : i32, i32
  }
}

</mosaic_0001>

<bundles_post_ra>
// kernel: siamese_forward.2
= control target key start
LH: loop header
LB: loop body
LE: loop exit
PB: predicated region body
PF: predicated region fallthrough
CT: control target
= control target key end

     0   :  { %12 = vsyncpa [#allocation4], 0  ;;  %s15940_s0 = inlined_call_operand.vmem [shape: bf16[4,4,256,9], index: 0, kind: input, shape index: {}]   ;;  %s15941_s1 = inlined_call_operand.hbm [shape: bf16[9,128], index: 1, kind: input, shape index: {}]   ;;  %s15942_s2 = inlined_call_operand.hbm [shape: f32[1,128], index: 2, kind: input, shape index: {}]   ;;  %s15943_s3 = inlined_call_operand.hbm [shape: bf16[9,128,128], index: 3, kind: input, shape index: {}]   ;;  %s15944_s4 = inlined_call_operand.hbm [shape: f32[1,128], index: 4, kind: input, shape index: {}]   ;;  %s15945_s5 = inlined_call_operand.hbm [shape: bf16[9,128,128], index: 5, kind: input, shape index: {}]   ;;  %s15946_s6 = inlined_call_operand.hbm [shape: f32[1,128], index: 6, kind: input, shape index: {}]   ;;  %s15947_s7 = inlined_call_operand.vmem [shape: bf16[4,256,128], index: 7, kind: output, shape index: {}]  }
   0x1   :  { %13 = vsyncpa [#allocation6], 0 }
   0x2   :  { %14 = vsyncpa [#allocation9], 0 }
   0x3   :  { %15 = vsyncpa [#allocation12], 0  ;;  %s12095_s24 = smov 0  }
   0x4 LB: > { %s12045_s25 = smov [#allocation5]   ;;  %s12101_s27 = sadd.s32 4294967295, %s12043_s24   ;;  %s12043_s24 = sphi %s12095_s24, %s21_s24  }
   0x5   : > { %s230_s26 = sshll.u32 %s12045_s25, 4  ;;  %p8839_p0 = scmp.ge.s32.totalorder %s12043_s24, 1  ;;  %s12106_s26 = int_to_ptr.vmem [resolvable:$true] %s230_s26 }
   0x6   : > { %p204_p1 = scmp.lt.s32.totalorder %s12043_s24, 5  ;;  %p15948_p2 = scmp.eq.s32.totalorder %s12101_s27, 0 }
   0x7   : > { %s12046_s29 = smov [#allocation8]   ;;  %s12047_s8 = smov [#allocation3]  }
   0x8   : > { %p12108_p3 = pnand %p8839_p0, %p204_p1  ;;  %s254_s30 = sshll.u32 %s12046_s29, 4  ;;  %s12114_s30 = int_to_ptr.vmem [resolvable:$true] %s254_s30 }
   0x9   : > { %s216_s9 = sshll.u32 %s12047_s8, 4  ;;  %s12048_s11 = smov [#allocation7]   ;;  %s12122_s9 = int_to_ptr.vmem [resolvable:$true] %s216_s9 }
   0xa   : > { %s16267_s28 = scalar_select %p12108_p3, 1, 0 }
   0xb   : > { %p11429_p4 = pneg %p12108_p3  ;;  %s12124_s12 = sshll.u32 %s12048_s11, 4  ;;  %s241_s12 = int_to_ptr.vmem [resolvable:$true] %s12124_s12 }
   0xc   : > { %s11853_s15 = scalar_lea.hbm %s15942_s2, 16 }
   0xd   : > { %p12118_p5 = pnand %p15948_p2, %p11429_p4  ;;  %p11854_p6 = scmp.ne.s32.totalorder %s15942_s2, %s11853_s15 }
   0xe   : > { %p11860_p10 = scmp.lt.u32.totalorder %s11853_s15, %s15942_s2 }
   0xf   : > { %p12134_p7 = pneg %p12118_p5 }
  0x11   : > { %p11856_p8 = pnand %p12134_p7, %p11854_p6 }
  0x13   : > { %p11857_p9 = pneg %p11856_p8 }
  0x15   : > { %p11862_p11 = pnand %p11860_p10, %p11857_p9 }
  0x17   : > { %11865 = shalt.err (!%p11862_p11)
}
  0x18   : > { %s11866_s21 = scalar_lea.vmem %s12106_s26, 16  ;;  %s11873_s22 = scalar_lea.vmem %s12106_s26, 32 }
  0x19   : > { %p11867_p12 = scmp.ne.s32.totalorder %s12106_s26, %s11866_s21  ;;  %p11874_p1 = scmp.lt.s32.totalorder %s12106_s26, %s12106_s26 }
  0x1a   : > { %p11875_p4 = scmp.lt.s32.totalorder %s11873_s22, %s11866_s21 }
  0x1b   : > { %p11869_p13 = pnand %p11867_p12, %p12134_p7 }
  0x1c   : > { %p11876_p6 = por %p11875_p4, %p11874_p1 }
  0x1d   : > { %p11870_p0 = pneg %p11869_p13 }
  0x1f   : > { %p11877_p8 = pnand %p11876_p6, %p11870_p0 }
  0x21   : > { %11880 = shalt.err (!%p11877_p8)
}
  0x22   : > { %11435 = dma.hbm_to_vmem [thread:$0]  (!%p12118_p5), %s15942_s2, 16, %s12106_s26, [#allocation6]  }
  0x23   : > { %s11881_s11 = scalar_lea.hbm %s15944_s4, 16 }
  0x24   : > { %p11882_p9 = scmp.ne.s32.totalorder %s15944_s4, %s11881_s11  ;;  %p11888_p12 = scmp.lt.u32.totalorder %s11881_s11, %s15944_s4 }
  0x26   : > { %p11884_p10 = pnand %p11882_p9, %p12134_p7 }
  0x28   : > { %p11885_p11 = pneg %p11884_p10 }
  0x2a   : > { %p11890_p13 = pnand %p11888_p12, %p11885_p11 }
  0x2c   : > { %11893 = shalt.err (!%p11890_p13)
}
  0x2d   : > { %s11894_s26 = scalar_lea.vmem %s12114_s30, 16  ;;  %s11901_s17 = scalar_lea.vmem %s12114_s30, 32 }
  0x2e   : > { %p11895_p0 = scmp.ne.s32.totalorder %s12114_s30, %s11894_s26  ;;  %p11902_p6 = scmp.lt.s32.totalorder %s12114_s30, %s12114_s30 }
  0x2f   : > { %p11903_p8 = scmp.lt.s32.totalorder %s11901_s17, %s11894_s26 }
  0x30   : > { %p11897_p1 = pnand %p11895_p0, %p12134_p7 }
  0x31   : > { %p11904_p9 = por %p11903_p8, %p11902_p6 }
  0x32   : > { %p11898_p4 = pneg %p11897_p1 }
  0x34   : > { %p11905_p10 = pnand %p11904_p9, %p11898_p4 }
  0x36   : > { %11908 = shalt.err (!%p11905_p10)
}
  0x37   : > { %11441 = dma.hbm_to_vmem [thread:$0]  (!%p12118_p5), %s15944_s4, 16, %s12114_s30, [#allocation9]  }
  0x38   : > { %s11909_s23 = scalar_lea.hbm %s15941_s1, 128 }
  0x39   : > { %p11910_p11 = scmp.ne.s32.totalorder %s15941_s1, %s11909_s23  ;;  %p11916_p0 = scmp.lt.u32.totalorder %s11909_s23, %s15941_s1 }
  0x3b   : > { %p11912_p12 = pnand %p11910_p11, %p12134_p7 }
  0x3d   : > { %p11913_p13 = pneg %p11912_p12 }
  0x3f   : > { %p11918_p1 = pnand %p11916_p0, %p11913_p13 }
  0x41   : > { %11921 = shalt.err (!%p11918_p1)
}
  0x42   : > { %s11922_s30 = scalar_lea.vmem %s12122_s9, 128  ;;  %p11930_p9 = scmp.lt.s32.totalorder %s12122_s9, %s12122_s9 }
  0x43   : > { %p11923_p4 = scmp.ne.s32.totalorder %s12122_s9, %s11922_s30  ;;  %p11931_p10 = scmp.lt.s32.totalorder %s11922_s30, %s11922_s30 }
  0x45   : > { %p11925_p6 = pnand %p11923_p4, %p12134_p7  ;;  %p11932_p11 = por %p11931_p10, %p11930_p9 }
  0x47   : > { %p11926_p8 = pneg %p11925_p6 }
  0x49   : > { %p11933_p12 = pnand %p11932_p11, %p11926_p8 }
  0x4b   : > { %11936 = shalt.err (!%p11933_p12)
}
  0x4c   : > { %s12049_s13 = smov 64   ;;  %s12050_s14 = smov 4  }
  0x4d   : > { %11432 = dma.hbm_to_vmem [thread:$0]  (!%p12118_p5), %s15941_s1, 128, %s12122_s9, [#allocation4], %s12049_s13, %s12049_s13, %s12050_s14  }
  0x4e   : > { %s11937_s19 = scalar_lea.hbm %s15943_s3, 9216 }
  0x4f   : > { %p11938_p13 = scmp.ne.s32.totalorder %s15943_s3, %s11937_s19  ;;  %p11944_p4 = scmp.lt.u32.totalorder %s11937_s19, %s15943_s3 }
  0x51   : > { %p11940_p0 = pnand %p11938_p13, %p12134_p7 }
  0x53   : > { %p11941_p1 = pneg %p11940_p0 }
  0x55   : > { %p11946_p6 = pnand %p11944_p4, %p11941_p1 }
  0x57   : > { %11949 = shalt.err (!%p11946_p6)
}
  0x58   : > { %s11950_s25 = scalar_lea.vmem %s241_s12, 9216  ;;  %p11958_p11 = scmp.lt.s32.totalorder %s241_s12, %s241_s12 }
  0x59   : > { %p11951_p8 = scmp.ne.s32.totalorder %s241_s12, %s11950_s25  ;;  %p11959_p12 = scmp.lt.s32.totalorder %s11950_s25, %s11950_s25 }
  0x5b   : > { %p11953_p9 = pnand %p11951_p8, %p12134_p7  ;;  %p11960_p2 = por %p11959_p12, %p11958_p11 }
  0x5d   : > { %p11954_p10 = pneg %p11953_p9 }
  0x5f   : > { %p11961_p3 = pnand %p11960_p2, %p11954_p10 }
  0x61   : > { %11964 = shalt.err (!%p11961_p3)
}
  0x62   : > { %11438 = dma.hbm_to_vmem [thread:$0]  (!%p12118_p5), %s15943_s3, 9216, %s241_s12, [#allocation6], %s12049_s13, %s12049_s13, %s12050_s14  }
  0x63   : > { %s12051_s8 = smov [#allocation10]   ;;  %s12052_s30 = smov [#allocation11]  }
  0x64   : > { %s264_s11 = sshll.u32 %s12051_s8, 4  ;;  %s278_s15 = sshll.u32 %s12052_s30, 4  ;;  %s265_s11 = int_to_ptr.vmem [resolvable:$true] %s264_s11  ;;  %s279_s15 = int_to_ptr.vmem [resolvable:$true] %s278_s15 }
  0x65   : > { %s11965_s17 = scalar_lea.hbm %s15945_s5, 9216 }
  0x66   : > { %p11966_p2 = scmp.ne.s32.totalorder %s15945_s5, %s11965_s17  ;;  %p11972_p0 = scmp.lt.u32.totalorder %s11965_s17, %s15945_s5 }
  0x68   : > { %p11968_p3 = pnand %p11966_p2, %p12134_p7 }
  0x6a   : > { %p11969_p13 = pneg %p11968_p3 }
  0x6c   : > { %p11974_p1 = pnand %p11972_p0, %p11969_p13 }
  0x6e   : > { %11977 = shalt.err (!%p11974_p1)
}
  0x6f   : > { %s11978_s12 = scalar_lea.vmem %s265_s11, 9216  ;;  %p11986_p9 = scmp.lt.s32.totalorder %s265_s11, %s265_s11 }
  0x70   : > { %p11979_p4 = scmp.ne.s32.totalorder %s265_s11, %s11978_s12  ;;  %p11987_p10 = scmp.lt.s32.totalorder %s11978_s12, %s11978_s12 }
  0x72   : > { %p11981_p6 = pnand %p11979_p4, %p12134_p7  ;;  %p11988_p11 = por %p11987_p10, %p11986_p9 }
  0x74   : > { %p11982_p8 = pneg %p11981_p6 }
  0x76   : > { %p11989_p12 = pnand %p11988_p11, %p11982_p8 }
  0x78   : > { %11992 = shalt.err (!%p11989_p12)
}
  0x79   : > { %11444 = dma.hbm_to_vmem [thread:$0]  (!%p12118_p5), %s15945_s5, 9216, %s265_s11, [#allocation9], %s12049_s13, %s12049_s13, %s12050_s14  }
  0x7a   : > { %s11993_s8 = scalar_lea.hbm %s15946_s6, 16 }
  0x7b   : > { %p11994_p2 = scmp.ne.s32.totalorder %s15946_s6, %s11993_s8  ;;  %p12000_p0 = scmp.lt.u32.totalorder %s11993_s8, %s15946_s6 }
  0x7d   : > { %p11996_p3 = pnand %p11994_p2, %p12134_p7 }
  0x7f   : > { %p11997_p13 = pneg %p11996_p3 }
  0x81   : > { %p12002_p1 = pnand %p12000_p0, %p11997_p13 }
  0x83   : > { %12005 = shalt.err (!%p12002_p1)
}
  0x84   : > { %s12006_s19 = scalar_lea.vmem %s279_s15, 16  ;;  %s12013_s13 = scalar_lea.vmem %s279_s15, 32 }
  0x85   : > { %p12007_p4 = scmp.ne.s32.totalorder %s279_s15, %s12006_s19  ;;  %p12014_p9 = scmp.lt.s32.totalorder %s279_s15, %s279_s15 }
  0x86   : > { %p12015_p10 = scmp.lt.s32.totalorder %s12013_s13, %s12006_s19 }
  0x87   : > { %p12009_p6 = pnand %p12007_p4, %p12134_p7 }
  0x88   : > { %p12016_p11 = por %p12015_p10, %p12014_p9 }
  0x89   : > { %p12010_p8 = pneg %p12009_p6 }
  0x8b   : > { %p12017_p12 = pnand %p12016_p11, %p12010_p8 }
  0x8d   : > { %12020 = shalt.err (!%p12017_p12)
}
  0x8e   : > { %11447 = dma.hbm_to_vmem [thread:$0]  (!%p12118_p5), %s15946_s6, 16, %s279_s15, [#allocation12]  }
  0x8f   : > { %p16270_p2 = scmp.ne.s32.totalorder %s16267_s28, 0 }
  0x91   : > { %299 = sbr.rel (%p16270_p2) target bundleno = 2095 (0x82f), region = 48 }
  0x98   : > { %p16271_p3 = scmp.eq.s32.totalorder %s12101_s27, 0 }
  0x9a   : > { %12026 = dma.done.wait (%p16271_p3), [#allocation4], 128   ;;  %p16272_p7 = pmov %p16271_p3 }
  0x9b   : > { %p16273_p13 = pmov %p16271_p3 }
  0x9c   : > { %12028 = vsyncadd (%p16272_p7), [#allocation4], 4294967168 }
  0x9d   : > { %12030 = dma.done.wait (%p16273_p13), [#allocation6], 9232   ;;  %p16274_p0 = pmov %p16271_p3 }
  0x9f   : > { %12032 = vsyncadd (%p16274_p0), [#allocation6], 4294958064  ;;  %p16275_p1 = pmov %p16274_p0 }
  0xa0   : > { %p16276_p5 = pmov %p16274_p0 }
  0xa1   : > { %12034 = dma.done.wait (%p16275_p1), [#allocation9], 9232  }
  0xa2   : > { %12036 = vsyncadd (%p16276_p5), [#allocation9], 4294958064  ;;  %p16277_p4 = pmov %p16274_p0 }
  0xa3   : > { %p16278_p6 = pmov %p16274_p0 }
  0xa4   : > { %12038 = dma.done.wait (%p16277_p4), [#allocation12], 16  }
  0xa5   : > { %12040 = vsyncadd (%p16278_p6), [#allocation12], 4294967280  ;;  %vm851_vm0 = vcmask 1043456   ;;  %p351_p8 = scmp.lt.s32.totalorder %s12101_s27, 3  ;;  %vm852_vm1 = vcmask 1044480   ;;  %v12053_v0 = vmov 65535  }
  0xa6   : > { %v853_v1 = vsel %vm851_vm0, 4294967295, %v12053_v0  ;;  %vm802_vm2 = vcmask 72704   ;;  %v11478_v3 = vld [vmem:[#allocation3] sm:$0x1f]   ;;  %v11543_v63 = vld [vmem:[#allocation7 + $0x40] sm:$0xff]  }
  0xa7   : > { %s17329_s27 = smov (!%p351_p8, %s12101_s27), 3  ;;  %v854_v2 = vsel %vm852_vm1, %v853_v1, 0 }
  0xa8   : > { %s9264_s28 = sshll.u32 %s17329_s27, 9  ;;  %v856_v5 = vand.u32 %v11478_v3, %v854_v2  ;;  %s9265_s20 = sshll.u32 %s17329_s27, 7 }
  0xa9   : > { %s12293_s15 = scalar_lea.vmem %s15940_s0, %s9264_s28  ;;  %s15891_s12 = scalar_lea.vmem %s15947_s7, %s9265_s20 }
  0xaa   : > { %v11479_v4 = vld [vmem:[%s12293_s15] sm:$0xff]   ;;  %v11481_v7 = vld [vmem:[%s12293_s15 + $0x8] sm:$0xff]   ;;  %9893 = vmatprep.subr.bf16.mxu0 %v856_v5  ;;  %9927 = vmatprep.subr.bf16.mxu1 %v856_v5  ;;  %v11483_v9 = vld [vmem:[%s12293_s15 + $0x10] sm:$0xff]  }
  0xab   : > { %v11480_v6 = vld [vmem:[%s12293_s15 + $0x80] sm:$0xff]   ;;  %9895 = vmatprep.mubr.msk.bf16.mxu0 %vm802_vm2, %v11479_v4  ;;  %v11482_v8 = vld [vmem:[%s12293_s15 + $0x88] sm:$0xff]   ;;  %9894 = vmatpush3.bf16.msra.mxu0 %v856_v5  ;;  %v11484_v10 = vld [vmem:[%s12293_s15 + $0x90] sm:$0xff]  }
  0xac   : > { %9928 = vmatpush3.bf16.msra.mxu1 %v856_v5  ;;  %9929 = vmatprep.mubr.msk.bf16.mxu1 %vm802_vm2, %v11480_v6  ;;  %v11485_v11 = vld [vmem:[%s12293_s15 + $0x18] sm:$0xff]   ;;  %v11487_v13 = vld [vmem:[%s12293_s15 + $0x20] sm:$0xff]   ;;  %v11489_v15 = vld [vmem:[%s12293_s15 + $0x28] sm:$0xff]  }
  0xad   : > { %9961 = vmatprep.subr.bf16.mxu0 %v856_v5  ;;  %9995 = vmatprep.subr.bf16.mxu1 %v856_v5  ;;  %v11486_v12 = vld [vmem:[%s12293_s15 + $0x98] sm:$0xff]   ;;  %v11488_v14 = vld [vmem:[%s12293_s15 + $0xa0] sm:$0xff]   ;;  %v11490_v16 = vld [vmem:[%s12293_s15 + $0xa8] sm:$0xff]  }
  0xae   : > { %9896 = vmatmul.mubr.msk.bf16.vlgmr.msra.gmra.mrb[0].mxu0 %vm802_vm2, %v11481_v7  ;;  %v11491_v17 = vld [vmem:[%s12293_s15 + $0x30] sm:$0xff]   ;;  %v11493_v19 = vld [vmem:[%s12293_s15 + $0x38] sm:$0xff]   ;;  %v11495_v21 = vld [vmem:[%s12293_s15 + $0x40] sm:$0xff]  }
  0xaf   : > { %9930 = vmatmul.mubr.msk.bf16.vlgmr.msra.gmra.mrb[0].mxu1 %vm802_vm2, %v11482_v8  ;;  %9962 = vmatpush3.bf16.msra.mxu0 %v856_v5  ;;  %v11492_v18 = vld [vmem:[%s12293_s15 + $0xb0] sm:$0xff]   ;;  %v11494_v20 = vld [vmem:[%s12293_s15 + $0xb8] sm:$0xff]   ;;  %v11496_v22 = vld [vmem:[%s12293_s15 + $0xc0] sm:$0xff]  }
  0xb0   : > { %9996 = vmatpush3.bf16.msra.mxu1 %v856_v5  ;;  %9899 = vmatprep.mubr.msk.bf16.mxu0 %vm802_vm2, %v11483_v9  ;;  %v11497_v23 = vld [vmem:[%s12293_s15 + $0x48] sm:$0xff]   ;;  %v11499_v25 = vld [vmem:[%s12293_s15 + $0x50] sm:$0xff]   ;;  %v11501_v27 = vld [vmem:[%s12293_s15 + $0x58] sm:$0xff]  }
  0xb1   : > { %9933 = vmatprep.mubr.msk.bf16.mxu1 %vm802_vm2, %v11484_v10  ;;  %v11498_v24 = vld [vmem:[%s12293_s15 + $0xc8] sm:$0xff]   ;;  %v11500_v26 = vld [vmem:[%s12293_s15 + $0xd0] sm:$0xff]   ;;  %v11502_v28 = vld [vmem:[%s12293_s15 + $0xd8] sm:$0xff]   ;;  %10029 = vmatprep.subr.bf16.mxu0 %v11543_v63 }
  0xb2   : > { %v11503_v29 = vld [vmem:[%s12293_s15 + $0x60] sm:$0xff]   ;;  %v11505_v31 = vld [vmem:[%s12293_s15 + $0x68] sm:$0xff]   ;;  %v11507_v33 = vld [vmem:[%s12293_s15 + $0x70] sm:$0xff]  }
  0xb3   : > { %v11504_v30 = vld [vmem:[%s12293_s15 + $0xe0] sm:$0xff]   ;;  %v11506_v32 = vld [vmem:[%s12293_s15 + $0xe8] sm:$0xff]   ;;  %v11508_v34 = vld [vmem:[%s12293_s15 + $0xf0] sm:$0xff]  }
  0xb4   : > { %v11509_v35 = vld [vmem:[%s12293_s15 + $0x78] sm:$0xff]   ;;  %v11511_v37 = vld [vmem:[%s12293_s15 + $0x100] sm:$0xff]   ;;  %v11513_v39 = vld [vmem:[%s12293_s15 + $0x108] sm:$0xff]  }
  0xb5   : > { %v11510_v36 = vld [vmem:[%s12293_s15 + $0xf8] sm:$0xff]   ;;  %v11512_v38 = vld [vmem:[%s12293_s15 + $0x180] sm:$0xff]   ;;  %v11514_v40 = vld [vmem:[%s12293_s15 + $0x188] sm:$0xff]  }
  0xb6   : > { %9900 = vmatmul.mubr.msk.bf16.gmra.mrb[4].mxu0 %vm802_vm2, %v11485_v11  ;;  %v11515_v41 = vld [vmem:[%s12293_s15 + $0x110] sm:$0xff]   ;;  %v11517_v43 = vld [vmem:[%s12293_s15 + $0x118] sm:$0xff]   ;;  %v11519_v45 = vld [vmem:[%s12293_s15 + $0x120] sm:$0xff]  }
  0xb7   : > { %9934 = vmatmul.mubr.msk.bf16.gmra.mrb[4].mxu1 %vm802_vm2, %v11486_v12  ;;  %9903 = vmatprep.mubr.msk.bf16.mxu0 %vm802_vm2, %v11487_v13  ;;  %v11516_v42 = vld [vmem:[%s12293_s15 + $0x190] sm:$0xff]   ;;  %v11518_v44 = vld [vmem:[%s12293_s15 + $0x198] sm:$0xff]   ;;  %v11520_v46 = vld [vmem:[%s12293_s15 + $0x1a0] sm:$0xff]   ;;  %v15950_v13 = vmov 0  }
  0xb8   : > { %9937 = vmatprep.mubr.msk.bf16.mxu1 %vm802_vm2, %v11488_v14  ;;  %v11521_v47 = vld [vmem:[%s12293_s15 + $0x128] sm:$0xff]   ;;  %v11523_v49 = vld [vmem:[%s12293_s15 + $0x130] sm:$0xff]   ;;  %v11525_v51 = vld [vmem:[%s12293_s15 + $0x138] sm:$0xff]   ;;  %2185 = vst [vmem:[#allocation2 + $0x8] sm:$0xff] %v15950_v13 }
  0xb9   : > { %v11522_v48 = vld [vmem:[%s12293_s15 + $0x1a8] sm:$0xff]   ;;  %v11524_v50 = vld [vmem:[%s12293_s15 + $0x1b0] sm:$0xff]   ;;  %v11526_v52 = vld [vmem:[%s12293_s15 + $0x1b8] sm:$0xff]   ;;  %2184 = vst [vmem:[#allocation2] sm:$0xff] %v15950_v13 }
  0xba   : > { %v11527_v53 = vld [vmem:[%s12293_s15 + $0x140] sm:$0xff]   ;;  %v11529_v55 = vld [vmem:[%s12293_s15 + $0x148] sm:$0xff]   ;;  %v11531_v57 = vld [vmem:[%s12293_s15 + $0x150] sm:$0xff]   ;;  %2186 = vst [vmem:[#allocation2 + $0x90] sm:$0xff] %v15950_v13 }
  0xbb   : > { %v11528_v54 = vld [vmem:[%s12293_s15 + $0x1c0] sm:$0xff]   ;;  %v11530_v56 = vld [vmem:[%s12293_s15 + $0x1c8] sm:$0xff]   ;;  %v11532_v58 = vld [vmem:[%s12293_s15 + $0x1d0] sm:$0xff]   ;;  %2187 = vst [vmem:[#allocation2 + $0x98] sm:$0xff] %v15950_v13 }
  0xbc   : > { %v11533_v59 = vld [vmem:[%s12293_s15 + $0x158] sm:$0xff]   ;;  %v11535_v61 = vld [vmem:[%s12293_s15 + $0x160] sm:$0xff]   ;;  %v11537_v0 = vld [vmem:[%s12293_s15 + $0x168] sm:$0xff]  }
  0xbd   : > { %v11534_v60 = vld [vmem:[%s12293_s15 + $0x1d8] sm:$0xff]   ;;  %v11536_v62 = vld [vmem:[%s12293_s15 + $0x1e0] sm:$0xff]   ;;  %v11538_v1 = vld [vmem:[%s12293_s15 + $0x1e8] sm:$0xff]  }
  0xbe   : > { %9904 = vmatmul.mubr.msk.bf16.gmra.mrb[8].mxu0 %vm802_vm2, %v11489_v15  ;;  %v11539_v2 = vld [vmem:[%s12293_s15 + $0x170] sm:$0xff]   ;;  %v11541_v5 = vld [vmem:[%s12293_s15 + $0x178] sm:$0xff]   ;;  %v11546_v8 = vld [vmem:[#allocation7 + $0x58] sm:$0xff]  }
  0xbf   : > { %9938 = vmatmul.mubr.msk.bf16.gmra.mrb[8].mxu1 %vm802_vm2, %v11490_v16  ;;  %9907 = vmatprep.mubr.msk.bf16.mxu0 %vm802_vm2, %v11491_v17  ;;  %v11540_v3 = vld [vmem:[%s12293_s15 + $0x1f0] sm:$0xff]   ;;  %v11542_v6 = vld [vmem:[%s12293_s15 + $0x1f8] sm:$0xff]   ;;  %v11550_v12 = vld [vmem:[#allocation7 + $0x78] sm:$0xff]  }
  0xc0   : > { %9941 = vmatprep.mubr.msk.bf16.mxu1 %vm802_vm2, %v11492_v18  ;;  %v11544_v4 = vld [vmem:[#allocation7 + $0x48] sm:$0xff]   ;;  %v11545_v7 = vld [vmem:[#allocation7 + $0x50] sm:$0xff]   ;;  %v11547_v9 = vld [vmem:[#allocation7 + $0x60] sm:$0xff]  }
  0xc1   : > { %v11548_v10 = vld [vmem:[#allocation7 + $0x68] sm:$0xff]   ;;  %v11549_v11 = vld [vmem:[#allocation7 + $0x70] sm:$0xff]   ;;  %v12429_v14 = vld [vmem:[#allocation7] sm:$0xff]  }
  0xc6   : > { %9908 = vmatmul.mubr.msk.bf16.gmra.mrb[12].mxu0 %vm802_vm2, %v11493_v19 }
  0xc7   : > { %9942 = vmatmul.mubr.msk.bf16.gmra.mrb[12].mxu1 %vm802_vm2, %v11494_v20  ;;  %9911 = vmatprep.mubr.msk.bf16.mxu0 %vm802_vm2, %v11495_v21 }
  0xc8   : > { %9945 = vmatprep.mubr.msk.bf16.mxu1 %vm802_vm2, %v11496_v22 }
  0xce   : > { %9912 = vmatmul.mubr.msk.bf16.gmra.mrb[16].mxu0 %vm802_vm2, %v11497_v23 }
  0xcf   : > { %9946 = vmatmul.mubr.msk.bf16.gmra.mrb[16].mxu1 %vm802_vm2, %v11498_v24  ;;  %9915 = vmatprep.mubr.msk.bf16.mxu0 %vm802_vm2, %v11499_v25 }
  0xd0   : > { %9949 = vmatprep.mubr.msk.bf16.mxu1 %vm802_vm2, %v11500_v26 }
  0xd6   : > { %9916 = vmatmul.mubr.msk.bf16.gmra.mrb[20].mxu0 %vm802_vm2, %v11501_v27 }
  0xd7   : > { %9950 = vmatmul.mubr.msk.bf16.gmra.mrb[20].mxu1 %vm802_vm2, %v11502_v28  ;;  %9919 = vmatprep.mubr.msk.bf16.mxu0 %vm802_vm2, %v11503_v29 }
  0xd8   : > { %9953 = vmatprep.mubr.msk.bf16.mxu1 %vm802_vm2, %v11504_v30 }
  0xde   : > { %9920 = vmatmul.mubr.msk.bf16.gmra.mrb[24].mxu0 %vm802_vm2, %v11505_v31 }
  0xdf   : > { %9954 = vmatmul.mubr.msk.bf16.gmra.mrb[24].mxu1 %vm802_vm2, %v11506_v32  ;;  %9923 = vmatprep.mubr.msk.bf16.mxu0 %vm802_vm2, %v11507_v33 }
  0xe0   : > { %9957 = vmatprep.mubr.msk.bf16.mxu1 %vm802_vm2, %v11508_v34 }
  0xe6   : > { %9924 = vmatmul.mubr.msk.bf16.gmra.mrb[28].mxu0 %vm802_vm2, %v11509_v35 }
  0xe7   : > { %9958 = vmatmul.mubr.msk.bf16.gmra.mrb[28].mxu1 %vm802_vm2, %v11510_v36  ;;  %9963 = vmatprep.mubr.msk.bf16.mxu0 %vm802_vm2, %v11511_v37 }
  0xe8   : > { %9997 = vmatprep.mubr.msk.bf16.mxu1 %vm802_vm2, %v11512_v38 }
  0xee   : > { %9964 = vmatmul.mubr.msk.bf16.vlgmr.msra.gmra.mrb[32].mxu0 %vm802_vm2, %v11513_v39 }
  0xef   : > { %9998 = vmatmul.mubr.msk.bf16.vlgmr.msra.gmra.mrb[32].mxu1 %vm802_vm2, %v11514_v40  ;;  %9967 = vmatprep.mubr.msk.bf16.mxu0 %vm802_vm2, %v11515_v41 }
  0xf0   : > { %10001 = vmatprep.mubr.msk.bf16.mxu1 %vm802_vm2, %v11516_v42  ;;  %10030 = vmatpush3.bf16.msra.mxu0 %v11543_v63 }
  0xf1   : > { %10031 = vmatprep.subr.bf16.mxu0 %v11544_v4 }
  0xf4   : > { %10032 = vmatpush3.bf16.msra.mxu0 %v11544_v4 }
  0xf5   : > { %10033 = vmatprep.subr.bf16.mxu0 %v11545_v7 }
  0xf6   : > { %9968 = vmatmul.mubr.msk.bf16.gmra.mrb[36].mxu0 %vm802_vm2, %v11517_v43 }
  0xf7   : > { %10002 = vmatmul.mubr.msk.bf16.gmra.mrb[36].mxu1 %vm802_vm2, %v11518_v44  ;;  %9971 = vmatprep.mubr.msk.bf16.mxu0 %vm802_vm2, %v11519_v45 }
  0xf8   : > { %10005 = vmatprep.mubr.msk.bf16.mxu1 %vm802_vm2, %v11520_v46  ;;  %10034 = vmatpush3.bf16.msra.mxu0 %v11545_v7 }
  0xf9   : > { %10035 = vmatprep.subr.bf16.mxu0 %v11546_v8 }
  0xfc   : > { %10036 = vmatpush3.bf16.msra.mxu0 %v11546_v8 }
  0xfd   : > { %10037 = vmatprep.subr.bf16.mxu0 %v11547_v9 }
  0xfe   : > { %9972 = vmatmul.mubr.msk.bf16.gmra.mrb[40].mxu0 %vm802_vm2, %v11521_v47 }
  0xff   : > { %10006 = vmatmul.mubr.msk.bf16.gmra.mrb[40].mxu1 %vm802_vm2, %v11522_v48  ;;  %9975 = vmatprep.mubr.msk.bf16.mxu0 %vm802_vm2, %v11523_v49 }
 0x100   : > { %10009 = vmatprep.mubr.msk.bf16.mxu1 %vm802_vm2, %v11524_v50  ;;  %10038 = vmatpush3.bf16.msra.mxu0 %v11547_v9 }
 0x101   : > { %10039 = vmatprep.subr.bf16.mxu0 %v11548_v10 }
 0x104   : > { %10040 = vmatpush3.bf16.msra.mxu0 %v11548_v10 }
 0x105   : > { %10041 = vmatprep.subr.bf16.mxu0 %v11549_v11 }
 0x106   : > { %9976 = vmatmul.mubr.msk.bf16.gmra.mrb[44].mxu0 %vm802_vm2, %v11525_v51 }
 0x107   : > { %10010 = vmatmul.mubr.msk.bf16.gmra.mrb[44].mxu1 %vm802_vm2, %v11526_v52  ;;  %9979 = vmatprep.mubr.msk.bf16.mxu0 %vm802_vm2, %v11527_v53 }
 0x108   : > { %10013 = vmatprep.mubr.msk.bf16.mxu1 %vm802_vm2, %v11528_v54  ;;  %10042 = vmatpush3.bf16.msra.mxu0 %v11549_v11  ;;  %v362_v11 = vlaneseq }
 0x109   : > { %10043 = vmatprep.subr.bf16.mxu0 %v11550_v12 }
 0x10a   : > { %v12562_v7 = vshrl.u32 %v362_v11, 7 }
 0x10c   : > { %10044 = vmatpush3.bf16.msra.mxu0 %v11550_v12  ;;  %v365_v11 = vadd.s32 16, %v12562_v7  ;;  %v12593_v29 = vadd.s32 8, %v12562_v7  ;;  %v12602_v20 = vadd.s32 48, %v12562_v7  ;;  %v12605_v38 = vadd.s32 32, %v12562_v7 }
 0x10d   : > { %10077 = vmatprep.subr.bf16.mxu0 %v12429_v14  ;;  %v395_v4 = vshra.s32 %v12562_v7, 4 }
 0x10e   : > { %9980 = vmatmul.mubr.msk.bf16.gmra.mrb[48].mxu0 %vm802_vm2, %v11529_v55  ;;  %v397_v32 = vshra.s32 %v365_v11, 4 }
 0x10f   : > { %10014 = vmatmul.mubr.msk.bf16.gmra.mrb[48].mxu1 %vm802_vm2, %v11530_v56  ;;  %9983 = vmatprep.mubr.msk.bf16.mxu0 %vm802_vm2, %v11531_v57  ;;  %vm12644_vm5 = vcmp.ge.s32.totalorder %v395_v4, 1  ;;  %vm12648_vm6 = vcmp.le.s32.totalorder %v395_v4, 14  ;;  %v12703_v4 = vadd.s32 96, %v12562_v7 }
 0x110   : > { %10017 = vmatprep.mubr.msk.bf16.mxu1 %vm802_vm2, %v11532_v58  ;;  %vm12624_vm3 = vcmp.ge.s32.totalorder %v397_v32, 1  ;;  %vm12628_vm4 = vcmp.le.s32.totalorder %v397_v32, 14  ;;  %v12642_v32 = vadd.s32 64, %v12562_v7 }
 0x116   : > { %9984 = vmatmul.mubr.msk.bf16.gmra.mrb[52].mxu0 %vm802_vm2, %v11533_v59  ;;  %v12584_v59 = vadd.s32 24, %v12562_v7 }
 0x117   : > { %10018 = vmatmul.mubr.msk.bf16.gmra.mrb[52].mxu1 %vm802_vm2, %v11534_v60  ;;  %9987 = vmatprep.mubr.msk.bf16.mxu0 %vm802_vm2, %v11535_v61 }
 0x118   : > { %10021 = vmatprep.mubr.msk.bf16.mxu1 %vm802_vm2, %v11536_v62 }
 0x11e   : > { %9988 = vmatmul.mubr.msk.bf16.gmra.mrb[56].mxu0 %vm802_vm2, %v11537_v0 }
 0x11f   : > { %10022 = vmatmul.mubr.msk.bf16.gmra.mrb[56].mxu1 %vm802_vm2, %v11538_v1  ;;  %9991 = vmatprep.mubr.msk.bf16.mxu0 %vm802_vm2, %v11539_v2 }
 0x120   : > { %10025 = vmatprep.mubr.msk.bf16.mxu1 %vm802_vm2, %v11540_v3 }
 0x126   : > { %9992 = vmatmul.mubr.msk.bf16.gmra.mrb[60].mxu0 %vm802_vm2, %v11541_v5 }
 0x127   : > { %10026 = vmatmul.mubr.msk.bf16.gmra.mrb[60].mxu1 %vm802_vm2, %v11542_v6  ;;  %10045 = vmatprep.mubr.bf16.mxu0 %v15950_v13 }
 0x128   : > { %10477 = vmatprep.mubr.bf16.mxu1 %v15950_v13 }
 0x181   : > { %v12432_v15 = vpop.f32.mrb[0].mxu0 }
 0x182   : > { %v12434_v16 = vpop.f32.mrb[0].mxu1  ;;  %v12438_v18 = vpop.f32.mrb[1].mxu0 }
 0x183   : > { %v12440_v19 = vpop.f32.mrb[1].mxu1  ;;  %v12444_v21 = vpop.f32.mrb[2].mxu0 }
 0x184   : > { %v12446_v22 = vpop.f32.mrb[2].mxu1  ;;  %v12450_v24 = vpop.f32.mrb[3].mxu0 }
 0x185   : > { %v12452_v25 = vpop.f32.mrb[3].mxu1 }
 0x189   : > { %v12456_v27 = vpop.f32.mrb[4].mxu0 }
 0x18a   : > { %v12458_v28 = vpop.f32.mrb[4].mxu1  ;;  %v12462_v30 = vpop.f32.mrb[5].mxu0 }
 0x18b   : > { %v12464_v31 = vpop.f32.mrb[5].mxu1  ;;  %v12468_v33 = vpop.f32.mrb[6].mxu0 }
 0x18c   : > { %v12470_v34 = vpop.f32.mrb[6].mxu1  ;;  %v12474_v36 = vpop.f32.mrb[7].mxu0 }
 0x18d   : > { %v12476_v37 = vpop.f32.mrb[7].mxu1 }
 0x191   : > { %v12480_v39 = vpop.f32.mrb[8].mxu0 }
 0x192   : > { %v12482_v40 = vpop.f32.mrb[8].mxu1  ;;  %v12486_v42 = vpop.f32.mrb[9].mxu0 }
 0x193   : > { %16279 = vst [vmem:[#allocation17_spill] sm:$0xff] %v12486_v42  ;;  %v12488_v43 = vpop.f32.mrb[9].mxu1  ;;  %v12492_v45 = vpop.f32.mrb[10].mxu0 }
 0x194   : > { %16280 = vst [vmem:[#allocation18_spill] sm:$0xff] %v12488_v43  ;;  %16281 = vst [vmem:[#allocation19_spill] sm:$0xff] %v12492_v45  ;;  %v12494_v46 = vpop.f32.mrb[10].mxu1  ;;  %v12498_v48 = vpop.f32.mrb[11].mxu0 }
 0x195   : > { %16282 = vst [vmem:[#allocation20_spill] sm:$0xff] %v12494_v46  ;;  %16283 = vst [vmem:[#allocation21_spill] sm:$0xff] %v12498_v48  ;;  %v12500_v49 = vpop.f32.mrb[11].mxu1  ;;  %v16363_v46 = vmax.f32 %v12432_v15, %v12434_v16  ;;  %v16370_v16 = vmax.f32 %v12438_v18, %v12440_v19  ;;  %v12824_v18 = vadd.s32 160, %v12562_v7  ;;  %v16376_v19 = vmov 0 }
 0x196   : > { %16284 = vst [vmem:[#allocation22_spill] sm:$0xff] %v12500_v49  ;;  %v12778_v49 = vld [vmem:[#allocation5] ss:$0 sm:$0xff] }
 0x197   : > { %16374 = vst [vmem:[#allocation67_spill] sm:$0xff] %v12824_v18 }
 0x199   : > { %v12504_v51 = vpop.f32.mrb[12].mxu0 }
 0x19a   : > { %16285 = vst [vmem:[#allocation23_spill] sm:$0xff] %v12504_v51  ;;  %v12506_v52 = vpop.f32.mrb[12].mxu1  ;;  %v12510_v54 = vpop.f32.mrb[13].mxu0  ;;  %v16425_v51 = vmov 0 }
 0x19b   : > { %16286 = vst [vmem:[#allocation24_spill] sm:$0xff] %v12506_v52  ;;  %16287 = vst [vmem:[#allocation25_spill] sm:$0xff] %v12510_v54  ;;  %v12512_v55 = vpop.f32.mrb[13].mxu1  ;;  %v12516_v57 = vpop.f32.mrb[14].mxu0  ;;  %v16358_v52 = vmov 0 }
 0x19c   : > { %16288 = vst [vmem:[#allocation26_spill] sm:$0xff] %v12512_v55  ;;  %16289 = vst [vmem:[#allocation27_spill] sm:$0xff] %v12516_v57  ;;  %v12518_v58 = vpop.f32.mrb[14].mxu1  ;;  %v12522_v60 = vpop.f32.mrb[15].mxu0  ;;  %v12735_v57 = vadd.s32 144, %v12562_v7 }
 0x19d   : > { %16290 = vst [vmem:[#allocation28_spill] sm:$0xff] %v12518_v58  ;;  %16291 = vst [vmem:[#allocation29_spill] sm:$0xff] %v12522_v60  ;;  %v12524_v61 = vpop.f32.mrb[15].mxu1  ;;  %v16356_v60 = vmov 0 }
 0x19e   : > { %16292 = vst [vmem:[#allocation30_spill] sm:$0xff] %v12524_v61  ;;  %16349 = vst [vmem:[#allocation65_spill] sm:$0xff] %v12735_v57  ;;  %v16530_v61 = vmov 0 }
 0x1a1   : > { %v12528_v63 = vpop.f32.mrb[16].mxu0 }
 0x1a2   : > { %16293 = vst [vmem:[#allocation31_spill] sm:$0xff] %v12528_v63  ;;  %v12530_v0 = vpop.f32.mrb[16].mxu1  ;;  %v12534_v2 = vpop.f32.mrb[17].mxu0  ;;  %v12688_v63 = vadd.s32 112, %v12562_v7 }
 0x1a3   : > { %16294 = vst [vmem:[#allocation32_spill] sm:$0xff] %v12530_v0  ;;  %16295 = vst [vmem:[#allocation33_spill] sm:$0xff] %v12534_v2  ;;  %v12536_v3 = vpop.f32.mrb[17].mxu1  ;;  %v12540_v5 = vpop.f32.mrb[18].mxu0  ;;  %v16413_v0 = vmov 0 }
 0x1a4   : > { %16296 = vst [vmem:[#allocation34_spill] sm:$0xff] %v12536_v3  ;;  %16297 = vst [vmem:[#allocation35_spill] sm:$0xff] %v12540_v5  ;;  %v12542_v6 = vpop.f32.mrb[18].mxu1  ;;  %v12546_v8 = vpop.f32.mrb[19].mxu0  ;;  %v16381_v5 = vmov 0  ;;  %v16447_v3 = vmov 0 }
 0x1a5   : > { %16298 = vst [vmem:[#allocation36_spill] sm:$0xff] %v12542_v6  ;;  %16299 = vst [vmem:[#allocation37_spill] sm:$0xff] %v12546_v8  ;;  %v12548_v9 = vpop.f32.mrb[19].mxu1 }
 0x1a6   : > { %16300 = vst [vmem:[#allocation38_spill] sm:$0xff] %v12548_v9 }
 0x1a9   : > { %v12552_v12 = vpop.f32.mrb[20].mxu0 }
 0x1aa   : > { %16301 = vst [vmem:[#allocation39_spill] sm:$0xff] %v12552_v12  ;;  %v12554_v13 = vpop.f32.mrb[20].mxu1  ;;  %v12558_v1 = vpop.f32.mrb[21].mxu0 }
 0x1ab   : > { %16302 = vst [vmem:[#allocation40_spill] sm:$0xff] %v12554_v13  ;;  %16303 = vst [vmem:[#allocation41_spill] sm:$0xff] %v12558_v1  ;;  %v12560_v62 = vpop.f32.mrb[21].mxu1  ;;  %v12566_v56 = vpop.f32.mrb[22].mxu0  ;;  %v399_v1 = vshra.s32 %v12605_v38, 4 }
 0x1ac   : > { %16304 = vst [vmem:[#allocation42_spill] sm:$0xff] %v12560_v62  ;;  %16305 = vst [vmem:[#allocation43_spill] sm:$0xff] %v12566_v56  ;;  %v12568_v10 = vpop.f32.mrb[22].mxu1  ;;  %v12572_v50 = vpop.f32.mrb[23].mxu0  ;;  %v12622_v56 = vadd.s32 40, %v12562_v7  ;;  %v433_v62 = vand.u32 15, %v12602_v20 }
 0x1ad   : > { %16306 = vst [vmem:[#allocation44_spill] sm:$0xff] %v12568_v10  ;;  %16307 = vst [vmem:[#allocation45_spill] sm:$0xff] %v12572_v50  ;;  %v12574_v47 = vpop.f32.mrb[23].mxu1  ;;  %v427_v50 = vand.u32 15, %v12562_v7  ;;  %v398_v10 = vshra.s32 %v12584_v59, 4  ;;  %vm12763_vm1 = vcmp.ge.s32.totalorder %v399_v1, 1 }
 0x1ae   : > { %16308 = vst [vmem:[#allocation46_spill] sm:$0xff] %v12574_v47  ;;  %v429_v47 = vand.u32 15, %v365_v11  ;;  %v16357_v60 = vsel %vm12763_vm1, 4294967295, %v16356_v60  ;;  %vm12767_vm2 = vcmp.le.s32.totalorder %v399_v1, 14  ;;  %vm12780_vm1 = vcmp.ge.s32.totalorder %v433_v62, 1 }
 0x1af   : > { %vm12677_vm8 = vcmp.ge.s32.totalorder %v398_v10, 1  ;;  %vm12681_vm9 = vcmp.le.s32.totalorder %v398_v10, 14  ;;  %vm12696_vm10 = vcmp.ge.s32.totalorder %v427_v50, 1  ;;  %v12721_v10 = vadd.s32 120, %v12562_v7 }
 0x1b0   : > { %vm12662_vm7 = vcmp.ge.s32.totalorder %v429_v47, 1  ;;  %v16359_v52 = vsel %vm12767_vm2, 4294967295, %v16358_v52  ;;  %v16360_v1 = vmov 0  ;;  %v16380_v15 = vshra.s32 %v12622_v56, 4 }
 0x1b1   : > { %v12579_v44 = vpop.f32.mrb[24].mxu0  ;;  %16345 = vst [vmem:[#allocation63_spill] sm:$0xff] %v12721_v10  ;;  %v16361_v1 = vsel %vm12780_vm1, 4294967295, %v16360_v1  ;;  %v16365_v10 = vmov 0  ;;  %v16433_v50 = vand.u32 15, %v12642_v32  ;;  %v16505_v11 = vmov 0 }
 0x1b2   : > { %16309 = vst [vmem:[#allocation47_spill] sm:$0xff] %v12579_v44  ;;  %v12581_v41 = vpop.f32.mrb[24].mxu1  ;;  %v12588_v53 = vpop.f32.mrb[25].mxu0  ;;  %v16383_v17 = vmov %v16380_v15 }
 0x1b3   : > { %16310 = vst [vmem:[#allocation48_spill] sm:$0xff] %v12581_v41  ;;  %16311 = vst [vmem:[#allocation49_spill] sm:$0xff] %v12588_v53  ;;  %v12590_v35 = vpop.f32.mrb[25].mxu1  ;;  %v12597_v26 = vpop.f32.mrb[26].mxu0  ;;  %v428_v53 = vand.u32 15, %v12593_v29 }
 0x1b4   : > { %16312 = vst [vmem:[#allocation50_spill] sm:$0xff] %v12590_v35  ;;  %16313 = vst [vmem:[#allocation51_spill] sm:$0xff] %v12597_v26  ;;  %v12599_v23 = vpop.f32.mrb[26].mxu1  ;;  %v12609_v41 = vpop.f32.mrb[27].mxu0  ;;  %v12615_v35 = vadd.s32 56, %v12562_v7  ;;  %v396_v26 = vshra.s32 %v12593_v29, 4 }
 0x1b5   : > { %16314 = vst [vmem:[#allocation52_spill] sm:$0xff] %v12599_v23  ;;  %16315 = vst [vmem:[#allocation53_spill] sm:$0xff] %v12609_v41  ;;  %v12611_v44 = vpop.f32.mrb[27].mxu1  ;;  %v430_v23 = vand.u32 15, %v12584_v59  ;;  %v401_v41 = vshra.s32 %v12602_v20, 4  ;;  %v12656_v20 = vadd.s32 88, %v12562_v7 }
 0x1b6   : > { %16316 = vst [vmem:[#allocation54_spill] sm:$0xff] %v12611_v44  ;;  %v12636_v44 = vadd.s32 80, %v12562_v7  ;;  %v12669_v29 = vadd.s32 72, %v12562_v7  ;;  %vm12711_vm11 = vcmp.ge.s32.totalorder %v396_v26, 1  ;;  %vm12715_vm12 = vcmp.le.s32.totalorder %v396_v26, 14 }
 0x1b7   : > { %vm12728_vm13 = vcmp.le.s32.totalorder %v430_v23, 14  ;;  %vm12737_vm14 = vcmp.ge.s32.totalorder %v401_v41, 1  ;;  %vm12741_vm15 = vcmp.le.s32.totalorder %v401_v41, 14  ;;  %v12751_v26 = vadd.s32 152, %v12562_v7 }
 0x1b8   : > { %vm12753_vm0 = vcmp.le.s32.totalorder %v428_v53, 14  ;;  %v12761_v23 = vadd.s32 136, %v12562_v7  ;;  %v16364_v62 = vshra.s32 %v12615_v35, 4  ;;  %v16368_v53 = vmov 0 }
 0x1b9   : > { %v12658_v8 = vpop.f32.mrb[28].mxu0  ;;  %v12901_v59 = vadd.s32 208, %v12562_v7 }
 0x1ba   : > { %16325 = vst [vmem:[#allocation55_spill] sm:$0xff] %v12658_v8  ;;  %v12660_v6 = vpop.f32.mrb[28].mxu1  ;;  %v12673_v12 = vpop.f32.mrb[29].mxu0  ;;  %v16367_v48 = vmov %v16364_v62 }
 0x1bb   : > { %16326 = vst [vmem:[#allocation56_spill] sm:$0xff] %v12660_v6  ;;  %16329 = vst [vmem:[#allocation57_spill] sm:$0xff] %v12673_v12  ;;  %v12675_v2 = vpop.f32.mrb[29].mxu1  ;;  %v12692_v6 = vpop.f32.mrb[30].mxu0  ;;  %v12724_v12 = vadd.s32 104, %v12562_v7  ;;  %vm12801_vm1 = vcmp.le.s32.totalorder %v16367_v48, 14 }
 0x1bc   : > { %16330 = vst [vmem:[#allocation58_spill] sm:$0xff] %v12675_v2  ;;  %16335 = vst [vmem:[#allocation59_spill] sm:$0xff] %v12692_v6  ;;  %v12694_v8 = vpop.f32.mrb[30].mxu1  ;;  %v12707_v58 = vpop.f32.mrb[31].mxu0  ;;  %v16354_v6 = vmov 0  ;;  %v16369_v53 = vsel %vm12801_vm1, 4294967295, %v16368_v53 }
 0x1bd   : > { %16336 = vst [vmem:[#allocation60_spill] sm:$0xff] %v12694_v8  ;;  %16339 = vst [vmem:[#allocation61_spill] sm:$0xff] %v12707_v58  ;;  %v12709_v9 = vpop.f32.mrb[31].mxu1  ;;  %v16355_v6 = vsel %vm12753_vm0, 4294967295, %v16354_v6  ;;  %v12788_v58 = vadd.s32 176, %v12562_v7  ;;  %vm12795_vm0 = vcmp.ge.s32.totalorder %v16364_v62, 1 }
 0x1be   : > { %16340 = vst [vmem:[#allocation62_spill] sm:$0xff] %v12709_v9  ;;  %16346 = vst [vmem:[#allocation64_spill] sm:$0xff] %v12724_v12  ;;  %v12748_v9 = vadd.s32 128, %v12562_v7  ;;  %v16366_v10 = vsel %vm12795_vm0, 4294967295, %v16365_v10  ;;  %v16371_v62 = vand.u32 15, %v12605_v38  ;;  %v16372_v12 = vmov 0 }
 0x1bf   : > { %16362 = vst [vmem:[#allocation66_spill] sm:$0xff] %v12788_v58  ;;  %vm16375_vm0 = vmand %vm12624_vm3, %vm12628_vm4  ;;  %vm12848_vm3 = vcmp.le.s32.totalorder %v16383_v17, 14 }
 0x1c0   : > { %vm12817_vm1 = vcmp.ge.s32.totalorder %v16371_v62, 1  ;;  %vm12833_vm2 = vmand %vm16375_vm0, %vm12662_vm7 }
 0x1c1   : > { %v9965_v41 = vpop.f32.mrb[32].mxu0  ;;  %v16373_v12 = vsel %vm12817_vm1, 4294967295, %v16372_v12  ;;  %v16377_v19 = vsel %vm12833_vm2, 4294967295, %v16376_v19  ;;  %vm12842_vm1 = vcmp.ge.s32.totalorder %v16380_v15, 1  ;;  %vm16392_vm0 = vmand %vm12644_vm5, %vm12648_vm6 }
 0x1c2   : > { %v9999_v54 = vpop.f32.mrb[32].mxu1  ;;  %v1697_v45 = vmax.f32 %v16363_v46, %v9965_v41  ;;  %v1568_v43 = vpop.f32.mrb[33].mxu0  ;;  %16378 = vst [vmem:[#allocation68_spill] sm:$0xff] %v16377_v19  ;;  %v16382_v5 = vsel %vm12842_vm1, 4294967295, %v16381_v5  ;;  %vm12883_vm4 = vmand %vm16392_vm0, %vm12696_vm10 }
 0x1c3   : > { %v1922_v42 = vpop.f32.mrb[33].mxu1  ;;  %v1695_v46 = vmax.f32 %v16370_v16, %v1568_v43  ;;  %v9966_v41 = vpop.f32.mrb[34].mxu0  ;;  %v16379_v43 = vmax.f32 %v12444_v21, %v12446_v22  ;;  %v16387_v22 = vmax.f32 %v12450_v24, %v12452_v25  ;;  %v16393_v24 = vmov 0  ;;  %vm16405_vm10 = vmand %vm12677_vm8, %vm12681_vm9 }
 0x1c4   : > { %v10000_v48 = vpop.f32.mrb[34].mxu1  ;;  %v2051_v38 = vmax.f32 %v1697_v45, %v9999_v54  ;;  %v1571_v62 = vpop.f32.mrb[35].mxu0  ;;  %v12854_v54 = vadd.s32 184, %v12562_v7  ;;  %v12871_v45 = vadd.s32 168, %v12562_v7  ;;  %v16394_v24 = vsel %vm12883_vm4, 4294967295, %v16393_v24  ;;  %vm12926_vm0 = vmand %vm16405_vm10, %vm12728_vm13 }
 0x1c5   : > { %v1698_v16 = vmax.f32 %v16379_v43, %v9966_v41  ;;  %v1925_v57 = vpop.f32.mrb[35].mxu1  ;;  %v2049_v21 = vmax.f32 %v1695_v46, %v1922_v42  ;;  %v1696_v15 = vmax.f32 %v16387_v22, %v1571_v62  ;;  %v16388_v41 = vand.u32 15, %v12615_v35  ;;  %16395 = vst [vmem:[#allocation71_spill] sm:$0xff] %v16394_v24  ;;  %vm16419_vm10 = vmand %vm12711_vm11, %vm12715_vm12 }
 0x1c6   : > { %16386 = vst [vmem:[#allocation69_spill] sm:$0xff] %v12854_v54  ;;  %v16389_v43 = vmov 0  ;;  %16391 = vst [vmem:[#allocation70_spill] sm:$0xff] %v12871_v45  ;;  %v12874_v42 = vadd.f32 %v12778_v49, %v2051_v38  ;;  %v16396_v35 = vshra.s32 %v12636_v44, 4  ;;  %v16403_v22 = vmov 0 }
 0x1c7   : > { %vm12865_vm7 = vcmp.le.s32.totalorder %v16388_v41, 14  ;;  %v2052_v25 = vmax.f32 %v1698_v16, %v10000_v48  ;;  %v12904_v62 = vadd.f32 %v12778_v49, %v2049_v21  ;;  %v2050_v48 = vmax.f32 %v1696_v15, %v1925_v57 }
 0x1c8   : > { %v16390_v43 = vsel %vm12865_vm7, 4294967295, %v16389_v43  ;;  %vm12889_vm7 = vcmp.ge.s32.totalorder %v16396_v35, 1  ;;  %v16399_v38 = vmov %v16396_v35  ;;  %v16402_v16 = vand.u32 15, %v12622_v56 }
 0x1c9   : > { %vm12895_vm1 = vcmp.le.s32.totalorder %v16399_v38, 14  ;;  %v16011_v38 = vmax.f32 %v12874_v42, 0.0  ;;  %v16406_v57 = vmov 0  ;;  %v12931_v56 = vadd.f32 %v12778_v49, %v2052_v25  ;;  %v9969_v13 = vpop.f32.mrb[36].mxu0 }
 0x1ca   : > { %vm12912_vm6 = vcmp.le.s32.totalorder %v16402_v16, 14  ;;  %v16407_v57 = vsel %vm12926_vm0, 4294967295, %v16406_v57  ;;  %v16409_v21 = vshra.s32 %v12642_v32, 4  ;;  %v16410_v15 = vmov 0  ;;  %v1584_v47 = vpop.f32.mrb[37].mxu0 }
 0x1cb   : > { %v16404_v22 = vsel %vm12912_vm6, 4294967295, %v16403_v22  ;;  %16408 = vst [vmem:[#allocation72_spill] sm:$0xff] %v16407_v57  ;;  %v2120_v35 = vmax.f32 %v12904_v62, 0.0  ;;  %v2089_v25 = vadd.f32 %v12778_v49, %v2050_v48  ;;  %v16416_v41 = vmov 0  ;;  %v16525_v57 = vld [vmem:[#allocation64_spill] sm:$0xff] }
 0x1cc   : > { %vm12935_vm5 = vcmp.ge.s32.totalorder %v16409_v21, 1  ;;  %v16412_v8 = vmov %v16409_v21  ;;  %v10003_v21 = vpop.f32.mrb[36].mxu1  ;;  %vm16418_vm13 = vnez %v16355_v6  ;;  %v16420_v48 = vmov 0 }
 0x1cd   : > { %v16411_v15 = vsel %vm12935_vm5, 4294967295, %v16410_v15  ;;  %vm12941_vm6 = vcmp.le.s32.totalorder %v16412_v8, 14  ;;  %v16415_v8 = vand.u32 15, %v12636_v44  ;;  %vm12969_vm8 = vmand %vm16419_vm10, %vm16418_vm13  ;;  %v16423_v44 = vmax.f32 %v12456_v27, %v12458_v28  ;;  %v1938_v17 = vpop.f32.mrb[37].mxu1 }
 0x1ce   : > { %v16414_v0 = vsel %vm12941_vm6, 4294967295, %v16413_v0  ;;  %v16421_v48 = vsel %vm12969_vm8, 4294967295, %v16420_v48  ;;  %v16424_v16 = vshra.s32 %v12656_v20, 4  ;;  %v16428_v6 = vmov 0 }
 0x1cf   : > { %vm12955_vm9 = vcmp.ge.s32.totalorder %v16415_v8, 1  ;;  %16422 = vst [vmem:[#allocation73_spill] sm:$0xff] %v16421_v48  ;;  %v1701_v8 = vmax.f32 %v16423_v44, %v9969_v13  ;;  %v12990_v62 = vadd.s32 192, %v12562_v7  ;;  %v2154_v27 = vsel %vm12833_vm2, %v16011_v38, 0.0  ;;  %v9970_v44 = vpop.f32.mrb[38].mxu0 }
 0x1d0   : > { %v16417_v41 = vsel %vm12955_vm9, 4294967295, %v16416_v41  ;;  %vm12978_vm9 = vcmp.ge.s32.totalorder %v16424_v16, 1  ;;  %v16427_v2 = vmov %v16424_v16  ;;  %v2121_v28 = vmax.f32 %v2089_v25, 0.0  ;;  %v1587_v54 = vpop.f32.mrb[39].mxu0 }
 0x1d1   : > { %v16426_v51 = vsel %vm12978_vm9, 4294967295, %v16425_v51  ;;  %vm12984_vm5 = vcmp.le.s32.totalorder %v16427_v2, 14  ;;  %v16430_v13 = vmax.f32 %v12462_v30, %v12464_v31  ;;  %vm16431_vm11 = vnez %v16359_v52  ;;  %v10004_v2 = vpop.f32.mrb[38].mxu1  ;;  %vm16438_vm9 = vmand %vm12737_vm14, %vm12741_vm15 }
 0x1d2   : > { %v16429_v6 = vsel %vm12984_vm5, 4294967295, %v16428_v6  ;;  %vm16432_vm12 = vnez %v16357_v60  ;;  %vm13005_vm10 = vcmp.ge.s32.totalorder %v16433_v50, 1  ;;  %v16434_v45 = vmov 0  ;;  %v1941_v18 = vpop.f32.mrb[39].mxu1  ;;  %v13089_v60 = vld [vmem:[#allocation7 + $0x8] sm:$0xff]  }
 0x1d3   : > { %v1699_v16 = vmax.f32 %v16430_v13, %v1584_v47  ;;  %v16435_v45 = vsel %vm13005_vm10, 4294967295, %v16434_v45  ;;  %v13010_v38 = vadd.s32 216, %v12562_v7  ;;  %v2152_v30 = vsel %vm12883_vm4, %v2120_v35, 0.0 }
 0x1d4   : > { %v16436_v31 = vmax.f32 %v12931_v56, 0.0  ;;  %vm16437_vm13 = vnez %v16361_v1  ;;  %v16439_v32 = vmov 0  ;;  %v2055_v25 = vmax.f32 %v1701_v8, %v10003_v21 }
 0x1d5   : > { %vm13025_vm5 = vmand %vm16438_vm9, %vm16437_vm13  ;;  %v16442_v50 = vmax.f32 %v12468_v33, %v12470_v34  ;;  %v16444_v1 = vmov 0  ;;  %v2153_v33 = vsel %vm12969_vm8, %v2121_v28, 0.0  ;;  %v2053_v34 = vmax.f32 %v1699_v16, %v1938_v17 }
 0x1d6   : > { %v2155_v47 = vsel %vm12926_vm0, %v16436_v31, 0.0  ;;  %v16440_v32 = vsel %vm13025_vm5, 4294967295, %v16439_v32  ;;  %v16443_v31 = vshra.s32 %v12669_v29, 4  ;;  %vm16449_vm15 = vnez %v16369_v53  ;;  %vm16457_vm13 = vmand %vm16432_vm12, %vm16431_vm11 }
 0x1d7   : > { %16441 = vst [vmem:[#allocation74_spill] sm:$0xff] %v16440_v32  ;;  %v1702_v13 = vmax.f32 %v16442_v50, %v9970_v44  ;;  %v13044_v58 = vpack.c.bf16 %v2155_v47, %v2154_v27  ;;  %vm16450_vm9 = vnez %v16366_v10  ;;  %v16451_v21 = vmax.f32 %v12474_v36, %v12476_v37 }
 0x1d8   : > { %vm13034_vm10 = vcmp.ge.s32.totalorder %v16443_v31, 1  ;;  %v16446_v55 = vmov %v16443_v31  ;;  %v16452_v44 = vand.u32 15, %v12656_v20  ;;  %v16453_v50 = vmov 0 }
 0x1d9   : > { %v16445_v1 = vsel %vm13034_vm10, 4294967295, %v16444_v1  ;;  %vm13040_vm14 = vcmp.le.s32.totalorder %v16446_v55, 14  ;;  %v1700_v8 = vmax.f32 %v16451_v21, %v1587_v54  ;;  %v13061_v27 = vpack.c.bf16 %v2153_v33, %v2152_v30  ;;  %2205 = vst [vmem:[#allocation2 + $0x18] sm:$0xff] %v13044_v58 }
 0x1da   : > { %v16448_v3 = vsel %vm13040_vm14, 4294967295, %v16447_v3  ;;  %vm13057_vm10 = vcmp.le.s32.totalorder %v16452_v44, 14  ;;  %v13064_v47 = vadd.f32 %v12778_v49, %v2055_v25  ;;  %vm16456_vm14 = vnez %v16373_v12 }
 0x1db   : > { %v16454_v50 = vsel %vm13057_vm10, 4294967295, %v16453_v50  ;;  %16455 = vst [vmem:[#allocation75_spill] sm:$0xff] %v13061_v27  ;;  %vm13073_vm6 = vmand %vm16457_vm13, %vm16456_vm14  ;;  %v16458_v36 = vmov 0  ;;  %v2056_v37 = vmax.f32 %v1702_v13, %v10004_v2  ;;  %v16461_v20 = vshra.s32 %v12688_v63, 4 }
 0x1dc   : > { %v16459_v36 = vsel %vm13073_vm6, 4294967295, %v16458_v36  ;;  %v16462_v54 = vmov 0  ;;  %v13094_v16 = vadd.f32 %v12778_v49, %v2053_v34  ;;  %vm16467_vm12 = vnez %v16382_v5  ;;  %2204 = vst [vmem:[#allocation2 + $0x10] sm:$0xff] %v13061_v27  ;;  %vm16472_vm14 = vmand %vm16450_vm9, %vm16449_vm15 }
 0x1dd   : > { %16460 = vst [vmem:[#allocation76_spill] sm:$0xff] %v16459_v36  ;;  %vm13079_vm10 = vcmp.ge.s32.totalorder %v16461_v20, 1  ;;  %v16464_v17 = vmov %v16461_v20  ;;  %v2054_v2 = vmax.f32 %v1700_v8, %v1941_v18  ;;  %v16468_v30 = vand.u32 15, %v12669_v29  ;;  %v10007_v20 = vpop.f32.mrb[40].mxu1 }
 0x1de   : > { %v16463_v54 = vsel %vm13079_vm10, 4294967295, %v16462_v54  ;;  %vm13085_vm5 = vcmp.le.s32.totalorder %v16464_v17, 14  ;;  %v16469_v25 = vmov 0  ;;  %v2501_v13 = vshrl.u32 %v13044_v58, 16 }
 0x1df   : > { %vm13102_vm13 = vcmp.le.s32.totalorder %v16468_v30, 14  ;;  %v16032_v55 = vmax.f32 %v13064_v47, 0.0  ;;  %vm16471_vm11 = vnez %v16390_v43  ;;  %v16473_v29 = vmov 0 }
 0x1e0   : > { %v16470_v25 = vsel %vm13102_vm13, 4294967295, %v16469_v25  ;;  %vm13117_vm10 = vmand %vm16472_vm14, %vm16471_vm11  ;;  %v13122_v18 = vadd.f32 %v12778_v49, %v2056_v37  ;;  %v16476_v33 = vmov 0  ;;  %v11692_v43 = vpack.c.bf16 %v2121_v28, %v2120_v35  ;;  %v9973_v37 = vpop.f32.mrb[40].mxu0 }
 0x1e1   : > { %v16474_v29 = vsel %vm13117_vm10, 4294967295, %v16473_v29  ;;  %vm13128_vm13 = vmpackc.low %vm12969_vm8, %vm12883_vm4  ;;  %v2493_v10 = vshrl.u32 %v13061_v27, 16  ;;  %v16479_v53 = vshra.s32 %v12703_v4, 4  ;;  %v16480_v34 = vmov 0 }
 0x1e2   : > { %16475 = vst [vmem:[#allocation77_spill] sm:$0xff] %v16474_v29  ;;  %v16477_v33 = vsel %vm13128_vm13, 4294967295, %v16476_v33  ;;  %11693 = vmatmul.mubr.msk.bf16.vlgmr.msra.gmra.mrb[64].mxu0 %vm13128_vm13, %v11692_v43  ;;  %v13148_v44 = vadd.s32 200, %v12562_v7  ;;  %v16041_v35 = vmax.f32 %v13094_v16, 0.0  ;;  %v13152_v28 = vadd.f32 %v12778_v49, %v2054_v2  ;;  %vm13168_vm13 = vmpackc.low %vm12926_vm0, %vm12833_vm2 }
 0x1e3   : > { %16478 = vst [vmem:[#allocation78_spill] sm:$0xff] %v16477_v33  ;;  %vm13137_vm15 = vcmp.ge.s32.totalorder %v16479_v53, 1  ;;  %v16482_v21 = vmov %v16479_v53  ;;  %v16485_v17 = vand.u32 15, %v12688_v63  ;;  %v16486_v30 = vmov 0  ;;  %10078 = vmatpush3.bf16.msra.mxu0 %v12429_v14 }
 0x1e4   : > { %v16481_v34 = vsel %vm13137_vm15, 4294967295, %v16480_v34  ;;  %vm13143_vm9 = vcmp.le.s32.totalorder %v16482_v21, 14  ;;  %v16488_v2 = vmov 0  ;;  %v16491_v43 = vmax.f32 %v12874_v42, 0.0  ;;  %10079 = vmatprep.subr.bf16.mxu0 %v13089_v60 }
 0x1e5   : > { %vm13160_vm14 = vcmp.ge.s32.totalorder %v16485_v17, 1  ;;  %v16489_v2 = vsel %vm13168_vm13, 4294967295, %v16488_v2  ;;  %v16492_v53 = vmax.f32 %v12931_v56, 0.0  ;;  %v13178_v63 = vrot.slane %v2501_v13, 7  ;;  %v1600_v13 = vpop.f32.mrb[41].mxu0 }
 0x1e6   : > { %v16487_v30 = vsel %vm13160_vm14, 4294967295, %v16486_v30  ;;  %16490 = vst [vmem:[#allocation79_spill] sm:$0xff] %v16489_v2  ;;  %vm16493_vm11 = vnez %v16440_v32  ;;  %vm16494_vm8 = vnez %v16404_v22  ;;  %v16496_v42 = vmov 0 }
 0x1e7   : > { %v11695_v21 = vpack.c.bf16 %v16492_v53, %v16491_v43  ;;  %v2158_v52 = vsel %vm16493_vm11, %v16032_v55, 0.0  ;;  %v16499_v14 = vmax.f32 %v12480_v39, %v12482_v40  ;;  %v1954_v43 = vpop.f32.mrb[41].mxu1  ;;  %v2504_v53 = vshll.u32 %v13044_v58, 16  ;;  %v11553_v39 = vld [vmem:[#allocation7 + $0x10] sm:$0xff]   ;;  %10080 = vmatpush3.bf16.msra.mxu0 %v13089_v60 }
 0x1e8   : > { %v16502_v22 = vmov 0  ;;  %v2156_v40 = vsel %vm13073_vm6, %v16041_v35, 0.0  ;;  %v2125_v58 = vmax.f32 %v13152_v28, 0.0  ;;  %v10008_v31 = vpop.f32.mrb[42].mxu1  ;;  %v13227_v2 = vrot.slane %v2493_v10, 7  ;;  %10081 = vmatprep.subr.bf16.mxu0 %v11553_v39 }
 0x1e9   : > { %11696 = vmatprep.mubr.msk.bf16.mxu0 %vm13168_vm13, %v11695_v21  ;;  %vm16495_vm13 = vmand %vm16467_vm12, %vm12848_vm3  ;;  %v1705_v56 = vmax.f32 %v16499_v14, %v9973_v37  ;;  %v16500_v21 = vld [vmem:[#allocation63_spill] sm:$0xff]  ;;  %v16507_v37 = vld [vmem:[#allocation17_spill] sm:$0xff]  ;;  %vm16511_vm12 = vnez %v16411_v15  ;;  %v16513_v33 = vand.u32 15, %v12703_v4  ;;  %v16514_v48 = vmov 0  ;;  %v1957_v24 = vpop.f32.mrb[43].mxu1 }
 0x1ea   : > { %vm13194_vm4 = vmand %vm16495_vm13, %vm16494_vm8  ;;  %v16501_v17 = vshra.s32 %v16500_v21, 4  ;;  %vm16510_vm8 = vnez %v16414_v0  ;;  %16512 = vst [vmem:[#allocation63_spill] sm:$0xff] %v13227_v2  ;;  %v16516_v28 = vmax.f32 %v13122_v18, 0.0  ;;  %v16519_v10 = vmov 0  ;;  %v13312_v15 = vld [vmem:[#allocation7 + $0x18] sm:$0xff]  }
 0x1eb   : > { %v16497_v42 = vsel %vm13194_vm4, 4294967295, %v16496_v42  ;;  %vm13231_vm2 = vcmp.ge.s32.totalorder %v16513_v33, 1  ;;  %vm16518_vm13 = vmand %vm12889_vm7, %vm12895_vm1  ;;  %v2059_v4 = vmax.f32 %v1705_v56, %v10007_v20  ;;  %v16522_v33 = vld [vmem:[#allocation19_spill] sm:$0xff]  ;;  %v2506_v20 = vor.u32 %v2504_v53, %v13178_v63  ;;  %10082 = vmatpush3.bf16.msra.mxu0 %v11553_v39 }
 0x1ec   : > { %16498 = vst [vmem:[#allocation80_spill] sm:$0xff] %v16497_v42  ;;  %vm13204_vm0 = vcmp.ge.s32.totalorder %v16501_v17, 1  ;;  %v16504_v5 = vmov %v16501_v17  ;;  %v16508_v17 = vld [vmem:[#allocation18_spill] sm:$0xff]  ;;  %v16515_v48 = vsel %vm13231_vm2, 4294967295, %v16514_v48  ;;  %vm16532_vm7 = vnez %v16429_v6  ;;  %v16588_v39 = vld [vmem:[#allocation23_spill] sm:$0xff]  ;;  %10083 = vmatprep.subr.bf16.mxu0 %v13312_v15 }
 0x1ed   : > { %v16503_v22 = vsel %vm13204_vm0, 4294967295, %v16502_v22  ;;  %vm13210_vm3 = vcmp.le.s32.totalorder %v16504_v5, 14  ;;  %v16509_v14 = vmax.f32 %v16507_v37, %v16508_v17  ;;  %v9974_v5 = vpop.f32.mrb[42].mxu0  ;;  %vm16517_vm0 = vnez %v16417_v41  ;;  %v16523_v37 = vld [vmem:[#allocation20_spill] sm:$0xff] }
 0x1ee   : > { %v16506_v11 = vsel %vm13210_vm3, 4294967295, %v16505_v11  ;;  %vm13246_vm3 = vmand %vm16518_vm13, %vm16517_vm0  ;;  %v16524_v17 = vmax.f32 %v16522_v33, %v16523_v37  ;;  %v1603_v35 = vpop.f32.mrb[43].mxu0  ;;  %v16527_v41 = vmov 0  ;;  %vm16533_vm0 = vnez %v16426_v51  ;;  %v16534_v37 = vld [vmem:[#allocation21_spill] sm:$0xff] }
 0x1ef   : > { %v1703_v55 = vmax.f32 %v16509_v14, %v1600_v13  ;;  %v2159_v13 = vsel %vm13117_vm10, %v16516_v28, 0.0  ;;  %v16520_v10 = vsel %vm13246_vm3, 4294967295, %v16519_v10  ;;  %v16526_v28 = vshra.s32 %v16525_v57, 4  ;;  %vm16541_vm13 = vmand %vm16511_vm12, %vm16510_vm8  ;;  %10084 = vmatpush3.bf16.msra.mxu0 %v13312_v15 }
 0x1f0   : > { %16521 = vst [vmem:[#allocation17_spill] sm:$0xff] %v16520_v10  ;;  %v1706_v14 = vmax.f32 %v16524_v17, %v9974_v5  ;;  %v13266_v56 = vpack.c.bf16 %v2159_v13, %v2158_v52  ;;  %v2157_v5 = vsel %vm13194_vm4, %v2125_v58, 0.0  ;;  %v16535_v17 = vld [vmem:[#allocation22_spill] sm:$0xff]  ;;  %v16537_v19 = vand.u32 15, %v16500_v21 }
 0x1f1   : > { %vm13255_vm2 = vcmp.ge.s32.totalorder %v16526_v28, 1  ;;  %v16529_v46 = vmov %v16526_v28  ;;  %v2057_v33 = vmax.f32 %v1703_v55, %v1954_v43  ;;  %v16536_v28 = vmax.f32 %v16534_v37, %v16535_v17  ;;  %v16545_v43 = vld [vmem:[#allocation65_spill] sm:$0xff]  ;;  %v16704_v10 = vld [vmem:[#allocation70_spill] sm:$0xff] }
 0x1f2   : > { %v16528_v41 = vsel %vm13255_vm2, 4294967295, %v16527_v41  ;;  %vm13261_vm1 = vcmp.le.s32.totalorder %v16529_v46, 14  ;;  %vm13279_vm2 = vcmp.le.s32.totalorder %v16537_v19, 14  ;;  %v16538_v27 = vmov 0  ;;  %2207 = vst [vmem:[#allocation2 + $0x28] sm:$0xff] %v13266_v56 }
 0x1f3   : > { %v16531_v61 = vsel %vm13261_vm1, 4294967295, %v16530_v61  ;;  %v1704_v46 = vmax.f32 %v16536_v28, %v1603_v35  ;;  %v16539_v27 = vsel %vm13279_vm2, 4294967295, %v16538_v27  ;;  %v13284_v52 = vpack.c.bf16 %v2157_v5, %v2156_v40  ;;  %v13767_v28 = vld [vmem:[#allocation7 + $0x38] sm:$0xff]  }
 0x1f4   : > { %v13287_v55 = vadd.f32 %v12778_v49, %v2059_v4  ;;  %vm16540_vm1 = vnez %v16435_v45  ;;  %v16542_v35 = vmov 0  ;;  %v2060_v19 = vmax.f32 %v1706_v14, %v10008_v31 }
 0x1f5   : > { %vm13296_vm14 = vmand %vm16541_vm13, %vm16540_vm1  ;;  %v16546_v53 = vshra.s32 %v16545_v43, 4  ;;  %v16547_v60 = vmov 0  ;;  %v16550_v45 = vmov 0  ;;  %v13315_v0 = vadd.s32 240, %v12562_v7  ;;  %2206 = vst [vmem:[#allocation2 + $0x20] sm:$0xff] %v13284_v52 }
 0x1f6   : > { %v16543_v35 = vsel %vm13296_vm14, 4294967295, %v16542_v35  ;;  %v13319_v31 = vadd.f32 %v12778_v49, %v2057_v33  ;;  %vm16552_vm8 = vnez %v16448_v3  ;;  %vm16553_vm12 = vnez %v16445_v1  ;;  %vm16558_vm1 = vmand %vm16533_vm0, %vm16532_vm7 }
 0x1f7   : > { %16544 = vst [vmem:[#allocation18_spill] sm:$0xff] %v16543_v35  ;;  %vm13302_vm2 = vcmp.ge.s32.totalorder %v16546_v53, 1  ;;  %v16549_v21 = vmov %v16546_v53  ;;  %v2058_v40 = vmax.f32 %v1704_v46, %v1957_v24  ;;  %v16554_v13 = vand.u32 15, %v16525_v57  ;;  %v9977_v53 = vpop.f32.mrb[44].mxu0 }
 0x1f8   : > { %v16548_v60 = vsel %vm13302_vm2, 4294967295, %v16547_v60  ;;  %vm13308_vm15 = vcmp.le.s32.totalorder %v16549_v21, 14  ;;  %v16555_v4 = vmov 0  ;;  %v2517_v14 = vshrl.u32 %v13266_v56, 16 }
 0x1f9   : > { %v16551_v45 = vsel %vm13308_vm15, 4294967295, %v16550_v45  ;;  %vm13327_vm13 = vcmp.le.s32.totalorder %v16554_v13, 14  ;;  %v2520_v5 = vshll.u32 %v13266_v56, 16  ;;  %v16058_v33 = vmax.f32 %v13287_v55, 0.0 }
 0x1fa   : > { %v16556_v4 = vsel %vm13327_vm13, 4294967295, %v16555_v4  ;;  %vm16557_vm2 = vnez %v16454_v50  ;;  %v16559_v24 = vmov 0  ;;  %v13347_v57 = vadd.f32 %v12778_v49, %v2060_v19  ;;  %vm13353_vm13 = vmpackc.low %vm13194_vm4, %vm13073_vm6 }
 0x1fb   : > { %vm13342_vm15 = vmand %vm16558_vm1, %vm16557_vm2  ;;  %v16562_v56 = vmov 0  ;;  %v16565_v51 = vmax.f32 %v13094_v16, 0.0  ;;  %v2509_v6 = vshrl.u32 %v13284_v52, 16  ;;  %v2512_v37 = vshll.u32 %v13284_v52, 16  ;;  %v10011_v52 = vpop.f32.mrb[44].mxu1 }
 0x1fc   : > { %v16560_v24 = vsel %vm13342_vm15, 4294967295, %v16559_v24  ;;  %v16563_v56 = vsel %vm13353_vm13, 4294967295, %v16562_v56  ;;  %v16566_v17 = vshra.s32 %v12748_v9, 4  ;;  %v16065_v16 = vmax.f32 %v13319_v31, 0.0  ;;  %vm13393_vm4 = vmpackc.low %vm13117_vm10, %vm16493_vm11 }
 0x1fd   : > { %16561 = vst [vmem:[#allocation19_spill] sm:$0xff] %v16560_v24  ;;  %16564 = vst [vmem:[#allocation20_spill] sm:$0xff] %v16563_v56  ;;  %v11698_v50 = vpack.c.bf16 %v2125_v58, %v16565_v51  ;;  %v13377_v58 = vadd.f32 %v12778_v49, %v2058_v40  ;;  %vm16572_vm0 = vnez %v16463_v54  ;;  %v16573_v21 = vand.u32 15, %v16545_v43 }
 0x1fe   : > { %vm13365_vm2 = vcmp.ge.s32.totalorder %v16566_v17, 1  ;;  %v16569_v46 = vmov %v16566_v17  ;;  %v16574_v13 = vmov 0  ;;  %v16576_v40 = vmov 0 }
 0x1ff   : > { %11699 = vmatmul.mubr.msk.bf16.gmra.mrb[68].mxu0 %vm13353_vm13, %v11698_v50  ;;  %vm13371_vm7 = vcmp.le.s32.totalorder %v16569_v46, 14  ;;  %vm13385_vm13 = vcmp.ge.s32.totalorder %v16573_v21, 1  ;;  %v16577_v40 = vsel %vm13393_vm4, 4294967295, %v16576_v40  ;;  %v16579_v51 = vmax.f32 %v13064_v47, 0.0 }
 0x200   : > { %v16575_v13 = vsel %vm13385_vm13, 4294967295, %v16574_v13  ;;  %16578 = vst [vmem:[#allocation64_spill] sm:$0xff] %v16577_v40  ;;  %v16580_v50 = vmax.f32 %v13122_v18, 0.0  ;;  %v13403_v43 = vrot.slane %v2517_v14, 7  ;;  %vm16581_vm1 = vsmask.f32 256 }
 0x201   : > { %v13407_v46 = vsel %vm16581_vm1, %v13227_v2, %v2506_v20  ;;  %v2162_v21 = vsel %vm13246_vm3, %v16058_v33, 0.0  ;;  %vm16583_vm6 = vnez %v16470_v25  ;;  %v16585_v18 = vmov 0  ;;  %v16589_v20 = vld [vmem:[#allocation24_spill] sm:$0xff] }
 0x202   : > { %v11701_v17 = vpack.c.bf16 %v16580_v50, %v16579_v51  ;;  %16582 = vst [vmem:[#allocation21_spill] sm:$0xff] %v13407_v46  ;;  %v16590_v14 = vmax.f32 %v16588_v39, %v16589_v20  ;;  %v1616_v50 = vpop.f32.mrb[45].mxu0  ;;  %v13428_v33 = vrot.slane %v2509_v6, 7  ;;  %v16591_v47 = vshra.s32 %v12751_v26, 4  ;;  %v11555_v39 = vld [vmem:[#allocation7 + $0x20] sm:$0xff]   ;;  %v16598_v20 = vld [vmem:[#allocation26_spill] sm:$0xff] }
 0x203   : > { %v16592_v25 = vmov 0  ;;  %v16595_v3 = vmov 0  ;;  %v2160_v6 = vsel %vm13296_vm14, %v16065_v16, 0.0  ;;  %v16601_v42 = vand.u32 15, %v12748_v9  ;;  %10085 = vmatprep.subr.bf16.mxu0 %v11555_v39 }
 0x204   : > { %11702 = vmatprep.mubr.msk.bf16.mxu0 %vm13393_vm4, %v11701_v17  ;;  %vm16584_vm4 = vmand %vm16553_vm12, %vm16552_vm8  ;;  %v1709_v51 = vmax.f32 %v16590_v14, %v9977_v53  ;;  %v1970_v17 = vpop.f32.mrb[45].mxu1  ;;  %vm13432_vm1 = vcmp.ge.s32.totalorder %v16591_v47, 1  ;;  %v16594_v1 = vmov %v16591_v47  ;;  %v2129_v53 = vmax.f32 %v13377_v58, 0.0  ;;  %v16597_v47 = vld [vmem:[#allocation25_spill] sm:$0xff]  ;;  %10086 = vmatpush3.bf16.msra.mxu0 %v11555_v39 }
 0x205   : > { %vm13421_vm10 = vmand %vm16584_vm4, %vm16583_vm6  ;;  %v16593_v25 = vsel %vm13432_vm1, 4294967295, %v16592_v25  ;;  %vm13438_vm4 = vcmp.le.s32.totalorder %v16594_v1, 14  ;;  %v16599_v14 = vmax.f32 %v16597_v47, %v16598_v20  ;;  %vm16600_vm6 = vnez %v16481_v34  ;;  %v9978_v1 = vpop.f32.mrb[46].mxu0  ;;  %v10012_v56 = vpop.f32.mrb[46].mxu1  ;;  %v16610_v47 = vld [vmem:[#allocation27_spill] sm:$0xff]  ;;  %v16611_v20 = vld [vmem:[#allocation28_spill] sm:$0xff] }
 0x206   : > { %v16586_v18 = vsel %vm13421_vm10, 4294967295, %v16585_v18  ;;  %v16596_v3 = vsel %vm13438_vm4, 4294967295, %v16595_v3  ;;  %vm13457_vm12 = vcmp.ge.s32.totalorder %v16601_v42, 1  ;;  %v16602_v36 = vmov 0  ;;  %vm16606_vm8 = vmand %vm16572_vm0, %vm13085_vm5  ;;  %v1619_v29 = vpop.f32.mrb[47].mxu0  ;;  %v1973_v32 = vpop.f32.mrb[47].mxu1 }
 0x207   : > { %16587 = vst [vmem:[#allocation22_spill] sm:$0xff] %v16586_v18  ;;  %v1707_v40 = vmax.f32 %v16599_v14, %v1616_v50  ;;  %v16603_v36 = vsel %vm13457_vm12, 4294967295, %v16602_v36  ;;  %v2522_v16 = vor.u32 %v2520_v5, %v13403_v43  ;;  %v16604_v58 = vmax.f32 %v13347_v57, 0.0  ;;  %v13539_v34 = vld [vmem:[#allocation7 + $0x28] sm:$0xff]  }
 0x208   : > { %vm16605_vm11 = vnez %v16487_v30  ;;  %v16607_v9 = vmov 0  ;;  %v2063_v42 = vmax.f32 %v1709_v51, %v10011_v52  ;;  %v16612_v5 = vmax.f32 %v16610_v47, %v16611_v20  ;;  %v16621_v20 = vld [vmem:[#allocation29_spill] sm:$0xff]  ;;  %10087 = vmatprep.subr.bf16.mxu0 %v13539_v34 }
 0x209   : > { %v2163_v50 = vsel %vm13342_vm15, %v16604_v58, 0.0  ;;  %vm13473_vm1 = vmand %vm16606_vm8, %vm16605_vm11  ;;  %v16613_v58 = vshra.s32 %v12761_v23, 4  ;;  %v16614_v30 = vmov 0  ;;  %v16617_v12 = vmov 0  ;;  %10088 = vmatpush3.bf16.msra.mxu0 %v13539_v34 }
 0x20a   : > { %v16608_v9 = vsel %vm13473_vm1, 4294967295, %v16607_v9  ;;  %v1710_v14 = vmax.f32 %v16612_v5, %v9978_v1  ;;  %v2514_v52 = vor.u32 %v2512_v37, %v13428_v33  ;;  %v13493_v51 = vpack.c.bf16 %v2163_v50, %v2162_v21  ;;  %v16622_v5 = vld [vmem:[#allocation30_spill] sm:$0xff]  ;;  %vm16628_vm8 = vmand %vm16600_vm6, %vm13143_vm9 }
 0x20b   : > { %16609 = vst [vmem:[#allocation65_spill] sm:$0xff] %v16608_v9  ;;  %vm13482_vm12 = vcmp.ge.s32.totalorder %v16613_v58, 1  ;;  %v16616_v54 = vmov %v16613_v58  ;;  %v2161_v1 = vsel %vm13421_vm10, %v2129_v53, 0.0  ;;  %v2061_v47 = vmax.f32 %v1707_v40, %v1970_v17 }
 0x20c   : > { %v16615_v30 = vsel %vm13482_vm12, 4294967295, %v16614_v30  ;;  %vm13488_vm5 = vcmp.le.s32.totalorder %v16616_v54, 14  ;;  %vm16619_vm11 = vnez %v16506_v11  ;;  %vm16620_vm0 = vnez %v16503_v22  ;;  %2209 = vst [vmem:[#allocation2 + $0x38] sm:$0xff] %v13493_v51 }
 0x20d   : > { %v16618_v12 = vsel %vm13488_vm5, 4294967295, %v16617_v12  ;;  %v16623_v58 = vmax.f32 %v16621_v20, %v16622_v5  ;;  %v16624_v46 = vand.u32 15, %v12751_v26  ;;  %v16625_v2 = vmov 0 }
 0x20e   : > { %v13511_v37 = vpack.c.bf16 %v2161_v1, %v2160_v6  ;;  %v13514_v40 = vadd.f32 %v12778_v49, %v2063_v42  ;;  %vm16627_vm5 = vnez %v16515_v48  ;;  %v16629_v26 = vmov 0 }
 0x20f   : > { %v1708_v54 = vmax.f32 %v16623_v58, %v1619_v29  ;;  %vm13506_vm12 = vcmp.le.s32.totalorder %v16624_v46, 14  ;;  %vm13523_vm4 = vmand %vm16628_vm8, %vm16627_vm5  ;;  %v2064_v29 = vmax.f32 %v1710_v14, %v10012_v56  ;;  %v16632_v46 = vld [vmem:[#allocation66_spill] sm:$0xff]  ;;  %v16634_v15 = vmov 0 }
 0x210   : > { %v16626_v2 = vsel %vm13506_vm12, 4294967295, %v16625_v2  ;;  %v16630_v26 = vsel %vm13523_vm4, 4294967295, %v16629_v26  ;;  %v16633_v21 = vshra.s32 %v16632_v46, 4  ;;  %v16637_v48 = vmov 0  ;;  %2208 = vst [vmem:[#allocation2 + $0x30] sm:$0xff] %v13511_v37  ;;  %vm16646_vm8 = vmand %vm16620_vm0, %vm16619_vm11 }
 0x211   : > { %16631 = vst [vmem:[#allocation23_spill] sm:$0xff] %v16630_v26  ;;  %vm16639_vm9 = vsmask.f32 256  ;;  %v13547_v56 = vadd.f32 %v12778_v49, %v2061_v47  ;;  %vm16640_vm6 = vnez %v16531_v61  ;;  %vm16641_vm5 = vnez %v16528_v41  ;;  %v16654_v47 = vld [vmem:[#allocation67_spill] sm:$0xff] }
 0x212   : > { %vm13529_vm12 = vcmp.ge.s32.totalorder %v16633_v21, 1  ;;  %v16636_v17 = vmov %v16633_v21  ;;  %v13543_v8 = vsel %vm16639_vm9, %v13178_v63, %v2514_v52  ;;  %v2062_v6 = vmax.f32 %v1708_v54, %v1973_v32 }
 0x213   : > { %v16635_v15 = vsel %vm13529_vm12, 4294967295, %v16634_v15  ;;  %vm13535_vm13 = vcmp.le.s32.totalorder %v16636_v17, 14  ;;  %v16642_v50 = vand.u32 15, %v12761_v23  ;;  %v16643_v42 = vmov 0 }
 0x214   : > { %v16638_v48 = vsel %vm13535_vm13, 4294967295, %v16637_v48  ;;  %v2533_v63 = vshrl.u32 %v13493_v51, 16  ;;  %v2536_v14 = vshll.u32 %v13493_v51, 16  ;;  %v16084_v52 = vmax.f32 %v13514_v40, 0.0 }
 0x215   : > { %vm13555_vm12 = vcmp.le.s32.totalorder %v16642_v50, 14  ;;  %vm16645_vm9 = vnez %v16539_v27  ;;  %v16647_v23 = vmov 0  ;;  %v13575_v32 = vadd.f32 %v12778_v49, %v2064_v29  ;;  %v9981_v29 = vpop.f32.mrb[48].mxu0 }
 0x216   : > { %v16644_v42 = vsel %vm13555_vm12, 4294967295, %v16643_v42  ;;  %vm13570_vm13 = vmand %vm16646_vm8, %vm16645_vm9  ;;  %v16650_v51 = vmov 0  ;;  %v16653_v27 = vmax.f32 %v13319_v31, 0.0  ;;  %v2525_v11 = vshrl.u32 %v13511_v37, 16 }
 0x217   : > { %v16648_v23 = vsel %vm13570_vm13, 4294967295, %v16647_v23  ;;  %vm13581_vm12 = vmpackc.low %vm13421_vm10, %vm13296_vm14  ;;  %v2528_v1 = vshll.u32 %v13511_v37, 16  ;;  %v16655_v20 = vshra.s32 %v16654_v47, 4  ;;  %v16090_v31 = vmax.f32 %v13547_v56, 0.0  ;;  %v10015_v37 = vpop.f32.mrb[48].mxu1 }
 0x218   : > { %16649 = vst [vmem:[#allocation24_spill] sm:$0xff] %v16648_v23  ;;  %v16651_v51 = vsel %vm13581_vm12, 4294967295, %v16650_v51  ;;  %v11704_v22 = vpack.c.bf16 %v2129_v53, %v16653_v27  ;;  %v13605_v53 = vadd.f32 %v12778_v49, %v2062_v6  ;;  %vm16661_vm8 = vnez %v16551_v45  ;;  %vm13621_vm14 = vmpackc.low %vm13342_vm15, %vm13246_vm3 }
 0x219   : > { %16652 = vst [vmem:[#allocation25_spill] sm:$0xff] %v16651_v51  ;;  %vm13593_vm11 = vcmp.ge.s32.totalorder %v16655_v20, 1  ;;  %v16658_v58 = vmov %v16655_v20  ;;  %vm16662_vm9 = vnez %v16548_v60  ;;  %v16663_v21 = vand.u32 15, %v16632_v46 }
 0x21a   : > { %11705 = vmatmul.mubr.msk.bf16.gmra.mrb[72].mxu0 %vm13581_vm12, %v11704_v22  ;;  %vm13599_vm0 = vcmp.le.s32.totalorder %v16658_v58, 14  ;;  %v16664_v17 = vmov 0  ;;  %v16666_v6 = vmov 0  ;;  %v16669_v50 = vmax.f32 %v13287_v55, 0.0 }
 0x21b   : > { %vm13613_vm10 = vcmp.ge.s32.totalorder %v16663_v21, 1  ;;  %v16667_v6 = vsel %vm13621_vm14, 4294967295, %v16666_v6  ;;  %v16670_v27 = vmax.f32 %v13347_v57, 0.0  ;;  %v13631_v46 = vrot.slane %v2533_v63, 7  ;;  %v1632_v21 = vpop.f32.mrb[49].mxu0 }
 0x21c   : > { %v16665_v17 = vsel %vm13613_vm10, 4294967295, %v16664_v17  ;;  %16668 = vst [vmem:[#allocation26_spill] sm:$0xff] %v16667_v6  ;;  %vm16672_vm12 = vsmask.f32 256  ;;  %v2166_v58 = vsel %vm13473_vm1, %v16084_v52, 0.0  ;;  %vm16674_vm15 = vnez %v16556_v4 }
 0x21d   : > { %v11707_v22 = vpack.c.bf16 %v16670_v27, %v16669_v50  ;;  %16671 = vst [vmem:[#allocation27_spill] sm:$0xff] %v13631_v46  ;;  %v13635_v20 = vsel %vm16672_vm12, %v13428_v33, %v2522_v16  ;;  %v16676_v57 = vmov 0  ;;  %v16679_v33 = vld [vmem:[#allocation31_spill] sm:$0xff]  ;;  %v16680_v16 = vld [vmem:[#allocation32_spill] sm:$0xff]  ;;  %v1986_v50 = vpop.f32.mrb[49].mxu1  ;;  %v13656_v27 = vrot.slane %v2525_v11, 7 }
 0x21e   : > { %16673 = vst [vmem:[#allocation28_spill] sm:$0xff] %v13635_v20  ;;  %v16681_v39 = vmax.f32 %v16679_v33, %v16680_v16  ;;  %v16684_v4 = vmov 0  ;;  %v16687_v61 = vmov 0  ;;  %v11557_v33 = vld [vmem:[#allocation7 + $0x30] sm:$0xff]   ;;  %v2164_v11 = vsel %vm13523_vm4, %v16090_v31, 0.0  ;;  %v10016_v6 = vpop.f32.mrb[50].mxu1 }
 0x21f   : > { %11708 = vmatprep.mubr.msk.bf16.mxu0 %vm13621_vm14, %v11707_v22  ;;  %vm16675_vm14 = vmand %vm16641_vm5, %vm16640_vm6  ;;  %v16682_v22 = vld [vmem:[#allocation69_spill] sm:$0xff]  ;;  %v16690_v16 = vld [vmem:[#allocation34_spill] sm:$0xff]  ;;  %v16692_v51 = vand.u32 15, %v16654_v47  ;;  %v16693_v18 = vmov 0  ;;  %v2538_v31 = vor.u32 %v2536_v14, %v13631_v46  ;;  %vm16696_vm5 = vnez %v16575_v13  ;;  %v1989_v24 = vpop.f32.mrb[51].mxu1  ;;  %10089 = vmatprep.subr.bf16.mxu0 %v11557_v33 }
 0x220   : > { %vm13649_vm3 = vmand %vm16675_vm14, %vm16674_vm15  ;;  %v1713_v63 = vmax.f32 %v16681_v39, %v9981_v29  ;;  %v16683_v52 = vshra.s32 %v16682_v22, 4  ;;  %v2133_v29 = vmax.f32 %v13605_v53, 0.0  ;;  %v16695_v53 = vmax.f32 %v13575_v32, 0.0  ;;  %10090 = vmatpush3.bf16.msra.mxu0 %v11557_v33 }
 0x221   : > { %v16677_v57 = vsel %vm13649_vm3, 4294967295, %v16676_v57  ;;  %vm13685_vm6 = vcmp.ge.s32.totalorder %v16692_v51, 1  ;;  %vm16697_vm14 = vmand %vm16662_vm9, %vm16661_vm8  ;;  %v16698_v47 = vmov 0  ;;  %v16706_v13 = vmov 0  ;;  %10091 = vmatprep.subr.bf16.mxu0 %v13767_v28 }
 0x222   : > { %16678 = vst [vmem:[#allocation29_spill] sm:$0xff] %v16677_v57  ;;  %vm13660_vm12 = vcmp.ge.s32.totalorder %v16683_v52, 1  ;;  %v16686_v41 = vmov %v16683_v52  ;;  %v16689_v52 = vld [vmem:[#allocation33_spill] sm:$0xff]  ;;  %v16694_v18 = vsel %vm13685_vm6, 4294967295, %v16693_v18  ;;  %v2067_v51 = vmax.f32 %v1713_v63, %v10015_v37 }
 0x223   : > { %v16685_v4 = vsel %vm13660_vm12, 4294967295, %v16684_v4  ;;  %vm13666_vm15 = vcmp.le.s32.totalorder %v16686_v41, 14  ;;  %v16691_v39 = vmax.f32 %v16689_v52, %v16690_v16  ;;  %v9982_v41 = vpop.f32.mrb[50].mxu0  ;;  %vm13701_vm12 = vmand %vm16697_vm14, %vm16696_vm5  ;;  %v16701_v52 = vld [vmem:[#allocation35_spill] sm:$0xff]  ;;  %v16702_v16 = vld [vmem:[#allocation36_spill] sm:$0xff]  ;;  %v16709_v45 = vmov 0 }
 0x224   : > { %v16688_v61 = vsel %vm13666_vm15, 4294967295, %v16687_v61  ;;  %v16699_v47 = vsel %vm13701_vm12, 4294967295, %v16698_v47  ;;  %v16703_v14 = vmax.f32 %v16701_v52, %v16702_v16  ;;  %v1635_v35 = vpop.f32.mrb[51].mxu0  ;;  %v2530_v37 = vor.u32 %v2528_v1, %v13656_v27  ;;  %v16713_v16 = vld [vmem:[#allocation37_spill] sm:$0xff]  ;;  %vm16720_vm5 = vmand %vm13365_vm2, %vm13371_vm7  ;;  %10092 = vmatpush3.bf16.msra.mxu0 %v13767_v28 }
 0x225   : > { %v1711_v55 = vmax.f32 %v16691_v39, %v1632_v21  ;;  %v2167_v21 = vsel %vm13570_vm13, %v16695_v53, 0.0  ;;  %16700 = vst [vmem:[#allocation30_spill] sm:$0xff] %v16699_v47  ;;  %v16705_v53 = vshra.s32 %v16704_v10, 4  ;;  %vm16711_vm9 = vnez %v16596_v3 }
 0x226   : > { %v1714_v39 = vmax.f32 %v16703_v14, %v9982_v41  ;;  %v13721_v63 = vpack.c.bf16 %v2167_v21, %v2166_v58  ;;  %v2165_v41 = vsel %vm13649_vm3, %v2133_v29, 0.0  ;;  %vm16712_vm14 = vnez %v16593_v25  ;;  %v16714_v14 = vld [vmem:[#allocation38_spill] sm:$0xff] }
 0x227   : > { %vm13710_vm6 = vcmp.ge.s32.totalorder %v16705_v53, 1  ;;  %v16708_v60 = vmov %v16705_v53  ;;  %v2065_v52 = vmax.f32 %v1711_v55, %v1986_v50  ;;  %v16715_v53 = vmax.f32 %v16713_v16, %v16714_v14 }
 0x228   : > { %v16707_v13 = vsel %vm13710_vm6, 4294967295, %v16706_v13  ;;  %vm13716_vm8 = vcmp.le.s32.totalorder %v16708_v60, 14  ;;  %v16716_v46 = vand.u32 15, %v16682_v22  ;;  %v16717_v20 = vmov 0  ;;  %2211 = vst [vmem:[#allocation2 + $0x48] sm:$0xff] %v13721_v63 }
 0x229   : > { %v16710_v45 = vsel %vm13716_vm8, 4294967295, %v16709_v45  ;;  %v1712_v60 = vmax.f32 %v16715_v53, %v1635_v35  ;;  %v13739_v1 = vpack.c.bf16 %v2165_v41, %v2164_v11  ;;  %v13742_v58 = vadd.f32 %v12778_v49, %v2067_v51 }
 0x22a   : > { %vm13734_vm6 = vcmp.le.s32.totalorder %v16716_v46, 14  ;;  %vm16719_vm8 = vnez %v16603_v36  ;;  %v16721_v35 = vmov 0  ;;  %v2068_v46 = vmax.f32 %v1714_v39, %v10016_v6 }
 0x22b   : > { %v16718_v20 = vsel %vm13734_vm6, 4294967295, %v16717_v20  ;;  %vm13751_vm15 = vmand %vm16720_vm5, %vm16719_vm8  ;;  %v16724_v55 = vshra.s32 %v12901_v59, 4  ;;  %v16725_v34 = vmov 0  ;;  %v16728_v36 = vmov 0  ;;  %2210 = vst [vmem:[#allocation2 + $0x40] sm:$0xff] %v13739_v1 }
 0x22c   : > { %v16722_v35 = vsel %vm13751_vm15, 4294967295, %v16721_v35  ;;  %vm16730_vm2 = vsmask.f32 256  ;;  %v13775_v6 = vadd.f32 %v12778_v49, %v2065_v52  ;;  %vm16731_vm7 = vnez %v16618_v12  ;;  %vm16737_vm5 = vmand %vm16712_vm14, %vm16711_vm9 }
 0x22d   : > { %16723 = vst [vmem:[#allocation66_spill] sm:$0xff] %v16722_v35  ;;  %vm13757_vm6 = vcmp.ge.s32.totalorder %v16724_v55, 1  ;;  %v16727_v50 = vmov %v16724_v55  ;;  %v13771_v19 = vsel %vm16730_vm2, %v13403_v43, %v2530_v37  ;;  %vm16732_vm8 = vnez %v16615_v30 }
 0x22e   : > { %v16726_v34 = vsel %vm13757_vm6, 4294967295, %v16725_v34  ;;  %vm13763_vm10 = vcmp.le.s32.totalorder %v16727_v50, 14  ;;  %v2066_v22 = vmax.f32 %v1712_v60, %v1989_v24  ;;  %v16733_v11 = vand.u32 15, %v16704_v10  ;;  %v9985_v60 = vpop.f32.mrb[52].mxu0 }
 0x22f   : > { %v16729_v36 = vsel %vm13763_vm10, 4294967295, %v16728_v36  ;;  %v16734_v21 = vmov 0  ;;  %v451_v43 = vand.u32 15, %v12990_v62  ;;  %v454_v51 = vand.u32 15, %v13010_v38 }
 0x230   : > { %vm13783_vm6 = vcmp.le.s32.totalorder %v16733_v11, 14  ;;  %v16111_v39 = vmax.f32 %v13742_v58, 0.0  ;;  %vm16736_vm2 = vnez %v16626_v2  ;;  %v16738_v10 = vmov 0 }
 0x231   : > { %v16735_v21 = vsel %vm13783_vm6, 4294967295, %v16734_v21  ;;  %vm13798_vm10 = vmand %vm16737_vm5, %vm16736_vm2  ;;  %v13803_v24 = vadd.f32 %v12778_v49, %v2068_v46  ;;  %v16741_v37 = vmov 0  ;;  %v16744_v2 = vmax.f32 %v13547_v56, 0.0 }
 0x232   : > { %v16739_v10 = vsel %vm13798_vm10, 4294967295, %v16738_v10  ;;  %vm13809_vm6 = vmpackc.low %vm13649_vm3, %vm13523_vm4  ;;  %v16745_v3 = vshra.s32 %v12990_v62, 4  ;;  %v16746_v41 = vmov 0  ;;  %v420_v14 = vshra.s32 %v13148_v44, 4  ;;  %v10019_v62 = vpop.f32.mrb[52].mxu1 }
 0x233   : > { %16740 = vst [vmem:[#allocation67_spill] sm:$0xff] %v16739_v10  ;;  %v16742_v37 = vsel %vm13809_vm6, 4294967295, %v16741_v37  ;;  %v11710_v25 = vpack.c.bf16 %v2133_v29, %v16744_v2  ;;  %v452_v56 = vand.u32 15, %v13148_v44  ;;  %v13833_v53 = vadd.f32 %v12778_v49, %v2066_v22  ;;  %vm13849_vm4 = vmpackc.low %vm13570_vm13, %vm13473_vm1  ;;  %v16856_v10 = vld [vmem:[#allocation54_spill] sm:$0xff] }
 0x234   : > { %16743 = vst [vmem:[#allocation31_spill] sm:$0xff] %v16742_v37  ;;  %vm13819_vm9 = vcmp.ge.s32.totalorder %v16745_v3, 1  ;;  %v16748_v52 = vmov %v16745_v3  ;;  %vm16751_vm5 = vnez %v16638_v48  ;;  %vm16752_vm2 = vnez %v16635_v15  ;;  %vm16763_vm1 = vmand %vm16732_vm8, %vm16731_vm7  ;;  %v16768_v3 = vld [vmem:[#allocation40_spill] sm:$0xff] }
 0x235   : > { %11711 = vmatmul.mubr.msk.bf16.gmra.mrb[76].mxu0 %vm13809_vm6, %v11710_v25  ;;  %v16747_v41 = vsel %vm13819_vm9, 4294967295, %v16746_v41  ;;  %vm13825_vm14 = vcmp.le.s32.totalorder %v16748_v52, 14  ;;  %v16753_v46 = vand.u32 15, %v12901_v59  ;;  %v16754_v55 = vmov 0  ;;  %vm16783_vm8 = vmand %vm16752_vm2, %vm16751_vm5 }
 0x236   : > { %v16756_v44 = vmov 0  ;;  %v16759_v50 = vmax.f32 %v13514_v40, 0.0  ;;  %v16760_v22 = vmax.f32 %v13575_v32, 0.0  ;;  %v13860_v59 = vadd.s32 224, %v12562_v7  ;;  %v16767_v32 = vld [vmem:[#allocation39_spill] sm:$0xff] }
 0x237   : > { %vm13841_vm3 = vcmp.ge.s32.totalorder %v16753_v46, 1  ;;  %v16757_v44 = vsel %vm13849_vm4, 4294967295, %v16756_v44  ;;  %vm16761_vm6 = vsmask.f32 256  ;;  %v2139_v25 = vmax.f32 %v13803_v24, 0.0  ;;  %v1648_v46 = vpop.f32.mrb[53].mxu0 }
 0x238   : > { %v16755_v55 = vsel %vm13841_vm3, 4294967295, %v16754_v55  ;;  %16758 = vst [vmem:[#allocation32_spill] sm:$0xff] %v16757_v44  ;;  %v11713_v11 = vpack.c.bf16 %v16760_v22, %v16759_v50  ;;  %v13864_v2 = vsel %vm16761_vm6, %v13656_v27, %v2538_v31  ;;  %vm16762_vm13 = vnez %v16644_v42  ;;  %v2002_v31 = vpop.f32.mrb[53].mxu1 }
 0x239   : > { %vm13874_vm3 = vmand %vm16763_vm1, %vm16762_vm13  ;;  %v16764_v40 = vmov 0  ;;  %v16769_v33 = vmax.f32 %v16767_v32, %v16768_v3  ;;  %v16770_v27 = vshra.s32 %v13010_v38, 4  ;;  %v16771_v24 = vmov 0  ;;  %v16777_v32 = vld [vmem:[#allocation42_spill] sm:$0xff] }
 0x23a   : > { %11714 = vmatprep.mubr.msk.bf16.mxu0 %vm13849_vm4, %v11713_v11  ;;  %v16765_v40 = vsel %vm13874_vm3, 4294967295, %v16764_v40  ;;  %v16774_v12 = vmov 0  ;;  %v425_v42 = vshra.s32 %v13315_v0, 4  ;;  %v13895_v50 = vadd.s32 248, %v12562_v7  ;;  %v16776_v11 = vld [vmem:[#allocation41_spill] sm:$0xff]  ;;  %vm14014_vm9 = vmpackc.low %vm13874_vm3, %vm13751_vm15 }
 0x23b   : > { %16766 = vst [vmem:[#allocation69_spill] sm:$0xff] %v16765_v40  ;;  %v1717_v52 = vmax.f32 %v16769_v33, %v9985_v60  ;;  %vm13883_vm6 = vcmp.ge.s32.totalorder %v16770_v27, 1  ;;  %v16773_v30 = vmov %v16770_v27  ;;  %v13898_v60 = vld [vmem:[#allocation7 + $0x80] sm:$0xff]   ;;  %v2170_v22 = vsel %vm13701_vm12, %v16111_v39, 0.0  ;;  %v9986_v27 = vpop.f32.mrb[54].mxu0 }
 0x23c   : > { %v16772_v24 = vsel %vm13883_vm6, 4294967295, %v16771_v24  ;;  %vm13889_vm4 = vcmp.le.s32.totalorder %v16773_v30, 14  ;;  %v2137_v38 = vmax.f32 %v13833_v53, 0.0  ;;  %v16778_v3 = vmax.f32 %v16776_v11, %v16777_v32  ;;  %v10020_v30 = vpop.f32.mrb[54].mxu1  ;;  %v16787_v11 = vld [vmem:[#allocation43_spill] sm:$0xff]  ;;  %v16788_v32 = vld [vmem:[#allocation44_spill] sm:$0xff]  ;;  %10125 = vmatprep.subr.bf16.mxu0 %v13898_v60 }
 0x23d   : > { %v16775_v12 = vsel %vm13889_vm4, 4294967295, %v16774_v12  ;;  %vm13912_vm1 = vcmp.ge.s32.totalorder %v451_v43, 1  ;;  %v16779_v29 = vmov 0  ;;  %v457_v44 = vand.u32 15, %v13315_v0  ;;  %v2005_v57 = vpop.f32.mrb[55].mxu1 }
 0x23e   : > { %v1715_v33 = vmax.f32 %v16778_v3, %v1648_v46  ;;  %v16780_v29 = vsel %vm13912_vm1, 4294967295, %v16779_v29  ;;  %v16781_v39 = vmax.f32 %v13775_v6, 0.0  ;;  %v2171_v46 = vsel %vm13798_vm10, %v2139_v25, 0.0 }
 0x23f   : > { %vm16782_vm7 = vnez %v16665_v17  ;;  %v16784_v43 = vmov 0  ;;  %v2071_v0 = vmax.f32 %v1717_v52, %v10019_v62  ;;  %v16789_v3 = vmax.f32 %v16787_v11, %v16788_v32  ;;  %v16796_v52 = vld [vmem:[#allocation45_spill] sm:$0xff] }
 0x240   : > { %v2168_v53 = vsel %vm13751_vm15, %v16781_v39, 0.0  ;;  %vm13930_vm13 = vmand %vm16783_vm8, %vm16782_vm7  ;;  %v1651_v39 = vpop.f32.mrb[55].mxu0  ;;  %vm13937_vm1 = vcmp.ge.s32.totalorder %v420_v14, 1  ;;  %v16790_v26 = vmov 0  ;;  %vm13941_vm6 = vcmp.le.s32.totalorder %v420_v14, 14 }
 0x241   : > { %v16785_v43 = vsel %vm13930_vm13, 4294967295, %v16784_v43  ;;  %v1718_v37 = vmax.f32 %v16789_v3, %v9986_v27  ;;  %v16791_v26 = vsel %vm13937_vm1, 4294967295, %v16790_v26  ;;  %v16792_v15 = vmov 0  ;;  %v16797_v27 = vld [vmem:[#allocation46_spill] sm:$0xff]  ;;  %vm16802_vm7 = vmand %vm13593_vm11, %vm13599_vm0  ;;  %v9989_v3 = vpop.f32.mrb[56].mxu0 }
 0x242   : > { %16786 = vst [vmem:[#allocation33_spill] sm:$0xff] %v16785_v43  ;;  %v16793_v15 = vsel %vm13941_vm6, 4294967295, %v16792_v15  ;;  %v13945_v48 = vpack.c.bf16 %v2171_v46, %v2170_v22  ;;  %v2169_v17 = vsel %vm13874_vm3, %v2137_v38, 0.0  ;;  %v2069_v62 = vmax.f32 %v1715_v33, %v2002_v31  ;;  %vm14043_vm15 = vmpackc.low %vm13798_vm10, %vm13701_vm12 }
 0x243   : > { %vm16794_vm5 = vnez %v16688_v61  ;;  %vm16795_vm2 = vnez %v16685_v4  ;;  %v16798_v11 = vmax.f32 %v16796_v52, %v16797_v27  ;;  %vm13956_vm8 = vcmp.le.s32.totalorder %v454_v51, 14  ;;  %v16835_v27 = vld [vmem:[#allocation48_spill] sm:$0xff] }
 0x244   : > { %v16799_v14 = vmov 0  ;;  %v13961_v22 = vpack.c.bf16 %v2169_v17, %v2168_v53  ;;  %v13964_v46 = vadd.f32 %v12778_v49, %v2071_v0  ;;  %vm16801_vm1 = vnez %v16694_v18  ;;  %2213 = vst [vmem:[#allocation2 + $0x58] sm:$0xff] %v13945_v48 }
 0x245   : > { %v1716_v32 = vmax.f32 %v16798_v11, %v1651_v39  ;;  %v16800_v14 = vsel %vm13956_vm8, 4294967295, %v16799_v14  ;;  %vm13973_vm6 = vmand %vm16802_vm7, %vm16801_vm1  ;;  %v16803_v31 = vmov 0  ;;  %v2072_v51 = vmax.f32 %v1718_v37, %v10020_v30  ;;  %v16913_v30 = vld [vmem:[#allocation61_spill] sm:$0xff] }
 0x246   : > { %v16804_v31 = vsel %vm13973_vm6, 4294967295, %v16803_v31  ;;  %v423_v33 = vshra.s32 %v13860_v59, 4  ;;  %v13981_v28 = vadd.f32 %v12778_v49, %v2069_v62  ;;  %vm16806_vm8 = vnez %v16710_v45  ;;  %2212 = vst [vmem:[#allocation2 + $0x50] sm:$0xff] %v13961_v22  ;;  %vm16811_vm1 = vmand %vm16795_vm2, %vm16794_vm5 }
 0x247   : > { %16805 = vst [vmem:[#allocation34_spill] sm:$0xff] %v16804_v31  ;;  %vm16807_vm4 = vnez %v16707_v13  ;;  %v2070_v18 = vmax.f32 %v1716_v32, %v2005_v57  ;;  %vm13987_vm11 = vcmp.le.s32.totalorder %v452_v56, 14  ;;  %v16808_v5 = vmov 0 }
 0x248   : > { %v16809_v5 = vsel %vm13987_vm11, 4294967295, %v16808_v5  ;;  %v13992_v54 = vadd.s32 232, %v12562_v7  ;;  %v16130_v37 = vmax.f32 %v13964_v46, 0.0  ;;  %vm16810_vm0 = vnez %v16718_v20  ;;  %vm16830_vm10 = vmand %vm16807_vm4, %vm16806_vm8 }
 0x249   : > { %vm14003_vm7 = vmand %vm16811_vm1, %vm16810_vm0  ;;  %v16812_v57 = vmov 0  ;;  %v14008_v56 = vadd.f32 %v12778_v49, %v2072_v51  ;;  %v16815_v7 = vmov 0  ;;  %v16818_v20 = vmax.f32 %v13775_v6, 0.0  ;;  %v10023_v6 = vpop.f32.mrb[56].mxu1 }
 0x24a   : > { %v16813_v57 = vsel %vm14003_vm7, 4294967295, %v16812_v57  ;;  %v16816_v7 = vsel %vm14014_vm9, 4294967295, %v16815_v7  ;;  %vm14025_vm5 = vcmp.ge.s32.totalorder %v425_v42, 1  ;;  %vm14029_vm2 = vcmp.le.s32.totalorder %v425_v42, 14  ;;  %v2018_v51 = vpop.f32.mrb[57].mxu1 }
 0x24b   : > { %16814 = vst [vmem:[#allocation35_spill] sm:$0xff] %v16813_v57  ;;  %16817 = vst [vmem:[#allocation36_spill] sm:$0xff] %v16816_v7  ;;  %v14020_v4 = vpack.c.bf16 %v2137_v38, %v16818_v20  ;;  %v2140_v53 = vmax.f32 %v13981_v28, 0.0  ;;  %v2109_v0 = vadd.f32 %v12778_v49, %v2070_v18  ;;  %vm16823_vm0 = vnez %v16729_v36  ;;  %v16841_v18 = vld [vmem:[#allocation49_spill] sm:$0xff] }
 0x24c   : > { %vm16824_vm1 = vnez %v16726_v34  ;;  %v16825_v42 = vmov 0  ;;  %v16828_v38 = vmax.f32 %v13742_v58, 0.0  ;;  %v455_v17 = vand.u32 15, %v13860_v59  ;;  %v1664_v59 = vpop.f32.mrb[57].mxu0  ;;  %v16855_v36 = vld [vmem:[#allocation53_spill] sm:$0xff] }
 0x24d   : > { %11717 = vmatmul.mubr.msk.bf16.gmra.mrb[80].mxu0 %vm14014_vm9, %v14020_v4  ;;  %v16826_v42 = vsel %vm14043_vm15, 4294967295, %v16825_v42  ;;  %v426_v62 = vshra.s32 %v13895_v50, 4  ;;  %v2143_v52 = vmax.f32 %v14008_v56, 0.0  ;;  %vm16829_vm3 = vnez %v16735_v21  ;;  %v16842_v56 = vld [vmem:[#allocation50_spill] sm:$0xff]  ;;  %vm16846_vm8 = vmand %vm16824_vm1, %vm16823_vm0 }
 0x24e   : > { %16827 = vst [vmem:[#allocation70_spill] sm:$0xff] %v16826_v42  ;;  %v14049_v39 = vpack.c.bf16 %v2139_v25, %v16828_v38  ;;  %vm14064_vm12 = vmand %vm16830_vm10, %vm16829_vm3  ;;  %v16831_v58 = vmov 0  ;;  %v16834_v25 = vld [vmem:[#allocation47_spill] sm:$0xff]  ;;  %v16837_v28 = vmov 0  ;;  %vm14075_vm9 = vcmp.ge.s32.totalorder %v423_v33, 1  ;;  %v10024_v38 = vpop.f32.mrb[58].mxu1 }
 0x24f   : > { %v16832_v58 = vsel %vm14064_vm12, 4294967295, %v16831_v58  ;;  %v16836_v11 = vmax.f32 %v16834_v25, %v16835_v27  ;;  %v16839_v21 = vmov 0  ;;  %v2174_v13 = vsel %vm13930_vm13, %v16130_v37, 0.0  ;;  %v2021_v40 = vpop.f32.mrb[59].mxu1 }
 0x250   : > { %11720 = vmatprep.mubr.msk.bf16.mxu0 %vm14043_vm15, %v14049_v39  ;;  %16833 = vst [vmem:[#allocation37_spill] sm:$0xff] %v16832_v58  ;;  %vm14071_vm15 = vcmp.ge.s32.totalorder %v457_v44, 1  ;;  %v16840_v21 = vsel %vm14075_vm9, 4294967295, %v16839_v21  ;;  %v2141_v45 = vmax.f32 %v2109_v0, 0.0  ;;  %v16843_v20 = vmax.f32 %v16841_v18, %v16842_v56  ;;  %v9990_v44 = vpop.f32.mrb[58].mxu0  ;;  %v16850_v18 = vld [vmem:[#allocation51_spill] sm:$0xff] }
 0x251   : > { %v1721_v32 = vmax.f32 %v16836_v11, %v9989_v3  ;;  %v16838_v28 = vsel %vm14071_vm15, 4294967295, %v16837_v28  ;;  %vm16844_vm10 = vnez %v16747_v41  ;;  %v458_v25 = vand.u32 15, %v13895_v50  ;;  %v16851_v50 = vld [vmem:[#allocation52_spill] sm:$0xff]  ;;  %v1667_v37 = vpop.f32.mrb[59].mxu0  ;;  %v16914_v58 = vld [vmem:[#allocation62_spill] sm:$0xff] }
 0x252   : > { %v1719_v3 = vmax.f32 %v16843_v20, %v1664_v59  ;;  %v2172_v27 = vsel %vm13973_vm6, %v2140_v53, 0.0  ;;  %v2175_v11 = vsel %vm14003_vm7, %v2143_v52, 0.0  ;;  %vm16845_vm4 = vnez %v16755_v55 }
 0x253   : > { %vm14102_vm9 = vmand %vm16846_vm8, %vm16845_vm4  ;;  %v16847_v0 = vmov 0  ;;  %v2075_v59 = vmax.f32 %v1721_v32, %v10023_v6  ;;  %v16852_v56 = vmax.f32 %v16850_v18, %v16851_v50  ;;  %v14109_v35 = vpack.c.bf16 %v2175_v11, %v2174_v13  ;;  %v10027_v11 = vpop.f32.mrb[60].mxu1 }
 0x254   : > { %v16848_v0 = vsel %vm14102_vm9, 4294967295, %v16847_v0  ;;  %v2173_v55 = vsel %vm14064_vm12, %v2141_v45, 0.0  ;;  %v2073_v34 = vmax.f32 %v1719_v3, %v2018_v51  ;;  %vm16853_vm3 = vnez %v16775_v12  ;;  %vm16859_vm8 = vmand %vm16844_vm10, %vm13825_vm14 }
 0x255   : > { %16849 = vst [vmem:[#allocation38_spill] sm:$0xff] %v16848_v0  ;;  %v1722_v20 = vmax.f32 %v16852_v56, %v9990_v44  ;;  %vm16854_vm0 = vnez %v16772_v24  ;;  %v16857_v6 = vmax.f32 %v16855_v36, %v16856_v10  ;;  %v14120_v47 = vpack.c.bf16 %v2173_v55, %v2172_v27  ;;  %2215 = vst [vmem:[#allocation2 + $0x68] sm:$0xff] %v14109_v35  ;;  %v9993_v27 = vpop.f32.mrb[60].mxu0 }
 0x256   : > { %v14123_v44 = vadd.f32 %v12778_v49, %v2075_v59  ;;  %vm16858_vm4 = vnez %v16780_v29  ;;  %v16860_v51 = vmov 0  ;;  %v424_v10 = vshra.s32 %v13992_v54, 4  ;;  %v1680_v55 = vpop.f32.mrb[61].mxu0 }
 0x257   : > { %v1720_v32 = vmax.f32 %v16857_v6, %v1667_v37  ;;  %vm14132_vm15 = vmand %vm16859_vm8, %vm16858_vm4  ;;  %v2076_v13 = vmax.f32 %v1722_v20, %v10024_v38  ;;  %v14139_v37 = vadd.f32 %v12778_v49, %v2073_v34  ;;  %vm16863_vm1 = vnez %v16793_v15  ;;  %2214 = vst [vmem:[#allocation2 + $0x60] sm:$0xff] %v14120_v47  ;;  %v2034_v34 = vpop.f32.mrb[61].mxu1  ;;  %v16901_v6 = vld [vmem:[#allocation57_spill] sm:$0xff] }
 0x258   : > { %v16861_v51 = vsel %vm14132_vm15, 4294967295, %v16860_v51  ;;  %vm16864_vm9 = vnez %v16791_v26  ;;  %vm14145_vm7 = vcmp.le.s32.totalorder %v423_v33, 14  ;;  %vm14149_vm14 = vcmp.ge.s32.totalorder %v455_v17, 1  ;;  %vm16870_vm4 = vmand %vm16854_vm0, %vm16853_vm3 }
 0x259   : > { %16862 = vst [vmem:[#allocation39_spill] sm:$0xff] %v16861_v51  ;;  %v2074_v41 = vmax.f32 %v1720_v32, %v2021_v40  ;;  %v16867_v29 = vmov 0  ;;  %v16143_v3 = vmax.f32 %v14123_v44, 0.0  ;;  %vm16869_vm10 = vnez %v16800_v14  ;;  %vm14181_vm3 = vmpackc.low %vm14064_vm12, %vm13973_vm6  ;;  %v16902_v32 = vld [vmem:[#allocation58_spill] sm:$0xff] }
 0x25a   : > { %v16868_v29 = vsel %vm14149_vm14, 4294967295, %v16867_v29  ;;  %vm14162_vm8 = vmand %vm16870_vm4, %vm16869_vm10  ;;  %v16871_v40 = vmov 0  ;;  %v14167_v33 = vadd.f32 %v12778_v49, %v2076_v13  ;;  %vm14169_vm11 = vcmp.ge.s32.totalorder %v426_v62, 1 }
 0x25b   : > { %v16872_v40 = vsel %vm14162_vm8, 4294967295, %v16871_v40  ;;  %vm14173_vm14 = vcmp.le.s32.totalorder %v426_v62, 14  ;;  %v16878_v24 = vmov 0  ;;  %v14185_v12 = vpack.c.bf16 %v2141_v45, %v2140_v53  ;;  %vm16889_vm6 = vmand %vm16864_vm9, %vm16863_vm1 }
 0x25c   : > { %16873 = vst [vmem:[#allocation40_spill] sm:$0xff] %v16872_v40  ;;  %v16879_v24 = vsel %vm14181_vm3, 4294967295, %v16878_v24  ;;  %v2144_v14 = vmax.f32 %v14139_v37, 0.0  ;;  %v2113_v62 = vadd.f32 %v12778_v49, %v2074_v41  ;;  %vm14196_vm10 = vcmp.le.s32.totalorder %v458_v25, 14  ;;  %v9994_v41 = vpop.f32.mrb[62].mxu0  ;;  %vm16905_vm1 = vmand %vm14025_vm5, %vm14029_vm2 }
 0x25d   : > { %16880 = vst [vmem:[#allocation41_spill] sm:$0xff] %v16879_v24  ;;  %11723 = vmatmul.mubr.msk.bf16.gmra.mrb[84].mxu0 %vm14181_vm3, %v14185_v12  ;;  %v456_v53 = vand.u32 15, %v13992_v54  ;;  %vm16883_vm4 = vnez %v16813_v57  ;;  %v16884_v45 = vmov 0  ;;  %v16887_v18 = vmax.f32 %v13964_v46, 0.0  ;;  %v16893_v46 = vld [vmem:[#allocation55_spill] sm:$0xff] }
 0x25e   : > { %vm14205_vm12 = vmpackc.low %vm16883_vm4, %vm13930_vm13  ;;  %v2147_v25 = vmax.f32 %v14167_v33, 0.0  ;;  %vm16888_vm0 = vnez %v16809_v5  ;;  %v16890_v54 = vmov 0  ;;  %vm14231_vm13 = vcmp.ge.s32.totalorder %v424_v10, 1  ;;  %v10028_v33 = vpop.f32.mrb[62].mxu1 }
 0x25f   : > { %v16885_v45 = vsel %vm14205_vm12, 4294967295, %v16884_v45  ;;  %v14211_v50 = vpack.c.bf16 %v2143_v52, %v16887_v18  ;;  %vm14224_vm4 = vmand %vm16889_vm6, %vm16888_vm0  ;;  %v16894_v52 = vld [vmem:[#allocation56_spill] sm:$0xff]  ;;  %vm16900_vm9 = vnez %v16848_v0  ;;  %v2145_v15 = vmax.f32 %v2113_v62, 0.0 }
 0x260   : > { %16886 = vst [vmem:[#allocation42_spill] sm:$0xff] %v16885_v45  ;;  %v16891_v54 = vsel %vm14224_vm4, 4294967295, %v16890_v54  ;;  %v16895_v56 = vmax.f32 %v16893_v46, %v16894_v52  ;;  %v2178_v26 = vsel %vm16900_vm9, %v16143_v3, 0.0  ;;  %v16903_v13 = vmax.f32 %v16901_v6, %v16902_v32  ;;  %v16909_v52 = vld [vmem:[#allocation59_spill] sm:$0xff]  ;;  %v1683_v32 = vpop.f32.mrb[63].mxu0 }
 0x261   : > { %11726 = vmatprep.mubr.msk.bf16.mxu0 %vm14205_vm12, %v14211_v50  ;;  %16892 = vst [vmem:[#allocation43_spill] sm:$0xff] %v16891_v54  ;;  %vm14235_vm12 = vcmp.le.s32.totalorder %v424_v10, 14  ;;  %v2176_v18 = vsel %vm14132_vm15, %v2144_v14, 0.0  ;;  %v2179_v10 = vsel %vm14162_vm8, %v2147_v25, 0.0  ;;  %vm16904_vm6 = vnez %v16838_v28 }
 0x262   : > { %v1725_v20 = vmax.f32 %v16895_v56, %v9993_v27  ;;  %v1723_v37 = vmax.f32 %v16903_v13, %v1680_v55  ;;  %v2220_v27 = vld [vmem:[#allocation2] sm:$0x80]  ;;  %vm14257_vm0 = vmand %vm16905_vm1, %vm16904_vm6  ;;  %v16906_v62 = vmov 0  ;;  %v2037_v13 = vpop.f32.mrb[63].mxu1  ;;  %v14264_v3 = vpack.c.bf16 %v2179_v10, %v2178_v26 }
 0x263   : > { %v16907_v62 = vsel %vm14257_vm0, 4294967295, %v16906_v62  ;;  %v16910_v56 = vld [vmem:[#allocation60_spill] sm:$0xff]  ;;  %v2177_v28 = vsel %vm14224_vm4, %v2145_v15, 0.0  ;;  %vm16912_vm5 = vnez %v16840_v21  ;;  %v2481_v10 = vshrl.u32 %v2220_v27, 16  ;;  %vm14315_vm1 = vmpackc.low %vm14224_vm4, %vm14132_vm15 }
 0x264   : > { %16908 = vst [vmem:[#allocation44_spill] sm:$0xff] %v16907_v62  ;;  %v2079_v46 = vmax.f32 %v1725_v20, %v10027_v11  ;;  %v16911_v55 = vmax.f32 %v16909_v52, %v16910_v56  ;;  %v2077_v61 = vmax.f32 %v1723_v37, %v2034_v34  ;;  %v16915_v11 = vmax.f32 %v16913_v30, %v16914_v58  ;;  %vm16920_vm3 = vmand %vm16912_vm5, %vm14145_vm7  ;;  %v16944_v30 = vld [vmem:[#allocation75_spill] sm:$0xff] }
 0x265   : > { %v14275_v31 = vpack.c.bf16 %v2177_v28, %v2176_v18  ;;  %2217 = vst [vmem:[#allocation2 + $0x78] sm:$0xff] %v14264_v3  ;;  %vm14290_vm2 = vcmp.le.s32.totalorder %v456_v53, 14  ;;  %v16918_v18 = vmov 0   ;;  %vm16919_vm6 = vnez %v16868_v29  ;;  %vm16927_vm7 = vmand %vm14169_vm11, %vm14173_vm14 }
 0x266   : > { %v1726_v6 = vmax.f32 %v16911_v55, %v9994_v41  ;;  %v1724_v20 = vmax.f32 %v16915_v11, %v1683_v32  ;;  %v14278_v41 = vadd.f32 %v12778_v49, %v2079_v46  ;;  %v2116_v34 = vadd.f32 %v12778_v49, %v2077_v61  ;;  %vm14304_vm0 = vmand %vm16920_vm3, %vm16919_vm6 }
 0x267   : > { %v2487_v46 = vrot.slane %v16918_v18, 7  ;;  %2216 = vst [vmem:[#allocation2 + $0x70] sm:$0xff] %v14275_v31  ;;  %v16921_v27 = vmov 0  ;;  %v16924_v52 = vmov 0  ;;  %v14319_v29 = vpack.c.bf16 %v2145_v15, %v2144_v14  ;;  %vm14331_vm3 = vmand %vm16927_vm7, %vm14196_vm10  ;;  %v11561_v18 = vld [vmem:[#allocation7 + $0x90] sm:$0xff]  }
 0x268   : > { %v2080_v26 = vmax.f32 %v1726_v6, %v10028_v33  ;;  %v2078_v37 = vmax.f32 %v1724_v20, %v2037_v13  ;;  %v16150_v33 = vmax.f32 %v14278_v41, 0.0  ;;  %v16922_v27 = vsel %vm14304_vm0, 4294967295, %v16921_v27  ;;  %vm14340_vm5 = vmpackc.low %vm14162_vm8, %vm16900_vm9  ;;  %v16945_v20 = vld [vmem:[#allocation63_spill] sm:$0xff] }
 0x269   : > { %16923 = vst [vmem:[#allocation45_spill] sm:$0xff] %v16922_v27  ;;  %v16925_v52 = vsel %vm14315_vm1, 4294967295, %v16924_v52  ;;  %11729 = vmatmul.mubr.msk.bf16.gmra.mrb[88].mxu0 %vm14315_vm1, %v14319_v29  ;;  %v2148_v21 = vmax.f32 %v2116_v34, 0.0  ;;  %v16928_v16 = vmov 0  ;;  %v16931_v14 = vmov 0  ;;  %vm16935_vm11 = vmand %vm14231_vm13, %vm14235_vm12 }
 0x26a   : > { %v14309_v53 = vadd.f32 %v12778_v49, %v2080_v26  ;;  %16926 = vst [vmem:[#allocation46_spill] sm:$0xff] %v16925_v52  ;;  %v16929_v16 = vsel %vm14331_vm3, 4294967295, %v16928_v16  ;;  %v2117_v56 = vadd.f32 %v12778_v49, %v2078_v37  ;;  %v16932_v14 = vsel %vm14340_vm5, 4294967295, %v16931_v14  ;;  %vm14359_vm14 = vmand %vm16935_vm11, %vm14290_vm2  ;;  %v16947_v37 = vld [vmem:[#allocation21_spill] sm:$0xff] }
 0x26b   : > { %16930 = vst [vmem:[#allocation47_spill] sm:$0xff] %v16929_v16  ;;  %16933 = vst [vmem:[#allocation48_spill] sm:$0xff] %v16932_v14  ;;  %v16934_v59 = vmax.f32 %v14123_v44, 0.0  ;;  %v16936_v49 = vmov 0  ;;  %v2483_v44 = vrot.slane %v2481_v10, 7  ;;  %vm16939_vm10 = vnez %v16907_v62  ;;  %v11560_v10 = vld [vmem:[#allocation7 + $0x88] sm:$0xff]  }
 0x26c   : > { %v16149_v38 = vmax.f32 %v14309_v53, 0.0  ;;  %v16937_v49 = vsel %vm14359_vm14, 4294967295, %v16936_v49  ;;  %v2182_v15 = vsel %vm16939_vm10, %v16150_v33, 0.0  ;;  %v2180_v36 = vsel %vm14304_vm0, %v2148_v21, 0.0  ;;  %vm14386_vm13 = vmpackc.low %vm14359_vm14, %vm14304_vm0  ;;  %v14427_v33 = vld [vmem:[#allocation2 + $0x18] sm:$0xff] }
 0x26d   : > { %v14346_v17 = vpack.c.bf16 %v2147_v25, %v16934_v59  ;;  %16938 = vst [vmem:[#allocation49_spill] sm:$0xff] %v16937_v49  ;;  %v2149_v25 = vmax.f32 %v2117_v56, 0.0  ;;  %vm16940_vm12 = vsmask.f32 256  ;;  %v16941_v28 = vmov 0 }
 0x26e   : > { %v2183_v55 = vsel %vm14331_vm3, %v16149_v38, 0.0  ;;  %v2491_v13 = vsel %vm16940_vm12, %v2483_v44, %v2487_v46  ;;  %v16942_v28 = vsel %vm14386_vm13, 4294967295, %v16941_v28  ;;  %v2496_v11 = vshll.u32 %v16944_v30, 16  ;;  %vm16946_vm2 = vmmov %vm16940_vm12 }
 0x26f   : > { %11732 = vmatprep.mubr.msk.bf16.mxu0 %vm14340_vm5, %v14346_v17  ;;  %v14373_v5 = vpack.c.bf16 %v2183_v55, %v2182_v15  ;;  %v2181_v6 = vsel %vm14359_vm14, %v2149_v25, 0.0  ;;  %16943 = vst [vmem:[#allocation50_spill] sm:$0xff] %v16942_v28  ;;  %v14390_v61 = vpack.c.bf16 %v2149_v25, %v2148_v21  ;;  %v16151_v34 = vshrl.u32 %v13739_v1, 16  ;;  %v14401_v21 = vld [vmem:[#allocation2 + $0x48] sm:$0xff]  ;;  %v14409_v25 = vld [vmem:[#allocation2 + $0x10] sm:$0xff]  ;;  %vm16957_vm6 = vmmov %vm16946_vm2 }
 0x270   : > { %v14377_v32 = vpack.c.bf16 %v2181_v6, %v2180_v36  ;;  %v2498_v26 = vor.u32 %v2496_v11, %v16945_v20  ;;  %v16152_v59 = vshrl.u32 %v13961_v22, 16  ;;  %v16153_v44 = vshrl.u32 %v13945_v48, 16  ;;  %vm16958_vm7 = vmmov %vm16946_vm2 }
 0x271   : > { %2219 = vst [vmem:[#allocation2 + $0x88] sm:$0xff] %v14373_v5  ;;  %11735 = vmatmul.mubr.msk.bf16.gmra.mrb[92].mxu0 %vm14386_vm13, %v14390_v61  ;;  %v14405_v56 = vrot.slane %v16151_v34, 7  ;;  %v16156_v15 = vshrl.u32 %v14109_v35, 16  ;;  %v16158_v55 = vshrl.u32 %v14264_v3, 16  ;;  %v16154_v36 = vshll.u32 %v13739_v1, 16  ;;  %vm16960_vm11 = vmmov %vm16946_vm2 }
 0x272   : > { %2218 = vst [vmem:[#allocation2 + $0x80] sm:$0xff] %v14377_v32  ;;  %10093 = vmatprep.mubr.bf16.mxu0 %v2491_v13  ;;  %v2499_v58 = vsel %vm16946_vm2, %v2487_v46, %v2498_v26  ;;  %v16155_v46 = vshrl.u32 %v14120_v47, 16  ;;  %v16160_v6 = vshrl.u32 %v14377_v32, 16  ;;  %v16161_v13 = vshrl.u32 %v14401_v21, 16  ;;  %v11562_v26 = vld [vmem:[#allocation7 + $0x98] sm:$0xff]   ;;  %vm16961_vm12 = vmmov %vm16946_vm2 }
 0x273   : > { %v2549_v30 = vshrl.u32 %v13721_v63, 16  ;;  %v2567_v38 = vrot.slane %v16153_v44, 7  ;;  %v14432_v34 = vor.u32 %v16154_v36, %v14405_v56  ;;  %v2583_v11 = vrot.slane %v16156_v15, 7 }
 0x274   : > { %v2575_v20 = vrot.slane %v16155_v46, 7  ;;  %v2599_v44 = vrot.slane %v16158_v55, 7  ;;  %v14446_v36 = vrot.slane %v16160_v6, 7  ;;  %v16167_v46 = vshll.u32 %v14401_v21, 16 }
 0x275   : > { %v14452_v15 = vrot.slane %v16161_v13, 7  ;;  %v16951_v13 = vshll.u32 %v13961_v22, 16  ;;  %v16952_v55 = vshll.u32 %v13945_v48, 16  ;;  %v16953_v54 = vshll.u32 %v14120_v47, 16 }
 0x276   : > { %v16954_v51 = vshll.u32 %v14109_v35, 16  ;;  %v16956_v0 = vshll.u32 %v14264_v3, 16  ;;  %v2551_v23 = vrot.slane %v2549_v30, 7  ;;  %v14526_v30 = vld [vmem:[#allocation2 + $0x38] sm:$0xff]  ;;  %vm17046_vm0 = vsmask.f32 256 }
 0x277   : > { %v3312_v27 = vor.u32 %v16952_v55, %v2567_v38 }
 0x278   : > { %v3318_v6 = vor.u32 %v16954_v51, %v2583_v11  ;;  %v16959_v51 = vshll.u32 %v14377_v32, 16 }
 0x279   : > { %10094 = vmatmul.mubr.bf16.vlgmr.msra.gmra.mrb[64].mxu0 %v2499_v58  ;;  %v16948_v58 = vld [vmem:[#allocation28_spill] sm:$0xff] }
 0x27a   : > { %10097 = vmatprep.mubr.bf16.mxu0 %v16947_v37  ;;  %10126 = vmatpush3.bf16.msra.mxu0 %v13898_v60  ;;  %v16157_v60 = vshrl.u32 %v14275_v31, 16  ;;  %v2559_v37 = vrot.slane %v16152_v59, 7 }
 0x27b   : > { %10127 = vmatprep.subr.bf16.mxu0 %v11560_v10 }
 0x27c   : > { %v2591_v59 = vrot.slane %v16157_v60, 7  ;;  %v14469_v60 = vor.u32 %v16951_v13, %v2559_v37  ;;  %v14488_v55 = vsel %vm16958_vm7, %v2559_v37, %v3312_v27  ;;  %v16963_v27 = vshll.u32 %v14427_v33, 16  ;;  %vm16964_vm7 = vmmov %vm16946_vm2 }
 0x27e   : > { %10128 = vmatpush3.bf16.msra.mxu0 %v11560_v10  ;;  %v16949_v10 = vshll.u32 %v14409_v25, 16  ;;  %v14507_v37 = vrot.slane %v16963_v27, 1  ;;  %v11567_v27 = vld [vmem:[#allocation7 + $0xc0] sm:$0xff]  }
 0x27f   : > { %10129 = vmatprep.subr.bf16.mxu0 %v11561_v18 }
 0x280   : > { %v14458_v49 = vrot.slane %v16949_v10, 1  ;;  %v3315_v10 = vor.u32 %v16953_v54, %v2575_v20  ;;  %v3327_v54 = vor.u32 %v16959_v51, %v14446_v36 }
 0x281   : > { %10098 = vmatmul.mubr.bf16.gmra.mrb[68].mxu0 %v13543_v8  ;;  %v11563_v8 = vld [vmem:[#allocation7 + $0xa0] sm:$0xff]  }
 0x282   : > { %10101 = vmatprep.mubr.bf16.mxu0 %v16948_v58  ;;  %10130 = vmatpush3.bf16.msra.mxu0 %v11561_v18  ;;  %v14465_v58 = vor.u32 %v14452_v15, %v16167_v46  ;;  %v16955_v18 = vshll.u32 %v14275_v31, 16  ;;  %v3324_v46 = vor.u32 %v16956_v0, %v2599_v44  ;;  %v14494_v43 = vsel %vm16960_vm11, %v2567_v38, %v3315_v10 }
 0x283   : > { %10131 = vmatprep.subr.bf16.mxu0 %v11562_v26  ;;  %v14497_v0 = vsel %vm16961_vm12, %v2575_v20, %v3318_v6  ;;  %v14510_v51 = vsel %vm16964_vm7, %v2599_v44, %v3327_v54  ;;  %v16965_v38 = vshrl.u32 %v14409_v25, 16  ;;  %vm16206_vm11 = vsmask.f32 7424  ;;  %v11565_v44 = vld [vmem:[#allocation7 + $0xb0] sm:$0xff]   ;;  %vm16969_vm12 = vmmov %vm16946_vm2 }
 0x284   : > { %16950 = vst [vmem:[#allocation51_spill] sm:$0xff] %v14465_v58  ;;  %v3321_v40 = vor.u32 %v16955_v18, %v2591_v59  ;;  %v14485_v13 = vsel %vm16957_vm6, %v14405_v56, %v14465_v58  ;;  %v11564_v18 = vld [vmem:[#allocation7 + $0xa8] sm:$0xff]   ;;  %vm16962_vm6 = vmmov %vm16946_vm2  ;;  %v14522_v6 = vld [vmem:[#allocation2 + $0x40] sm:$0xff] }
 0x285   : > { %v14503_v57 = vsel %vm16962_vm6, %v2591_v59, %v3324_v46  ;;  %v3892_v10 = vor.u32 %v16965_v38, %v14458_v49  ;;  %v2552_v59 = vshll.u32 %v13721_v63, 16  ;;  %16966 = vst [vmem:[#allocation52_spill] sm:$0xff] %v14522_v6  ;;  %v16174_v38 = vshll.u32 %v14522_v6, 16  ;;  %vm16972_vm6 = vmmov %vm16946_vm2 }
 0x286   : > { %10132 = vmatpush3.bf16.msra.mxu0 %v11562_v26  ;;  %v14500_v26 = vsel %vm16946_vm2, %v2583_v11, %v3321_v40  ;;  %v14524_v11 = vld [vmem:[#allocation2 + $0x50] sm:$0xff]  ;;  %vm16974_vm7 = vmmov %vm16946_vm2 }
 0x287   : > { %10133 = vmatprep.subr.bf16.mxu0 %v11563_v8  ;;  %v14519_v40 = vsel %vm16206_vm11, %v3892_v10, %v14507_v37  ;;  %v2554_v46 = vor.u32 %v2552_v59, %v2551_v23  ;;  %16967 = vst [vmem:[#allocation53_spill] sm:$0xff] %v14524_v11  ;;  %v16171_v54 = vshrl.u32 %v14524_v11, 16  ;;  %v16173_v59 = vshll.u32 %v14524_v11, 16 }
 0x289   : > { %10102 = vmatmul.mubr.bf16.gmra.mrb[72].mxu0 %v13771_v19  ;;  %v11566_v19 = vld [vmem:[#allocation7 + $0xb8] sm:$0xff]   ;;  %v2555_v63 = vsel %vm16946_vm2, %v14405_v56, %v2554_v46 }
 0x28a   : > { %10105 = vmatprep.mubr.bf16.mxu0 %v13864_v2  ;;  %10134 = vmatpush3.bf16.msra.mxu0 %v11563_v8  ;;  %v16968_v2 = vld [vmem:[#allocation27_spill] sm:$0xff]  ;;  %v16172_v8 = vshrl.u32 %v14522_v6, 16 }
 0x28b   : > { %10135 = vmatprep.subr.bf16.mxu0 %v11564_v18  ;;  %v2547_v20 = vsel %vm16969_vm12, %v16968_v2, %v14432_v34  ;;  %v14544_v2 = vrot.slane %v16171_v54, 7  ;;  %vm16976_vm12 = vmmov %vm16946_vm2 }
 0x28c   : > { %v14539_v10 = vrot.slane %v16172_v8, 7 }
 0x28d   : > { %16971 = vst [vmem:[#allocation55_spill] sm:$0xff] %v14544_v2  ;;  %v4320_v46 = vor.u32 %v14544_v2, %v16173_v59  ;;  %v16189_v2 = vshrl.u32 %v14427_v33, 16 }
 0x28e   : > { %10136 = vmatpush3.bf16.msra.mxu0 %v11564_v18  ;;  %v16176_v18 = vshrl.u32 %v14526_v30, 16  ;;  %16970 = vst [vmem:[#allocation54_spill] sm:$0xff] %v14539_v10 }
 0x28f   : > { %10137 = vmatprep.subr.bf16.mxu0 %v11565_v44  ;;  %v14566_v54 = vsel %vm16976_vm12, %v14452_v15, %v4320_v46  ;;  %vm17017_vm12 = vmmov %vm16946_vm2 }
 0x290   : > { %v14548_v56 = vrot.slane %v16176_v18, 7  ;;  %16977 = vst [vmem:[#allocation58_spill] sm:$0xff] %v14566_v54 }
 0x291   : > { %10106 = vmatmul.mubr.bf16.gmra.mrb[76].mxu0 %v2547_v20  ;;  %v2563_v20 = vsel %vm16972_vm6, %v2551_v23, %v14469_v60  ;;  %vm17011_vm6 = vmmov %vm16946_vm2 }
 0x292   : > { %10109 = vmatprep.mubr.bf16.mxu0 %v2555_v63  ;;  %10138 = vmatpush3.bf16.msra.mxu0 %v11565_v44  ;;  %v4314_v44 = vor.u32 %v14539_v10, %v16174_v38  ;;  %v14558_v63 = vld [vmem:[#allocation2 + $0x88] sm:$0xff]  ;;  %v11568_v10 = vld [vmem:[#allocation7 + $0xc8] sm:$0xff]  }
 0x293   : > { %10139 = vmatprep.subr.bf16.mxu0 %v11566_v19  ;;  %16973 = vst [vmem:[#allocation56_spill] sm:$0xff] %v14558_v63  ;;  %v16175_v8 = vshll.u32 %v14558_v63, 16  ;;  %v16181_v23 = vshrl.u32 %v14558_v63, 16  ;;  %v14598_v63 = vld [vmem:[#allocation2 + $0x20] sm:$0xff] }
 0x295   : > { %v14572_v59 = vrot.slane %v16175_v8, 1 }
 0x296   : > { %10140 = vmatpush3.bf16.msra.mxu0 %v11566_v19  ;;  %v14562_v19 = vsel %vm16974_vm7, %v14548_v56, %v4314_v44  ;;  %v14577_v44 = vld [vmem:[#allocation2 + $0x8] sm:$0xff]  ;;  %vm17013_vm7 = vmmov %vm16946_vm2 }
 0x297   : > { %10173 = vmatprep.subr.bf16.mxu0 %v11567_v27  ;;  %16975 = vst [vmem:[#allocation57_spill] sm:$0xff] %v14562_v19  ;;  %16978 = vst [vmem:[#allocation59_spill] sm:$0xff] %v14572_v59  ;;  %v14583_v46 = vor.u32 %v16181_v23, %v14572_v59  ;;  %v16185_v18 = vshrl.u32 %v14577_v44, 16  ;;  %v16187_v23 = vshll.u32 %v14598_v63, 16  ;;  %v16197_v19 = vshll.u32 %v14526_v30, 16 }
 0x298   : > { %16979 = vst [vmem:[#allocation60_spill] sm:$0xff] %v14577_v44 }
 0x299   : > { %10110 = vmatmul.mubr.bf16.gmra.mrb[80].mxu0 %v2563_v20  ;;  %v16180_v20 = vshll.u32 %v14577_v44, 16  ;;  %16980 = vst [vmem:[#allocation61_spill] sm:$0xff] %v14583_v46  ;;  %v2898_v44 = vrot.slane %v16187_v23, 1  ;;  %v16193_v23 = vshrl.u32 %v14598_v63, 16 }
 0x29a   : > { %10113 = vmatprep.mubr.bf16.mxu0 %v14488_v55 }
 0x29b   : > { %v5022_v38 = vrot.slane %v16180_v20, 1 }
 0x29d   : > { %v14589_v8 = vsel %vm16206_vm11, %v14583_v46, %v5022_v38  ;;  %v14596_v9 = vor.u32 %v5022_v38, %v16185_v18  ;;  %v14610_v38 = vld [vmem:[#allocation2 + $0x30] sm:$0xff]  ;;  %v2894_v18 = vor.u32 %v16189_v2, %v14507_v37  ;;  %v11569_v37 = vld [vmem:[#allocation7 + $0xd0] sm:$0xff]   ;;  %v2902_v2 = vor.u32 %v16193_v23, %v2898_v44  ;;  %v11570_v46 = vld [vmem:[#allocation7 + $0xd8] sm:$0xff]  }
 0x29e   : > { %16981 = vst [vmem:[#allocation62_spill] sm:$0xff] %v14589_v8  ;;  %v14605_v8 = vld [vmem:[#allocation2 + $0x28] sm:$0xff]  ;;  %v2922_v23 = vrot.slane %v16197_v19, 1  ;;  %v11572_v19 = vld [vmem:[#allocation7 + $0xe8] sm:$0xff]  }
 0x29f   : > { %16982 = vst [vmem:[#allocation75_spill] sm:$0xff] %v14596_v9  ;;  %v2883_v20 = vsel %vm16206_vm11, %v14596_v9, %v14458_v49  ;;  %v16192_v54 = vshll.u32 %v14605_v8, 16  ;;  %v14618_v49 = vsel %vm16206_vm11, %v2894_v18, %v2898_v44  ;;  %v16195_v58 = vshrl.u32 %v14605_v8, 16 }
 0x2a1   : > { %10114 = vmatmul.mubr.bf16.gmra.mrb[84].mxu0 %v14494_v43  ;;  %v2906_v9 = vrot.slane %v16192_v54, 1 }
 0x2a2   : > { %10117 = vmatprep.mubr.bf16.mxu0 %v14497_v0 }
 0x2a3   : > { %v14634_v54 = vsel %vm16206_vm11, %v2902_v2, %v2906_v9 }
 0x2a9   : > { %10118 = vmatmul.mubr.bf16.gmra.mrb[88].mxu0 %v14500_v26 }
 0x2aa   : > { %10121 = vmatprep.mubr.bf16.mxu0 %v14503_v57 }
 0x2b1   : > { %10122 = vmatmul.mubr.bf16.gmra.mrb[92].mxu0 %v14510_v51 }
 0x2b2   : > { %10141 = vmatprep.mubr.bf16.mxu0 %v2883_v20  ;;  %v16194_v20 = vshll.u32 %v14610_v38, 16 }
 0x2b4   : > { %v2914_v18 = vrot.slane %v16194_v20, 1  ;;  %v11571_v20 = vld [vmem:[#allocation7 + $0xe0] sm:$0xff]  }
 0x2b9   : > { %10142 = vmatmul.mubr.bf16.vlgmr.msra.gmra.mrb[64].mxu0 %v14519_v40 }
 0x2ba   : > { %10145 = vmatprep.mubr.bf16.mxu0 %v14618_v49  ;;  %10174 = vmatpush3.bf16.msra.mxu0 %v11567_v27  ;;  %v2910_v27 = vor.u32 %v16195_v58, %v2906_v9  ;;  %v16983_v9 = vshrl.u32 %v14526_v30, 16 }
 0x2bb   : > { %10175 = vmatprep.subr.bf16.mxu0 %v11568_v10 }
 0x2bc   : > { %v14638_v44 = vsel %vm16206_vm11, %v2910_v27, %v2914_v18  ;;  %v14648_v2 = vor.u32 %v16983_v9, %v2922_v23  ;;  %v16985_v27 = vshll.u32 %v13739_v1, 16  ;;  %v11573_v9 = vld [vmem:[#allocation7 + $0xf0] sm:$0xff]  }
 0x2be   : > { %10176 = vmatpush3.bf16.msra.mxu0 %v11568_v10  ;;  %v16200_v10 = vshrl.u32 %v14610_v38, 16  ;;  %16984 = vst [vmem:[#allocation63_spill] sm:$0xff] %v14648_v2  ;;  %v2930_v59 = vrot.slane %v16985_v27, 1 }
 0x2bf   : > { %10177 = vmatprep.subr.bf16.mxu0 %v11569_v37 }
 0x2c0   : > { %v2918_v58 = vor.u32 %v16200_v10, %v2914_v18  ;;  %v16987_v18 = vshll.u32 %v14401_v21, 16 }
 0x2c1   : > { %10146 = vmatmul.mubr.bf16.gmra.mrb[68].mxu0 %v14634_v54 }
 0x2c2   : > { %10149 = vmatprep.mubr.bf16.mxu0 %v14638_v44  ;;  %10178 = vmatpush3.bf16.msra.mxu0 %v11569_v37  ;;  %v14653_v11 = vsel %vm16206_vm11, %v2918_v58, %v2922_v23  ;;  %v2931_v37 = vsel %vm16206_vm11, %v14648_v2, %v2930_v59  ;;  %v14660_v10 = vrot.slane %v16987_v18, 1  ;;  %v16990_v58 = vshll.u32 %v13961_v22, 16  ;;  %v11574_v2 = vld [vmem:[#allocation7 + $0xf8] sm:$0xff]  }
 0x2c3   : > { %10179 = vmatprep.subr.bf16.mxu0 %v11570_v46  ;;  %16986 = vst [vmem:[#allocation21_spill] sm:$0xff] %v14653_v11  ;;  %v16992_v18 = vshll.u32 %v13945_v48, 16 }
 0x2c4   : > { %v2946_v23 = vrot.slane %v16990_v58, 1  ;;  %v11575_v58 = vld [vmem:[#allocation7 + $0x100] sm:$0xff]  }
 0x2c6   : > { %10180 = vmatpush3.bf16.msra.mxu0 %v11570_v46  ;;  %v16988_v46 = vshrl.u32 %v14401_v21, 16 }
 0x2c7   : > { %10181 = vmatprep.subr.bf16.mxu0 %v11571_v20 }
 0x2c8   : > { %v14665_v27 = vor.u32 %v16988_v46, %v14660_v10  ;;  %v2954_v46 = vrot.slane %v16992_v18, 1 }
 0x2c9   : > { %10150 = vmatmul.mubr.bf16.gmra.mrb[72].mxu0 %v14653_v11  ;;  %v16991_v11 = vshrl.u32 %v13739_v1, 16  ;;  %v16993_v1 = vshrl.u32 %v13961_v22, 16  ;;  %v16997_v22 = vshrl.u32 %v14120_v47, 16 }
 0x2ca   : > { %10153 = vmatprep.mubr.bf16.mxu0 %v2931_v37  ;;  %10182 = vmatpush3.bf16.msra.mxu0 %v11571_v20  ;;  %16989 = vst [vmem:[#allocation28_spill] sm:$0xff] %v14665_v27  ;;  %v2947_v20 = vsel %vm16206_vm11, %v14665_v27, %v2946_v23 }
 0x2cb   : > { %10183 = vmatprep.subr.bf16.mxu0 %v11572_v19  ;;  %v2934_v6 = vor.u32 %v2930_v59, %v16991_v11  ;;  %v2950_v11 = vor.u32 %v2946_v23, %v16993_v1  ;;  %v16994_v59 = vshll.u32 %v14120_v47, 16  ;;  %v16998_v1 = vshll.u32 %v14275_v31, 16 }
 0x2cc   : > { %v17002_v47 = vshll.u32 %v14377_v32, 16 }
 0x2cd   : > { %v2939_v37 = vsel %vm16206_vm11, %v2934_v6, %v14660_v10  ;;  %v16995_v6 = vshrl.u32 %v13945_v48, 16  ;;  %v2955_v27 = vsel %vm16206_vm11, %v2950_v11, %v2954_v46 }
 0x2ce   : > { %10184 = vmatpush3.bf16.msra.mxu0 %v11572_v19  ;;  %v2962_v19 = vrot.slane %v16994_v59, 1  ;;  %v2978_v59 = vrot.slane %v16998_v1, 1 }
 0x2cf   : > { %10185 = vmatprep.subr.bf16.mxu0 %v11573_v9 }
 0x2d0   : > { %v2966_v23 = vor.u32 %v2962_v19, %v16997_v22  ;;  %v3261_v22 = vld [vmem:[#allocation2 + $0x8] sm:$0x80] }
 0x2d1   : > { %10154 = vmatmul.mubr.bf16.gmra.mrb[76].mxu0 %v2939_v37  ;;  %v2958_v37 = vor.u32 %v2954_v46, %v16995_v6  ;;  %v17000_v46 = vshll.u32 %v14264_v3, 16 }
 0x2d2   : > { %10157 = vmatprep.mubr.bf16.mxu0 %v2947_v20  ;;  %10186 = vmatpush3.bf16.msra.mxu0 %v11573_v9  ;;  %v16996_v20 = vshll.u32 %v14109_v35, 16 }
 0x2d3   : > { %10187 = vmatprep.subr.bf16.mxu0 %v11574_v2  ;;  %v2963_v9 = vsel %vm16206_vm11, %v2958_v37, %v2962_v19  ;;  %v2986_v11 = vrot.slane %v17000_v46, 1  ;;  %v17001_v37 = vshrl.u32 %v14275_v31, 16  ;;  %v2994_v19 = vrot.slane %v17002_v47, 1 }
 0x2d4   : > { %v2970_v18 = vrot.slane %v16996_v20, 1  ;;  %v2853_v20 = vld [vmem:[#allocation2 + $0x88] sm:$0x1]  ;;  %v17005_v46 = vshll.u32 %v14409_v25, 16  ;;  %v17006_v47 = vshrl.u32 %v14377_v32, 16 }
 0x2d6   : > { %10188 = vmatpush3.bf16.msra.mxu0 %v11574_v2  ;;  %v16999_v2 = vshrl.u32 %v14109_v35, 16  ;;  %v2971_v6 = vsel %vm16206_vm11, %v2966_v23, %v2970_v18  ;;  %v17003_v35 = vshrl.u32 %v14264_v3, 16  ;;  %v3000_v23 = vshll.u32 %v2853_v20, 16 }
 0x2d7   : > { %10221 = vmatprep.subr.bf16.mxu0 %v11575_v58  ;;  %v2998_v3 = vor.u32 %v2994_v19, %v17006_v47  ;;  %v11577_v47 = vld [vmem:[#allocation7 + $0x110] sm:$0xff]  }
 0x2d8   : > { %v2974_v48 = vor.u32 %v2970_v18, %v16999_v2  ;;  %v2990_v1 = vor.u32 %v2986_v11, %v17003_v35  ;;  %v3002_v31 = vrot.slane %v3000_v23, 1  ;;  %v17007_v35 = vshrl.u32 %v14427_v33, 16 }
 0x2d9   : > { %10158 = vmatmul.mubr.bf16.gmra.mrb[80].mxu0 %v2955_v27 }
 0x2da   : > { %10161 = vmatprep.mubr.bf16.mxu0 %v2963_v9  ;;  %v2979_v27 = vsel %vm16206_vm11, %v2974_v48, %v2978_v59  ;;  %v2982_v9 = vor.u32 %v2978_v59, %v17001_v37  ;;  %v2995_v2 = vsel %vm16206_vm11, %v2990_v1, %v2994_v19  ;;  %v3281_v48 = vshrl.u32 %v3261_v22, 16  ;;  %v11576_v19 = vld [vmem:[#allocation7 + $0x108] sm:$0xff]  }
 0x2db   : > { %v17008_v22 = vshrl.u32 %v14598_v63, 16 }
 0x2dc   : > { %v2987_v18 = vsel %vm16206_vm11, %v2982_v9, %v2986_v11  ;;  %v3283_v59 = vrot.slane %v3281_v48, 7  ;;  %v3287_v11 = vrot.slane %v17007_v35, 7  ;;  %v3003_v9 = vsel %vm16206_vm11, %v2998_v3, %v3002_v31  ;;  %vm16207_vm11 = vmpackc.low %vm14331_vm3, %vm16939_vm10 }
 0x2dd   : > { %v3290_v1 = vrot.slane %v17008_v22, 7  ;;  %v17015_v3 = vshll.u32 %v14605_v8, 16 }
 0x2e1   : > { %10162 = vmatmul.mubr.bf16.gmra.mrb[84].mxu0 %v2971_v6  ;;  %v17004_v6 = vshrl.u32 %v14409_v25, 16 }
 0x2e2   : > { %10165 = vmatprep.mubr.bf16.mxu0 %v2979_v27 }
 0x2e3   : > { %v3284_v27 = vrot.slane %v17004_v6, 7  ;;  %v17012_v6 = vshrl.u32 %v14605_v8, 16 }
 0x2e5   : > { %v3285_v37 = vor.u32 %v3284_v27, %v17005_v46  ;;  %v3293_v31 = vrot.slane %v17012_v6, 7  ;;  %v17014_v46 = vshrl.u32 %v14610_v38, 16  ;;  %v11582_v6 = vld [vmem:[#allocation7 + $0x138] sm:$0xff]  }
 0x2e7   : > { %v3286_v20 = vsel %vm16946_vm2, %v3283_v59, %v3285_v37  ;;  %v3296_v37 = vrot.slane %v17014_v46, 7  ;;  %v3294_v35 = vor.u32 %v3293_v31, %v17015_v3  ;;  %v11583_v46 = vld [vmem:[#allocation7 + $0x140] sm:$0xff]   ;;  %v14827_v3 = vld [vmem:[#allocation2 + $0x58] sm:$0xff] }
 0x2e9   : > { %10166 = vmatmul.mubr.bf16.gmra.mrb[88].mxu0 %v2987_v18  ;;  %v17009_v18 = vshll.u32 %v14427_v33, 16 }
 0x2ea   : > { %10169 = vmatprep.mubr.bf16.mxu0 %v2995_v2  ;;  %v17010_v2 = vshll.u32 %v14598_v63, 16 }
 0x2eb   : > { %v14719_v23 = vor.u32 %v3287_v11, %v17009_v18  ;;  %v17018_v18 = vshll.u32 %v14526_v30, 16 }
 0x2ec   : > { %v3291_v32 = vor.u32 %v3290_v1, %v17010_v2 }
 0x2ed   : > { %v3289_v48 = vsel %vm17011_vm6, %v3284_v27, %v14719_v23  ;;  %v17016_v27 = vshll.u32 %v14610_v38, 16  ;;  %v3300_v2 = vor.u32 %v14548_v56, %v17018_v18  ;;  %vm17019_vm6 = vmmov %vm16946_vm2  ;;  %v3958_v18 = vshll.u32 %v14827_v3, 16 }
 0x2ee   : > { %v14728_v59 = vsel %vm17013_vm7, %v3287_v11, %v3291_v32  ;;  %v14738_v11 = vsel %vm17017_vm12, %v3290_v1, %v3294_v35  ;;  %v11580_v32 = vld [vmem:[#allocation7 + $0x128] sm:$0xff]   ;;  %vm17020_vm7 = vmmov %vm16946_vm2 }
 0x2ef   : > { %v14749_v1 = vsel %vm17019_vm6, %v3296_v37, %v3300_v2  ;;  %vm17021_vm12 = vmmov %vm16946_vm2  ;;  %vm17022_vm6 = vnez %v16816_v7  ;;  %v11597_v2 = vld [vmem:[#allocation7 + $0x1b0] sm:$0xff]  }
 0x2f1   : > { %10170 = vmatmul.mubr.bf16.gmra.mrb[92].mxu0 %v3003_v9  ;;  %v3297_v9 = vor.u32 %v3296_v37, %v17016_v27  ;;  %v11596_v37 = vld [vmem:[#allocation7 + $0x1a8] sm:$0xff]  }
 0x2f2   : > { %10189 = vmatprep.mubr.bf16.mxu0 %v3286_v20  ;;  %v11578_v20 = vld [vmem:[#allocation7 + $0x118] sm:$0xff]   ;;  %v17035_v27 = vld [vmem:[#allocation53_spill] sm:$0xff] }
 0x2f3   : > { %v14742_v22 = vsel %vm16946_vm2, %v3293_v31, %v3297_v9  ;;  %v3310_v31 = vsel %vm17021_vm12, %v14452_v15, %v14469_v60  ;;  %v3333_v15 = vshll.u32 %v14373_v5, 16  ;;  %vm17024_vm12 = vnez %v16879_v24 }
 0x2f4   : > { %v17036_v9 = vshll.u32 %v17035_v27, 16 }
 0x2f9   : > { %10190 = vmatmul.mubr.bf16.vlgmr.msra.gmra.mrb[64].mxu0 %v3289_v48  ;;  %v11581_v48 = vld [vmem:[#allocation7 + $0x130] sm:$0xff]  }
 0x2fa   : > { %10193 = vmatprep.mubr.bf16.mxu0 %v14728_v59  ;;  %10222 = vmatpush3.bf16.msra.mxu0 %v11575_v58  ;;  %v11579_v58 = vld [vmem:[#allocation7 + $0x120] sm:$0xff]  }
 0x2fb   : > { %10223 = vmatprep.subr.bf16.mxu0 %v11576_v19 }
 0x2fe   : > { %10224 = vmatpush3.bf16.msra.mxu0 %v11576_v19  ;;  %v3304_v19 = vsel %vm17020_vm7, %v14548_v56, %v14432_v34  ;;  %v3330_v34 = vshrl.u32 %v14373_v5, 16  ;;  %v11587_v5 = vld [vmem:[#allocation7 + $0x160] sm:$0xff]   ;;  %vm17023_vm7 = vnez %v16826_v42 }
 0x2ff   : > { %10225 = vmatprep.subr.bf16.mxu0 %v11577_v47  ;;  %v17140_v42 = vld [vmem:[#allocation37_spill] sm:$0xff] }
 0x301   : > { %10194 = vmatmul.mubr.bf16.gmra.mrb[68].mxu0 %v14738_v11 }
 0x302   : > { %10197 = vmatprep.mubr.bf16.mxu0 %v14742_v22  ;;  %10226 = vmatpush3.bf16.msra.mxu0 %v11577_v47  ;;  %v17032_v47 = vld [vmem:[#allocation63_spill] sm:$0xff] }
 0x303   : > { %10227 = vmatprep.subr.bf16.mxu0 %v11578_v20 }
 0x306   : > { %10228 = vmatpush3.bf16.msra.mxu0 %v11578_v20  ;;  %v14834_v20 = vrot.slane %v17036_v9, 1 }
 0x307   : > { %10229 = vmatprep.subr.bf16.mxu0 %v11579_v58 }
 0x309   : > { %10198 = vmatmul.mubr.bf16.gmra.mrb[72].mxu0 %v14749_v1 }
 0x30a   : > { %10201 = vmatprep.mubr.bf16.mxu0 %v3304_v19  ;;  %10230 = vmatpush3.bf16.msra.mxu0 %v11579_v58  ;;  %v14836_v58 = vld [vmem:[#allocation2 + $0x60] sm:$0xff] }
 0x30b   : > { %10231 = vmatprep.subr.bf16.mxu0 %v11580_v32 }
 0x30e   : > { %10232 = vmatpush3.bf16.msra.mxu0 %v11580_v32  ;;  %v17037_v32 = vshrl.u32 %v17035_v27, 16 }
 0x30f   : > { %10233 = vmatprep.subr.bf16.mxu0 %v11581_v48 }
 0x310   : > { %v3956_v19 = vor.u32 %v17037_v32, %v14834_v20  ;;  %v3868_v32 = vld [vmem:[#allocation2 + $0x90] sm:$0x1] }
 0x311   : > { %10202 = vmatmul.mubr.bf16.gmra.mrb[76].mxu0 %v14485_v13  ;;  %v3332_v13 = vrot.slane %v3330_v34, 7  ;;  %v14848_v34 = vld [vmem:[#allocation2 + $0x68] sm:$0xff] }
 0x312   : > { %10205 = vmatprep.mubr.bf16.mxu0 %v3310_v31  ;;  %10234 = vmatpush3.bf16.msra.mxu0 %v11581_v48  ;;  %v3966_v48 = vshll.u32 %v14836_v58, 16  ;;  %v17038_v31 = vld [vmem:[#allocation28_spill] sm:$0xff] }
 0x313   : > { %10235 = vmatprep.subr.bf16.mxu0 %v11582_v6  ;;  %v3335_v60 = vor.u32 %v3333_v15, %v3332_v13 }
 0x314   : > { %v3968_v15 = vrot.slane %v3966_v48, 1 }
 0x315   : > { %v3336_v56 = vsel %vm16946_vm2, %v14446_v36, %v3335_v60  ;;  %v11688_v36 = vld [vmem:[#allocation2 + $0x40] sm:$0xff]  ;;  %vm17025_vm2 = vnez %v16885_v45  ;;  %v14856_v60 = vld [vmem:[#allocation2 + $0x70] sm:$0xff] }
 0x316   : > { %10236 = vmatpush3.bf16.msra.mxu0 %v11582_v6  ;;  %v11598_v6 = vld [vmem:[#allocation7 + $0x1b8] sm:$0xff]  }
 0x317   : > { %10269 = vmatprep.subr.bf16.mxu0 %v11583_v46 }
 0x319   : > { %10206 = vmatmul.mubr.bf16.gmra.mrb[80].mxu0 %v14488_v55  ;;  %v11585_v55 = vld [vmem:[#allocation7 + $0x150] sm:$0xff]  }
 0x31a   : > { %10209 = vmatprep.mubr.bf16.mxu0 %v14494_v43  ;;  %v11584_v43 = vld [vmem:[#allocation7 + $0x148] sm:$0xff]  }
 0x321   : > { %10210 = vmatmul.mubr.bf16.gmra.mrb[84].mxu0 %v14497_v0  ;;  %v11589_v0 = vld [vmem:[#allocation7 + $0x170] sm:$0xff]  }
 0x322   : > { %10213 = vmatprep.mubr.bf16.mxu0 %v14500_v26  ;;  %v11590_v26 = vld [vmem:[#allocation7 + $0x178] sm:$0xff]  }
 0x329   : > { %10214 = vmatmul.mubr.bf16.gmra.mrb[88].mxu0 %v14503_v57  ;;  %v11586_v57 = vld [vmem:[#allocation7 + $0x158] sm:$0xff]  }
 0x32a   : > { %10217 = vmatprep.mubr.bf16.mxu0 %v14510_v51  ;;  %v11591_v51 = vld [vmem:[#allocation7 + $0x180] sm:$0xff]  }
 0x331   : > { %10218 = vmatmul.mubr.bf16.gmra.mrb[92].mxu0 %v3336_v56  ;;  %v3970_v56 = vshrl.u32 %v14836_v58, 16 }
 0x332   : > { %10237 = vmatprep.mubr.bf16.mxu0 %v14409_v25  ;;  %v11588_v25 = vld [vmem:[#allocation7 + $0x168] sm:$0xff]  }
 0x339   : > { %10238 = vmatmul.mubr.bf16.vlgmr.msra.gmra.mrb[64].mxu0 %v14427_v33 }
 0x33a   : > { %10241 = vmatprep.mubr.bf16.mxu0 %v14598_v63  ;;  %10270 = vmatpush3.bf16.msra.mxu0 %v11583_v46 }
 0x33b   : > { %10271 = vmatprep.subr.bf16.mxu0 %v11584_v43 }
 0x33e   : > { %10272 = vmatpush3.bf16.msra.mxu0 %v11584_v43  ;;  %v3974_v43 = vshll.u32 %v14848_v34, 16 }
 0x33f   : > { %10273 = vmatprep.subr.bf16.mxu0 %v11585_v55 }
 0x341   : > { %10242 = vmatmul.mubr.bf16.gmra.mrb[68].mxu0 %v14605_v8 }
 0x342   : > { %10245 = vmatprep.mubr.bf16.mxu0 %v14610_v38  ;;  %10274 = vmatpush3.bf16.msra.mxu0 %v11585_v55  ;;  %v11599_v55 = vld [vmem:[#allocation7 + $0x1c0] sm:$0xff]  }
 0x343   : > { %10275 = vmatprep.subr.bf16.mxu0 %v11586_v57 }
 0x346   : > { %10276 = vmatpush3.bf16.msra.mxu0 %v11586_v57  ;;  %v3962_v57 = vshrl.u32 %v14827_v3, 16 }
 0x347   : > { %10277 = vmatprep.subr.bf16.mxu0 %v11587_v5 }
 0x349   : > { %10246 = vmatmul.mubr.bf16.gmra.mrb[72].mxu0 %v14526_v30 }
 0x34a   : > { %10249 = vmatprep.mubr.bf16.mxu0 %v11688_v36  ;;  %10278 = vmatpush3.bf16.msra.mxu0 %v11587_v5  ;;  %v3972_v5 = vor.u32 %v3970_v56, %v3968_v15 }
 0x34b   : > { %10279 = vmatprep.subr.bf16.mxu0 %v11588_v25 }
 0x34e   : > { %10280 = vmatpush3.bf16.msra.mxu0 %v11588_v25  ;;  %v3982_v25 = vshll.u32 %v14856_v60, 16 }
 0x34f   : > { %10281 = vmatprep.subr.bf16.mxu0 %v11589_v0 }
 0x351   : > { %10250 = vmatmul.mubr.bf16.gmra.mrb[76].mxu0 %v14401_v21  ;;  %v17030_v21 = vld [vmem:[#allocation21_spill] sm:$0xff] }
 0x352   : > { %11738 = vmatprep.mubr.msk.bf16.mxu0 %vm17022_vm6, %v14020_v4  ;;  %10282 = vmatpush3.bf16.msra.mxu0 %v11589_v0  ;;  %v17026_v4 = vmax.f32 %v14278_v41, 0.0  ;;  %v11594_v41 = vld [vmem:[#allocation7 + $0x198] sm:$0xff]   ;;  %v3976_v0 = vrot.slane %v3974_v43, 1 }
 0x353   : > { %10283 = vmatprep.subr.bf16.mxu0 %v11590_v26 }
 0x356   : > { %10284 = vmatpush3.bf16.msra.mxu0 %v11590_v26 }
 0x357   : > { %10317 = vmatprep.subr.bf16.mxu0 %v11591_v51 }
 0x359   : > { %11741 = vmatmul.mubr.msk.bf16.gmra.mrb[80].mxu0 %vm17023_vm7, %v14049_v39  ;;  %v17027_v39 = vmax.f32 %v14309_v53, 0.0  ;;  %v17028_v53 = vld [vmem:[#allocation52_spill] sm:$0xff] }
 0x35a   : > { %11744 = vmatprep.mubr.msk.bf16.mxu0 %vm17024_vm12, %v14185_v12 }
 0x35b   : > { %v11758_v12 = vpack.c.bf16 %v17027_v39, %v17026_v4  ;;  %v3984_v39 = vrot.slane %v3982_v25, 1 }
 0x361   : > { %11747 = vmatmul.mubr.msk.bf16.gmra.mrb[84].mxu0 %vm17025_vm2, %v14211_v50  ;;  %v11592_v50 = vld [vmem:[#allocation7 + $0x188] sm:$0xff]  }
 0x362   : > { %11750 = vmatprep.mubr.msk.bf16.mxu0 %vm14315_vm1, %v14319_v29  ;;  %v11593_v29 = vld [vmem:[#allocation7 + $0x190] sm:$0xff]  }
 0x369   : > { %11753 = vmatmul.mubr.msk.bf16.gmra.mrb[88].mxu0 %vm14340_vm5, %v14346_v17  ;;  %v17029_v17 = vshll.u32 %v17028_v53, 16 }
 0x36a   : > { %11756 = vmatprep.mubr.msk.bf16.mxu0 %vm14386_vm13, %v14390_v61 }
 0x36b   : > { %v14816_v61 = vrot.slane %v17029_v17, 1 }
 0x371   : > { %11759 = vmatmul.mubr.msk.bf16.gmra.mrb[92].mxu0 %vm16207_vm11, %v11758_v12  ;;  %vm17033_vm11 = vsmask.f32 7424  ;;  %v14880_v12 = vld [vmem:[#allocation2 + $0x80] sm:$0xff] }
 0x372   : > { %10285 = vmatprep.mubr.bf16.mxu0 %v14519_v40  ;;  %v11595_v40 = vld [vmem:[#allocation7 + $0x1a0] sm:$0xff]   ;;  %vm17034_vm13 = vmmov %vm17033_vm11  ;;  %v14875_v4 = vsel %vm17033_vm11, %v3972_v5, %v3976_v0 }
 0x373   : > { %vm17045_vm14 = vmmov %vm17033_vm11 }
 0x379   : > { %10286 = vmatmul.mubr.bf16.vlgmr.msra.gmra.mrb[64].mxu0 %v14618_v49 }
 0x37a   : > { %10289 = vmatprep.mubr.bf16.mxu0 %v14634_v54  ;;  %10318 = vmatpush3.bf16.msra.mxu0 %v11591_v51  ;;  %v17031_v54 = vshrl.u32 %v17028_v53, 16  ;;  %v14871_v51 = vld [vmem:[#allocation2 + $0x78] sm:$0xff] }
 0x37b   : > { %10319 = vmatprep.subr.bf16.mxu0 %v11592_v50  ;;  %v3994_v9 = vshrl.u32 %v14871_v51, 16 }
 0x37c   : > { %v14822_v49 = vor.u32 %v17031_v54, %v14816_v61 }
 0x37e   : > { %10320 = vmatpush3.bf16.msra.mxu0 %v11592_v50  ;;  %v3945_v35 = vsel %vm17034_vm13, %v14822_v49, %v14660_v10  ;;  %v3960_v10 = vrot.slane %v3958_v18, 1  ;;  %vm17039_vm13 = vmmov %vm17033_vm11  ;;  %v3986_v50 = vshrl.u32 %v14856_v60, 16 }
 0x37f   : > { %10321 = vmatprep.subr.bf16.mxu0 %v11593_v29  ;;  %v3953_v46 = vsel %vm17039_vm13, %v17038_v31, %v14834_v20  ;;  %vm17040_vm13 = vmmov %vm17033_vm11  ;;  %v4014_v31 = vshll.u32 %v3868_v32, 16  ;;  %v11603_v32 = vld [vmem:[#allocation7 + $0x1e0] sm:$0xff]  }
 0x380   : > { %v14851_v13 = vsel %vm17033_vm11, %v3956_v19, %v3960_v10  ;;  %v3964_v36 = vor.u32 %v3962_v57, %v3960_v10  ;;  %v3988_v17 = vor.u32 %v3986_v50, %v3984_v39  ;;  %v4275_v10 = vld [vmem:[#allocation2 + $0x10] sm:$0x80] }
 0x381   : > { %10290 = vmatmul.mubr.bf16.gmra.mrb[68].mxu0 %v14638_v44  ;;  %v3937_v44 = vsel %vm17033_vm11, %v17032_v47, %v14816_v61  ;;  %v4295_v5 = vshrl.u32 %v4275_v10, 16  ;;  %v4322_v10 = vrot.slane %v3962_v57, 7  ;;  %v11607_v57 = vld [vmem:[#allocation7 + $0x200] sm:$0xff]  }
 0x382   : > { %10293 = vmatprep.mubr.bf16.mxu0 %v17030_v21  ;;  %10322 = vmatpush3.bf16.msra.mxu0 %v11593_v29  ;;  %v14869_v26 = vsel %vm17040_vm13, %v3964_v36, %v3968_v15  ;;  %v3990_v29 = vshll.u32 %v14871_v51, 16  ;;  %v3998_v21 = vshll.u32 %v14880_v12, 16  ;;  %vm17041_vm13 = vmmov %vm17033_vm11  ;;  %v4016_v36 = vrot.slane %v4014_v31, 1  ;;  %v11606_v31 = vld [vmem:[#allocation7 + $0x1f8] sm:$0xff]  }
 0x383   : > { %10323 = vmatprep.subr.bf16.mxu0 %v11594_v41 }
 0x384   : > { %v3992_v54 = vrot.slane %v3990_v29, 1 }
 0x386   : > { %10324 = vmatpush3.bf16.msra.mxu0 %v11594_v41  ;;  %v3978_v41 = vshrl.u32 %v14848_v34, 16  ;;  %v14895_v47 = vsel %vm17033_vm11, %v3988_v17, %v3992_v54  ;;  %v3996_v19 = vor.u32 %v3994_v9, %v3992_v54  ;;  %v11600_v54 = vld [vmem:[#allocation7 + $0x1c8] sm:$0xff]  }
 0x387   : > { %10325 = vmatprep.subr.bf16.mxu0 %v11595_v40 }
 0x389   : > { %10294 = vmatmul.mubr.bf16.gmra.mrb[72].mxu0 %v3937_v44  ;;  %v4000_v44 = vrot.slane %v3998_v21, 1 }
 0x38a   : > { %10297 = vmatprep.mubr.bf16.mxu0 %v3945_v35  ;;  %10326 = vmatpush3.bf16.msra.mxu0 %v11595_v40  ;;  %v3980_v40 = vor.u32 %v3978_v41, %v3976_v0  ;;  %v4002_v35 = vshrl.u32 %v14880_v12, 16  ;;  %v4297_v0 = vrot.slane %v4295_v5, 7  ;;  %v17050_v5 = vld [vmem:[#allocation58_spill] sm:$0xff] }
 0x38b   : > { %10327 = vmatprep.subr.bf16.mxu0 %v11596_v37 }
 0x38e   : > { %10328 = vmatpush3.bf16.msra.mxu0 %v11596_v37  ;;  %v14891_v37 = vsel %vm17041_vm13, %v3980_v40, %v3984_v39  ;;  %vm17042_vm13 = vmmov %vm17033_vm11  ;;  %v17044_v39 = vld [vmem:[#allocation61_spill] sm:$0xff]  ;;  %v4300_v40 = vsel %vm17046_vm0, %v4297_v0, %v14719_v23 }
 0x38f   : > { %10329 = vmatprep.subr.bf16.mxu0 %v11597_v2  ;;  %v4017_v17 = vsel %vm17045_vm14, %v17044_v39, %v4016_v36  ;;  %v11604_v23 = vld [vmem:[#allocation7 + $0x1e8] sm:$0xff]   ;;  %v17051_v36 = vld [vmem:[#allocation55_spill] sm:$0xff]  ;;  %vm17052_vm14 = vmmov %vm17046_vm0  ;;  %v4328_v39 = vrot.slane %v3978_v41, 7 }
 0x391   : > { %10298 = vmatmul.mubr.bf16.gmra.mrb[76].mxu0 %v3953_v46  ;;  %v17043_v46 = vld [vmem:[#allocation59_spill] sm:$0xff] }
 0x392   : > { %10301 = vmatprep.mubr.bf16.mxu0 %v14851_v13  ;;  %10330 = vmatpush3.bf16.msra.mxu0 %v11597_v2  ;;  %v4004_v2 = vor.u32 %v4002_v35, %v4000_v44 }
 0x393   : > { %10331 = vmatprep.subr.bf16.mxu0 %v11598_v6 }
 0x394   : > { %v14910_v15 = vsel %vm17033_vm11, %v4004_v2, %v17043_v46  ;;  %v11602_v2 = vld [vmem:[#allocation7 + $0x1d8] sm:$0xff]   ;;  %v4325_v46 = vrot.slane %v3970_v56, 7  ;;  %vm17054_vm11 = vmmov %vm17046_vm0 }
 0x396   : > { %10332 = vmatpush3.bf16.msra.mxu0 %v11598_v6  ;;  %v14905_v6 = vsel %vm17042_vm13, %v3996_v19, %v4000_v44  ;;  %v11601_v44 = vld [vmem:[#allocation7 + $0x1d0] sm:$0xff]   ;;  %v17047_v19 = vld [vmem:[#allocation57_spill] sm:$0xff]  ;;  %vm17053_vm13 = vmmov %vm17046_vm0 }
 0x397   : > { %10365 = vmatprep.subr.bf16.mxu0 %v11599_v55 }
 0x399   : > { %10302 = vmatmul.mubr.bf16.gmra.mrb[80].mxu0 %v14869_v26 }
 0x39a   : > { %10305 = vmatprep.mubr.bf16.mxu0 %v14875_v4 }
 0x3a1   : > { %10306 = vmatmul.mubr.bf16.gmra.mrb[84].mxu0 %v14891_v37 }
 0x3a2   : > { %10309 = vmatprep.mubr.bf16.mxu0 %v14895_v47 }
 0x3a9   : > { %10310 = vmatmul.mubr.bf16.gmra.mrb[88].mxu0 %v14905_v6 }
 0x3aa   : > { %10313 = vmatprep.mubr.bf16.mxu0 %v14910_v15 }
 0x3b1   : > { %10314 = vmatmul.mubr.bf16.gmra.mrb[92].mxu0 %v4017_v17  ;;  %v4326_v17 = vor.u32 %v4325_v46, %v3966_v48 }
 0x3b2   : > { %10333 = vmatprep.mubr.bf16.mxu0 %v4300_v40  ;;  %v4331_v40 = vrot.slane %v3986_v50, 7  ;;  %v17056_v50 = vld [vmem:[#allocation56_spill] sm:$0xff] }
 0x3b3   : > { %v4327_v56 = vsel %vm17053_vm13, %v4322_v10, %v4326_v17  ;;  %vm17059_vm13 = vmmov %vm17046_vm0  ;;  %v11619_v17 = vld [vmem:[#allocation10 + $0x60] sm:$0xff]  }
 0x3b9   : > { %10334 = vmatmul.mubr.bf16.vlgmr.msra.gmra.mrb[64].mxu0 %v14728_v59  ;;  %v17048_v59 = vld [vmem:[#allocation51_spill] sm:$0xff] }
 0x3ba   : > { %10337 = vmatprep.mubr.bf16.mxu0 %v14738_v11  ;;  %10366 = vmatpush3.bf16.msra.mxu0 %v11599_v55  ;;  %v17049_v11 = vld [vmem:[#allocation54_spill] sm:$0xff] }
 0x3bb   : > { %10367 = vmatprep.subr.bf16.mxu0 %v11600_v54  ;;  %v4318_v55 = vsel %vm17046_vm0, %v17049_v11, %v17048_v59  ;;  %v17060_v11 = vld [vmem:[#allocation60_spill] sm:$0xff] }
 0x3be   : > { %10368 = vmatpush3.bf16.msra.mxu0 %v11600_v54  ;;  %v4334_v54 = vrot.slane %v3994_v9, 7 }
 0x3bf   : > { %10369 = vmatprep.subr.bf16.mxu0 %v11601_v44 }
 0x3c0   : > { %v4335_v48 = vor.u32 %v4334_v54, %v3990_v29 }
 0x3c1   : > { %10338 = vmatmul.mubr.bf16.gmra.mrb[68].mxu0 %v14742_v22  ;;  %v11605_v22 = vld [vmem:[#allocation7 + $0x1f0] sm:$0xff]  }
 0x3c2   : > { %10341 = vmatprep.mubr.bf16.mxu0 %v14749_v1  ;;  %10370 = vmatpush3.bf16.msra.mxu0 %v11601_v44  ;;  %v4323_v1 = vor.u32 %v4322_v10, %v3958_v18  ;;  %v4329_v18 = vor.u32 %v4328_v39, %v3974_v43  ;;  %v4332_v44 = vor.u32 %v4331_v40, %v3982_v25  ;;  %v17058_v25 = vshll.u32 %v17056_v50, 16 }
 0x3c3   : > { %10371 = vmatprep.subr.bf16.mxu0 %v11602_v2 }
 0x3c4   : > { %v4324_v0 = vsel %vm17052_vm14, %v17051_v36, %v4323_v1  ;;  %v4330_v41 = vsel %vm17054_vm11, %v4325_v46, %v4329_v18  ;;  %v4333_v43 = vsel %vm17046_vm0, %v4328_v39, %v4332_v44  ;;  %vm17055_vm14 = vmmov %vm17046_vm0  ;;  %v11616_v46 = vld [vmem:[#allocation10 + $0x48] sm:$0xff]  }
 0x3c5   : > { %vm17062_vm11 = vmmov %vm17046_vm0  ;;  %v11608_v36 = vld [vmem:[#allocation7 + $0x208] sm:$0xff]   ;;  %v11609_v39 = vld [vmem:[#allocation7 + $0x210] sm:$0xff]  }
 0x3c6   : > { %10372 = vmatpush3.bf16.msra.mxu0 %v11602_v2  ;;  %v4337_v2 = vrot.slane %v4002_v35, 7  ;;  %v11620_v18 = vld [vmem:[#allocation10 + $0x68] sm:$0xff]  }
 0x3c7   : > { %10373 = vmatprep.subr.bf16.mxu0 %v11603_v32 }
 0x3c8   : > { %v4338_v9 = vor.u32 %v4337_v2, %v3998_v21 }
 0x3c9   : > { %10342 = vmatmul.mubr.bf16.gmra.mrb[72].mxu0 %v17047_v19 }
 0x3ca   : > { %10345 = vmatprep.mubr.bf16.mxu0 %v4318_v55  ;;  %10374 = vmatpush3.bf16.msra.mxu0 %v11603_v32  ;;  %v4336_v32 = vsel %vm17055_vm14, %v4331_v40, %v4335_v48  ;;  %v4339_v29 = vsel %vm17059_vm13, %v4334_v54, %v4338_v9  ;;  %v17061_v55 = vshrl.u32 %v17060_v11, 16  ;;  %v4869_v48 = vld [vmem:[#allocation2 + $0x30] sm:$0xff]  ;;  %vm17064_vm14 = vsmask.f32 7424 }
 0x3cb   : > { %10375 = vmatprep.subr.bf16.mxu0 %v11604_v23  ;;  %vm17065_vm13 = vmmov %vm17064_vm14 }
 0x3cc   : > { %v14959_v10 = vrot.slane %v17061_v55, 7 }
 0x3ce   : > { %10376 = vmatpush3.bf16.msra.mxu0 %v11604_v23  ;;  %v17057_v23 = vshrl.u32 %v17056_v50, 16 }
 0x3cf   : > { %10377 = vmatprep.subr.bf16.mxu0 %v11605_v22 }
 0x3d0   : > { %v4340_v19 = vrot.slane %v17057_v23, 7 }
 0x3d1   : > { %10346 = vmatmul.mubr.bf16.gmra.mrb[76].mxu0 %v17050_v5  ;;  %v11617_v5 = vld [vmem:[#allocation10 + $0x50] sm:$0xff]  }
 0x3d2   : > { %10349 = vmatprep.mubr.bf16.mxu0 %v4324_v0  ;;  %10378 = vmatpush3.bf16.msra.mxu0 %v11605_v22  ;;  %v4341_v59 = vor.u32 %v4340_v19, %v17058_v25  ;;  %v17063_v22 = vshll.u32 %v17060_v11, 16  ;;  %v11618_v0 = vld [vmem:[#allocation10 + $0x58] sm:$0xff]  }
 0x3d3   : > { %10379 = vmatprep.subr.bf16.mxu0 %v11606_v31 }
 0x3d4   : > { %v4342_v35 = vsel %vm17062_vm11, %v4337_v2, %v4341_v59  ;;  %v14965_v1 = vor.u32 %v17063_v22, %v14959_v10  ;;  %vm17066_vm11 = vmmov %vm17065_vm13 }
 0x3d6   : > { %10380 = vmatpush3.bf16.msra.mxu0 %v11606_v31  ;;  %v4350_v21 = vsel %vm17046_vm0, %v4340_v19, %v14965_v1  ;;  %v11615_v31 = vld [vmem:[#allocation10 + $0x40] sm:$0xff]   ;;  %vm17067_vm0 = vmmov %vm17066_vm11 }
 0x3d7   : > { %10413 = vmatprep.subr.bf16.mxu0 %v11607_v57  ;;  %10461 = vmatprep.subr.bf16.mxu1 %v11615_v31 }
 0x3d8   : > { %10462 = vmatpush3.bf16.msra.mxu1 %v11615_v31 }
 0x3d9   : > { %10350 = vmatmul.mubr.bf16.gmra.mrb[80].mxu0 %v4327_v56  ;;  %10463 = vmatprep.subr.bf16.mxu1 %v11616_v46  ;;  %v11614_v56 = vld [vmem:[#allocation7 + $0x238] sm:$0xff]  }
 0x3da   : > { %10353 = vmatprep.mubr.bf16.mxu0 %v4330_v41 }
 0x3dc   : > { %10464 = vmatpush3.bf16.msra.mxu1 %v11616_v46 }
 0x3dd   : > { %10465 = vmatprep.subr.bf16.mxu1 %v11617_v5 }
 0x3e0   : > { %10466 = vmatpush3.bf16.msra.mxu1 %v11617_v5 }
 0x3e1   : > { %10354 = vmatmul.mubr.bf16.gmra.mrb[84].mxu0 %v4333_v43  ;;  %10467 = vmatprep.subr.bf16.mxu1 %v11618_v0 }
 0x3e2   : > { %10357 = vmatprep.mubr.bf16.mxu0 %v4336_v32 }
 0x3e4   : > { %10468 = vmatpush3.bf16.msra.mxu1 %v11618_v0 }
 0x3e5   : > { %10469 = vmatprep.subr.bf16.mxu1 %v11619_v17 }
 0x3e8   : > { %10470 = vmatpush3.bf16.msra.mxu1 %v11619_v17 }
 0x3e9   : > { %10358 = vmatmul.mubr.bf16.gmra.mrb[88].mxu0 %v4339_v29  ;;  %10471 = vmatprep.subr.bf16.mxu1 %v11620_v18  ;;  %v4928_v29 = vshrl.u32 %v4869_v48, 16 }
 0x3ea   : > { %10361 = vmatprep.mubr.bf16.mxu0 %v4342_v35  ;;  %v4872_v35 = vld [vmem:[#allocation2 + $0x48] sm:$0xff] }
 0x3eb   : > { %v4948_v31 = vshll.u32 %v4872_v35, 16  ;;  %v4952_v0 = vshrl.u32 %v4872_v35, 16  ;;  %v17081_v35 = vld [vmem:[#allocation78_spill] sm:$0xff] }
 0x3ec   : > { %10472 = vmatpush3.bf16.msra.mxu1 %v11620_v18 }
 0x3f1   : > { %10362 = vmatmul.mubr.bf16.gmra.mrb[92].mxu0 %v4350_v21 }
 0x3f2   : > { %10381 = vmatprep.mubr.bf16.mxu0 %v14427_v33  ;;  %v11610_v33 = vld [vmem:[#allocation7 + $0x218] sm:$0xff]  }
 0x3f9   : > { %10382 = vmatmul.mubr.bf16.vlgmr.msra.gmra.mrb[64].mxu0 %v14598_v63  ;;  %v11611_v63 = vld [vmem:[#allocation7 + $0x220] sm:$0xff]  }
 0x3fa   : > { %10385 = vmatprep.mubr.bf16.mxu0 %v14605_v8  ;;  %10414 = vmatpush3.bf16.msra.mxu0 %v11607_v57  ;;  %v11612_v8 = vld [vmem:[#allocation7 + $0x228] sm:$0xff]   ;;  %v11689_v57 = vld [vmem:[#allocation2 + $0x48] sm:$0xff] }
 0x3fb   : > { %10415 = vmatprep.subr.bf16.mxu0 %v11608_v36 }
 0x3fe   : > { %10416 = vmatpush3.bf16.msra.mxu0 %v11608_v36  ;;  %v4950_v36 = vrot.slane %v4948_v31, 1 }
 0x3ff   : > { %10417 = vmatprep.subr.bf16.mxu0 %v11609_v39 }
 0x401   : > { %10386 = vmatmul.mubr.bf16.gmra.mrb[68].mxu0 %v14610_v38  ;;  %v11613_v38 = vld [vmem:[#allocation7 + $0x230] sm:$0xff]  }
 0x402   : > { %10389 = vmatprep.mubr.bf16.mxu0 %v14526_v30  ;;  %10418 = vmatpush3.bf16.msra.mxu0 %v11609_v39  ;;  %v4866_v30 = vld [vmem:[#allocation2 + $0x18] sm:$0xff]  ;;  %v4954_v39 = vor.u32 %v4952_v0, %v4950_v36 }
 0x403   : > { %10419 = vmatprep.subr.bf16.mxu0 %v11610_v33  ;;  %v4903_v40 = vshll.u32 %v4866_v30, 16  ;;  %v4901_v54 = vshrl.u32 %v4866_v30, 16 }
 0x406   : > { %10420 = vmatpush3.bf16.msra.mxu0 %v11610_v33 }
 0x407   : > { %10421 = vmatprep.subr.bf16.mxu0 %v11611_v63 }
 0x409   : > { %10390 = vmatmul.mubr.bf16.gmra.mrb[72].mxu0 %v17028_v53  ;;  %v4867_v53 = vld [vmem:[#allocation2 + $0x20] sm:$0xff] }
 0x40a   : > { %10393 = vmatprep.mubr.bf16.mxu0 %v11689_v57  ;;  %10422 = vmatpush3.bf16.msra.mxu0 %v11611_v63  ;;  %v4908_v41 = vshll.u32 %v4867_v53, 16  ;;  %v17072_v63 = vld [vmem:[#allocation75_spill] sm:$0xff] }
 0x40b   : > { %10423 = vmatprep.subr.bf16.mxu0 %v11612_v8 }
 0x40c   : > { %v4910_v44 = vrot.slane %v4908_v41, 1 }
 0x40e   : > { %10424 = vmatpush3.bf16.msra.mxu0 %v11612_v8 }
 0x40f   : > { %10425 = vmatprep.subr.bf16.mxu0 %v11613_v38 }
 0x411   : > { %10394 = vmatmul.mubr.bf16.gmra.mrb[76].mxu0 %v17035_v27  ;;  %v4868_v27 = vld [vmem:[#allocation2 + $0x28] sm:$0xff] }
 0x412   : > { %10397 = vmatprep.mubr.bf16.mxu0 %v14827_v3  ;;  %10426 = vmatpush3.bf16.msra.mxu0 %v11613_v38  ;;  %v4905_v3 = vrot.slane %v4903_v40, 1  ;;  %v4916_v43 = vshll.u32 %v4868_v27, 16  ;;  %v4920_v23 = vshrl.u32 %v4868_v27, 16 }
 0x413   : > { %10427 = vmatprep.subr.bf16.mxu0 %v11614_v56 }
 0x414   : > { %v4918_v2 = vrot.slane %v4916_v43, 1  ;;  %v17077_v43 = vld [vmem:[#allocation71_spill] sm:$0xff] }
 0x416   : > { %10428 = vmatpush3.bf16.msra.mxu0 %v11614_v56 }
 0x419   : > { %10398 = vmatmul.mubr.bf16.gmra.mrb[80].mxu0 %v14836_v58  ;;  %v4906_v58 = vor.u32 %v4905_v3, %v4901_v54  ;;  %v17073_v54 = vld [vmem:[#allocation68_spill] sm:$0xff] }
 0x41a   : > { %10401 = vmatprep.mubr.bf16.mxu0 %v14848_v34 }
 0x41b   : > { %v4911_v34 = vsel %vm17064_vm14, %v4906_v58, %v4910_v44  ;;  %vm17068_vm14 = vmmov %vm17067_vm0 }
 0x421   : > { %10402 = vmatmul.mubr.bf16.gmra.mrb[84].mxu0 %v14856_v60  ;;  %v4924_v60 = vshll.u32 %v4869_v48, 16  ;;  %v17075_v48 = vld [vmem:[#allocation72_spill] sm:$0xff] }
 0x422   : > { %10405 = vmatprep.mubr.bf16.mxu0 %v14871_v51  ;;  %v4912_v51 = vshrl.u32 %v4867_v53, 16 }
 0x423   : > { %v4926_v19 = vrot.slane %v4924_v60, 1 }
 0x424   : > { %v4914_v32 = vor.u32 %v4912_v51, %v4910_v44  ;;  %v17079_v51 = vld [vmem:[#allocation73_spill] sm:$0xff] }
 0x425   : > { %v4930_v55 = vor.u32 %v4928_v29, %v4926_v19 }
 0x426   : > { %v4919_v25 = vsel %vm17065_vm13, %v4914_v32, %v4918_v2  ;;  %vm17069_vm13 = vmmov %vm17067_vm0 }
 0x427   : > { %v4951_v17 = vsel %vm17069_vm13, %v14822_v49, %v4950_v36  ;;  %v17071_v49 = vld [vmem:[#allocation62_spill] sm:$0xff]  ;;  %vm17076_vm13 = vnez %v17075_v48 }
 0x429   : > { %10406 = vmatmul.mubr.bf16.gmra.mrb[88].mxu0 %v14880_v12  ;;  %v4870_v12 = vld [vmem:[#allocation2 + $0x38] sm:$0xff] }
 0x42a   : > { %10409 = vmatprep.mubr.bf16.mxu0 %v17056_v50  ;;  %v4922_v50 = vor.u32 %v4920_v23, %v4918_v2  ;;  %v4932_v9 = vshll.u32 %v4870_v12, 16  ;;  %v4936_v22 = vshrl.u32 %v4870_v12, 16 }
 0x42c   : > { %v4927_v59 = vsel %vm17066_vm11, %v4922_v50, %v4926_v19  ;;  %vm17070_vm11 = vmmov %vm17067_vm0  ;;  %v11624_v50 = vld [vmem:[#allocation10 + $0x8] sm:$0xff]  }
 0x42d   : > { %v4959_v33 = vsel %vm17070_vm11, %v4954_v39, %v14834_v20  ;;  %vm17078_vm11 = vnez %v17077_v43  ;;  %v11625_v39 = vld [vmem:[#allocation10 + $0x10] sm:$0xff]  }
 0x431   : > { %10410 = vmatmul.mubr.bf16.gmra.mrb[92].mxu0 %v17060_v11  ;;  %v4934_v11 = vrot.slane %v4932_v9, 1 }
 0x432   : > { %10429 = vmatprep.mubr.bf16.mxu0 %v4911_v34 }
 0x433   : > { %v4938_v21 = vor.u32 %v4936_v22, %v4934_v11  ;;  %v4935_v46 = vsel %vm17067_vm0, %v4930_v55, %v4934_v11 }
 0x435   : > { %v4943_v5 = vsel %vm17068_vm14, %v4938_v21, %v14816_v61  ;;  %v4882_v61 = vld [vmem:[#allocation2 + $0x98] sm:$0x1]  ;;  %vm17074_vm14 = vnez %v17073_v54 }
 0x436   : > { %v5028_v18 = vshll.u32 %v4882_v61, 16  ;;  %v17085_v61 = vld [vmem:[#allocation74_spill] sm:$0xff] }
 0x438   : > { %v5030_v20 = vrot.slane %v5028_v18, 1 }
 0x439   : > { %10430 = vmatmul.mubr.bf16.vlgmr.msra.gmra.mrb[64].mxu0 %v4919_v25 }
 0x43a   : > { %10433 = vmatprep.mubr.bf16.mxu0 %v4927_v59 }
 0x441   : > { %10434 = vmatmul.mubr.bf16.gmra.mrb[68].mxu0 %v4935_v46 }
 0x442   : > { %10437 = vmatprep.mubr.bf16.mxu0 %v4943_v5  ;;  %v17083_v5 = vld [vmem:[#allocation79_spill] sm:$0xff] }
 0x449   : > { %10438 = vmatmul.mubr.bf16.gmra.mrb[72].mxu0 %v4951_v17 }
 0x44a   : > { %10441 = vmatprep.mubr.bf16.mxu0 %v4959_v33 }
 0x451   : > { %10442 = vmatmul.mubr.bf16.gmra.mrb[76].mxu0 %v14851_v13  ;;  %v5031_v13 = vsel %vm17067_vm0, %v17072_v63, %v5030_v20  ;;  %vm17080_vm0 = vnez %v17079_v51  ;;  %v17095_v51 = vld [vmem:[#allocation64_spill] sm:$0xff] }
 0x452   : > { %10445 = vmatprep.mubr.bf16.mxu0 %v14869_v26  ;;  %v11621_v26 = vld [vmem:[#allocation10 + $0x70] sm:$0xff]  }
 0x453   : > { %10473 = vmatprep.subr.bf16.mxu1 %v11621_v26 }
 0x454   : > { %10474 = vmatpush3.bf16.msra.mxu1 %v11621_v26 }
 0x459   : > { %10446 = vmatmul.mubr.bf16.gmra.mrb[80].mxu0 %v14875_v4  ;;  %v11622_v4 = vld [vmem:[#allocation10 + $0x78] sm:$0xff]  }
 0x45a   : > { %10449 = vmatprep.mubr.bf16.mxu0 %v14891_v37  ;;  %10475 = vmatprep.subr.bf16.mxu1 %v11622_v4  ;;  %v11623_v37 = vld [vmem:[#allocation10] sm:$0xff]  }
 0x45b   : > { %10476 = vmatpush3.bf16.msra.mxu1 %v11622_v4 }
 0x45c   : > { %10509 = vmatprep.subr.bf16.mxu1 %v11623_v37 }
 0x461   : > { %10450 = vmatmul.mubr.bf16.gmra.mrb[84].mxu0 %v14895_v47  ;;  %v15004_v47 = vld [vmem:[#allocation8] ss:$0 sm:$0xff] }
 0x462   : > { %10453 = vmatprep.mubr.bf16.mxu0 %v14905_v6 }
 0x469   : > { %10454 = vmatmul.mubr.bf16.gmra.mrb[88].mxu0 %v14910_v15 }
 0x46a   : > { %10457 = vmatprep.mubr.bf16.mxu0 %v17071_v49  ;;  %v17087_v49 = vld [vmem:[#allocation77_spill] sm:$0xff] }
 0x471   : > { %10458 = vmatmul.mubr.bf16.gmra.mrb[92].mxu0 %v5031_v13  ;;  %v17089_v13 = vld [vmem:[#allocation76_spill] sm:$0xff] }
 0x50c   : > { %v10431_v6 = vpop.f32.mrb[64].mxu0 }
 0x50d   : > { %v5298_v15 = vadd.f32 %v10431_v6, %v15004_v47  ;;  %v5130_v8 = vpop.f32.mrb[65].mxu0 }
 0x50e   : > { %v5296_v57 = vadd.f32 %v15004_v47, %v5130_v8  ;;  %v10432_v38 = vpop.f32.mrb[66].mxu0 }
 0x50f   : > { %v5330_v56 = vmax.f32 %v5298_v15, 0.0  ;;  %v5299_v30 = vadd.f32 %v10432_v38, %v15004_v47  ;;  %v5133_v53 = vpop.f32.mrb[67].mxu0 }
 0x510   : > { %v5328_v40 = vmax.f32 %v5296_v57, 0.0  ;;  %v5297_v41 = vadd.f32 %v15004_v47, %v5133_v53 }
 0x511   : > { %v5331_v3 = vmax.f32 %v5299_v30, 0.0  ;;  %v5362_v44 = vsel %vm17074_vm14, %v5330_v56, 0.0  ;;  %vm17082_vm14 = vnez %v17081_v35  ;;  %v11626_v30 = vld [vmem:[#allocation10 + $0x18] sm:$0xff]  }
 0x512   : > { %v5329_v27 = vmax.f32 %v5297_v41, 0.0  ;;  %v5360_v34 = vsel %vm17078_vm11, %v5328_v40, 0.0  ;;  %vm17086_vm11 = vnez %v17085_v61 }
 0x513   : > { %v5363_v58 = vsel %vm17076_vm13, %v5331_v3, 0.0  ;;  %v15034_v46 = vpack.c.bf16 %v5331_v3, %v5330_v56  ;;  %vm17084_vm13 = vnez %v17083_v5 }
 0x514   : > { %v15016_v60 = vpack.c.bf16 %v5363_v58, %v5362_v44  ;;  %v5361_v2 = vsel %vm17080_vm0, %v5329_v27, 0.0  ;;  %v10435_v32 = vpop.f32.mrb[68].mxu0  ;;  %v15027_v55 = vpack.c.bf16 %v5329_v27, %v5328_v40  ;;  %vm17088_vm0 = vnez %v17087_v49  ;;  %v17093_v44 = vld [vmem:[#allocation20_spill] sm:$0xff] }
 0x515   : > { %v15020_v12 = vpack.c.bf16 %v5361_v2, %v5360_v34  ;;  %v5302_v23 = vadd.f32 %v10435_v32, %v15004_v47  ;;  %v5146_v19 = vpop.f32.mrb[69].mxu0  ;;  %v11627_v32 = vld [vmem:[#allocation10 + $0x20] sm:$0xff]  }
 0x516   : > { %5409 = vst [vmem:[#allocation2 + $0x18] sm:$0xff] %v15016_v60  ;;  %v5300_v9 = vadd.f32 %v15004_v47, %v5146_v19  ;;  %v10436_v25 = vpop.f32.mrb[70].mxu0  ;;  %11762 = vmatmul.mubr.msk.bf16.vlgmr.msra.gmra.mrb[64].mxu1 %vm17082_vm14, %v15027_v55  ;;  %v16214_v63 = vshrl.u32 %v15016_v60, 16  ;;  %v16218_v19 = vshll.u32 %v15016_v60, 16 }
 0x517   : > { %5408 = vst [vmem:[#allocation2 + $0x10] sm:$0xff] %v15020_v12  ;;  %v5334_v59 = vmax.f32 %v5302_v23, 0.0  ;;  %v5303_v29 = vadd.f32 %v10436_v25, %v15004_v47  ;;  %v5149_v11 = vpop.f32.mrb[71].mxu0  ;;  %v16217_v22 = vshrl.u32 %v15020_v12, 16  ;;  %11765 = vmatprep.mubr.msk.bf16.mxu1 %vm17084_vm13, %v15034_v46  ;;  %10510 = vmatpush3.bf16.msra.mxu1 %v11623_v37  ;;  %v16220_v33 = vshll.u32 %v15020_v12, 16  ;;  %v17091_v37 = vld [vmem:[#allocation80_spill] sm:$0xff] }
 0x518   : > { %v5332_v21 = vmax.f32 %v5300_v9, 0.0  ;;  %v5301_v31 = vadd.f32 %v15004_v47, %v5149_v11  ;;  %10511 = vmatprep.subr.bf16.mxu1 %v11624_v50  ;;  %vm17090_vm13 = vnez %v17089_v13  ;;  %vm17092_vm14 = vnez %v17091_v37  ;;  %v17099_v25 = vld [vmem:[#allocation19_spill] sm:$0xff]  ;;  %v17101_v11 = vld [vmem:[#allocation18_spill] sm:$0xff] }
 0x519   : > { %v5335_v36 = vmax.f32 %v5303_v29, 0.0  ;;  %v5698_v0 = vrot.slane %v16217_v22, 7  ;;  %v5366_v18 = vsel %vm17086_vm11, %v5334_v59, 0.0  ;;  %v5706_v43 = vrot.slane %v16214_v63, 7  ;;  %v11628_v13 = vld [vmem:[#allocation10 + $0x28] sm:$0xff]  }
 0x51a   : > { %v5333_v17 = vmax.f32 %v5301_v31, 0.0  ;;  %v5364_v26 = vsel %vm17090_vm13, %v5332_v21, 0.0  ;;  %vm17096_vm13 = vnez %v17095_v51 }
 0x51b   : > { %v5367_v20 = vsel %vm17088_vm0, %v5335_v36, 0.0  ;;  %10512 = vmatpush3.bf16.msra.mxu1 %v11624_v50  ;;  %v15055_v8 = vor.u32 %v16220_v33, %v5698_v0  ;;  %v15072_v34 = vpack.c.bf16 %v5335_v36, %v5334_v59  ;;  %v17097_v50 = vld [vmem:[#allocation17_spill] sm:$0xff]  ;;  %vm17100_vm0 = vnez %v17099_v25  ;;  %v17103_v36 = vld [vmem:[#allocation22_spill] sm:$0xff]  ;;  %v17136_v33 = vld [vmem:[#allocation35_spill] sm:$0xff] }
 0x51c   : > { %v15049_v4 = vpack.c.bf16 %v5367_v20, %v5366_v18  ;;  %v5365_v6 = vsel %vm17092_vm14, %v5333_v17, 0.0  ;;  %v10439_v15 = vpop.f32.mrb[72].mxu0  ;;  %10513 = vmatprep.subr.bf16.mxu1 %v11625_v39  ;;  %v15064_v54 = vpack.c.bf16 %v5333_v17, %v5332_v21  ;;  %vm17094_vm14 = vnez %v17093_v44  ;;  %v17110_v25 = vld [vmem:[#allocation65_spill] sm:$0xff] }
 0x51d   : > { %v15057_v57 = vpack.c.bf16 %v5365_v6, %v5364_v26  ;;  %v5306_v38 = vadd.f32 %v10439_v15, %v15004_v47  ;;  %v5162_v56 = vpop.f32.mrb[73].mxu0  ;;  %vm17098_vm11 = vnez %v17097_v50  ;;  %v6490_v61 = vor.u32 %v16218_v19, %v5706_v43  ;;  %v17134_v19 = vld [vmem:[#allocation33_spill] sm:$0xff] }
 0x51e   : > { %5411 = vst [vmem:[#allocation2 + $0x28] sm:$0xff] %v15049_v4  ;;  %v5304_v53 = vadd.f32 %v15004_v47, %v5162_v56  ;;  %v10440_v40 = vpop.f32.mrb[74].mxu0  ;;  %11768 = vmatmul.mubr.msk.bf16.gmra.mrb[68].mxu1 %vm17094_vm14, %v15064_v54  ;;  %vm17102_vm14 = vnez %v17101_v11  ;;  %v17112_v11 = vld [vmem:[#allocation24_spill] sm:$0xff] }
 0x51f   : > { %5410 = vst [vmem:[#allocation2 + $0x20] sm:$0xff] %v15057_v57  ;;  %v5338_v41 = vmax.f32 %v5306_v38, 0.0  ;;  %v5307_v3 = vadd.f32 %v10440_v40, %v15004_v47  ;;  %v5165_v27 = vpop.f32.mrb[75].mxu0  ;;  %11771 = vmatprep.mubr.msk.bf16.mxu1 %vm17096_vm13, %v15072_v34  ;;  %10514 = vmatpush3.bf16.msra.mxu1 %v11625_v39  ;;  %v16213_v59 = vshrl.u32 %v15057_v57, 16  ;;  %vm17104_vm13 = vnez %v17103_v36 }
 0x520   : > { %v5336_v48 = vmax.f32 %v5304_v53, 0.0  ;;  %v5305_v58 = vadd.f32 %v15004_v47, %v5165_v27  ;;  %10515 = vmatprep.subr.bf16.mxu1 %v11626_v30  ;;  %v17106_v53 = vld [vmem:[#allocation25_spill] sm:$0xff] }
 0x521   : > { %v5339_v2 = vmax.f32 %v5307_v3, 0.0  ;;  %v5370_v9 = vsel %vm17098_vm11, %v5338_v41, 0.0  ;;  %v5714_v27 = vrot.slane %v16213_v59, 7 }
 0x522   : > { %v5337_v23 = vmax.f32 %v5305_v58, 0.0  ;;  %v5368_v21 = vsel %vm17102_vm14, %v5336_v48, 0.0  ;;  %vm17105_vm14 = vsmask.f32 256  ;;  %v17108_v58 = vld [vmem:[#allocation26_spill] sm:$0xff] }
 0x523   : > { %v5371_v29 = vsel %vm17100_vm0, %v5339_v2, 0.0  ;;  %10516 = vmatpush3.bf16.msra.mxu1 %v11626_v30  ;;  %v15097_v6 = vsel %vm17105_vm14, %v5698_v0, %v6490_v61  ;;  %v15109_v0 = vpack.c.bf16 %v5339_v2, %v5338_v41  ;;  %vm17109_vm11 = vnez %v17108_v58  ;;  %v17114_v2 = vld [vmem:[#allocation23_spill] sm:$0xff] }
 0x524   : > { %v15085_v31 = vpack.c.bf16 %v5371_v29, %v5370_v9  ;;  %v5369_v39 = vsel %vm17104_vm13, %v5337_v23, 0.0  ;;  %v10443_v17 = vpop.f32.mrb[76].mxu0  ;;  %10517 = vmatprep.subr.bf16.mxu1 %v11627_v32  ;;  %v15101_v30 = vpack.c.bf16 %v5337_v23, %v5336_v48  ;;  %vm17107_vm13 = vnez %v17106_v53  ;;  %v11629_v48 = vld [vmem:[#allocation10 + $0x30] sm:$0xff]  }
 0x525   : > { %v15091_v18 = vpack.c.bf16 %v5369_v39, %v5368_v21  ;;  %v5310_v49 = vadd.f32 %v10443_v17, %v15004_v47  ;;  %v5178_v20 = vpop.f32.mrb[77].mxu0  ;;  %v16215_v9 = vshll.u32 %v15057_v57, 16  ;;  %vm17111_vm0 = vnez %v17110_v25 }
 0x526   : > { %5413 = vst [vmem:[#allocation2 + $0x38] sm:$0xff] %v15085_v31  ;;  %v5308_v26 = vadd.f32 %v15004_v47, %v5178_v20  ;;  %v10444_v37 = vpop.f32.mrb[78].mxu0  ;;  %11774 = vmatmul.mubr.msk.bf16.gmra.mrb[72].mxu1 %vm17107_vm13, %v15101_v30  ;;  %vm17113_vm14 = vnez %v17112_v11  ;;  %v16212_v41 = vshrl.u32 %v15049_v4, 16  ;;  %vm17115_vm13 = vnez %v17114_v2  ;;  %v17119_v2 = vld [vmem:[#allocation31_spill] sm:$0xff] }
 0x527   : > { %5412 = vst [vmem:[#allocation2 + $0x30] sm:$0xff] %v15091_v18  ;;  %v5342_v15 = vmax.f32 %v5310_v49, 0.0  ;;  %v5311_v38 = vadd.f32 %v10444_v37, %v15004_v47  ;;  %v5181_v56 = vpop.f32.mrb[79].mxu0  ;;  %11777 = vmatprep.mubr.msk.bf16.mxu1 %vm17109_vm11, %v15109_v0  ;;  %10518 = vmatpush3.bf16.msra.mxu1 %v11627_v32  ;;  %v17116_v32 = vld [vmem:[#allocation29_spill] sm:$0xff]  ;;  %v6493_v49 = vor.u32 %v16215_v9, %v5714_v27 }
 0x528   : > { %v5340_v40 = vmax.f32 %v5308_v26, 0.0  ;;  %v5309_v3 = vadd.f32 %v15004_v47, %v5181_v56  ;;  %10519 = vmatprep.subr.bf16.mxu1 %v11628_v13  ;;  %vm17117_vm11 = vnez %v17116_v32 }
 0x529   : > { %v5343_v50 = vmax.f32 %v5311_v38, 0.0  ;;  %v5374_v29 = vsel %vm17111_vm0, %v5342_v15, 0.0  ;;  %v11630_v38 = vld [vmem:[#allocation10 + $0x38] sm:$0xff]  }
 0x52a   : > { %v5341_v23 = vmax.f32 %v5309_v3, 0.0  ;;  %v5372_v36 = vsel %vm17115_vm13, %v5340_v40, 0.0  ;;  %vm17118_vm13 = vsmask.f32 256 }
 0x52b   : > { %v5375_v21 = vsel %vm17113_vm14, %v5343_v50, 0.0  ;;  %10520 = vmatpush3.bf16.msra.mxu1 %v11628_v13  ;;  %v15134_v25 = vsel %vm17118_vm13, %v5706_v43, %v6493_v49  ;;  %v15146_v43 = vpack.c.bf16 %v5343_v50, %v5342_v15  ;;  %v16219_v15 = vshrl.u32 %v15091_v18, 16  ;;  %v17127_v50 = vld [vmem:[#allocation66_spill] sm:$0xff] }
 0x52c   : > { %v15122_v39 = vpack.c.bf16 %v5375_v21, %v5374_v29  ;;  %v5373_v17 = vsel %vm17117_vm11, %v5341_v23, 0.0  ;;  %v10447_v61 = vpop.f32.mrb[80].mxu0  ;;  %10521 = vmatprep.subr.bf16.mxu1 %v11629_v48  ;;  %v15138_v21 = vpack.c.bf16 %v5341_v23, %v5340_v40  ;;  %vm17120_vm11 = vnez %v17119_v2  ;;  %v15151_v40 = vld [vmem:[#allocation10 + $0x80] sm:$0xff]  }
 0x52d   : > { %v15128_v20 = vpack.c.bf16 %v5373_v17, %v5372_v36  ;;  %v5314_v26 = vadd.f32 %v10447_v61, %v15004_v47  ;;  %v5194_v37 = vpop.f32.mrb[81].mxu0  ;;  %v5722_v36 = vrot.slane %v16212_v41, 7  ;;  %v17121_v61 = vld [vmem:[#allocation32_spill] sm:$0xff]  ;;  %v16216_v23 = vshll.u32 %v15049_v4, 16 }
 0x52e   : > { %5415 = vst [vmem:[#allocation2 + $0x48] sm:$0xff] %v15122_v39  ;;  %v5312_v56 = vadd.f32 %v15004_v47, %v5194_v37  ;;  %v10448_v3 = vpop.f32.mrb[82].mxu0  ;;  %11780 = vmatmul.mubr.msk.bf16.gmra.mrb[76].mxu1 %vm17120_vm11, %v15138_v21  ;;  %vm17122_vm0 = vnez %v17121_v61  ;;  %v17123_v37 = vld [vmem:[#allocation30_spill] sm:$0xff]  ;;  %vm17128_vm11 = vnez %v17127_v50  ;;  %v5424_v50 = vld [vmem:[#allocation2] sm:$0x80] }
 0x52f   : > { %5414 = vst [vmem:[#allocation2 + $0x40] sm:$0xff] %v15128_v20  ;;  %v5346_v13 = vmax.f32 %v5314_v26, 0.0  ;;  %v5315_v29 = vadd.f32 %v10448_v3, %v15004_v47  ;;  %v5197_v11 = vpop.f32.mrb[83].mxu0  ;;  %11783 = vmatprep.mubr.msk.bf16.mxu1 %vm17122_vm0, %v15146_v43  ;;  %10522 = vmatpush3.bf16.msra.mxu1 %v11629_v48  ;;  %vm17124_vm14 = vnez %v17123_v37  ;;  %v17129_v48 = vld [vmem:[#allocation69_spill] sm:$0xff] }
 0x530   : > { %v5344_v32 = vmax.f32 %v5312_v56, 0.0  ;;  %v5313_v17 = vadd.f32 %v15004_v47, %v5197_v11  ;;  %10523 = vmatprep.subr.bf16.mxu1 %v11630_v38  ;;  %v17125_v56 = vld [vmem:[#allocation67_spill] sm:$0xff]  ;;  %vm17130_vm0 = vnez %v17129_v48 }
 0x531   : > { %v5347_v49 = vmax.f32 %v5315_v29, 0.0  ;;  %v5378_v3 = vsel %vm17124_vm14, %v5346_v13, 0.0  ;;  %vm17126_vm13 = vnez %v17125_v56  ;;  %vm17137_vm14 = vnez %v17136_v33 }
 0x532   : > { %v5345_v26 = vmax.f32 %v5313_v17, 0.0  ;;  %v5376_v41 = vsel %vm17128_vm11, %v5344_v32, 0.0  ;;  %v6496_v17 = vor.u32 %v16216_v23, %v5722_v36  ;;  %vm17131_vm11 = vsmask.f32 256 }
 0x533   : > { %v5379_v11 = vsel %vm17126_vm13, %v5347_v49, 0.0  ;;  %10524 = vmatpush3.bf16.msra.mxu1 %v11630_v38 }
 0x534   : > { %v15161_v59 = vpack.c.bf16 %v5379_v11, %v5378_v3  ;;  %v5377_v29 = vsel %vm17130_vm0, %v5345_v26, 0.0  ;;  %v10451_v63 = vpop.f32.mrb[84].mxu0  ;;  %10557 = vmatprep.subr.bf16.mxu1 %v15151_v40  ;;  %v15174_v48 = vsel %vm17131_vm11, %v5714_v27, %v6496_v17  ;;  %v15178_v23 = vpack.c.bf16 %v5345_v26, %v5344_v32 }
 0x535   : > { %v15167_v37 = vpack.c.bf16 %v5377_v29, %v5376_v41  ;;  %v5318_v56 = vadd.f32 %v10451_v63, %v15004_v47  ;;  %v5210_v9 = vpop.f32.mrb[85].mxu0  ;;  %v15185_v63 = vrot.slane %v16219_v15, 7  ;;  %v15188_v17 = vpack.c.bf16 %v5347_v49, %v5346_v13 }
 0x536   : > { %5417 = vst [vmem:[#allocation2 + $0x58] sm:$0xff] %v15161_v59  ;;  %v5316_v3 = vadd.f32 %v15004_v47, %v5210_v9  ;;  %v10452_v11 = vpop.f32.mrb[86].mxu0  ;;  %17132 = vst [vmem:[#allocation27_spill] sm:$0xff] %v15178_v23  ;;  %11786 = vmatmul.mubr.msk.bf16.gmra.mrb[80].mxu1 %vm17022_vm6, %v15178_v23  ;;  %v5684_v32 = vshrl.u32 %v5424_v50, 16  ;;  %v16224_v26 = vshll.u32 %v15091_v18, 16  ;;  %vm17135_vm0 = vnez %v17134_v19 }
 0x537   : > { %5416 = vst [vmem:[#allocation2 + $0x50] sm:$0xff] %v15167_v37  ;;  %v5350_v38 = vmax.f32 %v5318_v56, 0.0  ;;  %v5319_v41 = vadd.f32 %v10452_v11, %v15004_v47  ;;  %v5213_v29 = vpop.f32.mrb[87].mxu0  ;;  %17133 = vst [vmem:[#allocation52_spill] sm:$0xff] %v15188_v17  ;;  %11789 = vmatprep.mubr.msk.bf16.mxu1 %vm17023_vm7, %v15188_v17  ;;  %vm17141_vm11 = vnez %v17140_v42  ;;  %v16227_v42 = vshrl.u32 %v15122_v39, 16 }
 0x538   : > { %v5348_v9 = vmax.f32 %v5316_v3, 0.0  ;;  %v5317_v27 = vadd.f32 %v15004_v47, %v5213_v29  ;;  %v17138_v29 = vld [vmem:[#allocation34_spill] sm:$0xff]  ;;  %v5686_v33 = vrot.slane %v5684_v32, 7 }
 0x539   : > { %v5351_v56 = vmax.f32 %v5319_v41, 0.0  ;;  %v5382_v15 = vsel %vm17135_vm0, %v5350_v38, 0.0  ;;  %vm17139_vm13 = vnez %v17138_v29  ;;  %vm17142_vm0 = vsmask.f32 256 }
 0x53a   : > { %v5349_v11 = vmax.f32 %v5317_v27, 0.0  ;;  %v5380_v13 = vsel %vm17139_vm13, %v5348_v9, 0.0  ;;  %v6499_v27 = vor.u32 %v16224_v26, %v15185_v63  ;;  %vm17175_vm13 = vnez %v16942_v28 }
 0x53b   : > { %v5383_v3 = vsel %vm17137_vm14, %v5351_v56, 0.0  ;;  %vm17146_vm14 = vmmov %vm17142_vm0 }
 0x53c   : > { %v15201_v49 = vpack.c.bf16 %v5383_v3, %v5382_v15  ;;  %v5381_v41 = vsel %vm17141_vm11, %v5349_v11, 0.0  ;;  %v10455_v50 = vpop.f32.mrb[88].mxu0  ;;  %v15214_v3 = vsel %vm17142_vm0, %v5722_v36, %v6499_v27  ;;  %v15219_v26 = vpack.c.bf16 %v5349_v11, %v5348_v9  ;;  %vm17176_vm11 = vmmov %vm17142_vm0 }
 0x53d   : > { %v15208_v22 = vpack.c.bf16 %v5381_v41, %v5380_v13  ;;  %v5322_v19 = vadd.f32 %v10455_v50, %v15004_v47  ;;  %v5226_v17 = vpop.f32.mrb[89].mxu0  ;;  %v15229_v27 = vpack.c.bf16 %v5351_v56, %v5350_v38  ;;  %v15236_v9 = vsel %vm17146_vm14, %v5686_v33, %v14965_v1  ;;  %vm17178_vm14 = vmmov %vm17142_vm0 }
 0x53e   : > { %5419 = vst [vmem:[#allocation2 + $0x68] sm:$0xff] %v15201_v49  ;;  %v5320_v29 = vadd.f32 %v15004_v47, %v5226_v17  ;;  %v10456_v15 = vpop.f32.mrb[90].mxu0  ;;  %17143 = vst [vmem:[#allocation21_spill] sm:$0xff] %v15219_v26  ;;  %11792 = vmatmul.mubr.msk.bf16.gmra.mrb[84].mxu1 %vm17024_vm12, %v15219_v26  ;;  %v17144_v17 = vshrl.u32 %v15085_v31, 16  ;;  %v15244_v38 = vrot.slane %v16227_v42, 7 }
 0x53f   : > { %5418 = vst [vmem:[#allocation2 + $0x60] sm:$0xff] %v15208_v22  ;;  %v5354_v7 = vmax.f32 %v5322_v19, 0.0  ;;  %v5323_v13 = vadd.f32 %v10456_v15, %v15004_v47  ;;  %v5229_v41 = vpop.f32.mrb[91].mxu0  ;;  %17145 = vst [vmem:[#allocation63_spill] sm:$0xff] %v15229_v27  ;;  %11795 = vmatprep.mubr.msk.bf16.mxu1 %vm17025_vm2, %v15229_v27 }
 0x540   : > { %v15226_v32 = vrot.slane %v17144_v17, 7  ;;  %v5352_v36 = vmax.f32 %v5320_v29, 0.0  ;;  %v5321_v50 = vadd.f32 %v15004_v47, %v5229_v41  ;;  %v17151_v41 = vshll.u32 %v15085_v31, 16 }
 0x541   : > { %v5355_v19 = vmax.f32 %v5323_v13, 0.0  ;;  %v5386_v13 = vsel %vm16900_vm9, %v5354_v7, 0.0  ;;  %vm17171_vm9 = vmmov %vm17142_vm0 }
 0x542   : > { %v5353_v29 = vmax.f32 %v5321_v50, 0.0  ;;  %v5384_v11 = vsel %vm14132_vm15, %v5352_v36, 0.0  ;;  %v6502_v42 = vor.u32 %v17151_v41, %v15226_v32  ;;  %vm17154_vm15 = vmmov %vm17142_vm0 }
 0x543   : > { %v5387_v1 = vsel %vm14162_vm8, %v5355_v19, 0.0 }
 0x544   : > { %v15252_v27 = vpack.c.bf16 %v5387_v1, %v5386_v13  ;;  %v5385_v50 = vsel %vm14224_vm4, %v5353_v29, 0.0  ;;  %v10459_v17 = vpop.f32.mrb[92].mxu0  ;;  %v17153_v13 = vshrl.u32 %v15128_v20, 16  ;;  %v15281_v56 = vpack.c.bf16 %v5353_v29, %v5352_v36 }
 0x545   : > { %v15259_v24 = vpack.c.bf16 %v5385_v50, %v5384_v11  ;;  %v15264_v26 = vadd.f32 %v10459_v17, %v15004_v47  ;;  %v5242_v33 = vpop.f32.mrb[93].mxu0  ;;  %v15273_v11 = vsel %vm17154_vm15, %v15185_v63, %v6502_v42  ;;  %v17158_v36 = vshrl.u32 %v15167_v37, 16  ;;  %vm17179_vm15 = vmmov %vm17142_vm0 }
 0x546   : > { %v5746_v1 = vrot.slane %v17153_v13, 7  ;;  %5421 = vst [vmem:[#allocation2 + $0x78] sm:$0xff] %v15252_v27  ;;  %v5324_v15 = vadd.f32 %v15004_v47, %v5242_v33  ;;  %v10460_v23 = vpop.f32.mrb[94].mxu0  ;;  %17156 = vst [vmem:[#allocation59_spill] sm:$0xff] %v15281_v56  ;;  %11798 = vmatmul.mubr.msk.bf16.gmra.mrb[88].mxu1 %vm14315_vm1, %v15281_v56  ;;  %v17159_v13 = vshrl.u32 %v15161_v59, 16  ;;  %v17162_v63 = vshrl.u32 %v15201_v49, 16 }
 0x547   : > { %17152 = vst [vmem:[#allocation53_spill] sm:$0xff] %v15264_v26  ;;  %5420 = vst [vmem:[#allocation2 + $0x70] sm:$0xff] %v15259_v24  ;;  %v15278_v50 = vadd.f32 %v10460_v23, %v15004_v47  ;;  %v5245_v45 = vpop.f32.mrb[95].mxu0  ;;  %v15290_v23 = vpack.c.bf16 %v5355_v19, %v5354_v7  ;;  %v5762_v29 = vrot.slane %v17158_v36, 7  ;;  %v17163_v14 = vshrl.u32 %v15259_v24, 16 }
 0x548   : > { %v5356_v41 = vmax.f32 %v5324_v15, 0.0  ;;  %v5325_v17 = vadd.f32 %v15004_v47, %v5245_v45  ;;  %v5770_v52 = vrot.slane %v17159_v13, 7  ;;  %v17160_v15 = vshrl.u32 %v15208_v22, 16 }
 0x549   : > { %17155 = vst [vmem:[#allocation28_spill] sm:$0xff] %v15278_v50  ;;  %17157 = vst [vmem:[#allocation61_spill] sm:$0xff] %v15290_v23  ;;  %11801 = vmatprep.mubr.msk.bf16.mxu1 %vm14340_vm5, %v15290_v23  ;;  %v16238_v33 = vmax.f32 %v15278_v50, 0.0  ;;  %v17161_v45 = vmax.f32 %v15264_v26, 0.0  ;;  %v17164_v23 = vld [vmem:[#allocation45_spill] sm:$0xff] }
 0x54a   : > { %v5357_v42 = vmax.f32 %v5325_v17, 0.0  ;;  %v5778_v47 = vrot.slane %v17160_v15, 7  ;;  %v5786_v17 = vrot.slane %v17162_v63, 7  ;;  %v5794_v15 = vrot.slane %v17163_v14, 7  ;;  %v17166_v26 = vld [vmem:[#allocation49_spill] sm:$0xff] }
 0x54b   : > { %v5390_v36 = vsel %vm16939_vm10, %v17161_v45, 0.0  ;;  %v5391_v13 = vsel %vm14331_vm3, %v16238_v33, 0.0  ;;  %vm17165_vm8 = vnez %v17164_v23  ;;  %vm17167_vm4 = vnez %v17166_v26 }
 0x54c   : > { %v5388_v7 = vsel %vm17165_vm8, %v5356_v41, 0.0  ;;  %v15319_v19 = vpack.c.bf16 %v5391_v13, %v5390_v36  ;;  %v5389_v62 = vsel %vm17167_vm4, %v5357_v42, 0.0  ;;  %v17168_v45 = vshll.u32 %v15128_v20, 16  ;;  %vm17182_vm8 = vmmov %vm17142_vm0 }
 0x54d   : > { %v15325_v56 = vpack.c.bf16 %v5389_v62, %v5388_v7  ;;  %v17169_v63 = vshrl.u32 %v15252_v27, 16  ;;  %v17170_v14 = vshll.u32 %v15122_v39, 16  ;;  %v17172_v36 = vshll.u32 %v15167_v37, 16  ;;  %vm17184_vm4 = vmmov %vm17142_vm0 }
 0x54e   : > { %v6505_v50 = vor.u32 %v17168_v45, %v5746_v1  ;;  %5423 = vst [vmem:[#allocation2 + $0x88] sm:$0xff] %v15319_v19  ;;  %v17173_v62 = vshll.u32 %v15161_v59, 16  ;;  %v17174_v45 = vshll.u32 %v15208_v22, 16 }
 0x54f   : > { %v5802_v16 = vrot.slane %v17169_v63, 7  ;;  %v6508_v23 = vor.u32 %v17170_v14, %v15244_v38  ;;  %v6511_v13 = vor.u32 %v17172_v36, %v5762_v29  ;;  %5422 = vst [vmem:[#allocation2 + $0x80] sm:$0xff] %v15325_v56  ;;  %v15346_v14 = vpack.c.bf16 %v5357_v42, %v5356_v41 }
 0x550   : > { %v15336_v26 = vsel %vm17171_vm9, %v15226_v32, %v6505_v50  ;;  %v6514_v7 = vor.u32 %v17173_v62, %v5770_v52  ;;  %v6517_v33 = vor.u32 %v17174_v45, %v5778_v47  ;;  %v17177_v36 = vshll.u32 %v15201_v49, 16  ;;  %vm17185_vm9 = vmmov %vm17142_vm0 }
 0x551   : > { %11804 = vmatmul.mubr.msk.bf16.gmra.mrb[92].mxu1 %vm17175_vm13, %v15346_v14  ;;  %v15353_v50 = vsel %vm17176_vm11, %v5746_v1, %v6508_v23  ;;  %v15360_v45 = vsel %vm17142_vm0, %v15244_v38, %v6511_v13  ;;  %v17180_v63 = vshll.u32 %v15259_v24, 16  ;;  %v17181_v1 = vshrl.u32 %v15325_v56, 16  ;;  %vm17186_vm11 = vmmov %vm17142_vm0 }
 0x552   : > { %v6520_v62 = vor.u32 %v17177_v36, %v5786_v17  ;;  %10525 = vmatprep.mubr.bf16.mxu1 %v15236_v9  ;;  %v15363_v41 = vsel %vm17178_vm14, %v5762_v29, %v6514_v7  ;;  %v15366_v42 = vsel %vm17179_vm15, %v5770_v52, %v6517_v33  ;;  %v17183_v9 = vshll.u32 %v15252_v27, 16  ;;  %v11632_v7 = vld [vmem:[#allocation10 + $0x88] sm:$0xff]  }
 0x553   : > { %v6523_v32 = vor.u32 %v17180_v63, %v5794_v15  ;;  %v15372_v23 = vrot.slane %v17181_v1, 7  ;;  %v16240_v13 = vshll.u32 %v15325_v56, 16  ;;  %v15405_v1 = vld [vmem:[#allocation2 + $0x20] sm:$0xff]  ;;  %vm17195_vm14 = vsmask.f32 7424 }
 0x554   : > { %v15375_v36 = vsel %vm17182_vm8, %v5778_v47, %v6520_v62  ;;  %v6526_v38 = vor.u32 %v17183_v9, %v5802_v16  ;;  %v5702_v47 = vsel %vm17186_vm11, %v14959_v10, %v15055_v8  ;;  %v11635_v10 = vld [vmem:[#allocation10 + $0xa0] sm:$0xff]   ;;  %17189 = vst [vmem:[#allocation54_spill] sm:$0xff] %v15405_v1  ;;  %v11638_v9 = vld [vmem:[#allocation10 + $0xb8] sm:$0xff]   ;;  %vm17197_vm15 = vmmov %vm17195_vm14 }
 0x555   : > { %v15381_v29 = vsel %vm17184_vm4, %v5786_v17, %v6523_v32  ;;  %v6529_v33 = vor.u32 %v16240_v13, %v15372_v23  ;;  %v11633_v17 = vld [vmem:[#allocation10 + $0x90] sm:$0xff]   ;;  %v15403_v62 = vld [vmem:[#allocation2 + $0x88] sm:$0xff]  ;;  %vm17200_vm8 = vmmov %vm17195_vm14 }
 0x556   : > { %v15384_v52 = vsel %vm17185_vm9, %v5794_v15, %v6526_v38  ;;  %v11634_v15 = vld [vmem:[#allocation10 + $0x98] sm:$0xff]   ;;  %v15401_v32 = vld [vmem:[#allocation2 + $0x18] sm:$0xff]  ;;  %17188 = vst [vmem:[#allocation51_spill] sm:$0xff] %v15403_v62  ;;  %v16245_v13 = vshrl.u32 %v15403_v62, 16  ;;  %vm17205_vm4 = vmmov %vm17200_vm8 }
 0x557   : > { %v15393_v63 = vsel %vm17142_vm0, %v5802_v16, %v6529_v33  ;;  %v11636_v16 = vld [vmem:[#allocation10 + $0xa8] sm:$0xff]   ;;  %17187 = vst [vmem:[#allocation57_spill] sm:$0xff] %v15401_v32  ;;  %v16241_v38 = vshll.u32 %v15401_v32, 16  ;;  %v16242_v33 = vshll.u32 %v15403_v62, 16  ;;  %vm17206_vm9 = vmmov %vm17205_vm4 }
 0x558   : > { %vm17211_vm11 = vmmov %vm17205_vm4 }
 0x559   : > { %10526 = vmatmul.mubr.bf16.vlgmr.msra.gmra.mrb[64].mxu1 %v5702_v47  ;;  %v11639_v47 = vld [vmem:[#allocation10 + $0xc0] sm:$0xff]   ;;  %vm17212_vm0 = vmmov %vm17205_vm4 }
 0x55a   : > { %10529 = vmatprep.mubr.bf16.mxu1 %v15097_v6  ;;  %10558 = vmatpush3.bf16.msra.mxu1 %v15151_v40  ;;  %v11637_v40 = vld [vmem:[#allocation10 + $0xb0] sm:$0xff]  }
 0x55b   : > { %10559 = vmatprep.subr.bf16.mxu1 %v11632_v7 }
 0x55e   : > { %10560 = vmatpush3.bf16.msra.mxu1 %v11632_v7  ;;  %v16244_v7 = vshll.u32 %v15405_v1, 16  ;;  %v11640_v1 = vld [vmem:[#allocation10 + $0xc8] sm:$0xff]  }
 0x55f   : > { %10561 = vmatprep.subr.bf16.mxu1 %v11633_v17 }
 0x561   : > { %10530 = vmatmul.mubr.bf16.gmra.mrb[68].mxu1 %v15134_v25 }
 0x562   : > { %10533 = vmatprep.mubr.bf16.mxu1 %v15174_v48  ;;  %10562 = vmatpush3.bf16.msra.mxu1 %v11633_v17  ;;  %v15414_v17 = vrot.slane %v16241_v38, 1  ;;  %v15431_v38 = vld [vmem:[#allocation2 + $0x8] sm:$0xff] }
 0x563   : > { %10563 = vmatprep.subr.bf16.mxu1 %v11634_v15  ;;  %17194 = vst [vmem:[#allocation62_spill] sm:$0xff] %v15431_v38 }
 0x564   : > { %17190 = vst [vmem:[#allocation58_spill] sm:$0xff] %v15414_v17 }
 0x566   : > { %10564 = vmatpush3.bf16.msra.mxu1 %v11634_v15  ;;  %v15418_v15 = vrot.slane %v16242_v33, 1  ;;  %v16247_v33 = vshll.u32 %v15431_v38, 16 }
 0x567   : > { %10565 = vmatprep.subr.bf16.mxu1 %v11635_v10 }
 0x568   : > { %17191 = vst [vmem:[#allocation55_spill] sm:$0xff] %v15418_v15 }
 0x569   : > { %10534 = vmatmul.mubr.bf16.gmra.mrb[72].mxu1 %v15214_v3 }
 0x56a   : > { %10537 = vmatprep.mubr.bf16.mxu1 %v15273_v11  ;;  %10566 = vmatpush3.bf16.msra.mxu1 %v11635_v10  ;;  %v16246_v10 = vshrl.u32 %v15401_v32, 16 }
 0x56b   : > { %10567 = vmatprep.subr.bf16.mxu1 %v11636_v16 }
 0x56c   : > { %v8108_v28 = vor.u32 %v16246_v10, %v15414_v17  ;;  %v16258_v10 = vshrl.u32 %v15431_v38, 16 }
 0x56e   : > { %10568 = vmatpush3.bf16.msra.mxu1 %v11636_v16  ;;  %v15423_v16 = vrot.slane %v16244_v7, 1 }
 0x56f   : > { %10569 = vmatprep.subr.bf16.mxu1 %v11637_v40 }
 0x570   : > { %17192 = vst [vmem:[#allocation56_spill] sm:$0xff] %v15423_v16  ;;  %v15440_v7 = vsel %vm17195_vm14, %v8108_v28, %v15423_v16  ;;  %v17203_v16 = vshll.u32 %v15057_v57, 16  ;;  %vm17217_vm14 = vmmov %vm17212_vm0 }
 0x571   : > { %10538 = vmatmul.mubr.bf16.gmra.mrb[76].mxu1 %v15336_v26  ;;  %17196 = vst [vmem:[#allocation75_spill] sm:$0xff] %v15440_v7 }
 0x572   : > { %10541 = vmatprep.mubr.bf16.mxu1 %v15353_v50  ;;  %10570 = vmatpush3.bf16.msra.mxu1 %v11637_v40  ;;  %v15429_v40 = vor.u32 %v16245_v13, %v15418_v15  ;;  %v17202_v15 = vshrl.u32 %v15020_v12, 16  ;;  %v6100_v38 = vrot.slane %v17203_v16, 1  ;;  %v17209_v16 = vshll.u32 %v15091_v18, 16 }
 0x573   : > { %10571 = vmatprep.subr.bf16.mxu1 %v11638_v9 }
 0x574   : > { %17193 = vst [vmem:[#allocation60_spill] sm:$0xff] %v15429_v40 }
 0x576   : > { %10572 = vmatpush3.bf16.msra.mxu1 %v11638_v9  ;;  %v8224_v9 = vrot.slane %v16247_v33, 1  ;;  %v17199_v33 = vshll.u32 %v15020_v12, 16  ;;  %v11641_v12 = vld [vmem:[#allocation10 + $0xd0] sm:$0xff]  }
 0x577   : > { %10605 = vmatprep.subr.bf16.mxu1 %v11639_v47 }
 0x578   : > { %v15447_v13 = vsel %vm17197_vm15, %v15429_v40, %v8224_v9  ;;  %v15456_v28 = vor.u32 %v8224_v9, %v16258_v10  ;;  %v6084_v62 = vrot.slane %v17199_v33, 1  ;;  %v17201_v40 = vshll.u32 %v15016_v60, 16  ;;  %vm17218_vm15 = vmmov %vm17212_vm0 }
 0x579   : > { %10542 = vmatmul.mubr.bf16.gmra.mrb[80].mxu1 %v15360_v45  ;;  %17198 = vst [vmem:[#allocation68_spill] sm:$0xff] %v15447_v13  ;;  %v17204_v9 = vshrl.u32 %v15016_v60, 16  ;;  %v6116_v60 = vrot.slane %v17209_v16, 1 }
 0x57a   : > { %10545 = vmatprep.mubr.bf16.mxu1 %v15363_v41  ;;  %v6085_v13 = vsel %vm17200_vm8, %v15456_v28, %v6084_v62  ;;  %v6092_v32 = vrot.slane %v17201_v40, 1  ;;  %v6088_v7 = vor.u32 %v6084_v62, %v17202_v15  ;;  %v17208_v62 = vshrl.u32 %v15057_v57, 16  ;;  %vm17223_vm8 = vmmov %vm17212_vm0 }
 0x57c   : > { %v6096_v10 = vor.u32 %v6092_v32, %v17204_v9  ;;  %v6093_v33 = vsel %vm17205_vm4, %v6088_v7, %v6092_v32  ;;  %v6104_v15 = vor.u32 %v6100_v38, %v17208_v62  ;;  %v17210_v9 = vshrl.u32 %v15049_v4, 16  ;;  %v11642_v7 = vld [vmem:[#allocation10 + $0xd8] sm:$0xff]   ;;  %vm17224_vm4 = vmmov %vm17212_vm0 }
 0x57d   : > { %v17216_v62 = vshrl.u32 %v15085_v31, 16 }
 0x57e   : > { %v6101_v17 = vsel %vm17206_vm9, %v6096_v10, %v6100_v38  ;;  %v17213_v10 = vshll.u32 %v15085_v31, 16  ;;  %v11643_v38 = vld [vmem:[#allocation10 + $0xe0] sm:$0xff]   ;;  %v17221_v31 = vshll.u32 %v15167_v37, 16  ;;  %vm17229_vm9 = vmmov %vm17212_vm0 }
 0x580   : > { %v6124_v57 = vrot.slane %v17213_v10, 1 }
 0x581   : > { %10546 = vmatmul.mubr.bf16.gmra.mrb[84].mxu1 %v15366_v42 }
 0x582   : > { %10549 = vmatprep.mubr.bf16.mxu1 %v15375_v36 }
 0x589   : > { %10550 = vmatmul.mubr.bf16.gmra.mrb[88].mxu1 %v15381_v29 }
 0x58a   : > { %10553 = vmatprep.mubr.bf16.mxu1 %v15384_v52 }
 0x591   : > { %10554 = vmatmul.mubr.bf16.gmra.mrb[92].mxu1 %v15393_v63 }
 0x592   : > { %10573 = vmatprep.mubr.bf16.mxu1 %v6085_v13  ;;  %v17207_v13 = vshll.u32 %v15049_v4, 16  ;;  %v17215_v4 = vshll.u32 %v15128_v20, 16 }
 0x594   : > { %v6108_v40 = vrot.slane %v17207_v13, 1  ;;  %v6132_v13 = vrot.slane %v17215_v4, 1  ;;  %v11647_v4 = vld [vmem:[#allocation10 + $0x100] sm:$0xff]  }
 0x596   : > { %v6112_v32 = vor.u32 %v6108_v40, %v17210_v9  ;;  %v17219_v9 = vshll.u32 %v15122_v39, 16 }
 0x599   : > { %10574 = vmatmul.mubr.bf16.vlgmr.msra.gmra.mrb[64].mxu1 %v6093_v33  ;;  %v17214_v33 = vshrl.u32 %v15091_v18, 16  ;;  %v6140_v18 = vrot.slane %v17219_v9, 1 }
 0x59a   : > { %10577 = vmatprep.mubr.bf16.mxu1 %v6101_v17  ;;  %10606 = vmatpush3.bf16.msra.mxu1 %v11639_v47  ;;  %v6109_v17 = vsel %vm17211_vm11, %v6104_v15, %v6108_v40  ;;  %v6117_v47 = vsel %vm17212_vm0, %v6112_v32, %v6116_v60  ;;  %v6128_v40 = vor.u32 %v6124_v57, %v17216_v62  ;;  %v11644_v15 = vld [vmem:[#allocation10 + $0xe8] sm:$0xff]   ;;  %v17220_v32 = vshrl.u32 %v15128_v20, 16  ;;  %vm17230_vm11 = vmmov %vm17212_vm0 }
 0x59b   : > { %10607 = vmatprep.subr.bf16.mxu1 %v11640_v1 }
 0x59e   : > { %10608 = vmatpush3.bf16.msra.mxu1 %v11640_v1  ;;  %v6120_v1 = vor.u32 %v6116_v60, %v17214_v33  ;;  %v11645_v60 = vld [vmem:[#allocation10 + $0xf0] sm:$0xff]  }
 0x59f   : > { %10609 = vmatprep.subr.bf16.mxu1 %v11641_v12 }
 0x5a0   : > { %v6125_v16 = vsel %vm17217_vm14, %v6120_v1, %v6124_v57  ;;  %v11646_v57 = vld [vmem:[#allocation10 + $0xf8] sm:$0xff]   ;;  %v17225_v1 = vshll.u32 %v15161_v59, 16  ;;  %vm17235_vm14 = vmmov %vm17212_vm0 }
 0x5a1   : > { %10578 = vmatmul.mubr.bf16.gmra.mrb[68].mxu1 %v6109_v17  ;;  %v6148_v17 = vrot.slane %v17221_v31, 1 }
 0x5a2   : > { %10581 = vmatprep.mubr.bf16.mxu1 %v6117_v47  ;;  %10610 = vmatpush3.bf16.msra.mxu1 %v11641_v12  ;;  %v6133_v12 = vsel %vm17218_vm15, %v6128_v40, %v6132_v13  ;;  %v17222_v47 = vshrl.u32 %v15122_v39, 16  ;;  %v6156_v20 = vrot.slane %v17225_v1, 1  ;;  %v17227_v39 = vshll.u32 %v15208_v22, 16  ;;  %vm17240_vm15 = vmmov %vm17212_vm0 }
 0x5a3   : > { %10611 = vmatprep.subr.bf16.mxu1 %v11642_v7 }
 0x5a4   : > { %v6144_v10 = vor.u32 %v6140_v18, %v17222_v47  ;;  %v6164_v40 = vrot.slane %v17227_v39, 1 }
 0x5a6   : > { %10612 = vmatpush3.bf16.msra.mxu1 %v11642_v7  ;;  %v6136_v7 = vor.u32 %v6132_v13, %v17220_v32  ;;  %v17226_v13 = vshrl.u32 %v15167_v37, 16  ;;  %v17232_v37 = vshrl.u32 %v15208_v22, 16  ;;  %v17238_v22 = vshll.u32 %v15325_v56, 16 }
 0x5a7   : > { %10613 = vmatprep.subr.bf16.mxu1 %v11643_v38 }
 0x5a8   : > { %v6141_v33 = vsel %vm17223_vm8, %v6136_v7, %v6140_v18  ;;  %v6152_v62 = vor.u32 %v6148_v17, %v17226_v13  ;;  %v17231_v18 = vshll.u32 %v15201_v49, 16  ;;  %v6168_v32 = vor.u32 %v6164_v40, %v17232_v37  ;;  %v6056_v13 = vld [vmem:[#allocation2 + $0x88] sm:$0x1]  ;;  %vm17241_vm8 = vmmov %vm17212_vm0 }
 0x5a9   : > { %10582 = vmatmul.mubr.bf16.gmra.mrb[72].mxu1 %v6125_v16  ;;  %v17233_v7 = vshll.u32 %v15259_v24, 16 }
 0x5aa   : > { %10585 = vmatprep.mubr.bf16.mxu1 %v6133_v12  ;;  %10614 = vmatpush3.bf16.msra.mxu1 %v11643_v38  ;;  %v6149_v38 = vsel %vm17224_vm4, %v6144_v10, %v6148_v17  ;;  %v6157_v12 = vsel %vm17229_vm9, %v6152_v62, %v6156_v20  ;;  %v17234_v17 = vshrl.u32 %v15201_v49, 16  ;;  %v6463_v62 = vld [vmem:[#allocation2 + $0x8] sm:$0x80]  ;;  %v17239_v49 = vshrl.u32 %v15252_v27, 16  ;;  %vm17243_vm4 = vmmov %vm17212_vm0 }
 0x5ab   : > { %10615 = vmatprep.subr.bf16.mxu1 %v11644_v15  ;;  %v6180_v31 = vrot.slane %v17233_v7, 1  ;;  %vm17244_vm9 = vsmask.f32 256  ;;  %v11649_v7 = vld [vmem:[#allocation10 + $0x110] sm:$0xff]  }
 0x5ae   : > { %10616 = vmatpush3.bf16.msra.mxu1 %v11644_v15  ;;  %v17228_v15 = vshrl.u32 %v15161_v59, 16 }
 0x5af   : > { %10617 = vmatprep.subr.bf16.mxu1 %v11645_v60 }
 0x5b0   : > { %v6160_v16 = vor.u32 %v6156_v20, %v17228_v15  ;;  %v6196_v20 = vrot.slane %v17238_v22, 1  ;;  %v6202_v15 = vshll.u32 %v6056_v13, 16 }
 0x5b1   : > { %10586 = vmatmul.mubr.bf16.gmra.mrb[76].mxu1 %v6141_v33 }
 0x5b2   : > { %10589 = vmatprep.mubr.bf16.mxu1 %v6149_v38  ;;  %10618 = vmatpush3.bf16.msra.mxu1 %v11645_v60  ;;  %v6165_v9 = vsel %vm17230_vm11, %v6160_v16, %v6164_v40  ;;  %v6172_v60 = vrot.slane %v17231_v18, 1  ;;  %v17237_v38 = vshrl.u32 %v15259_v24, 16  ;;  %v17242_v24 = vshrl.u32 %v15325_v56, 16  ;;  %v11651_v56 = vld [vmem:[#allocation10 + $0x120] sm:$0xff]   ;;  %vm17245_vm11 = vmmov %vm17244_vm9 }
 0x5b3   : > { %10619 = vmatprep.subr.bf16.mxu1 %v11646_v57 }
 0x5b4   : > { %v6176_v59 = vor.u32 %v6172_v60, %v17234_v17  ;;  %v6173_v47 = vsel %vm17212_vm0, %v6168_v32, %v6172_v60  ;;  %v6184_v1 = vor.u32 %v6180_v31, %v17237_v38  ;;  %v6200_v60 = vor.u32 %v6196_v20, %v17242_v24  ;;  %v11648_v32 = vld [vmem:[#allocation10 + $0x108] sm:$0xff]   ;;  %v17278_v24 = vld [vmem:[#allocation75_spill] sm:$0xff] }
 0x5b5   : > { %vm17246_vm0 = vnez %v17081_v35  ;;  %v11660_v35 = vld [vmem:[#allocation10 + $0x168] sm:$0xff]  }
 0x5b6   : > { %10620 = vmatpush3.bf16.msra.mxu1 %v11646_v57  ;;  %v6181_v10 = vsel %vm17235_vm14, %v6176_v59, %v6180_v31  ;;  %v17236_v57 = vshll.u32 %v15252_v27, 16  ;;  %v11650_v31 = vld [vmem:[#allocation10 + $0x118] sm:$0xff]   ;;  %vm17247_vm14 = vnez %v17083_v5 }
 0x5b7   : > { %10653 = vmatprep.subr.bf16.mxu1 %v11647_v4  ;;  %v11662_v5 = vld [vmem:[#allocation10 + $0x178] sm:$0xff]  }
 0x5b8   : > { %v6188_v33 = vrot.slane %v17236_v57, 1  ;;  %v15601_v59 = vld [vmem:[#allocation2 + $0x28] sm:$0xff] }
 0x5b9   : > { %10590 = vmatmul.mubr.bf16.gmra.mrb[80].mxu1 %v6157_v12  ;;  %v6483_v12 = vshrl.u32 %v6463_v62, 16  ;;  %v17269_v57 = vld [vmem:[#allocation28_spill] sm:$0xff]  ;;  %v17276_v62 = vld [vmem:[#allocation54_spill] sm:$0xff] }
 0x5ba   : > { %10593 = vmatprep.mubr.bf16.mxu1 %v6165_v9  ;;  %v6192_v39 = vor.u32 %v6188_v33, %v17239_v49  ;;  %v6189_v40 = vsel %vm17240_vm15, %v6184_v1, %v6188_v33  ;;  %v6204_v9 = vrot.slane %v6202_v15, 1  ;;  %vm17248_vm15 = vnez %v17093_v44  ;;  %v11671_v1 = vld [vmem:[#allocation10 + $0x1c0] sm:$0xff]  }
 0x5bb   : > { %v6485_v18 = vrot.slane %v6483_v12, 7  ;;  %v17270_v33 = vmax.f32 %v17269_v57, 0.0  ;;  %v7108_v49 = vshrl.u32 %v17276_v62, 16  ;;  %v15705_v57 = vld [vmem:[#allocation2 + $0x70] sm:$0xff] }
 0x5bc   : > { %v6197_v16 = vsel %vm17241_vm8, %v6192_v39, %v6196_v20  ;;  %v6205_v37 = vsel %vm17243_vm4, %v6200_v60, %v6204_v9  ;;  %vm17249_vm8 = vnez %v17095_v51  ;;  %vm17250_vm4 = vnez %v17106_v53  ;;  %v17256_v51 = vld [vmem:[#allocation52_spill] sm:$0xff]  ;;  %v17258_v53 = vld [vmem:[#allocation21_spill] sm:$0xff]  ;;  %v17274_v20 = vld [vmem:[#allocation58_spill] sm:$0xff] }
 0x5bd   : > { %v6488_v27 = vsel %vm17244_vm9, %v6485_v18, %v15055_v8  ;;  %v11652_v8 = vld [vmem:[#allocation10 + $0x128] sm:$0xff]   ;;  %vm17251_vm9 = vnez %v17108_v58  ;;  %v17260_v58 = vld [vmem:[#allocation63_spill] sm:$0xff]  ;;  %v7112_v39 = vshll.u32 %v15601_v59, 16 }
 0x5be   : > { %v11664_v9 = vld [vmem:[#allocation10 + $0x188] sm:$0xff]  }
 0x5bf   : > { %v7114_v12 = vrot.slane %v7112_v39, 1  ;;  %v15624_v18 = vld [vmem:[#allocation2 + $0x38] sm:$0xff] }
 0x5c1   : > { %10594 = vmatmul.mubr.bf16.gmra.mrb[84].mxu1 %v6173_v47  ;;  %v17267_v47 = vld [vmem:[#allocation53_spill] sm:$0xff] }
 0x5c2   : > { %10597 = vmatprep.mubr.bf16.mxu1 %v6181_v10  ;;  %v17268_v10 = vmax.f32 %v17267_v47, 0.0 }
 0x5c4   : > { %v11851_v38 = vpack.c.bf16 %v17270_v33, %v17268_v10 }
 0x5c9   : > { %10598 = vmatmul.mubr.bf16.gmra.mrb[88].mxu1 %v6189_v40  ;;  %v17277_v40 = vld [vmem:[#allocation56_spill] sm:$0xff] }
 0x5ca   : > { %10601 = vmatprep.mubr.bf16.mxu1 %v6197_v16  ;;  %v7110_v15 = vor.u32 %v7108_v49, %v17277_v40 }
 0x5d1   : > { %10602 = vmatmul.mubr.bf16.gmra.mrb[92].mxu1 %v6205_v37 }
 0x5d2   : > { %10621 = vmatprep.mubr.bf16.mxu1 %v6488_v27  ;;  %v15633_v27 = vld [vmem:[#allocation2 + $0x40] sm:$0xff] }
 0x5d9   : > { %10622 = vmatmul.mubr.bf16.vlgmr.msra.gmra.mrb[64].mxu1 %v15097_v6  ;;  %v11653_v6 = vld [vmem:[#allocation10 + $0x130] sm:$0xff]  }
 0x5da   : > { %10625 = vmatprep.mubr.bf16.mxu1 %v15134_v25  ;;  %10654 = vmatpush3.bf16.msra.mxu1 %v11647_v4  ;;  %v11654_v25 = vld [vmem:[#allocation10 + $0x138] sm:$0xff]  }
 0x5db   : > { %10655 = vmatprep.subr.bf16.mxu1 %v11648_v32 }
 0x5de   : > { %10656 = vmatpush3.bf16.msra.mxu1 %v11648_v32 }
 0x5df   : > { %10657 = vmatprep.subr.bf16.mxu1 %v11649_v7 }
 0x5e1   : > { %10626 = vmatmul.mubr.bf16.gmra.mrb[68].mxu1 %v15174_v48  ;;  %v11655_v48 = vld [vmem:[#allocation10 + $0x140] sm:$0xff]  }
 0x5e2   : > { %10629 = vmatprep.mubr.bf16.mxu1 %v15214_v3  ;;  %10658 = vmatpush3.bf16.msra.mxu1 %v11649_v7  ;;  %v6532_v3 = vshrl.u32 %v15319_v19, 16  ;;  %v7128_v7 = vshll.u32 %v15624_v18, 16 }
 0x5e3   : > { %10659 = vmatprep.subr.bf16.mxu1 %v11650_v31 }
 0x5e6   : > { %10660 = vmatpush3.bf16.msra.mxu1 %v11650_v31  ;;  %v11665_v31 = vld [vmem:[#allocation10 + $0x190] sm:$0xff]  }
 0x5e7   : > { %10661 = vmatprep.subr.bf16.mxu1 %v11651_v56 }
 0x5e9   : > { %10630 = vmatmul.mubr.bf16.gmra.mrb[72].mxu1 %v15273_v11  ;;  %v6534_v11 = vrot.slane %v6532_v3, 7  ;;  %v11666_v3 = vld [vmem:[#allocation10 + $0x198] sm:$0xff]  }
 0x5ea   : > { %10633 = vmatprep.mubr.bf16.mxu1 %v15336_v26  ;;  %10662 = vmatpush3.bf16.msra.mxu1 %v11651_v56  ;;  %v6535_v26 = vshll.u32 %v15319_v19, 16  ;;  %v11657_v19 = vld [vmem:[#allocation10 + $0x150] sm:$0xff]   ;;  %v7116_v56 = vshrl.u32 %v15601_v59, 16 }
 0x5eb   : > { %10663 = vmatprep.subr.bf16.mxu1 %v11652_v8 }
 0x5ee   : > { %10664 = vmatpush3.bf16.msra.mxu1 %v11652_v8 }
 0x5ef   : > { %10665 = vmatprep.subr.bf16.mxu1 %v11653_v6 }
 0x5f1   : > { %10634 = vmatmul.mubr.bf16.gmra.mrb[76].mxu1 %v15353_v50  ;;  %v6537_v50 = vor.u32 %v6535_v26, %v6534_v11  ;;  %v15648_v26 = vld [vmem:[#allocation2 + $0x48] sm:$0xff] }
 0x5f2   : > { %10637 = vmatprep.mubr.bf16.mxu1 %v15360_v45  ;;  %10666 = vmatpush3.bf16.msra.mxu1 %v11653_v6  ;;  %v7136_v6 = vshll.u32 %v15633_v27, 16 }
 0x5f3   : > { %10667 = vmatprep.subr.bf16.mxu1 %v11654_v25  ;;  %v6538_v45 = vsel %vm17245_vm11, %v15372_v23, %v6537_v50  ;;  %vm17252_vm11 = vnez %v17119_v2  ;;  %v17262_v2 = vld [vmem:[#allocation59_spill] sm:$0xff] }
 0x5f6   : > { %10668 = vmatpush3.bf16.msra.mxu1 %v11654_v25  ;;  %v7118_v25 = vor.u32 %v7116_v56, %v7114_v12 }
 0x5f7   : > { %10701 = vmatprep.subr.bf16.mxu1 %v11655_v48 }
 0x5f9   : > { %10638 = vmatmul.mubr.bf16.gmra.mrb[80].mxu1 %v15363_v41  ;;  %v11656_v41 = vld [vmem:[#allocation10 + $0x148] sm:$0xff]  }
 0x5fa   : > { %10641 = vmatprep.mubr.bf16.mxu1 %v15366_v42  ;;  %v11658_v42 = vld [vmem:[#allocation10 + $0x158] sm:$0xff]  }
 0x601   : > { %10642 = vmatmul.mubr.bf16.gmra.mrb[84].mxu1 %v15375_v36  ;;  %v17264_v36 = vld [vmem:[#allocation61_spill] sm:$0xff] }
 0x602   : > { %10645 = vmatprep.mubr.bf16.mxu1 %v15381_v29 }
 0x609   : > { %10646 = vmatmul.mubr.bf16.gmra.mrb[88].mxu1 %v15384_v52 }
 0x60a   : > { %10649 = vmatprep.mubr.bf16.mxu1 %v15393_v63  ;;  %v11670_v63 = vld [vmem:[#allocation10 + $0x1b8] sm:$0xff]  }
 0x611   : > { %10650 = vmatmul.mubr.bf16.gmra.mrb[92].mxu1 %v6538_v45  ;;  %v7138_v45 = vrot.slane %v7136_v6, 1 }
 0x612   : > { %11807 = vmatprep.mubr.msk.bf16.mxu1 %vm17246_vm0, %v15027_v55  ;;  %v11659_v55 = vld [vmem:[#allocation10 + $0x160] sm:$0xff]   ;;  %vm17253_vm0 = vnez %v17121_v61 }
 0x613   : > { %v7054_v61 = vld [vmem:[#allocation2 + $0x10] sm:$0xff] }
 0x614   : > { %v7091_v23 = vshll.u32 %v7054_v61, 16  ;;  %v7089_v4 = vshrl.u32 %v7054_v61, 16  ;;  %v7148_v61 = vshrl.u32 %v15648_v26, 16 }
 0x616   : > { %v7093_v52 = vrot.slane %v7091_v23, 1 }
 0x618   : > { %v7094_v17 = vor.u32 %v7093_v52, %v7089_v4 }
 0x619   : > { %11810 = vmatmul.mubr.msk.bf16.vlgmr.msra.gmra.mrb[64].mxu1 %vm17247_vm14, %v15034_v46  ;;  %v11661_v46 = vld [vmem:[#allocation10 + $0x170] sm:$0xff]  }
 0x61a   : > { %11813 = vmatprep.mubr.msk.bf16.mxu1 %vm17248_vm15, %v15064_v54  ;;  %10702 = vmatpush3.bf16.msra.mxu1 %v11655_v48  ;;  %v17254_v54 = vld [vmem:[#allocation27_spill] sm:$0xff]  ;;  %v7130_v48 = vrot.slane %v7128_v7, 1 }
 0x61b   : > { %10703 = vmatprep.subr.bf16.mxu1 %v11656_v41 }
 0x61e   : > { %10704 = vmatpush3.bf16.msra.mxu1 %v11656_v41  ;;  %v15657_v41 = vld [vmem:[#allocation2 + $0x50] sm:$0xff] }
 0x61f   : > { %10705 = vmatprep.subr.bf16.mxu1 %v11657_v19 }
 0x621   : > { %11816 = vmatmul.mubr.msk.bf16.gmra.mrb[68].mxu1 %vm17249_vm8, %v15072_v34  ;;  %v11663_v34 = vld [vmem:[#allocation10 + $0x180] sm:$0xff]  }
 0x622   : > { %11819 = vmatprep.mubr.msk.bf16.mxu1 %vm17250_vm4, %v15101_v30  ;;  %10706 = vmatpush3.bf16.msra.mxu1 %v11657_v19  ;;  %v7140_v19 = vshrl.u32 %v15633_v27, 16  ;;  %v15672_v30 = vld [vmem:[#allocation2 + $0x58] sm:$0xff] }
 0x623   : > { %10707 = vmatprep.subr.bf16.mxu1 %v11658_v42  ;;  %v7164_v22 = vshrl.u32 %v15672_v30, 16 }
 0x626   : > { %10708 = vmatpush3.bf16.msra.mxu1 %v11658_v42  ;;  %v7144_v42 = vshll.u32 %v15648_v26, 16 }
 0x627   : > { %10709 = vmatprep.subr.bf16.mxu1 %v11659_v55 }
 0x628   : > { %v7146_v44 = vrot.slane %v7144_v42, 1 }
 0x629   : > { %11822 = vmatmul.mubr.msk.bf16.gmra.mrb[72].mxu1 %vm17251_vm9, %v15109_v0 }
 0x62a   : > { %11825 = vmatprep.mubr.msk.bf16.mxu1 %vm17252_vm11, %v15138_v21  ;;  %10710 = vmatpush3.bf16.msra.mxu1 %v11659_v55  ;;  %v11667_v55 = vld [vmem:[#allocation10 + $0x1a0] sm:$0xff]   ;;  %v7156_v21 = vshrl.u32 %v15657_v41, 16  ;;  %v7150_v29 = vor.u32 %v7148_v61, %v7146_v44 }
 0x62b   : > { %10711 = vmatprep.subr.bf16.mxu1 %v11660_v35 }
 0x62e   : > { %10712 = vmatpush3.bf16.msra.mxu1 %v11660_v35  ;;  %v7132_v35 = vshrl.u32 %v15624_v18, 16 }
 0x62f   : > { %10713 = vmatprep.subr.bf16.mxu1 %v11661_v46 }
 0x631   : > { %11828 = vmatmul.mubr.msk.bf16.gmra.mrb[76].mxu1 %vm17253_vm0, %v15146_v43  ;;  %v11669_v43 = vld [vmem:[#allocation10 + $0x1b0] sm:$0xff]  }
 0x632   : > { %11831 = vmatprep.mubr.msk.bf16.mxu1 %vm17022_vm6, %v17254_v54  ;;  %10714 = vmatpush3.bf16.msra.mxu1 %v11661_v46  ;;  %v7142_v46 = vor.u32 %v7140_v19, %v7138_v45  ;;  %v7134_v54 = vor.u32 %v7132_v35, %v7130_v48 }
 0x633   : > { %10715 = vmatprep.subr.bf16.mxu1 %v11662_v5 }
 0x636   : > { %10716 = vmatpush3.bf16.msra.mxu1 %v11662_v5  ;;  %v7152_v5 = vshll.u32 %v15657_v41, 16 }
 0x637   : > { %10749 = vmatprep.subr.bf16.mxu1 %v11663_v34 }
 0x638   : > { %v7154_v0 = vrot.slane %v7152_v5, 1 }
 0x639   : > { %11834 = vmatmul.mubr.msk.bf16.gmra.mrb[80].mxu1 %vm17023_vm7, %v17256_v51 }
 0x63a   : > { %11837 = vmatprep.mubr.msk.bf16.mxu1 %vm17024_vm12, %v17258_v53  ;;  %v7158_v23 = vor.u32 %v7156_v21, %v7154_v0 }
 0x641   : > { %11840 = vmatmul.mubr.msk.bf16.gmra.mrb[84].mxu1 %vm17025_vm2, %v17260_v58  ;;  %v15681_v58 = vld [vmem:[#allocation2 + $0x60] sm:$0xff] }
 0x642   : > { %11843 = vmatprep.mubr.msk.bf16.mxu1 %vm14315_vm1, %v17262_v2  ;;  %vm17273_vm1 = vmpackc.low %vm14331_vm3, %vm16939_vm10  ;;  %v7160_v2 = vshll.u32 %v15672_v30, 16  ;;  %v7172_v33 = vshrl.u32 %v15681_v58, 16 }
 0x644   : > { %v7162_v52 = vrot.slane %v7160_v2, 1 }
 0x646   : > { %v7166_v40 = vor.u32 %v7164_v22, %v7162_v52 }
 0x649   : > { %11846 = vmatmul.mubr.msk.bf16.gmra.mrb[88].mxu1 %vm14340_vm5, %v17264_v36  ;;  %vm17275_vm5 = vsmask.f32 7424  ;;  %v7168_v36 = vshll.u32 %v15681_v58, 16 }
 0x64a   : > { %11849 = vmatprep.mubr.msk.bf16.mxu1 %vm17175_vm13, %v15346_v14  ;;  %v7099_v13 = vsel %vm17275_vm5, %v7094_v17, %v17274_v20  ;;  %v15614_v14 = vld [vmem:[#allocation2 + $0x30] sm:$0xff]  ;;  %vm17279_vm3 = vmmov %vm17275_vm5  ;;  %v15696_v17 = vld [vmem:[#allocation2 + $0x68] sm:$0xff] }
 0x64b   : > { %v7120_v16 = vshll.u32 %v15614_v14, 16  ;;  %v15628_v60 = vsel %vm17279_vm3, %v7110_v15, %v7114_v12  ;;  %v7124_v32 = vshrl.u32 %v15614_v14, 16  ;;  %vm17280_vm10 = vmmov %vm17279_vm3  ;;  %v7170_v10 = vrot.slane %v7168_v36, 1 }
 0x64c   : > { %vm17281_vm6 = vmmov %vm17279_vm3 }
 0x64d   : > { %v7122_v37 = vrot.slane %v7120_v16, 1  ;;  %vm17282_vm7 = vmmov %vm17279_vm3  ;;  %v7174_v20 = vor.u32 %v7172_v33, %v7170_v10 }
 0x64e   : > { %v15670_v51 = vsel %vm17282_vm7, %v7134_v54, %v7138_v45  ;;  %vm17283_vm12 = vmmov %vm17279_vm3 }
 0x64f   : > { %v7126_v8 = vor.u32 %v7124_v32, %v7122_v37  ;;  %v15646_v11 = vsel %vm17280_vm10, %v7118_v25, %v7122_v37  ;;  %v15676_v53 = vsel %vm17283_vm12, %v7142_v46, %v7146_v44  ;;  %vm17284_vm2 = vmmov %vm17279_vm3  ;;  %v7188_v25 = vshrl.u32 %v15705_v57, 16 }
 0x650   : > { %v15694_v4 = vsel %vm17284_vm2, %v7150_v29, %v7154_v0  ;;  %vm17285_vm13 = vmmov %vm17284_vm2 }
 0x651   : > { %11852 = vmatmul.mubr.msk.bf16.gmra.mrb[92].mxu1 %vm17273_vm1, %v11851_v38  ;;  %v15652_v50 = vsel %vm17281_vm6, %v7126_v8, %v7130_v48  ;;  %v15700_v47 = vsel %vm17285_vm13, %v7158_v23, %v7162_v52  ;;  %v7176_v38 = vshll.u32 %v15696_v17, 16  ;;  %vm17286_vm14 = vmmov %vm17284_vm2  ;;  %v15729_v8 = vld [vmem:[#allocation2 + $0x80] sm:$0xff]  ;;  %v7070_v52 = vld [vmem:[#allocation2 + $0x90] sm:$0x1]  ;;  %vm17298_vm1 = vsmask.f32 256 }
 0x652   : > { %10717 = vmatprep.mubr.bf16.mxu1 %v7099_v13  ;;  %v16265_v13 = vshll.u32 %v15705_v57, 16  ;;  %v15718_v12 = vsel %vm17286_vm14, %v7166_v40, %v7170_v10  ;;  %vm17287_vm15 = vmmov %vm17284_vm2  ;;  %v7477_v10 = vld [vmem:[#allocation2 + $0x10] sm:$0x80]  ;;  %v7216_v40 = vshll.u32 %v7070_v52, 16  ;;  %v17296_v52 = vld [vmem:[#allocation60_spill] sm:$0xff] }
 0x653   : > { %v7178_v15 = vrot.slane %v7176_v38, 1  ;;  %vm17288_vm8 = vmmov %vm17284_vm2 }
 0x654   : > { %vm17289_vm4 = vmmov %vm17284_vm2 }
 0x655   : > { %v15724_v37 = vsel %vm17287_vm15, %v7174_v20, %v7178_v15  ;;  %vm17290_vm9 = vmmov %vm17284_vm2 }
 0x656   : > { %vm17292_vm11 = vmmov %vm17284_vm2 }
 0x657   : > { %vm17297_vm0 = vmmov %vm17284_vm2 }
 0x658   : > { %vm17300_vm5 = vmmov %vm17298_vm1 }
 0x659   : > { %10718 = vmatmul.mubr.bf16.vlgmr.msra.gmra.mrb[64].mxu1 %v17278_v24  ;;  %vm17301_vm3 = vmmov %vm17298_vm1 }
 0x65a   : > { %10721 = vmatprep.mubr.bf16.mxu1 %v15628_v60  ;;  %10750 = vmatpush3.bf16.msra.mxu1 %v11663_v34  ;;  %v11668_v34 = vld [vmem:[#allocation10 + $0x1a8] sm:$0xff]   ;;  %vm17302_vm10 = vmmov %vm17298_vm1 }
 0x65b   : > { %10751 = vmatprep.subr.bf16.mxu1 %v11664_v9  ;;  %vm17303_vm6 = vmmov %vm17298_vm1 }
 0x65c   : > { %vm17304_vm7 = vmmov %vm17298_vm1 }
 0x65d   : > { %vm17305_vm12 = vmmov %vm17298_vm1 }
 0x65e   : > { %10752 = vmatpush3.bf16.msra.mxu1 %v11664_v9  ;;  %v15720_v9 = vld [vmem:[#allocation2 + $0x78] sm:$0xff]  ;;  %vm17306_vm2 = vmmov %vm17298_vm1 }
 0x65f   : > { %10753 = vmatprep.subr.bf16.mxu1 %v11665_v31  ;;  %v16263_v48 = vshll.u32 %v15720_v9, 16  ;;  %v16266_v23 = vshrl.u32 %v15720_v9, 16  ;;  %vm17307_vm13 = vmmov %vm17298_vm1 }
 0x660   : > { %vm17308_vm14 = vmmov %vm17298_vm1 }
 0x661   : > { %10722 = vmatmul.mubr.bf16.gmra.mrb[68].mxu1 %v15646_v11  ;;  %v7194_v54 = vrot.slane %v16263_v48, 1  ;;  %vm17309_vm15 = vmmov %vm17298_vm1 }
 0x662   : > { %10725 = vmatprep.mubr.bf16.mxu1 %v15652_v50  ;;  %10754 = vmatpush3.bf16.msra.mxu1 %v11665_v31  ;;  %v7186_v31 = vrot.slane %v16265_v13, 1 }
 0x663   : > { %10755 = vmatprep.subr.bf16.mxu1 %v11666_v3 }
 0x664   : > { %v7190_v45 = vor.u32 %v7188_v25, %v7186_v31 }
 0x666   : > { %10756 = vmatpush3.bf16.msra.mxu1 %v11666_v3  ;;  %v7180_v3 = vshrl.u32 %v15696_v17, 16 }
 0x667   : > { %10757 = vmatprep.subr.bf16.mxu1 %v11667_v55 }
 0x668   : > { %v7182_v46 = vor.u32 %v7180_v3, %v7178_v15  ;;  %v17291_v15 = vld [vmem:[#allocation55_spill] sm:$0xff] }
 0x669   : > { %10726 = vmatmul.mubr.bf16.gmra.mrb[72].mxu1 %v15670_v51 }
 0x66a   : > { %10729 = vmatprep.mubr.bf16.mxu1 %v15676_v53  ;;  %10758 = vmatpush3.bf16.msra.mxu1 %v11667_v55  ;;  %v16262_v55 = vshll.u32 %v15729_v8, 16  ;;  %v15742_v44 = vsel %vm17288_vm8, %v7182_v46, %v7186_v31  ;;  %v17293_v46 = vld [vmem:[#allocation57_spill] sm:$0xff]  ;;  %vm17313_vm8 = vmmov %vm17298_vm1 }
 0x66b   : > { %10759 = vmatprep.subr.bf16.mxu1 %v11668_v34 }
 0x66c   : > { %v7202_v0 = vrot.slane %v16262_v55, 1  ;;  %v17294_v55 = vshrl.u32 %v17293_v46, 16 }
 0x66e   : > { %10760 = vmatpush3.bf16.msra.mxu1 %v11668_v34  ;;  %v15746_v34 = vsel %vm17289_vm4, %v7190_v45, %v7194_v54  ;;  %v7497_v45 = vshrl.u32 %v7477_v10, 16  ;;  %v7500_v48 = vrot.slane %v17294_v55, 7  ;;  %v7506_v10 = vrot.slane %v7116_v56, 7  ;;  %v11673_v56 = vld [vmem:[#allocation10 + $0x1d0] sm:$0xff]   ;;  %vm17315_vm4 = vmmov %vm17298_vm1 }
 0x66f   : > { %10761 = vmatprep.subr.bf16.mxu1 %v11669_v43  ;;  %v17299_v55 = vshll.u32 %v17276_v62, 16 }
 0x670   : > { %v7499_v13 = vrot.slane %v7497_v45, 7  ;;  %v11672_v45 = vld [vmem:[#allocation10 + $0x1c8] sm:$0xff]  }
 0x671   : > { %10730 = vmatmul.mubr.bf16.gmra.mrb[76].mxu1 %v15694_v4 }
 0x672   : > { %10733 = vmatprep.mubr.bf16.mxu1 %v15700_v47  ;;  %10762 = vmatpush3.bf16.msra.mxu1 %v11669_v43  ;;  %v16264_v43 = vshrl.u32 %v15729_v8, 16 }
 0x673   : > { %10763 = vmatprep.subr.bf16.mxu1 %v11670_v63 }
 0x674   : > { %v7206_v29 = vor.u32 %v16264_v43, %v7202_v0  ;;  %v7218_v43 = vrot.slane %v7216_v40, 1 }
 0x676   : > { %10764 = vmatpush3.bf16.msra.mxu1 %v11670_v63  ;;  %v7198_v63 = vor.u32 %v16266_v23, %v7194_v54  ;;  %v15763_v31 = vsel %vm17292_vm11, %v7206_v29, %v17291_v15  ;;  %v17295_v54 = vshll.u32 %v17293_v46, 16  ;;  %v7507_v15 = vor.u32 %v7506_v10, %v7112_v39  ;;  %vm17323_vm11 = vmmov %vm17298_vm1 }
 0x677   : > { %10797 = vmatprep.subr.bf16.mxu1 %v11671_v1 }
 0x678   : > { %v15758_v20 = vsel %vm17290_vm9, %v7198_v63, %v7202_v0  ;;  %v7501_v23 = vor.u32 %v7500_v48, %v17295_v54  ;;  %v7503_v0 = vrot.slane %v7108_v49, 7  ;;  %v7219_v63 = vsel %vm17297_vm0, %v17296_v52, %v7218_v43  ;;  %vm17320_vm9 = vmmov %vm17298_vm1 }
 0x679   : > { %10734 = vmatmul.mubr.bf16.gmra.mrb[80].mxu1 %v15718_v12  ;;  %v7509_v49 = vrot.slane %v7124_v32, 7  ;;  %vm17325_vm0 = vmmov %vm17298_vm1 }
 0x67a   : > { %10737 = vmatprep.mubr.bf16.mxu1 %v15724_v37  ;;  %v7502_v29 = vsel %vm17298_vm1, %v7499_v13, %v7501_v23  ;;  %v7504_v40 = vor.u32 %v7503_v0, %v17299_v55  ;;  %v7508_v43 = vsel %vm17301_vm3, %v7503_v0, %v7507_v15  ;;  %v7512_v13 = vrot.slane %v7132_v35, 7 }
 0x67b   : > { %v7510_v23 = vor.u32 %v7509_v49, %v7120_v16  ;;  %v7515_v0 = vrot.slane %v7140_v19, 7  ;;  %v11675_v16 = vld [vmem:[#allocation10 + $0x1e0] sm:$0xff]   ;;  %v7527_v15 = vrot.slane %v7172_v33, 7  ;;  %vm17327_vm1 = vsmask.f32 7424 }
 0x67c   : > { %v7505_v54 = vsel %vm17300_vm5, %v7500_v48, %v7504_v40  ;;  %v7513_v39 = vor.u32 %v7512_v13, %v7128_v7  ;;  %v11674_v48 = vld [vmem:[#allocation10 + $0x1d8] sm:$0xff]  }
 0x67d   : > { %v7511_v32 = vsel %vm17302_vm10, %v7506_v10, %v7510_v23  ;;  %v7516_v7 = vor.u32 %v7515_v0, %v7136_v6  ;;  %v7524_v10 = vrot.slane %v7164_v22, 7  ;;  %v11677_v6 = vld [vmem:[#allocation10 + $0x1f0] sm:$0xff]   ;;  %v11678_v40 = vld [vmem:[#allocation10 + $0x1f8] sm:$0xff]   ;;  %v17312_v23 = vshll.u32 %v15720_v9, 16 }
 0x67e   : > { %v7514_v35 = vsel %vm17303_vm6, %v7509_v49, %v7513_v39  ;;  %v7533_v49 = vrot.slane %v7188_v25, 7 }
 0x67f   : > { %v7517_v19 = vsel %vm17304_vm7, %v7512_v13, %v7516_v7  ;;  %v7525_v55 = vor.u32 %v7524_v10, %v7160_v2  ;;  %v7528_v2 = vor.u32 %v7527_v15, %v7168_v36 }
 0x681   : > { %10738 = vmatmul.mubr.bf16.gmra.mrb[84].mxu1 %v15742_v44  ;;  %v7529_v33 = vsel %vm17308_vm14, %v7524_v10, %v7528_v2 }
 0x682   : > { %10741 = vmatprep.mubr.bf16.mxu1 %v15746_v34 }
 0x689   : > { %10742 = vmatmul.mubr.bf16.gmra.mrb[88].mxu1 %v15758_v20 }
 0x68a   : > { %10745 = vmatprep.mubr.bf16.mxu1 %v15763_v31 }
 0x691   : > { %10746 = vmatmul.mubr.bf16.gmra.mrb[92].mxu1 %v7219_v63  ;;  %v11676_v63 = vld [vmem:[#allocation10 + $0x1e8] sm:$0xff]  }
 0x692   : > { %10765 = vmatprep.mubr.bf16.mxu1 %v7502_v29  ;;  %v7521_v29 = vrot.slane %v7156_v21, 7 }
 0x694   : > { %v7526_v22 = vsel %vm17307_vm13, %v7521_v29, %v7525_v55 }
 0x699   : > { %10766 = vmatmul.mubr.bf16.vlgmr.msra.gmra.mrb[64].mxu1 %v7505_v54 }
 0x69a   : > { %10769 = vmatprep.mubr.bf16.mxu1 %v7508_v43  ;;  %10798 = vmatpush3.bf16.msra.mxu1 %v11671_v1  ;;  %v7518_v1 = vrot.slane %v7148_v61, 7  ;;  %v17310_v43 = vshrl.u32 %v15720_v9, 16 }
 0x69b   : > { %10799 = vmatprep.subr.bf16.mxu1 %v11672_v45 }
 0x69c   : > { %v7519_v52 = vor.u32 %v7518_v1, %v7144_v42  ;;  %v7522_v42 = vor.u32 %v7521_v29, %v7152_v5  ;;  %v11679_v5 = vld [vmem:[#allocation10 + $0x200] sm:$0xff]   ;;  %v7536_v13 = vrot.slane %v17310_v43, 7  ;;  %v17321_v29 = vld [vmem:[#allocation62_spill] sm:$0xff] }
 0x69e   : > { %10800 = vmatpush3.bf16.msra.mxu1 %v11672_v45  ;;  %v7520_v61 = vsel %vm17305_vm12, %v7515_v0, %v7519_v52  ;;  %v7523_v21 = vsel %vm17306_vm2, %v7518_v1, %v7522_v42  ;;  %v7530_v45 = vrot.slane %v7180_v3, 7  ;;  %v17316_v0 = vld [vmem:[#allocation51_spill] sm:$0xff]  ;;  %v17324_v42 = vshll.u32 %v17321_v29, 16 }
 0x69f   : > { %10801 = vmatprep.subr.bf16.mxu1 %v11673_v56  ;;  %v17319_v52 = vshll.u32 %v17316_v0, 16 }
 0x6a0   : > { %v7531_v54 = vor.u32 %v7530_v45, %v7176_v38  ;;  %v7537_v38 = vor.u32 %v7536_v13, %v17312_v23 }
 0x6a1   : > { %10770 = vmatmul.mubr.bf16.gmra.mrb[68].mxu1 %v7511_v32 }
 0x6a2   : > { %10773 = vmatprep.mubr.bf16.mxu1 %v7514_v35  ;;  %10802 = vmatpush3.bf16.msra.mxu1 %v11673_v56  ;;  %v7532_v3 = vsel %vm17309_vm15, %v7527_v15, %v7531_v54  ;;  %v17311_v56 = vshll.u32 %v15705_v57, 16  ;;  %v7538_v25 = vsel %vm17315_vm4, %v7533_v49, %v7537_v38  ;;  %v17317_v35 = vshrl.u32 %v17316_v0, 16  ;;  %v11681_v15 = vld [vmem:[#allocation10 + $0x210] sm:$0xff]  }
 0x6a3   : > { %10803 = vmatprep.subr.bf16.mxu1 %v11674_v48 }
 0x6a4   : > { %v7534_v36 = vor.u32 %v7533_v49, %v17311_v56  ;;  %v7542_v1 = vrot.slane %v17317_v35, 7 }
 0x6a6   : > { %10804 = vmatpush3.bf16.msra.mxu1 %v11674_v48  ;;  %v7535_v39 = vsel %vm17313_vm8, %v7530_v45, %v7534_v36  ;;  %v17314_v48 = vshrl.u32 %v15729_v8, 16  ;;  %v11683_v45 = vld [vmem:[#allocation10 + $0x220] sm:$0xff]  }
 0x6a7   : > { %10805 = vmatprep.subr.bf16.mxu1 %v11675_v16 }
 0x6a8   : > { %v7539_v32 = vrot.slane %v17314_v48, 7 }
 0x6a9   : > { %10774 = vmatmul.mubr.bf16.gmra.mrb[72].mxu1 %v7517_v19 }
 0x6aa   : > { %10777 = vmatprep.mubr.bf16.mxu1 %v7520_v61  ;;  %10806 = vmatpush3.bf16.msra.mxu1 %v11675_v16  ;;  %v17318_v16 = vshll.u32 %v15729_v8, 16  ;;  %v17322_v61 = vshrl.u32 %v17321_v29, 16 }
 0x6ab   : > { %10807 = vmatprep.subr.bf16.mxu1 %v11676_v63 }
 0x6ac   : > { %v7540_v7 = vor.u32 %v7539_v32, %v17318_v16  ;;  %v7548_v10 = vrot.slane %v17322_v61, 7 }
 0x6ae   : > { %10808 = vmatpush3.bf16.msra.mxu1 %v11676_v63  ;;  %v7543_v63 = vor.u32 %v7542_v1, %v17319_v52  ;;  %v7541_v19 = vsel %vm17320_vm9, %v7536_v13, %v7540_v7  ;;  %v7551_v55 = vor.u32 %v17324_v42, %v7548_v10 }
 0x6af   : > { %10809 = vmatprep.subr.bf16.mxu1 %v11677_v6 }
 0x6b1   : > { %10778 = vmatmul.mubr.bf16.gmra.mrb[76].mxu1 %v7523_v21  ;;  %v11680_v21 = vld [vmem:[#allocation10 + $0x208] sm:$0xff]  }
 0x6b2   : > { %10781 = vmatprep.mubr.bf16.mxu1 %v7526_v22  ;;  %10810 = vmatpush3.bf16.msra.mxu1 %v11677_v6  ;;  %v7544_v6 = vsel %vm17323_vm11, %v7539_v32, %v7543_v63  ;;  %v11682_v22 = vld [vmem:[#allocation10 + $0x218] sm:$0xff]  }
 0x6b3   : > { %10811 = vmatprep.subr.bf16.mxu1 %v11678_v40 }
 0x6b6   : > { %10812 = vmatpush3.bf16.msra.mxu1 %v11678_v40  ;;  %v7552_v40 = vsel %vm17325_vm0, %v7542_v1, %v7551_v55 }
 0x6b7   : > { %10845 = vmatprep.subr.bf16.mxu1 %v11679_v5 }
 0x6b9   : > { %10782 = vmatmul.mubr.bf16.gmra.mrb[80].mxu1 %v7529_v33 }
 0x6ba   : > { %10785 = vmatprep.mubr.bf16.mxu1 %v7532_v3 }
 0x6c1   : > { %10786 = vmatmul.mubr.bf16.gmra.mrb[84].mxu1 %v7535_v39 }
 0x6c2   : > { %10789 = vmatprep.mubr.bf16.mxu1 %v7538_v25 }
 0x6c9   : > { %10790 = vmatmul.mubr.bf16.gmra.mrb[88].mxu1 %v7541_v19 }
 0x6ca   : > { %10793 = vmatprep.mubr.bf16.mxu1 %v7544_v6 }
 0x6d1   : > { %10794 = vmatmul.mubr.bf16.gmra.mrb[92].mxu1 %v7552_v40 }
 0x6d2   : > { %10813 = vmatprep.mubr.bf16.mxu1 %v17293_v46  ;;  %v11684_v46 = vld [vmem:[#allocation10 + $0x228] sm:$0xff]  }
 0x6d9   : > { %10814 = vmatmul.mubr.bf16.vlgmr.msra.gmra.mrb[64].mxu1 %v17276_v62  ;;  %v11686_v62 = vld [vmem:[#allocation10 + $0x238] sm:$0xff]  }
 0x6da   : > { %10817 = vmatprep.mubr.bf16.mxu1 %v15601_v59  ;;  %10846 = vmatpush3.bf16.msra.mxu1 %v11679_v5  ;;  %v11685_v59 = vld [vmem:[#allocation10 + $0x230] sm:$0xff]  }
 0x6db   : > { %10847 = vmatprep.subr.bf16.mxu1 %v11680_v21 }
 0x6de   : > { %10848 = vmatpush3.bf16.msra.mxu1 %v11680_v21 }
 0x6df   : > { %10849 = vmatprep.subr.bf16.mxu1 %v11681_v15 }
 0x6e1   : > { %10818 = vmatmul.mubr.bf16.gmra.mrb[68].mxu1 %v15614_v14  ;;  %v8084_v14 = vld [vmem:[#allocation2 + $0x98] sm:$0x1] }
 0x6e2   : > { %10821 = vmatprep.mubr.bf16.mxu1 %v15624_v18  ;;  %10850 = vmatpush3.bf16.msra.mxu1 %v11681_v15  ;;  %v8230_v18 = vshll.u32 %v8084_v14, 16 }
 0x6e3   : > { %10851 = vmatprep.subr.bf16.mxu1 %v11682_v22 }
 0x6e6   : > { %10852 = vmatpush3.bf16.msra.mxu1 %v11682_v22 }
 0x6e7   : > { %10853 = vmatprep.subr.bf16.mxu1 %v11683_v45 }
 0x6e9   : > { %10822 = vmatmul.mubr.bf16.gmra.mrb[72].mxu1 %v15633_v27 }
 0x6ea   : > { %10825 = vmatprep.mubr.bf16.mxu1 %v15648_v26  ;;  %10854 = vmatpush3.bf16.msra.mxu1 %v11683_v45 }
 0x6eb   : > { %10855 = vmatprep.subr.bf16.mxu1 %v11684_v46 }
 0x6ee   : > { %10856 = vmatpush3.bf16.msra.mxu1 %v11684_v46 }
 0x6ef   : > { %10857 = vmatprep.subr.bf16.mxu1 %v11685_v59 }
 0x6f1   : > { %10826 = vmatmul.mubr.bf16.gmra.mrb[76].mxu1 %v15657_v41 }
 0x6f2   : > { %10829 = vmatprep.mubr.bf16.mxu1 %v15672_v30  ;;  %10858 = vmatpush3.bf16.msra.mxu1 %v11685_v59 }
 0x6f3   : > { %10859 = vmatprep.subr.bf16.mxu1 %v11686_v62 }
 0x6f6   : > { %10860 = vmatpush3.bf16.msra.mxu1 %v11686_v62 }
 0x6f9   : > { %10830 = vmatmul.mubr.bf16.gmra.mrb[80].mxu1 %v15681_v58 }
 0x6fa   : > { %10833 = vmatprep.mubr.bf16.mxu1 %v15696_v17 }
 0x701   : > { %10834 = vmatmul.mubr.bf16.gmra.mrb[84].mxu1 %v15705_v57 }
 0x702   : > { %10837 = vmatprep.mubr.bf16.mxu1 %v15720_v9 }
 0x709   : > { %10838 = vmatmul.mubr.bf16.gmra.mrb[88].mxu1 %v15729_v8 }
 0x70a   : > { %10841 = vmatprep.mubr.bf16.mxu1 %v17316_v0 }
 0x711   : > { %10842 = vmatmul.mubr.bf16.gmra.mrb[92].mxu1 %v17321_v29 }
 0x712   : > { %10861 = vmatprep.mubr.bf16.mxu1 %v17278_v24  ;;  %v17326_v24 = vld [vmem:[#allocation68_spill] sm:$0xff] }
 0x719   : > { %10862 = vmatmul.mubr.bf16.vlgmr.msra.gmra.mrb[64].mxu1 %v15628_v60  ;;  %v8232_v60 = vrot.slane %v8230_v18, 1 }
 0x71a   : > { %10865 = vmatprep.mubr.bf16.mxu1 %v15646_v11  ;;  %v15881_v11 = vld [vmem:[#allocation11] ss:$0 sm:$0xff] }
 0x71b   : > { %v8233_v27 = vsel %vm17327_vm1, %v15456_v28, %v8232_v60 }
 0x721   : > { %10866 = vmatmul.mubr.bf16.gmra.mrb[68].mxu1 %v15652_v50 }
 0x722   : > { %10869 = vmatprep.mubr.bf16.mxu1 %v15670_v51 }
 0x729   : > { %10870 = vmatmul.mubr.bf16.gmra.mrb[72].mxu1 %v15676_v53 }
 0x72a   : > { %10873 = vmatprep.mubr.bf16.mxu1 %v15694_v4 }
 0x731   : > { %10874 = vmatmul.mubr.bf16.gmra.mrb[76].mxu1 %v15700_v47 }
 0x732   : > { %10877 = vmatprep.mubr.bf16.mxu1 %v15718_v12 }
 0x739   : > { %10878 = vmatmul.mubr.bf16.gmra.mrb[80].mxu1 %v15724_v37 }
 0x73a   : > { %10881 = vmatprep.mubr.bf16.mxu1 %v15742_v44 }
 0x741   : > { %10882 = vmatmul.mubr.bf16.gmra.mrb[84].mxu1 %v15746_v34 }
 0x742   : > { %10885 = vmatprep.mubr.bf16.mxu1 %v15758_v20 }
 0x749   : > { %10886 = vmatmul.mubr.bf16.gmra.mrb[88].mxu1 %v15763_v31 }
 0x74a   : > { %10889 = vmatprep.mubr.bf16.mxu1 %v17326_v24 }
 0x751   : > { %10890 = vmatmul.mubr.bf16.gmra.mrb[92].mxu1 %v8233_v27 }
 0x7ec   : > { %v10863_v26 = vpop.f32.mrb[64].mxu1 }
 0x7ed   : > { %v8500_v50 = vadd.f32 %v10863_v26, %v15881_v11  ;;  %v8332_v41 = vpop.f32.mrb[65].mxu1 }
 0x7ee   : > { %v8498_v51 = vadd.f32 %v15881_v11, %v8332_v41  ;;  %v10864_v30 = vpop.f32.mrb[66].mxu1 }
 0x7ef   : > { %v8501_v53 = vadd.f32 %v10864_v30, %v15881_v11  ;;  %v8335_v58 = vpop.f32.mrb[67].mxu1  ;;  %v8532_v17 = vmax.f32 %v8500_v50, 0.0 }
 0x7f0   : > { %v8499_v4 = vadd.f32 %v15881_v11, %v8335_v58  ;;  %v8530_v57 = vmax.f32 %v8498_v51, 0.0 }
 0x7f1   : > { %v8533_v47 = vmax.f32 %v8501_v53, 0.0 }
 0x7f2   : > { %v8531_v28 = vmax.f32 %v8499_v4, 0.0 }
 0x7f3   : > { %v9306_v12 = vpack.c.bf16 %v8533_v47, %v8532_v17 }
 0x7f4   : > { %v9301_v9 = vpack.c.bf16 %v8531_v28, %v8530_v57  ;;  %v10867_v37 = vpop.f32.mrb[68].mxu1 }
 0x7f5   : > { %9378 = vst [vmem:[%s15891_s12 + $0x8] sm:$0xff] %v9306_v12   ;;  %v8504_v8 = vadd.f32 %v10867_v37, %v15881_v11  ;;  %v8348_v44 = vpop.f32.mrb[69].mxu1 }
 0x7f6   : > { %9302 = vst [vmem:[%s15891_s12] sm:$0xff] %v9301_v9   ;;  %v8502_v34 = vadd.f32 %v15881_v11, %v8348_v44  ;;  %v10868_v20 = vpop.f32.mrb[70].mxu1 }
 0x7f7   : > { %v8505_v31 = vadd.f32 %v10868_v20, %v15881_v11  ;;  %v8351_v5 = vpop.f32.mrb[71].mxu1  ;;  %v8536_v54 = vmax.f32 %v8504_v8, 0.0 }
 0x7f8   : > { %v8503_v2 = vadd.f32 %v15881_v11, %v8351_v5  ;;  %v8534_v49 = vmax.f32 %v8502_v34, 0.0 }
 0x7f9   : > { %v8537_v33 = vmax.f32 %v8505_v31, 0.0 }
 0x7fa   : > { %v8535_v3 = vmax.f32 %v8503_v2, 0.0 }
 0x7fb   : > { %v9316_v43 = vpack.c.bf16 %v8537_v33, %v8536_v54 }
 0x7fc   : > { %v9311_v13 = vpack.c.bf16 %v8535_v3, %v8534_v49  ;;  %v10871_v56 = vpop.f32.mrb[72].mxu1 }
 0x7fd   : > { %9380 = vst [vmem:[%s15891_s12 + $0x18] sm:$0xff] %v9316_v43   ;;  %v8508_v36 = vadd.f32 %v10871_v56, %v15881_v11  ;;  %v8364_v23 = vpop.f32.mrb[73].mxu1 }
 0x7fe   : > { %9379 = vst [vmem:[%s15891_s12 + $0x10] sm:$0xff] %v9311_v13   ;;  %v8506_v38 = vadd.f32 %v15881_v11, %v8364_v23  ;;  %v10872_v39 = vpop.f32.mrb[74].mxu1 }
 0x7ff   : > { %v8509_v48 = vadd.f32 %v10872_v39, %v15881_v11  ;;  %v8367_v32 = vpop.f32.mrb[75].mxu1  ;;  %v8540_v0 = vmax.f32 %v8508_v36, 0.0 }
 0x800   : > { %v8507_v25 = vadd.f32 %v15881_v11, %v8367_v32  ;;  %v8538_v1 = vmax.f32 %v8506_v38, 0.0 }
 0x801   : > { %v8541_v35 = vmax.f32 %v8509_v48, 0.0 }
 0x802   : > { %v8539_v16 = vmax.f32 %v8507_v25, 0.0 }
 0x803   : > { %v9326_v7 = vpack.c.bf16 %v8541_v35, %v8540_v0 }
 0x804   : > { %v9321_v52 = vpack.c.bf16 %v8539_v16, %v8538_v1  ;;  %v10875_v63 = vpop.f32.mrb[76].mxu1 }
 0x805   : > { %9382 = vst [vmem:[%s15891_s12 + $0x28] sm:$0xff] %v9326_v7   ;;  %v8512_v19 = vadd.f32 %v10875_v63, %v15881_v11  ;;  %v8380_v29 = vpop.f32.mrb[77].mxu1 }
 0x806   : > { %9381 = vst [vmem:[%s15891_s12 + $0x20] sm:$0xff] %v9321_v52   ;;  %v8510_v61 = vadd.f32 %v15881_v11, %v8380_v29  ;;  %v10876_v10 = vpop.f32.mrb[78].mxu1 }
 0x807   : > { %v8513_v6 = vadd.f32 %v10876_v10, %v15881_v11  ;;  %v8383_v42 = vpop.f32.mrb[79].mxu1  ;;  %v8544_v40 = vmax.f32 %v8512_v19, 0.0 }
 0x808   : > { %v8511_v55 = vadd.f32 %v15881_v11, %v8383_v42  ;;  %v8542_v15 = vmax.f32 %v8510_v61, 0.0 }
 0x809   : > { %v8545_v21 = vmax.f32 %v8513_v6, 0.0 }
 0x80a   : > { %v8543_v22 = vmax.f32 %v8511_v55, 0.0 }
 0x80b   : > { %v9336_v45 = vpack.c.bf16 %v8545_v21, %v8544_v40 }
 0x80c   : > { %v9331_v46 = vpack.c.bf16 %v8543_v22, %v8542_v15  ;;  %v10879_v59 = vpop.f32.mrb[80].mxu1 }
 0x80d   : > { %9384 = vst [vmem:[%s15891_s12 + $0x38] sm:$0xff] %v9336_v45   ;;  %v8516_v62 = vadd.f32 %v10879_v59, %v15881_v11  ;;  %v8396_v14 = vpop.f32.mrb[81].mxu1 }
 0x80e   : > { %9383 = vst [vmem:[%s15891_s12 + $0x30] sm:$0xff] %v9331_v46   ;;  %v8514_v18 = vadd.f32 %v15881_v11, %v8396_v14  ;;  %v10880_v24 = vpop.f32.mrb[82].mxu1 }
 0x80f   : > { %v8517_v60 = vadd.f32 %v10880_v24, %v15881_v11  ;;  %v8399_v27 = vpop.f32.mrb[83].mxu1  ;;  %v8548_v50 = vmax.f32 %v8516_v62, 0.0 }
 0x810   : > { %v8515_v26 = vadd.f32 %v15881_v11, %v8399_v27  ;;  %v8546_v51 = vmax.f32 %v8514_v18, 0.0 }
 0x811   : > { %v8549_v41 = vmax.f32 %v8517_v60, 0.0 }
 0x812   : > { %v8547_v30 = vmax.f32 %v8515_v26, 0.0 }
 0x813   : > { %v9346_v53 = vpack.c.bf16 %v8549_v41, %v8548_v50 }
 0x814   : > { %v9341_v58 = vpack.c.bf16 %v8547_v30, %v8546_v51  ;;  %v10883_v4 = vpop.f32.mrb[84].mxu1 }
 0x815   : > { %9386 = vst [vmem:[%s15891_s12 + $0x48] sm:$0xff] %v9346_v53   ;;  %v8520_v17 = vadd.f32 %v10883_v4, %v15881_v11  ;;  %v8412_v47 = vpop.f32.mrb[85].mxu1 }
 0x816   : > { %9385 = vst [vmem:[%s15891_s12 + $0x40] sm:$0xff] %v9341_v58   ;;  %v8518_v57 = vadd.f32 %v15881_v11, %v8412_v47  ;;  %v10884_v28 = vpop.f32.mrb[86].mxu1 }
 0x817   : > { %v8521_v12 = vadd.f32 %v10884_v28, %v15881_v11  ;;  %v8415_v9 = vpop.f32.mrb[87].mxu1  ;;  %v8552_v8 = vmax.f32 %v8520_v17, 0.0 }
 0x818   : > { %v8519_v37 = vadd.f32 %v15881_v11, %v8415_v9  ;;  %v8550_v34 = vmax.f32 %v8518_v57, 0.0 }
 0x819   : > { %v8553_v44 = vmax.f32 %v8521_v12, 0.0 }
 0x81a   : > { %v8551_v20 = vmax.f32 %v8519_v37, 0.0 }
 0x81b   : > { %v9356_v31 = vpack.c.bf16 %v8553_v44, %v8552_v8 }
 0x81c   : > { %v9351_v5 = vpack.c.bf16 %v8551_v20, %v8550_v34  ;;  %v10887_v2 = vpop.f32.mrb[88].mxu1 }
 0x81d   : > { %9388 = vst [vmem:[%s15891_s12 + $0x58] sm:$0xff] %v9356_v31   ;;  %v8524_v54 = vadd.f32 %v10887_v2, %v15881_v11  ;;  %v8428_v33 = vpop.f32.mrb[89].mxu1 }
 0x81e   : > { %9387 = vst [vmem:[%s15891_s12 + $0x50] sm:$0xff] %v9351_v5   ;;  %v8522_v49 = vadd.f32 %v15881_v11, %v8428_v33  ;;  %v10888_v3 = vpop.f32.mrb[90].mxu1 }
 0x81f   : > { %v8525_v43 = vadd.f32 %v10888_v3, %v15881_v11  ;;  %v8431_v13 = vpop.f32.mrb[91].mxu1  ;;  %v8556_v36 = vmax.f32 %v8524_v54, 0.0 }
 0x820   : > { %v8523_v56 = vadd.f32 %v15881_v11, %v8431_v13  ;;  %v8554_v38 = vmax.f32 %v8522_v49, 0.0 }
 0x821   : > { %v8557_v23 = vmax.f32 %v8525_v43, 0.0 }
 0x822   : > { %v8555_v39 = vmax.f32 %v8523_v56, 0.0 }
 0x823   : > { %v9366_v48 = vpack.c.bf16 %v8557_v23, %v8556_v36 }
 0x824   : > { %v9361_v32 = vpack.c.bf16 %v8555_v39, %v8554_v38  ;;  %v10891_v25 = vpop.f32.mrb[92].mxu1 }
 0x825   : > { %9390 = vst [vmem:[%s15891_s12 + $0x68] sm:$0xff] %v9366_v48   ;;  %v8528_v0 = vadd.f32 %v10891_v25, %v15881_v11  ;;  %v8444_v35 = vpop.f32.mrb[93].mxu1 }
 0x826   : > { %9389 = vst [vmem:[%s15891_s12 + $0x60] sm:$0xff] %v9361_v32   ;;  %v8526_v1 = vadd.f32 %v15881_v11, %v8444_v35  ;;  %v10892_v16 = vpop.f32.mrb[94].mxu1 }
 0x827   : > { %v8529_v7 = vadd.f32 %v10892_v16, %v15881_v11  ;;  %v8447_v52 = vpop.f32.mrb[95].mxu1  ;;  %v8560_v19 = vmax.f32 %v8528_v0, 0.0 }
 0x828   : > { %v8527_v63 = vadd.f32 %v15881_v11, %v8447_v52  ;;  %v8558_v61 = vmax.f32 %v8526_v1, 0.0 }
 0x829   : > { %v8561_v29 = vmax.f32 %v8529_v7, 0.0 }
 0x82a   : > { %v8559_v10 = vmax.f32 %v8527_v63, 0.0 }
 0x82b   : > { %v9376_v6 = vpack.c.bf16 %v8561_v29, %v8560_v19 }
 0x82c   : > { %v9371_v42 = vpack.c.bf16 %v8559_v10, %v8558_v61 }
 0x82d   : > { %9392 = vst [vmem:[%s15891_s12 + $0x78] sm:$0xff] %v9376_v6  }
 0x82e   : > { %9391 = vst [vmem:[%s15891_s12 + $0x70] sm:$0xff] %v9371_v42  }
 0x82f PF: > { %s21_s24 = sadd.s32 1, %s12043_s24  }
 0x830   : > { %p18_p9 = scmp.ge.s32.totalorder %s21_s24, 6  }
 0x832   :  { %20 = sbr.rel (!%p18_p9) target bundleno = 4 (0x4), region = 122 }
 0x839   :  { %8743 = vsyncpa [#allocation4], 1 }
 0x83a   :  { %8745 = vsyncpa [#allocation4 + $0x1], 1 }
 0x83b   :  { %8746 = vsyncpa [#allocation6], 1 }
 0x83c   :  { %8747 = vsyncpa [#allocation9], 1 }
 0x83d   :  { %8748 = vsyncpa [#allocation12], 1 }

// kernel: siamese_forward.3
= control target key start
LH: loop header
LB: loop body
LE: loop exit
PB: predicated region body
PF: predicated region fallthrough
CT: control target
= control target key end

     0   :  { %s5373_s12 = smov 0   ;;  %s5375_s13 = smov 0   ;;  %s6576_s0 = inlined_call_operand.vmem [shape: bf16[4,18816], index: 0, kind: input, shape index: {}]   ;;  %s6577_s1 = inlined_call_operand.vmem [shape: bf16[18816,512], index: 1, kind: input, shape index: {}]   ;;  %s6578_s2 = inlined_call_operand.vmem [shape: f32[1,512], index: 2, kind: input, shape index: {}]   ;;  %s6579_s3 = inlined_call_operand.vmem [shape: f32[4,512], index: 3, kind: output, shape index: {}]  }
   0x1   :  { %s5377_s14 = smov 0   ;;  %s5379_s15 = smov 0  }
   0x2   :  { %s5381_s16 = smov 0   ;;  %s5383_s17 = smov 0  }
   0x3   :  { %s5385_s18 = smov 0  }
   0x4 LB: > { %s22_s19 = sadd.s32 1, %s5340_s16  ;;  %s25_s20 = sadd.s32 1, %s5344_s17  ;;  %s5348_s18 = sphi %s5385_s18, %s13_s18   ;;  %s5344_s17 = sphi %s5383_s17, %s6585_s17   ;;  %s5340_s16 = sphi %s5381_s16, %s6584_s16   ;;  %s5336_s15 = sphi %s5379_s15, %s6583_s15   ;;  %s5332_s14 = sphi %s5377_s14, %s6582_s14   ;;  %s5328_s13 = sphi %s5375_s13, %s6581_s13   ;;  %s5324_s12 = sphi %s5373_s12, %s6580_s12  }
   0x5   : > { %p23_p0 = scmp.ge.s32.totalorder %s22_s19, 7  ;;  %p67_p1 = scmp.ne.s32.totalorder %s5328_s13, %s5324_s12 }
   0x6   : > { %p68_p2 = scmp.eq.s32.totalorder %s5348_s18, 0  ;;  %s60_s24 = sadd.s32 1, %s5328_s13 }
   0x7   : > { %s6587_s19 = smov (%p23_p0, %s22_s19), 0  ;;  %s6589_s20 = smov (!%p23_p0, %s25_s20), %s5344_s17 }
   0x8   : > { %p69_p3 = por %p68_p2, %p67_p1  ;;  %p27_p4 = scmp.ge.s32.totalorder %s6589_s20, 2 }
   0x9   : > { %s55_s21 = ssub.s32 %s5340_s16, %s6587_s19  ;;  %p4333_p6 = scmp.ge.s32.totalorder %s5348_s18, 14 }
   0xa   : > { %s6591_s20 = smov (%p27_p4, %s6589_s20), 0 }
   0xb   : > { %s56_s22 = ssub.s32 %s5344_s17, %s6591_s20  ;;  %145 = sbr.rel (%p4333_p6) target bundleno = 194 (0xc2), region = 16 }
   0xc   : > { %s57_s23 = sor.u32 %s56_s22, %s55_s21 }
   0xd   : > { %p58_p5 = scmp.eq.s32.totalorder %s57_s23, 0 }
   0xf   : > { %s5424_s25 = scalar_select %p58_p5, %s5328_s13, %s60_s24  }
  0x12   : > { %157 = sbr.rel (!%p69_p3) target bundleno = 194 (0xc2), region = 24  ;;  %s159_s26 = sand.u32 (%p69_p3), 1, %s5328_s13  }
  0x13   : > { %s4722_s27 = smul.u32 (%p69_p3), 2688, %s159_s26  ;;  %s4334_s28 = sshll.u32 (%p69_p3), %s5344_s17, 1 }
  0x14   : > { %s4683_s29 = smul.u32 (%p69_p3), 1344, %s5340_s16 }
  0x15   : > { %s5438_s8 = scalar_lea.vmem (%p69_p3), [#allocation3], %s4722_s27 }
  0x16   : > { %s165_s30 = sadd.s32 (%p69_p3), %s4683_s29, %s4334_s28 }
  0x17   : > { %s4336_s4 = sshll.u32 (%p69_p3), %s165_s30, 2 }
  0x18   : > { %s5433_s7 = scalar_lea.vmem (%p69_p3), %s6577_s1, %s4336_s4 }
  0x19   : > { %v865_v0 = vld [vmem:[%s5433_s7] sm:$0xff]  ;;  %v867_v1 = vld [vmem:[%s5433_s7 + $0x10] sm:$0xff] }
  0x1a   : > { %v869_v2 = vld [vmem:[%s5433_s7 + $0x20] sm:$0xff]  ;;  %866 = vst [vmem:[%s5438_s8] sm:$0xff] %v865_v0  ;;  %868 = vst [vmem:[%s5438_s8 + $0x8] sm:$0xff] %v867_v1  ;;  %v871_v3 = vld [vmem:[%s5433_s7 + $0x30] sm:$0xff] }
  0x1b   : > { %870 = vst [vmem:[%s5438_s8 + $0x10] sm:$0xff] %v869_v2  ;;  %v873_v4 = vld [vmem:[%s5433_s7 + $0x40] sm:$0xff]  ;;  %v875_v5 = vld [vmem:[%s5433_s7 + $0x50] sm:$0xff]  ;;  %872 = vst [vmem:[%s5438_s8 + $0x18] sm:$0xff] %v871_v3 }
  0x1c   : > { %874 = vst [vmem:[%s5438_s8 + $0x20] sm:$0xff] %v873_v4  ;;  %876 = vst [vmem:[%s5438_s8 + $0x28] sm:$0xff] %v875_v5  ;;  %v877_v6 = vld [vmem:[%s5433_s7 + $0x60] sm:$0xff]  ;;  %v879_v7 = vld [vmem:[%s5433_s7 + $0x70] sm:$0xff] }
  0x1d   : > { %v881_v8 = vld [vmem:[%s5433_s7 + $0x80] sm:$0xff]  ;;  %878 = vst [vmem:[%s5438_s8 + $0x30] sm:$0xff] %v877_v6  ;;  %880 = vst [vmem:[%s5438_s8 + $0x38] sm:$0xff] %v879_v7  ;;  %v883_v9 = vld [vmem:[%s5433_s7 + $0x90] sm:$0xff] }
  0x1e   : > { %882 = vst [vmem:[%s5438_s8 + $0x40] sm:$0xff] %v881_v8  ;;  %v885_v10 = vld [vmem:[%s5433_s7 + $0xa0] sm:$0xff]  ;;  %v887_v11 = vld [vmem:[%s5433_s7 + $0xb0] sm:$0xff]  ;;  %884 = vst [vmem:[%s5438_s8 + $0x48] sm:$0xff] %v883_v9 }
  0x1f   : > { %886 = vst [vmem:[%s5438_s8 + $0x50] sm:$0xff] %v885_v10  ;;  %888 = vst [vmem:[%s5438_s8 + $0x58] sm:$0xff] %v887_v11  ;;  %v889_v12 = vld [vmem:[%s5433_s7 + $0xc0] sm:$0xff]  ;;  %v891_v13 = vld [vmem:[%s5433_s7 + $0xd0] sm:$0xff] }
  0x20   : > { %v893_v14 = vld [vmem:[%s5433_s7 + $0xe0] sm:$0xff]  ;;  %890 = vst [vmem:[%s5438_s8 + $0x60] sm:$0xff] %v889_v12  ;;  %892 = vst [vmem:[%s5438_s8 + $0x68] sm:$0xff] %v891_v13  ;;  %v895_v15 = vld [vmem:[%s5433_s7 + $0xf0] sm:$0xff] }
  0x21   : > { %894 = vst [vmem:[%s5438_s8 + $0x70] sm:$0xff] %v893_v14  ;;  %v897_v16 = vld [vmem:[%s5433_s7 + $0x100] sm:$0xff]  ;;  %v899_v17 = vld [vmem:[%s5433_s7 + $0x110] sm:$0xff]  ;;  %896 = vst [vmem:[%s5438_s8 + $0x78] sm:$0xff] %v895_v15 }
  0x22   : > { %898 = vst [vmem:[%s5438_s8 + $0x80] sm:$0xff] %v897_v16  ;;  %900 = vst [vmem:[%s5438_s8 + $0x88] sm:$0xff] %v899_v17  ;;  %v901_v18 = vld [vmem:[%s5433_s7 + $0x120] sm:$0xff]  ;;  %v903_v19 = vld [vmem:[%s5433_s7 + $0x130] sm:$0xff] }
  0x23   : > { %v905_v20 = vld [vmem:[%s5433_s7 + $0x140] sm:$0xff]  ;;  %902 = vst [vmem:[%s5438_s8 + $0x90] sm:$0xff] %v901_v18  ;;  %904 = vst [vmem:[%s5438_s8 + $0x98] sm:$0xff] %v903_v19  ;;  %v907_v21 = vld [vmem:[%s5433_s7 + $0x150] sm:$0xff] }
  0x24   : > { %906 = vst [vmem:[%s5438_s8 + $0xa0] sm:$0xff] %v905_v20  ;;  %v909_v22 = vld [vmem:[%s5433_s7 + $0x160] sm:$0xff]  ;;  %v911_v23 = vld [vmem:[%s5433_s7 + $0x170] sm:$0xff]  ;;  %908 = vst [vmem:[%s5438_s8 + $0xa8] sm:$0xff] %v907_v21 }
  0x25   : > { %910 = vst [vmem:[%s5438_s8 + $0xb0] sm:$0xff] %v909_v22  ;;  %912 = vst [vmem:[%s5438_s8 + $0xb8] sm:$0xff] %v911_v23  ;;  %v913_v24 = vld [vmem:[%s5433_s7 + $0x180] sm:$0xff]  ;;  %v915_v25 = vld [vmem:[%s5433_s7 + $0x190] sm:$0xff] }
  0x26   : > { %v917_v26 = vld [vmem:[%s5433_s7 + $0x1a0] sm:$0xff]  ;;  %914 = vst [vmem:[%s5438_s8 + $0xc0] sm:$0xff] %v913_v24  ;;  %916 = vst [vmem:[%s5438_s8 + $0xc8] sm:$0xff] %v915_v25  ;;  %v919_v27 = vld [vmem:[%s5433_s7 + $0x1b0] sm:$0xff] }
  0x27   : > { %918 = vst [vmem:[%s5438_s8 + $0xd0] sm:$0xff] %v917_v26  ;;  %v921_v28 = vld [vmem:[%s5433_s7 + $0x1c0] sm:$0xff]  ;;  %v923_v29 = vld [vmem:[%s5433_s7 + $0x1d0] sm:$0xff]  ;;  %920 = vst [vmem:[%s5438_s8 + $0xd8] sm:$0xff] %v919_v27 }
  0x28   : > { %922 = vst [vmem:[%s5438_s8 + $0xe0] sm:$0xff] %v921_v28  ;;  %924 = vst [vmem:[%s5438_s8 + $0xe8] sm:$0xff] %v923_v29  ;;  %v925_v30 = vld [vmem:[%s5433_s7 + $0x1e0] sm:$0xff]  ;;  %v927_v31 = vld [vmem:[%s5433_s7 + $0x1f0] sm:$0xff] }
  0x29   : > { %v929_v32 = vld [vmem:[%s5433_s7 + $0x200] sm:$0xff]  ;;  %926 = vst [vmem:[%s5438_s8 + $0xf0] sm:$0xff] %v925_v30  ;;  %928 = vst [vmem:[%s5438_s8 + $0xf8] sm:$0xff] %v927_v31  ;;  %v931_v33 = vld [vmem:[%s5433_s7 + $0x210] sm:$0xff] }
  0x2a   : > { %930 = vst [vmem:[%s5438_s8 + $0x100] sm:$0xff] %v929_v32  ;;  %v933_v34 = vld [vmem:[%s5433_s7 + $0x220] sm:$0xff]  ;;  %v935_v35 = vld [vmem:[%s5433_s7 + $0x230] sm:$0xff]  ;;  %932 = vst [vmem:[%s5438_s8 + $0x108] sm:$0xff] %v931_v33 }
  0x2b   : > { %934 = vst [vmem:[%s5438_s8 + $0x110] sm:$0xff] %v933_v34  ;;  %936 = vst [vmem:[%s5438_s8 + $0x118] sm:$0xff] %v935_v35  ;;  %v937_v36 = vld [vmem:[%s5433_s7 + $0x240] sm:$0xff]  ;;  %v939_v37 = vld [vmem:[%s5433_s7 + $0x250] sm:$0xff] }
  0x2c   : > { %v941_v38 = vld [vmem:[%s5433_s7 + $0x260] sm:$0xff]  ;;  %938 = vst [vmem:[%s5438_s8 + $0x120] sm:$0xff] %v937_v36  ;;  %940 = vst [vmem:[%s5438_s8 + $0x128] sm:$0xff] %v939_v37  ;;  %v943_v39 = vld [vmem:[%s5433_s7 + $0x270] sm:$0xff] }
  0x2d   : > { %942 = vst [vmem:[%s5438_s8 + $0x130] sm:$0xff] %v941_v38  ;;  %v945_v40 = vld [vmem:[%s5433_s7 + $0x280] sm:$0xff]  ;;  %v947_v41 = vld [vmem:[%s5433_s7 + $0x290] sm:$0xff]  ;;  %944 = vst [vmem:[%s5438_s8 + $0x138] sm:$0xff] %v943_v39 }
  0x2e   : > { %946 = vst [vmem:[%s5438_s8 + $0x140] sm:$0xff] %v945_v40  ;;  %948 = vst [vmem:[%s5438_s8 + $0x148] sm:$0xff] %v947_v41  ;;  %v949_v42 = vld [vmem:[%s5433_s7 + $0x2a0] sm:$0xff]  ;;  %v951_v43 = vld [vmem:[%s5433_s7 + $0x2b0] sm:$0xff] }
  0x2f   : > { %v953_v44 = vld [vmem:[%s5433_s7 + $0x2c0] sm:$0xff]  ;;  %950 = vst [vmem:[%s5438_s8 + $0x150] sm:$0xff] %v949_v42  ;;  %952 = vst [vmem:[%s5438_s8 + $0x158] sm:$0xff] %v951_v43  ;;  %v955_v45 = vld [vmem:[%s5433_s7 + $0x2d0] sm:$0xff] }
  0x30   : > { %954 = vst [vmem:[%s5438_s8 + $0x160] sm:$0xff] %v953_v44  ;;  %v957_v46 = vld [vmem:[%s5433_s7 + $0x2e0] sm:$0xff]  ;;  %v959_v47 = vld [vmem:[%s5433_s7 + $0x2f0] sm:$0xff]  ;;  %956 = vst [vmem:[%s5438_s8 + $0x168] sm:$0xff] %v955_v45 }
  0x31   : > { %958 = vst [vmem:[%s5438_s8 + $0x170] sm:$0xff] %v957_v46  ;;  %960 = vst [vmem:[%s5438_s8 + $0x178] sm:$0xff] %v959_v47  ;;  %v961_v48 = vld [vmem:[%s5433_s7 + $0x300] sm:$0xff]  ;;  %v963_v49 = vld [vmem:[%s5433_s7 + $0x310] sm:$0xff] }
  0x32   : > { %v965_v50 = vld [vmem:[%s5433_s7 + $0x320] sm:$0xff]  ;;  %962 = vst [vmem:[%s5438_s8 + $0x180] sm:$0xff] %v961_v48  ;;  %964 = vst [vmem:[%s5438_s8 + $0x188] sm:$0xff] %v963_v49  ;;  %v967_v51 = vld [vmem:[%s5433_s7 + $0x330] sm:$0xff] }
  0x33   : > { %966 = vst [vmem:[%s5438_s8 + $0x190] sm:$0xff] %v965_v50  ;;  %v969_v52 = vld [vmem:[%s5433_s7 + $0x340] sm:$0xff]  ;;  %v971_v53 = vld [vmem:[%s5433_s7 + $0x350] sm:$0xff]  ;;  %968 = vst [vmem:[%s5438_s8 + $0x198] sm:$0xff] %v967_v51 }
  0x34   : > { %970 = vst [vmem:[%s5438_s8 + $0x1a0] sm:$0xff] %v969_v52  ;;  %972 = vst [vmem:[%s5438_s8 + $0x1a8] sm:$0xff] %v971_v53  ;;  %v973_v54 = vld [vmem:[%s5433_s7 + $0x360] sm:$0xff]  ;;  %v975_v55 = vld [vmem:[%s5433_s7 + $0x370] sm:$0xff] }
  0x35   : > { %v977_v56 = vld [vmem:[%s5433_s7 + $0x380] sm:$0xff]  ;;  %974 = vst [vmem:[%s5438_s8 + $0x1b0] sm:$0xff] %v973_v54  ;;  %976 = vst [vmem:[%s5438_s8 + $0x1b8] sm:$0xff] %v975_v55  ;;  %v979_v57 = vld [vmem:[%s5433_s7 + $0x390] sm:$0xff] }
  0x36   : > { %978 = vst [vmem:[%s5438_s8 + $0x1c0] sm:$0xff] %v977_v56  ;;  %v981_v58 = vld [vmem:[%s5433_s7 + $0x3a0] sm:$0xff]  ;;  %v983_v59 = vld [vmem:[%s5433_s7 + $0x3b0] sm:$0xff]  ;;  %980 = vst [vmem:[%s5438_s8 + $0x1c8] sm:$0xff] %v979_v57 }
  0x37   : > { %982 = vst [vmem:[%s5438_s8 + $0x1d0] sm:$0xff] %v981_v58  ;;  %984 = vst [vmem:[%s5438_s8 + $0x1d8] sm:$0xff] %v983_v59  ;;  %v985_v60 = vld [vmem:[%s5433_s7 + $0x3c0] sm:$0xff]  ;;  %v987_v61 = vld [vmem:[%s5433_s7 + $0x3d0] sm:$0xff] }
  0x38   : > { %v989_v62 = vld [vmem:[%s5433_s7 + $0x3e0] sm:$0xff]  ;;  %986 = vst [vmem:[%s5438_s8 + $0x1e0] sm:$0xff] %v985_v60  ;;  %988 = vst [vmem:[%s5438_s8 + $0x1e8] sm:$0xff] %v987_v61  ;;  %v991_v63 = vld [vmem:[%s5433_s7 + $0x3f0] sm:$0xff] }
  0x39   : > { %990 = vst [vmem:[%s5438_s8 + $0x1f0] sm:$0xff] %v989_v62  ;;  %v993_v0 = vld [vmem:[%s5433_s7 + $0x400] sm:$0xff]  ;;  %v995_v1 = vld [vmem:[%s5433_s7 + $0x410] sm:$0xff]  ;;  %992 = vst [vmem:[%s5438_s8 + $0x1f8] sm:$0xff] %v991_v63 }
  0x3a   : > { %994 = vst [vmem:[%s5438_s8 + $0x200] sm:$0xff] %v993_v0  ;;  %996 = vst [vmem:[%s5438_s8 + $0x208] sm:$0xff] %v995_v1  ;;  %v997_v2 = vld [vmem:[%s5433_s7 + $0x420] sm:$0xff]  ;;  %v999_v3 = vld [vmem:[%s5433_s7 + $0x430] sm:$0xff] }
  0x3b   : > { %v1001_v4 = vld [vmem:[%s5433_s7 + $0x440] sm:$0xff]  ;;  %998 = vst [vmem:[%s5438_s8 + $0x210] sm:$0xff] %v997_v2  ;;  %1000 = vst [vmem:[%s5438_s8 + $0x218] sm:$0xff] %v999_v3  ;;  %v1003_v5 = vld [vmem:[%s5433_s7 + $0x450] sm:$0xff] }
  0x3c   : > { %1002 = vst [vmem:[%s5438_s8 + $0x220] sm:$0xff] %v1001_v4  ;;  %v1005_v6 = vld [vmem:[%s5433_s7 + $0x460] sm:$0xff]  ;;  %v1007_v7 = vld [vmem:[%s5433_s7 + $0x470] sm:$0xff]  ;;  %1004 = vst [vmem:[%s5438_s8 + $0x228] sm:$0xff] %v1003_v5 }
  0x3d   : > { %1006 = vst [vmem:[%s5438_s8 + $0x230] sm:$0xff] %v1005_v6  ;;  %1008 = vst [vmem:[%s5438_s8 + $0x238] sm:$0xff] %v1007_v7  ;;  %v1009_v8 = vld [vmem:[%s5433_s7 + $0x480] sm:$0xff]  ;;  %v1011_v9 = vld [vmem:[%s5433_s7 + $0x490] sm:$0xff] }
  0x3e   : > { %v1013_v10 = vld [vmem:[%s5433_s7 + $0x4a0] sm:$0xff]  ;;  %1010 = vst [vmem:[%s5438_s8 + $0x240] sm:$0xff] %v1009_v8  ;;  %1012 = vst [vmem:[%s5438_s8 + $0x248] sm:$0xff] %v1011_v9  ;;  %v1015_v11 = vld [vmem:[%s5433_s7 + $0x4b0] sm:$0xff] }
  0x3f   : > { %1014 = vst [vmem:[%s5438_s8 + $0x250] sm:$0xff] %v1013_v10  ;;  %v1017_v12 = vld [vmem:[%s5433_s7 + $0x4c0] sm:$0xff]  ;;  %v1019_v13 = vld [vmem:[%s5433_s7 + $0x4d0] sm:$0xff]  ;;  %1016 = vst [vmem:[%s5438_s8 + $0x258] sm:$0xff] %v1015_v11 }
  0x40   : > { %1018 = vst [vmem:[%s5438_s8 + $0x260] sm:$0xff] %v1017_v12  ;;  %1020 = vst [vmem:[%s5438_s8 + $0x268] sm:$0xff] %v1019_v13  ;;  %v1021_v14 = vld [vmem:[%s5433_s7 + $0x4e0] sm:$0xff]  ;;  %v1023_v15 = vld [vmem:[%s5433_s7 + $0x4f0] sm:$0xff] }
  0x41   : > { %v1025_v16 = vld [vmem:[%s5433_s7 + $0x500] sm:$0xff]  ;;  %1022 = vst [vmem:[%s5438_s8 + $0x270] sm:$0xff] %v1021_v14  ;;  %1024 = vst [vmem:[%s5438_s8 + $0x278] sm:$0xff] %v1023_v15  ;;  %v1027_v17 = vld [vmem:[%s5433_s7 + $0x510] sm:$0xff] }
  0x42   : > { %1026 = vst [vmem:[%s5438_s8 + $0x280] sm:$0xff] %v1025_v16  ;;  %v1029_v18 = vld [vmem:[%s5433_s7 + $0x520] sm:$0xff]  ;;  %v1031_v19 = vld [vmem:[%s5433_s7 + $0x530] sm:$0xff]  ;;  %1028 = vst [vmem:[%s5438_s8 + $0x288] sm:$0xff] %v1027_v17 }
  0x43   : > { %1030 = vst [vmem:[%s5438_s8 + $0x290] sm:$0xff] %v1029_v18  ;;  %1032 = vst [vmem:[%s5438_s8 + $0x298] sm:$0xff] %v1031_v19  ;;  %v1033_v20 = vld [vmem:[%s5433_s7 + $0x540] sm:$0xff]  ;;  %v1035_v21 = vld [vmem:[%s5433_s7 + $0x550] sm:$0xff] }
  0x44   : > { %v1037_v22 = vld [vmem:[%s5433_s7 + $0x560] sm:$0xff]  ;;  %1034 = vst [vmem:[%s5438_s8 + $0x2a0] sm:$0xff] %v1033_v20  ;;  %1036 = vst [vmem:[%s5438_s8 + $0x2a8] sm:$0xff] %v1035_v21  ;;  %v1039_v23 = vld [vmem:[%s5433_s7 + $0x570] sm:$0xff] }
  0x45   : > { %1038 = vst [vmem:[%s5438_s8 + $0x2b0] sm:$0xff] %v1037_v22  ;;  %v1041_v24 = vld [vmem:[%s5433_s7 + $0x580] sm:$0xff]  ;;  %v1043_v25 = vld [vmem:[%s5433_s7 + $0x590] sm:$0xff]  ;;  %1040 = vst [vmem:[%s5438_s8 + $0x2b8] sm:$0xff] %v1039_v23 }
  0x46   : > { %1042 = vst [vmem:[%s5438_s8 + $0x2c0] sm:$0xff] %v1041_v24  ;;  %1044 = vst [vmem:[%s5438_s8 + $0x2c8] sm:$0xff] %v1043_v25  ;;  %v1045_v26 = vld [vmem:[%s5433_s7 + $0x5a0] sm:$0xff]  ;;  %v1047_v27 = vld [vmem:[%s5433_s7 + $0x5b0] sm:$0xff] }
  0x47   : > { %v1049_v28 = vld [vmem:[%s5433_s7 + $0x5c0] sm:$0xff]  ;;  %1046 = vst [vmem:[%s5438_s8 + $0x2d0] sm:$0xff] %v1045_v26  ;;  %1048 = vst [vmem:[%s5438_s8 + $0x2d8] sm:$0xff] %v1047_v27  ;;  %v1051_v29 = vld [vmem:[%s5433_s7 + $0x5d0] sm:$0xff] }
  0x48   : > { %1050 = vst [vmem:[%s5438_s8 + $0x2e0] sm:$0xff] %v1049_v28  ;;  %v1053_v30 = vld [vmem:[%s5433_s7 + $0x5e0] sm:$0xff]  ;;  %v1055_v31 = vld [vmem:[%s5433_s7 + $0x5f0] sm:$0xff]  ;;  %1052 = vst [vmem:[%s5438_s8 + $0x2e8] sm:$0xff] %v1051_v29 }
  0x49   : > { %1054 = vst [vmem:[%s5438_s8 + $0x2f0] sm:$0xff] %v1053_v30  ;;  %1056 = vst [vmem:[%s5438_s8 + $0x2f8] sm:$0xff] %v1055_v31  ;;  %v1057_v32 = vld [vmem:[%s5433_s7 + $0x600] sm:$0xff]  ;;  %v1059_v33 = vld [vmem:[%s5433_s7 + $0x610] sm:$0xff] }
  0x4a   : > { %v1061_v34 = vld [vmem:[%s5433_s7 + $0x620] sm:$0xff]  ;;  %1058 = vst [vmem:[%s5438_s8 + $0x300] sm:$0xff] %v1057_v32  ;;  %1060 = vst [vmem:[%s5438_s8 + $0x308] sm:$0xff] %v1059_v33  ;;  %v1063_v35 = vld [vmem:[%s5433_s7 + $0x630] sm:$0xff] }
  0x4b   : > { %1062 = vst [vmem:[%s5438_s8 + $0x310] sm:$0xff] %v1061_v34  ;;  %v1065_v36 = vld [vmem:[%s5433_s7 + $0x640] sm:$0xff]  ;;  %v1067_v37 = vld [vmem:[%s5433_s7 + $0x650] sm:$0xff]  ;;  %1064 = vst [vmem:[%s5438_s8 + $0x318] sm:$0xff] %v1063_v35 }
  0x4c   : > { %1066 = vst [vmem:[%s5438_s8 + $0x320] sm:$0xff] %v1065_v36  ;;  %1068 = vst [vmem:[%s5438_s8 + $0x328] sm:$0xff] %v1067_v37  ;;  %v1069_v38 = vld [vmem:[%s5433_s7 + $0x660] sm:$0xff]  ;;  %v1071_v39 = vld [vmem:[%s5433_s7 + $0x670] sm:$0xff] }
  0x4d   : > { %v1073_v40 = vld [vmem:[%s5433_s7 + $0x680] sm:$0xff]  ;;  %1070 = vst [vmem:[%s5438_s8 + $0x330] sm:$0xff] %v1069_v38  ;;  %1072 = vst [vmem:[%s5438_s8 + $0x338] sm:$0xff] %v1071_v39  ;;  %v1075_v41 = vld [vmem:[%s5433_s7 + $0x690] sm:$0xff] }
  0x4e   : > { %1074 = vst [vmem:[%s5438_s8 + $0x340] sm:$0xff] %v1073_v40  ;;  %v1077_v42 = vld [vmem:[%s5433_s7 + $0x6a0] sm:$0xff]  ;;  %v1079_v43 = vld [vmem:[%s5433_s7 + $0x6b0] sm:$0xff]  ;;  %1076 = vst [vmem:[%s5438_s8 + $0x348] sm:$0xff] %v1075_v41 }
  0x4f   : > { %1078 = vst [vmem:[%s5438_s8 + $0x350] sm:$0xff] %v1077_v42  ;;  %1080 = vst [vmem:[%s5438_s8 + $0x358] sm:$0xff] %v1079_v43  ;;  %v1081_v44 = vld [vmem:[%s5433_s7 + $0x6c0] sm:$0xff]  ;;  %v1083_v45 = vld [vmem:[%s5433_s7 + $0x6d0] sm:$0xff] }
  0x50   : > { %v1085_v46 = vld [vmem:[%s5433_s7 + $0x6e0] sm:$0xff]  ;;  %1082 = vst [vmem:[%s5438_s8 + $0x360] sm:$0xff] %v1081_v44  ;;  %1084 = vst [vmem:[%s5438_s8 + $0x368] sm:$0xff] %v1083_v45  ;;  %v1087_v47 = vld [vmem:[%s5433_s7 + $0x6f0] sm:$0xff] }
  0x51   : > { %1086 = vst [vmem:[%s5438_s8 + $0x370] sm:$0xff] %v1085_v46  ;;  %v1089_v48 = vld [vmem:[%s5433_s7 + $0x700] sm:$0xff]  ;;  %v1091_v49 = vld [vmem:[%s5433_s7 + $0x710] sm:$0xff]  ;;  %1088 = vst [vmem:[%s5438_s8 + $0x378] sm:$0xff] %v1087_v47 }
  0x52   : > { %1090 = vst [vmem:[%s5438_s8 + $0x380] sm:$0xff] %v1089_v48  ;;  %1092 = vst [vmem:[%s5438_s8 + $0x388] sm:$0xff] %v1091_v49  ;;  %v1093_v50 = vld [vmem:[%s5433_s7 + $0x720] sm:$0xff]  ;;  %v1095_v51 = vld [vmem:[%s5433_s7 + $0x730] sm:$0xff] }
  0x53   : > { %v1097_v52 = vld [vmem:[%s5433_s7 + $0x740] sm:$0xff]  ;;  %1094 = vst [vmem:[%s5438_s8 + $0x390] sm:$0xff] %v1093_v50  ;;  %1096 = vst [vmem:[%s5438_s8 + $0x398] sm:$0xff] %v1095_v51  ;;  %v1099_v53 = vld [vmem:[%s5433_s7 + $0x750] sm:$0xff] }
  0x54   : > { %1098 = vst [vmem:[%s5438_s8 + $0x3a0] sm:$0xff] %v1097_v52  ;;  %v1101_v54 = vld [vmem:[%s5433_s7 + $0x760] sm:$0xff]  ;;  %v1103_v55 = vld [vmem:[%s5433_s7 + $0x770] sm:$0xff]  ;;  %1100 = vst [vmem:[%s5438_s8 + $0x3a8] sm:$0xff] %v1099_v53 }
  0x55   : > { %1102 = vst [vmem:[%s5438_s8 + $0x3b0] sm:$0xff] %v1101_v54  ;;  %1104 = vst [vmem:[%s5438_s8 + $0x3b8] sm:$0xff] %v1103_v55  ;;  %v1105_v56 = vld [vmem:[%s5433_s7 + $0x780] sm:$0xff]  ;;  %v1107_v57 = vld [vmem:[%s5433_s7 + $0x790] sm:$0xff] }
  0x56   : > { %v1109_v58 = vld [vmem:[%s5433_s7 + $0x7a0] sm:$0xff]  ;;  %1106 = vst [vmem:[%s5438_s8 + $0x3c0] sm:$0xff] %v1105_v56  ;;  %1108 = vst [vmem:[%s5438_s8 + $0x3c8] sm:$0xff] %v1107_v57  ;;  %v1111_v59 = vld [vmem:[%s5433_s7 + $0x7b0] sm:$0xff] }
  0x57   : > { %1110 = vst [vmem:[%s5438_s8 + $0x3d0] sm:$0xff] %v1109_v58  ;;  %v1113_v60 = vld [vmem:[%s5433_s7 + $0x7c0] sm:$0xff]  ;;  %v1115_v61 = vld [vmem:[%s5433_s7 + $0x7d0] sm:$0xff]  ;;  %1112 = vst [vmem:[%s5438_s8 + $0x3d8] sm:$0xff] %v1111_v59 }
  0x58   : > { %1114 = vst [vmem:[%s5438_s8 + $0x3e0] sm:$0xff] %v1113_v60  ;;  %1116 = vst [vmem:[%s5438_s8 + $0x3e8] sm:$0xff] %v1115_v61  ;;  %v1117_v62 = vld [vmem:[%s5433_s7 + $0x7e0] sm:$0xff]  ;;  %v1119_v63 = vld [vmem:[%s5433_s7 + $0x7f0] sm:$0xff] }
  0x59   : > { %v1121_v0 = vld [vmem:[%s5433_s7 + $0x800] sm:$0xff]  ;;  %1118 = vst [vmem:[%s5438_s8 + $0x3f0] sm:$0xff] %v1117_v62  ;;  %1120 = vst [vmem:[%s5438_s8 + $0x3f8] sm:$0xff] %v1119_v63  ;;  %v1123_v1 = vld [vmem:[%s5433_s7 + $0x810] sm:$0xff] }
  0x5a   : > { %1122 = vst [vmem:[%s5438_s8 + $0x400] sm:$0xff] %v1121_v0  ;;  %v1125_v2 = vld [vmem:[%s5433_s7 + $0x820] sm:$0xff]  ;;  %v1127_v3 = vld [vmem:[%s5433_s7 + $0x830] sm:$0xff]  ;;  %1124 = vst [vmem:[%s5438_s8 + $0x408] sm:$0xff] %v1123_v1 }
  0x5b   : > { %1126 = vst [vmem:[%s5438_s8 + $0x410] sm:$0xff] %v1125_v2  ;;  %1128 = vst [vmem:[%s5438_s8 + $0x418] sm:$0xff] %v1127_v3  ;;  %v1129_v4 = vld [vmem:[%s5433_s7 + $0x840] sm:$0xff]  ;;  %v1131_v5 = vld [vmem:[%s5433_s7 + $0x850] sm:$0xff] }
  0x5c   : > { %v1133_v6 = vld [vmem:[%s5433_s7 + $0x860] sm:$0xff]  ;;  %1130 = vst [vmem:[%s5438_s8 + $0x420] sm:$0xff] %v1129_v4  ;;  %1132 = vst [vmem:[%s5438_s8 + $0x428] sm:$0xff] %v1131_v5  ;;  %v1135_v7 = vld [vmem:[%s5433_s7 + $0x870] sm:$0xff] }
  0x5d   : > { %1134 = vst [vmem:[%s5438_s8 + $0x430] sm:$0xff] %v1133_v6  ;;  %v1137_v8 = vld [vmem:[%s5433_s7 + $0x880] sm:$0xff]  ;;  %v1139_v9 = vld [vmem:[%s5433_s7 + $0x890] sm:$0xff]  ;;  %1136 = vst [vmem:[%s5438_s8 + $0x438] sm:$0xff] %v1135_v7 }
  0x5e   : > { %1138 = vst [vmem:[%s5438_s8 + $0x440] sm:$0xff] %v1137_v8  ;;  %1140 = vst [vmem:[%s5438_s8 + $0x448] sm:$0xff] %v1139_v9  ;;  %v1141_v10 = vld [vmem:[%s5433_s7 + $0x8a0] sm:$0xff]  ;;  %v1143_v11 = vld [vmem:[%s5433_s7 + $0x8b0] sm:$0xff] }
  0x5f   : > { %v1145_v12 = vld [vmem:[%s5433_s7 + $0x8c0] sm:$0xff]  ;;  %1142 = vst [vmem:[%s5438_s8 + $0x450] sm:$0xff] %v1141_v10  ;;  %1144 = vst [vmem:[%s5438_s8 + $0x458] sm:$0xff] %v1143_v11  ;;  %v1147_v13 = vld [vmem:[%s5433_s7 + $0x8d0] sm:$0xff] }
  0x60   : > { %1146 = vst [vmem:[%s5438_s8 + $0x460] sm:$0xff] %v1145_v12  ;;  %v1149_v14 = vld [vmem:[%s5433_s7 + $0x8e0] sm:$0xff]  ;;  %v1151_v15 = vld [vmem:[%s5433_s7 + $0x8f0] sm:$0xff]  ;;  %1148 = vst [vmem:[%s5438_s8 + $0x468] sm:$0xff] %v1147_v13 }
  0x61   : > { %1150 = vst [vmem:[%s5438_s8 + $0x470] sm:$0xff] %v1149_v14  ;;  %1152 = vst [vmem:[%s5438_s8 + $0x478] sm:$0xff] %v1151_v15  ;;  %v1153_v16 = vld [vmem:[%s5433_s7 + $0x900] sm:$0xff]  ;;  %v1155_v17 = vld [vmem:[%s5433_s7 + $0x910] sm:$0xff] }
  0x62   : > { %v1157_v18 = vld [vmem:[%s5433_s7 + $0x920] sm:$0xff]  ;;  %1154 = vst [vmem:[%s5438_s8 + $0x480] sm:$0xff] %v1153_v16  ;;  %1156 = vst [vmem:[%s5438_s8 + $0x488] sm:$0xff] %v1155_v17  ;;  %v1159_v19 = vld [vmem:[%s5433_s7 + $0x930] sm:$0xff] }
  0x63   : > { %1158 = vst [vmem:[%s5438_s8 + $0x490] sm:$0xff] %v1157_v18  ;;  %v1161_v20 = vld [vmem:[%s5433_s7 + $0x940] sm:$0xff]  ;;  %v1163_v21 = vld [vmem:[%s5433_s7 + $0x950] sm:$0xff]  ;;  %1160 = vst [vmem:[%s5438_s8 + $0x498] sm:$0xff] %v1159_v19 }
  0x64   : > { %1162 = vst [vmem:[%s5438_s8 + $0x4a0] sm:$0xff] %v1161_v20  ;;  %1164 = vst [vmem:[%s5438_s8 + $0x4a8] sm:$0xff] %v1163_v21  ;;  %v1165_v22 = vld [vmem:[%s5433_s7 + $0x960] sm:$0xff]  ;;  %v1167_v23 = vld [vmem:[%s5433_s7 + $0x970] sm:$0xff] }
  0x65   : > { %v1169_v24 = vld [vmem:[%s5433_s7 + $0x980] sm:$0xff]  ;;  %1166 = vst [vmem:[%s5438_s8 + $0x4b0] sm:$0xff] %v1165_v22  ;;  %1168 = vst [vmem:[%s5438_s8 + $0x4b8] sm:$0xff] %v1167_v23  ;;  %v1171_v25 = vld [vmem:[%s5433_s7 + $0x990] sm:$0xff] }
  0x66   : > { %1170 = vst [vmem:[%s5438_s8 + $0x4c0] sm:$0xff] %v1169_v24  ;;  %v1173_v26 = vld [vmem:[%s5433_s7 + $0x9a0] sm:$0xff]  ;;  %v1175_v27 = vld [vmem:[%s5433_s7 + $0x9b0] sm:$0xff]  ;;  %1172 = vst [vmem:[%s5438_s8 + $0x4c8] sm:$0xff] %v1171_v25 }
  0x67   : > { %1174 = vst [vmem:[%s5438_s8 + $0x4d0] sm:$0xff] %v1173_v26  ;;  %1176 = vst [vmem:[%s5438_s8 + $0x4d8] sm:$0xff] %v1175_v27  ;;  %v1177_v28 = vld [vmem:[%s5433_s7 + $0x9c0] sm:$0xff]  ;;  %v1179_v29 = vld [vmem:[%s5433_s7 + $0x9d0] sm:$0xff] }
  0x68   : > { %v1181_v30 = vld [vmem:[%s5433_s7 + $0x9e0] sm:$0xff]  ;;  %1178 = vst [vmem:[%s5438_s8 + $0x4e0] sm:$0xff] %v1177_v28  ;;  %1180 = vst [vmem:[%s5438_s8 + $0x4e8] sm:$0xff] %v1179_v29  ;;  %v1183_v31 = vld [vmem:[%s5433_s7 + $0x9f0] sm:$0xff] }
  0x69   : > { %1182 = vst [vmem:[%s5438_s8 + $0x4f0] sm:$0xff] %v1181_v30  ;;  %v1185_v32 = vld [vmem:[%s5433_s7 + $0xa00] sm:$0xff]  ;;  %v1187_v33 = vld [vmem:[%s5433_s7 + $0xa10] sm:$0xff]  ;;  %1184 = vst [vmem:[%s5438_s8 + $0x4f8] sm:$0xff] %v1183_v31 }
  0x6a   : > { %1186 = vst [vmem:[%s5438_s8 + $0x500] sm:$0xff] %v1185_v32  ;;  %1188 = vst [vmem:[%s5438_s8 + $0x508] sm:$0xff] %v1187_v33  ;;  %v1189_v34 = vld [vmem:[%s5433_s7 + $0xa20] sm:$0xff]  ;;  %v1191_v35 = vld [vmem:[%s5433_s7 + $0xa30] sm:$0xff] }
  0x6b   : > { %v1193_v36 = vld [vmem:[%s5433_s7 + $0xa40] sm:$0xff]  ;;  %1190 = vst [vmem:[%s5438_s8 + $0x510] sm:$0xff] %v1189_v34  ;;  %1192 = vst [vmem:[%s5438_s8 + $0x518] sm:$0xff] %v1191_v35  ;;  %v1195_v37 = vld [vmem:[%s5433_s7 + $0xa50] sm:$0xff] }
  0x6c   : > { %1194 = vst [vmem:[%s5438_s8 + $0x520] sm:$0xff] %v1193_v36  ;;  %v1197_v38 = vld [vmem:[%s5433_s7 + $0xa60] sm:$0xff]  ;;  %v1199_v39 = vld [vmem:[%s5433_s7 + $0xa70] sm:$0xff]  ;;  %1196 = vst [vmem:[%s5438_s8 + $0x528] sm:$0xff] %v1195_v37 }
  0x6d   : > { %1198 = vst [vmem:[%s5438_s8 + $0x530] sm:$0xff] %v1197_v38  ;;  %1200 = vst [vmem:[%s5438_s8 + $0x538] sm:$0xff] %v1199_v39  ;;  %v1201_v40 = vld [vmem:[%s5433_s7 + $0xa80] sm:$0xff]  ;;  %v1203_v41 = vld [vmem:[%s5433_s7 + $0xa90] sm:$0xff] }
  0x6e   : > { %v1205_v42 = vld [vmem:[%s5433_s7 + $0xaa0] sm:$0xff]  ;;  %1202 = vst [vmem:[%s5438_s8 + $0x540] sm:$0xff] %v1201_v40  ;;  %1204 = vst [vmem:[%s5438_s8 + $0x548] sm:$0xff] %v1203_v41  ;;  %v1207_v43 = vld [vmem:[%s5433_s7 + $0xab0] sm:$0xff] }
  0x6f   : > { %1206 = vst [vmem:[%s5438_s8 + $0x550] sm:$0xff] %v1205_v42  ;;  %v1209_v44 = vld [vmem:[%s5433_s7 + $0xac0] sm:$0xff]  ;;  %v1211_v45 = vld [vmem:[%s5433_s7 + $0xad0] sm:$0xff]  ;;  %1208 = vst [vmem:[%s5438_s8 + $0x558] sm:$0xff] %v1207_v43 }
  0x70   : > { %1210 = vst [vmem:[%s5438_s8 + $0x560] sm:$0xff] %v1209_v44  ;;  %1212 = vst [vmem:[%s5438_s8 + $0x568] sm:$0xff] %v1211_v45  ;;  %v1213_v46 = vld [vmem:[%s5433_s7 + $0xae0] sm:$0xff]  ;;  %v1215_v47 = vld [vmem:[%s5433_s7 + $0xaf0] sm:$0xff] }
  0x71   : > { %v1217_v48 = vld [vmem:[%s5433_s7 + $0xb00] sm:$0xff]  ;;  %1214 = vst [vmem:[%s5438_s8 + $0x570] sm:$0xff] %v1213_v46  ;;  %1216 = vst [vmem:[%s5438_s8 + $0x578] sm:$0xff] %v1215_v47  ;;  %v1219_v49 = vld [vmem:[%s5433_s7 + $0xb10] sm:$0xff] }
  0x72   : > { %1218 = vst [vmem:[%s5438_s8 + $0x580] sm:$0xff] %v1217_v48  ;;  %v1221_v50 = vld [vmem:[%s5433_s7 + $0xb20] sm:$0xff]  ;;  %v1223_v51 = vld [vmem:[%s5433_s7 + $0xb30] sm:$0xff]  ;;  %1220 = vst [vmem:[%s5438_s8 + $0x588] sm:$0xff] %v1219_v49 }
  0x73   : > { %1222 = vst [vmem:[%s5438_s8 + $0x590] sm:$0xff] %v1221_v50  ;;  %1224 = vst [vmem:[%s5438_s8 + $0x598] sm:$0xff] %v1223_v51  ;;  %v1225_v52 = vld [vmem:[%s5433_s7 + $0xb40] sm:$0xff]  ;;  %v1227_v53 = vld [vmem:[%s5433_s7 + $0xb50] sm:$0xff] }
  0x74   : > { %v1229_v54 = vld [vmem:[%s5433_s7 + $0xb60] sm:$0xff]  ;;  %1226 = vst [vmem:[%s5438_s8 + $0x5a0] sm:$0xff] %v1225_v52  ;;  %1228 = vst [vmem:[%s5438_s8 + $0x5a8] sm:$0xff] %v1227_v53  ;;  %v1231_v55 = vld [vmem:[%s5433_s7 + $0xb70] sm:$0xff] }
  0x75   : > { %1230 = vst [vmem:[%s5438_s8 + $0x5b0] sm:$0xff] %v1229_v54  ;;  %v1233_v56 = vld [vmem:[%s5433_s7 + $0xb80] sm:$0xff]  ;;  %v1235_v57 = vld [vmem:[%s5433_s7 + $0xb90] sm:$0xff]  ;;  %1232 = vst [vmem:[%s5438_s8 + $0x5b8] sm:$0xff] %v1231_v55 }
  0x76   : > { %1234 = vst [vmem:[%s5438_s8 + $0x5c0] sm:$0xff] %v1233_v56  ;;  %1236 = vst [vmem:[%s5438_s8 + $0x5c8] sm:$0xff] %v1235_v57  ;;  %v1237_v58 = vld [vmem:[%s5433_s7 + $0xba0] sm:$0xff]  ;;  %v1239_v59 = vld [vmem:[%s5433_s7 + $0xbb0] sm:$0xff] }
  0x77   : > { %v1241_v60 = vld [vmem:[%s5433_s7 + $0xbc0] sm:$0xff]  ;;  %1238 = vst [vmem:[%s5438_s8 + $0x5d0] sm:$0xff] %v1237_v58  ;;  %1240 = vst [vmem:[%s5438_s8 + $0x5d8] sm:$0xff] %v1239_v59  ;;  %v1243_v61 = vld [vmem:[%s5433_s7 + $0xbd0] sm:$0xff] }
  0x78   : > { %1242 = vst [vmem:[%s5438_s8 + $0x5e0] sm:$0xff] %v1241_v60  ;;  %v1245_v62 = vld [vmem:[%s5433_s7 + $0xbe0] sm:$0xff]  ;;  %v1247_v63 = vld [vmem:[%s5433_s7 + $0xbf0] sm:$0xff]  ;;  %1244 = vst [vmem:[%s5438_s8 + $0x5e8] sm:$0xff] %v1243_v61 }
  0x79   : > { %1246 = vst [vmem:[%s5438_s8 + $0x5f0] sm:$0xff] %v1245_v62  ;;  %1248 = vst [vmem:[%s5438_s8 + $0x5f8] sm:$0xff] %v1247_v63  ;;  %v1249_v0 = vld [vmem:[%s5433_s7 + $0xc00] sm:$0xff]  ;;  %v1251_v1 = vld [vmem:[%s5433_s7 + $0xc10] sm:$0xff] }
  0x7a   : > { %v1253_v2 = vld [vmem:[%s5433_s7 + $0xc20] sm:$0xff]  ;;  %1250 = vst [vmem:[%s5438_s8 + $0x600] sm:$0xff] %v1249_v0  ;;  %1252 = vst [vmem:[%s5438_s8 + $0x608] sm:$0xff] %v1251_v1  ;;  %v1255_v3 = vld [vmem:[%s5433_s7 + $0xc30] sm:$0xff] }
  0x7b   : > { %1254 = vst [vmem:[%s5438_s8 + $0x610] sm:$0xff] %v1253_v2  ;;  %v1257_v4 = vld [vmem:[%s5433_s7 + $0xc40] sm:$0xff]  ;;  %v1259_v5 = vld [vmem:[%s5433_s7 + $0xc50] sm:$0xff]  ;;  %1256 = vst [vmem:[%s5438_s8 + $0x618] sm:$0xff] %v1255_v3 }
  0x7c   : > { %1258 = vst [vmem:[%s5438_s8 + $0x620] sm:$0xff] %v1257_v4  ;;  %1260 = vst [vmem:[%s5438_s8 + $0x628] sm:$0xff] %v1259_v5  ;;  %v1261_v6 = vld [vmem:[%s5433_s7 + $0xc60] sm:$0xff]  ;;  %v1263_v7 = vld [vmem:[%s5433_s7 + $0xc70] sm:$0xff] }
  0x7d   : > { %v1265_v8 = vld [vmem:[%s5433_s7 + $0xc80] sm:$0xff]  ;;  %1262 = vst [vmem:[%s5438_s8 + $0x630] sm:$0xff] %v1261_v6  ;;  %1264 = vst [vmem:[%s5438_s8 + $0x638] sm:$0xff] %v1263_v7  ;;  %v1267_v9 = vld [vmem:[%s5433_s7 + $0xc90] sm:$0xff] }
  0x7e   : > { %1266 = vst [vmem:[%s5438_s8 + $0x640] sm:$0xff] %v1265_v8  ;;  %v1269_v10 = vld [vmem:[%s5433_s7 + $0xca0] sm:$0xff]  ;;  %v1271_v11 = vld [vmem:[%s5433_s7 + $0xcb0] sm:$0xff]  ;;  %1268 = vst [vmem:[%s5438_s8 + $0x648] sm:$0xff] %v1267_v9 }
  0x7f   : > { %1270 = vst [vmem:[%s5438_s8 + $0x650] sm:$0xff] %v1269_v10  ;;  %1272 = vst [vmem:[%s5438_s8 + $0x658] sm:$0xff] %v1271_v11  ;;  %v1273_v12 = vld [vmem:[%s5433_s7 + $0xcc0] sm:$0xff]  ;;  %v1275_v13 = vld [vmem:[%s5433_s7 + $0xcd0] sm:$0xff] }
  0x80   : > { %v1277_v14 = vld [vmem:[%s5433_s7 + $0xce0] sm:$0xff]  ;;  %1274 = vst [vmem:[%s5438_s8 + $0x660] sm:$0xff] %v1273_v12  ;;  %1276 = vst [vmem:[%s5438_s8 + $0x668] sm:$0xff] %v1275_v13  ;;  %v1279_v15 = vld [vmem:[%s5433_s7 + $0xcf0] sm:$0xff] }
  0x81   : > { %1278 = vst [vmem:[%s5438_s8 + $0x670] sm:$0xff] %v1277_v14  ;;  %v1281_v16 = vld [vmem:[%s5433_s7 + $0xd00] sm:$0xff]  ;;  %v1283_v17 = vld [vmem:[%s5433_s7 + $0xd10] sm:$0xff]  ;;  %1280 = vst [vmem:[%s5438_s8 + $0x678] sm:$0xff] %v1279_v15 }
  0x82   : > { %1282 = vst [vmem:[%s5438_s8 + $0x680] sm:$0xff] %v1281_v16  ;;  %1284 = vst [vmem:[%s5438_s8 + $0x688] sm:$0xff] %v1283_v17  ;;  %v1285_v18 = vld [vmem:[%s5433_s7 + $0xd20] sm:$0xff]  ;;  %v1287_v19 = vld [vmem:[%s5433_s7 + $0xd30] sm:$0xff] }
  0x83   : > { %v1289_v20 = vld [vmem:[%s5433_s7 + $0xd40] sm:$0xff]  ;;  %1286 = vst [vmem:[%s5438_s8 + $0x690] sm:$0xff] %v1285_v18  ;;  %1288 = vst [vmem:[%s5438_s8 + $0x698] sm:$0xff] %v1287_v19  ;;  %v1291_v21 = vld [vmem:[%s5433_s7 + $0xd50] sm:$0xff] }
  0x84   : > { %1290 = vst [vmem:[%s5438_s8 + $0x6a0] sm:$0xff] %v1289_v20  ;;  %v1293_v22 = vld [vmem:[%s5433_s7 + $0xd60] sm:$0xff]  ;;  %v1295_v23 = vld [vmem:[%s5433_s7 + $0xd70] sm:$0xff]  ;;  %1292 = vst [vmem:[%s5438_s8 + $0x6a8] sm:$0xff] %v1291_v21 }
  0x85   : > { %1294 = vst [vmem:[%s5438_s8 + $0x6b0] sm:$0xff] %v1293_v22  ;;  %1296 = vst [vmem:[%s5438_s8 + $0x6b8] sm:$0xff] %v1295_v23  ;;  %v1297_v24 = vld [vmem:[%s5433_s7 + $0xd80] sm:$0xff]  ;;  %v1299_v25 = vld [vmem:[%s5433_s7 + $0xd90] sm:$0xff] }
  0x86   : > { %v1301_v26 = vld [vmem:[%s5433_s7 + $0xda0] sm:$0xff]  ;;  %1298 = vst [vmem:[%s5438_s8 + $0x6c0] sm:$0xff] %v1297_v24  ;;  %1300 = vst [vmem:[%s5438_s8 + $0x6c8] sm:$0xff] %v1299_v25  ;;  %v1303_v27 = vld [vmem:[%s5433_s7 + $0xdb0] sm:$0xff] }
  0x87   : > { %1302 = vst [vmem:[%s5438_s8 + $0x6d0] sm:$0xff] %v1301_v26  ;;  %v1305_v28 = vld [vmem:[%s5433_s7 + $0xdc0] sm:$0xff]  ;;  %v1307_v29 = vld [vmem:[%s5433_s7 + $0xdd0] sm:$0xff]  ;;  %1304 = vst [vmem:[%s5438_s8 + $0x6d8] sm:$0xff] %v1303_v27 }
  0x88   : > { %1306 = vst [vmem:[%s5438_s8 + $0x6e0] sm:$0xff] %v1305_v28  ;;  %1308 = vst [vmem:[%s5438_s8 + $0x6e8] sm:$0xff] %v1307_v29  ;;  %v1309_v30 = vld [vmem:[%s5433_s7 + $0xde0] sm:$0xff]  ;;  %v1311_v31 = vld [vmem:[%s5433_s7 + $0xdf0] sm:$0xff] }
  0x89   : > { %v1313_v32 = vld [vmem:[%s5433_s7 + $0xe00] sm:$0xff]  ;;  %1310 = vst [vmem:[%s5438_s8 + $0x6f0] sm:$0xff] %v1309_v30  ;;  %1312 = vst [vmem:[%s5438_s8 + $0x6f8] sm:$0xff] %v1311_v31  ;;  %v1315_v33 = vld [vmem:[%s5433_s7 + $0xe10] sm:$0xff] }
  0x8a   : > { %1314 = vst [vmem:[%s5438_s8 + $0x700] sm:$0xff] %v1313_v32  ;;  %v1317_v34 = vld [vmem:[%s5433_s7 + $0xe20] sm:$0xff]  ;;  %v1319_v35 = vld [vmem:[%s5433_s7 + $0xe30] sm:$0xff]  ;;  %1316 = vst [vmem:[%s5438_s8 + $0x708] sm:$0xff] %v1315_v33 }
  0x8b   : > { %1318 = vst [vmem:[%s5438_s8 + $0x710] sm:$0xff] %v1317_v34  ;;  %1320 = vst [vmem:[%s5438_s8 + $0x718] sm:$0xff] %v1319_v35  ;;  %v1321_v36 = vld [vmem:[%s5433_s7 + $0xe40] sm:$0xff]  ;;  %v1323_v37 = vld [vmem:[%s5433_s7 + $0xe50] sm:$0xff] }
  0x8c   : > { %v1325_v38 = vld [vmem:[%s5433_s7 + $0xe60] sm:$0xff]  ;;  %1322 = vst [vmem:[%s5438_s8 + $0x720] sm:$0xff] %v1321_v36  ;;  %1324 = vst [vmem:[%s5438_s8 + $0x728] sm:$0xff] %v1323_v37  ;;  %v1327_v39 = vld [vmem:[%s5433_s7 + $0xe70] sm:$0xff] }
  0x8d   : > { %1326 = vst [vmem:[%s5438_s8 + $0x730] sm:$0xff] %v1325_v38  ;;  %v1329_v40 = vld [vmem:[%s5433_s7 + $0xe80] sm:$0xff]  ;;  %v1331_v41 = vld [vmem:[%s5433_s7 + $0xe90] sm:$0xff]  ;;  %1328 = vst [vmem:[%s5438_s8 + $0x738] sm:$0xff] %v1327_v39 }
  0x8e   : > { %1330 = vst [vmem:[%s5438_s8 + $0x740] sm:$0xff] %v1329_v40  ;;  %1332 = vst [vmem:[%s5438_s8 + $0x748] sm:$0xff] %v1331_v41  ;;  %v1333_v42 = vld [vmem:[%s5433_s7 + $0xea0] sm:$0xff]  ;;  %v1335_v43 = vld [vmem:[%s5433_s7 + $0xeb0] sm:$0xff] }
  0x8f   : > { %v1337_v44 = vld [vmem:[%s5433_s7 + $0xec0] sm:$0xff]  ;;  %1334 = vst [vmem:[%s5438_s8 + $0x750] sm:$0xff] %v1333_v42  ;;  %1336 = vst [vmem:[%s5438_s8 + $0x758] sm:$0xff] %v1335_v43  ;;  %v1339_v45 = vld [vmem:[%s5433_s7 + $0xed0] sm:$0xff] }
  0x90   : > { %1338 = vst [vmem:[%s5438_s8 + $0x760] sm:$0xff] %v1337_v44  ;;  %v1341_v46 = vld [vmem:[%s5433_s7 + $0xee0] sm:$0xff]  ;;  %v1343_v47 = vld [vmem:[%s5433_s7 + $0xef0] sm:$0xff]  ;;  %1340 = vst [vmem:[%s5438_s8 + $0x768] sm:$0xff] %v1339_v45 }
  0x91   : > { %1342 = vst [vmem:[%s5438_s8 + $0x770] sm:$0xff] %v1341_v46  ;;  %1344 = vst [vmem:[%s5438_s8 + $0x778] sm:$0xff] %v1343_v47  ;;  %v1345_v48 = vld [vmem:[%s5433_s7 + $0xf00] sm:$0xff]  ;;  %v1347_v49 = vld [vmem:[%s5433_s7 + $0xf10] sm:$0xff] }
  0x92   : > { %v1349_v50 = vld [vmem:[%s5433_s7 + $0xf20] sm:$0xff]  ;;  %1346 = vst [vmem:[%s5438_s8 + $0x780] sm:$0xff] %v1345_v48  ;;  %1348 = vst [vmem:[%s5438_s8 + $0x788] sm:$0xff] %v1347_v49  ;;  %v1351_v51 = vld [vmem:[%s5433_s7 + $0xf30] sm:$0xff] }
  0x93   : > { %1350 = vst [vmem:[%s5438_s8 + $0x790] sm:$0xff] %v1349_v50  ;;  %v1353_v52 = vld [vmem:[%s5433_s7 + $0xf40] sm:$0xff]  ;;  %v1355_v53 = vld [vmem:[%s5433_s7 + $0xf50] sm:$0xff]  ;;  %1352 = vst [vmem:[%s5438_s8 + $0x798] sm:$0xff] %v1351_v51 }
  0x94   : > { %1354 = vst [vmem:[%s5438_s8 + $0x7a0] sm:$0xff] %v1353_v52  ;;  %1356 = vst [vmem:[%s5438_s8 + $0x7a8] sm:$0xff] %v1355_v53  ;;  %v1357_v54 = vld [vmem:[%s5433_s7 + $0xf60] sm:$0xff]  ;;  %v1359_v55 = vld [vmem:[%s5433_s7 + $0xf70] sm:$0xff] }
  0x95   : > { %v1361_v56 = vld [vmem:[%s5433_s7 + $0xf80] sm:$0xff]  ;;  %1358 = vst [vmem:[%s5438_s8 + $0x7b0] sm:$0xff] %v1357_v54  ;;  %1360 = vst [vmem:[%s5438_s8 + $0x7b8] sm:$0xff] %v1359_v55  ;;  %v1363_v57 = vld [vmem:[%s5433_s7 + $0xf90] sm:$0xff] }
  0x96   : > { %1362 = vst [vmem:[%s5438_s8 + $0x7c0] sm:$0xff] %v1361_v56  ;;  %v1365_v58 = vld [vmem:[%s5433_s7 + $0xfa0] sm:$0xff]  ;;  %v1367_v59 = vld [vmem:[%s5433_s7 + $0xfb0] sm:$0xff]  ;;  %1364 = vst [vmem:[%s5438_s8 + $0x7c8] sm:$0xff] %v1363_v57 }
  0x97   : > { %1366 = vst [vmem:[%s5438_s8 + $0x7d0] sm:$0xff] %v1365_v58  ;;  %1368 = vst [vmem:[%s5438_s8 + $0x7d8] sm:$0xff] %v1367_v59  ;;  %v1369_v60 = vld [vmem:[%s5433_s7 + $0xfc0] sm:$0xff]  ;;  %v1371_v61 = vld [vmem:[%s5433_s7 + $0xfd0] sm:$0xff] }
  0x98   : > { %v1373_v62 = vld [vmem:[%s5433_s7 + $0xfe0] sm:$0xff]  ;;  %1370 = vst [vmem:[%s5438_s8 + $0x7e0] sm:$0xff] %v1369_v60  ;;  %1372 = vst [vmem:[%s5438_s8 + $0x7e8] sm:$0xff] %v1371_v61  ;;  %v1375_v63 = vld [vmem:[%s5433_s7 + $0xff0] sm:$0xff] }
  0x99   : > { %1374 = vst [vmem:[%s5438_s8 + $0x7f0] sm:$0xff] %v1373_v62  ;;  %v1377_v0 = vld [vmem:[%s5433_s7 + $0x1000] sm:$0xff]  ;;  %v1379_v1 = vld [vmem:[%s5433_s7 + $0x1010] sm:$0xff]  ;;  %1376 = vst [vmem:[%s5438_s8 + $0x7f8] sm:$0xff] %v1375_v63 }
  0x9a   : > { %1378 = vst [vmem:[%s5438_s8 + $0x800] sm:$0xff] %v1377_v0  ;;  %1380 = vst [vmem:[%s5438_s8 + $0x808] sm:$0xff] %v1379_v1  ;;  %v1381_v2 = vld [vmem:[%s5433_s7 + $0x1020] sm:$0xff]  ;;  %v1383_v3 = vld [vmem:[%s5433_s7 + $0x1030] sm:$0xff] }
  0x9b   : > { %v1385_v4 = vld [vmem:[%s5433_s7 + $0x1040] sm:$0xff]  ;;  %1382 = vst [vmem:[%s5438_s8 + $0x810] sm:$0xff] %v1381_v2  ;;  %1384 = vst [vmem:[%s5438_s8 + $0x818] sm:$0xff] %v1383_v3  ;;  %v1387_v5 = vld [vmem:[%s5433_s7 + $0x1050] sm:$0xff] }
  0x9c   : > { %1386 = vst [vmem:[%s5438_s8 + $0x820] sm:$0xff] %v1385_v4  ;;  %v1389_v6 = vld [vmem:[%s5433_s7 + $0x1060] sm:$0xff]  ;;  %v1391_v7 = vld [vmem:[%s5433_s7 + $0x1070] sm:$0xff]  ;;  %1388 = vst [vmem:[%s5438_s8 + $0x828] sm:$0xff] %v1387_v5 }
  0x9d   : > { %1390 = vst [vmem:[%s5438_s8 + $0x830] sm:$0xff] %v1389_v6  ;;  %1392 = vst [vmem:[%s5438_s8 + $0x838] sm:$0xff] %v1391_v7  ;;  %v1393_v8 = vld [vmem:[%s5433_s7 + $0x1080] sm:$0xff]  ;;  %v1395_v9 = vld [vmem:[%s5433_s7 + $0x1090] sm:$0xff] }
  0x9e   : > { %v1397_v10 = vld [vmem:[%s5433_s7 + $0x10a0] sm:$0xff]  ;;  %1394 = vst [vmem:[%s5438_s8 + $0x840] sm:$0xff] %v1393_v8  ;;  %1396 = vst [vmem:[%s5438_s8 + $0x848] sm:$0xff] %v1395_v9  ;;  %v1399_v11 = vld [vmem:[%s5433_s7 + $0x10b0] sm:$0xff] }
  0x9f   : > { %1398 = vst [vmem:[%s5438_s8 + $0x850] sm:$0xff] %v1397_v10  ;;  %v1401_v12 = vld [vmem:[%s5433_s7 + $0x10c0] sm:$0xff]  ;;  %v1403_v13 = vld [vmem:[%s5433_s7 + $0x10d0] sm:$0xff]  ;;  %1400 = vst [vmem:[%s5438_s8 + $0x858] sm:$0xff] %v1399_v11 }
  0xa0   : > { %1402 = vst [vmem:[%s5438_s8 + $0x860] sm:$0xff] %v1401_v12  ;;  %1404 = vst [vmem:[%s5438_s8 + $0x868] sm:$0xff] %v1403_v13  ;;  %v1405_v14 = vld [vmem:[%s5433_s7 + $0x10e0] sm:$0xff]  ;;  %v1407_v15 = vld [vmem:[%s5433_s7 + $0x10f0] sm:$0xff] }
  0xa1   : > { %v1409_v16 = vld [vmem:[%s5433_s7 + $0x1100] sm:$0xff]  ;;  %1406 = vst [vmem:[%s5438_s8 + $0x870] sm:$0xff] %v1405_v14  ;;  %1408 = vst [vmem:[%s5438_s8 + $0x878] sm:$0xff] %v1407_v15  ;;  %v1411_v17 = vld [vmem:[%s5433_s7 + $0x1110] sm:$0xff] }
  0xa2   : > { %1410 = vst [vmem:[%s5438_s8 + $0x880] sm:$0xff] %v1409_v16  ;;  %v1413_v18 = vld [vmem:[%s5433_s7 + $0x1120] sm:$0xff]  ;;  %v1415_v19 = vld [vmem:[%s5433_s7 + $0x1130] sm:$0xff]  ;;  %1412 = vst [vmem:[%s5438_s8 + $0x888] sm:$0xff] %v1411_v17 }
  0xa3   : > { %1414 = vst [vmem:[%s5438_s8 + $0x890] sm:$0xff] %v1413_v18  ;;  %1416 = vst [vmem:[%s5438_s8 + $0x898] sm:$0xff] %v1415_v19  ;;  %v1417_v20 = vld [vmem:[%s5433_s7 + $0x1140] sm:$0xff]  ;;  %v1419_v21 = vld [vmem:[%s5433_s7 + $0x1150] sm:$0xff] }
  0xa4   : > { %v1421_v22 = vld [vmem:[%s5433_s7 + $0x1160] sm:$0xff]  ;;  %1418 = vst [vmem:[%s5438_s8 + $0x8a0] sm:$0xff] %v1417_v20  ;;  %1420 = vst [vmem:[%s5438_s8 + $0x8a8] sm:$0xff] %v1419_v21  ;;  %v1423_v23 = vld [vmem:[%s5433_s7 + $0x1170] sm:$0xff] }
  0xa5   : > { %1422 = vst [vmem:[%s5438_s8 + $0x8b0] sm:$0xff] %v1421_v22  ;;  %v1425_v24 = vld [vmem:[%s5433_s7 + $0x1180] sm:$0xff]  ;;  %v1427_v25 = vld [vmem:[%s5433_s7 + $0x1190] sm:$0xff]  ;;  %1424 = vst [vmem:[%s5438_s8 + $0x8b8] sm:$0xff] %v1423_v23 }
  0xa6   : > { %1426 = vst [vmem:[%s5438_s8 + $0x8c0] sm:$0xff] %v1425_v24  ;;  %1428 = vst [vmem:[%s5438_s8 + $0x8c8] sm:$0xff] %v1427_v25  ;;  %v1429_v26 = vld [vmem:[%s5433_s7 + $0x11a0] sm:$0xff]  ;;  %v1431_v27 = vld [vmem:[%s5433_s7 + $0x11b0] sm:$0xff] }
  0xa7   : > { %v1433_v28 = vld [vmem:[%s5433_s7 + $0x11c0] sm:$0xff]  ;;  %1430 = vst [vmem:[%s5438_s8 + $0x8d0] sm:$0xff] %v1429_v26  ;;  %1432 = vst [vmem:[%s5438_s8 + $0x8d8] sm:$0xff] %v1431_v27  ;;  %v1435_v29 = vld [vmem:[%s5433_s7 + $0x11d0] sm:$0xff] }
  0xa8   : > { %1434 = vst [vmem:[%s5438_s8 + $0x8e0] sm:$0xff] %v1433_v28  ;;  %v1437_v30 = vld [vmem:[%s5433_s7 + $0x11e0] sm:$0xff]  ;;  %v1439_v31 = vld [vmem:[%s5433_s7 + $0x11f0] sm:$0xff]  ;;  %1436 = vst [vmem:[%s5438_s8 + $0x8e8] sm:$0xff] %v1435_v29 }
  0xa9   : > { %1438 = vst [vmem:[%s5438_s8 + $0x8f0] sm:$0xff] %v1437_v30  ;;  %1440 = vst [vmem:[%s5438_s8 + $0x8f8] sm:$0xff] %v1439_v31  ;;  %v1441_v32 = vld [vmem:[%s5433_s7 + $0x1200] sm:$0xff]  ;;  %v1443_v33 = vld [vmem:[%s5433_s7 + $0x1210] sm:$0xff] }
  0xaa   : > { %v1445_v34 = vld [vmem:[%s5433_s7 + $0x1220] sm:$0xff]  ;;  %1442 = vst [vmem:[%s5438_s8 + $0x900] sm:$0xff] %v1441_v32  ;;  %1444 = vst [vmem:[%s5438_s8 + $0x908] sm:$0xff] %v1443_v33  ;;  %v1447_v35 = vld [vmem:[%s5433_s7 + $0x1230] sm:$0xff] }
  0xab   : > { %1446 = vst [vmem:[%s5438_s8 + $0x910] sm:$0xff] %v1445_v34  ;;  %v1449_v36 = vld [vmem:[%s5433_s7 + $0x1240] sm:$0xff]  ;;  %v1451_v37 = vld [vmem:[%s5433_s7 + $0x1250] sm:$0xff]  ;;  %1448 = vst [vmem:[%s5438_s8 + $0x918] sm:$0xff] %v1447_v35 }
  0xac   : > { %1450 = vst [vmem:[%s5438_s8 + $0x920] sm:$0xff] %v1449_v36  ;;  %1452 = vst [vmem:[%s5438_s8 + $0x928] sm:$0xff] %v1451_v37  ;;  %v1453_v38 = vld [vmem:[%s5433_s7 + $0x1260] sm:$0xff]  ;;  %v1455_v39 = vld [vmem:[%s5433_s7 + $0x1270] sm:$0xff] }
  0xad   : > { %v1457_v40 = vld [vmem:[%s5433_s7 + $0x1280] sm:$0xff]  ;;  %1454 = vst [vmem:[%s5438_s8 + $0x930] sm:$0xff] %v1453_v38  ;;  %1456 = vst [vmem:[%s5438_s8 + $0x938] sm:$0xff] %v1455_v39  ;;  %v1459_v41 = vld [vmem:[%s5433_s7 + $0x1290] sm:$0xff] }
  0xae   : > { %1458 = vst [vmem:[%s5438_s8 + $0x940] sm:$0xff] %v1457_v40  ;;  %v1461_v42 = vld [vmem:[%s5433_s7 + $0x12a0] sm:$0xff]  ;;  %v1463_v43 = vld [vmem:[%s5433_s7 + $0x12b0] sm:$0xff]  ;;  %1460 = vst [vmem:[%s5438_s8 + $0x948] sm:$0xff] %v1459_v41 }
  0xaf   : > { %1462 = vst [vmem:[%s5438_s8 + $0x950] sm:$0xff] %v1461_v42  ;;  %1464 = vst [vmem:[%s5438_s8 + $0x958] sm:$0xff] %v1463_v43  ;;  %v1465_v44 = vld [vmem:[%s5433_s7 + $0x12c0] sm:$0xff]  ;;  %v1467_v45 = vld [vmem:[%s5433_s7 + $0x12d0] sm:$0xff] }
  0xb0   : > { %v1469_v46 = vld [vmem:[%s5433_s7 + $0x12e0] sm:$0xff]  ;;  %1466 = vst [vmem:[%s5438_s8 + $0x960] sm:$0xff] %v1465_v44  ;;  %1468 = vst [vmem:[%s5438_s8 + $0x968] sm:$0xff] %v1467_v45  ;;  %v1471_v47 = vld [vmem:[%s5433_s7 + $0x12f0] sm:$0xff] }
  0xb1   : > { %1470 = vst [vmem:[%s5438_s8 + $0x970] sm:$0xff] %v1469_v46  ;;  %v1473_v48 = vld [vmem:[%s5433_s7 + $0x1300] sm:$0xff]  ;;  %v1475_v49 = vld [vmem:[%s5433_s7 + $0x1310] sm:$0xff]  ;;  %1472 = vst [vmem:[%s5438_s8 + $0x978] sm:$0xff] %v1471_v47 }
  0xb2   : > { %1474 = vst [vmem:[%s5438_s8 + $0x980] sm:$0xff] %v1473_v48  ;;  %1476 = vst [vmem:[%s5438_s8 + $0x988] sm:$0xff] %v1475_v49  ;;  %v1477_v50 = vld [vmem:[%s5433_s7 + $0x1320] sm:$0xff]  ;;  %v1479_v51 = vld [vmem:[%s5433_s7 + $0x1330] sm:$0xff] }
  0xb3   : > { %v1481_v52 = vld [vmem:[%s5433_s7 + $0x1340] sm:$0xff]  ;;  %1478 = vst [vmem:[%s5438_s8 + $0x990] sm:$0xff] %v1477_v50  ;;  %1480 = vst [vmem:[%s5438_s8 + $0x998] sm:$0xff] %v1479_v51  ;;  %v1483_v53 = vld [vmem:[%s5433_s7 + $0x1350] sm:$0xff] }
  0xb4   : > { %1482 = vst [vmem:[%s5438_s8 + $0x9a0] sm:$0xff] %v1481_v52  ;;  %v1485_v54 = vld [vmem:[%s5433_s7 + $0x1360] sm:$0xff]  ;;  %v1487_v55 = vld [vmem:[%s5433_s7 + $0x1370] sm:$0xff]  ;;  %1484 = vst [vmem:[%s5438_s8 + $0x9a8] sm:$0xff] %v1483_v53 }
  0xb5   : > { %1486 = vst [vmem:[%s5438_s8 + $0x9b0] sm:$0xff] %v1485_v54  ;;  %1488 = vst [vmem:[%s5438_s8 + $0x9b8] sm:$0xff] %v1487_v55  ;;  %v1489_v56 = vld [vmem:[%s5433_s7 + $0x1380] sm:$0xff]  ;;  %v1491_v57 = vld [vmem:[%s5433_s7 + $0x1390] sm:$0xff] }
  0xb6   : > { %v1493_v58 = vld [vmem:[%s5433_s7 + $0x13a0] sm:$0xff]  ;;  %1490 = vst [vmem:[%s5438_s8 + $0x9c0] sm:$0xff] %v1489_v56  ;;  %1492 = vst [vmem:[%s5438_s8 + $0x9c8] sm:$0xff] %v1491_v57  ;;  %v1495_v59 = vld [vmem:[%s5433_s7 + $0x13b0] sm:$0xff] }
  0xb7   : > { %1494 = vst [vmem:[%s5438_s8 + $0x9d0] sm:$0xff] %v1493_v58  ;;  %v1497_v60 = vld [vmem:[%s5433_s7 + $0x13c0] sm:$0xff]  ;;  %v1499_v61 = vld [vmem:[%s5433_s7 + $0x13d0] sm:$0xff]  ;;  %1496 = vst [vmem:[%s5438_s8 + $0x9d8] sm:$0xff] %v1495_v59 }
  0xb8   : > { %1498 = vst [vmem:[%s5438_s8 + $0x9e0] sm:$0xff] %v1497_v60  ;;  %1500 = vst [vmem:[%s5438_s8 + $0x9e8] sm:$0xff] %v1499_v61  ;;  %v1501_v62 = vld [vmem:[%s5433_s7 + $0x13e0] sm:$0xff]  ;;  %v1503_v63 = vld [vmem:[%s5433_s7 + $0x13f0] sm:$0xff] }
  0xb9   : > { %v1505_v0 = vld [vmem:[%s5433_s7 + $0x1400] sm:$0xff]  ;;  %1502 = vst [vmem:[%s5438_s8 + $0x9f0] sm:$0xff] %v1501_v62  ;;  %1504 = vst [vmem:[%s5438_s8 + $0x9f8] sm:$0xff] %v1503_v63  ;;  %v1507_v1 = vld [vmem:[%s5433_s7 + $0x1410] sm:$0xff] }
  0xba   : > { %1506 = vst [vmem:[%s5438_s8 + $0xa00] sm:$0xff] %v1505_v0  ;;  %v1509_v2 = vld [vmem:[%s5433_s7 + $0x1420] sm:$0xff]  ;;  %v1511_v3 = vld [vmem:[%s5433_s7 + $0x1430] sm:$0xff]  ;;  %1508 = vst [vmem:[%s5438_s8 + $0xa08] sm:$0xff] %v1507_v1 }
  0xbb   : > { %1510 = vst [vmem:[%s5438_s8 + $0xa10] sm:$0xff] %v1509_v2  ;;  %1512 = vst [vmem:[%s5438_s8 + $0xa18] sm:$0xff] %v1511_v3  ;;  %v1513_v4 = vld [vmem:[%s5433_s7 + $0x1440] sm:$0xff]  ;;  %v1515_v5 = vld [vmem:[%s5433_s7 + $0x1450] sm:$0xff] }
  0xbc   : > { %v1517_v6 = vld [vmem:[%s5433_s7 + $0x1460] sm:$0xff]  ;;  %1514 = vst [vmem:[%s5438_s8 + $0xa20] sm:$0xff] %v1513_v4  ;;  %1516 = vst [vmem:[%s5438_s8 + $0xa28] sm:$0xff] %v1515_v5  ;;  %v1519_v7 = vld [vmem:[%s5433_s7 + $0x1470] sm:$0xff] }
  0xbd   : > { %1518 = vst [vmem:[%s5438_s8 + $0xa30] sm:$0xff] %v1517_v6  ;;  %v1521_v8 = vld [vmem:[%s5433_s7 + $0x1480] sm:$0xff]  ;;  %v1523_v9 = vld [vmem:[%s5433_s7 + $0x1490] sm:$0xff]  ;;  %1520 = vst [vmem:[%s5438_s8 + $0xa38] sm:$0xff] %v1519_v7 }
  0xbe   : > { %1522 = vst [vmem:[%s5438_s8 + $0xa40] sm:$0xff] %v1521_v8  ;;  %1524 = vst [vmem:[%s5438_s8 + $0xa48] sm:$0xff] %v1523_v9  ;;  %v1525_v10 = vld [vmem:[%s5433_s7 + $0x14a0] sm:$0xff]  ;;  %v1527_v11 = vld [vmem:[%s5433_s7 + $0x14b0] sm:$0xff] }
  0xbf   : > { %v1529_v12 = vld [vmem:[%s5433_s7 + $0x14c0] sm:$0xff]  ;;  %1526 = vst [vmem:[%s5438_s8 + $0xa50] sm:$0xff] %v1525_v10  ;;  %1528 = vst [vmem:[%s5438_s8 + $0xa58] sm:$0xff] %v1527_v11  ;;  %v1531_v13 = vld [vmem:[%s5433_s7 + $0x14d0] sm:$0xff] }
  0xc0   : > { %1530 = vst [vmem:[%s5438_s8 + $0xa60] sm:$0xff] %v1529_v12  ;;  %v1533_v14 = vld [vmem:[%s5433_s7 + $0x14e0] sm:$0xff]  ;;  %v1535_v15 = vld [vmem:[%s5433_s7 + $0x14f0] sm:$0xff]  ;;  %1532 = vst [vmem:[%s5438_s8 + $0xa68] sm:$0xff] %v1531_v13 }
  0xc1   : > { %1534 = vst [vmem:[%s5438_s8 + $0xa70] sm:$0xff] %v1533_v14  ;;  %1536 = vst [vmem:[%s5438_s8 + $0xa78] sm:$0xff] %v1535_v15 }
  0xc2 PF: > { %p4337_p7 = scmp.ge.s32.totalorder %s5348_s18, 1  ;;  %p1549_p8 = scmp.lt.s32.totalorder %s5348_s18, 15 }
  0xc4   : > { %p1550_p9 = pnand %p4337_p7, %p1549_p8 }
  0xc5   : > { %s1556_s9 = sand.u32 (!%p1550_p9), 1, %s5324_s12   ;;  %s1588_s10 = smul.u32 (!%p1550_p9), 21, %s5332_s14 }
  0xc6   : > { %1553 = sbr.rel (%p1550_p9) target bundleno = 801 (0x321), region = 66  ;;  %s4339_s21 = sshll.u32 (!%p1550_p9), %s5336_s15, 1 }
  0xc7   : > { %s4723_s11 = smul.u32 (!%p1550_p9), 2688, %s1556_s9  ;;  %p1589_p10 = scmp.lt.s32.totalorder (!%p1550_p9), %s1588_s10, 146 }
  0xc8   : > { %p1597_p11 = scmp.lt.s32.totalorder (!%p1550_p9), %s4339_s21, 3  ;;  %p4342_p12 = scmp.ne.s32.totalorder (!%p1550_p9), %s5332_s14, 0 }
  0xc9   : > { %s6131_s5 = scalar_lea.vmem (!%p1550_p9), [#allocation3], %s4723_s11 }
  0xcd   : > { %s6593_s10 = smov (!%p1589_p10, %s1588_s10), 146  ;;  %s6595_s21 = smov (!%p1597_p11, %s4339_s21), 3 }
  0xce   : > { %s4338_s22 = sshll.u32 %s6593_s10, 1  ;;  %s1599_s12 = scalar_lea.vmem %s6578_s2, %s6595_s21  ;;  %v5350_v16 = vmov (!%p4342_p12), 0.0  }
  0xcf   : > { %s6119_s26 = scalar_lea.vmem %s6576_s0, %s4338_s22  ;;  %s4341_s29 = sshll.u32 %s6595_s21, 2  ;;  %1612 = vst [vmem:[#allocation2] sm:$0xff] (!%p4342_p12), %v5350_v16 }
  0xd0   : > { %s6129_s4 = scalar_lea.vmem %s6579_s3, %s4341_s29  ;;  %1611 = sbr.rel (%p4342_p12) target bundleno = 215 (0xd7), region = 74 }
  0xd7 PF: > { %v4783_v17 = vld [vmem:[%s6131_s5 + $0x4] ss:$8 sps:$4 sm:$0xff]   ;;  %v4787_v19 = vld [vmem:[%s6131_s5] ss:$8 sps:$4 sm:$0xff]   ;;  %v4789_v21 = vld [vmem:[%s6131_s5 + $0x14] ss:$8 sps:$4 sm:$0xff]   ;;  %v1966_v55 = vlaneseq }
  0xd8   : > { %v4785_v18 = vld [vmem:[%s6131_s5 + $0x504] ss:$8 sps:$4 sm:$0xff]   ;;  %3755 = vmatprep.subr.bf16.mxu1 %v4783_v17  ;;  %v4788_v20 = vld [vmem:[%s6131_s5 + $0x500] ss:$8 sps:$4 sm:$0xff]   ;;  %v4791_v22 = vld [vmem:[%s6131_s5 + $0x514] ss:$8 sps:$4 sm:$0xff]  }
  0xd9   : > { %3960 = vmatprep.subr.bf16.mxu0 %v4785_v18  ;;  %3756 = vmatpush1.bf16.msra.mxu1 %v4787_v19  ;;  %v4793_v23 = vld [vmem:[%s6131_s5 + $0x10] ss:$8 sps:$4 sm:$0xff]   ;;  %v4795_v25 = vld [vmem:[%s6131_s5 + $0x24] ss:$8 sps:$4 sm:$0xff]   ;;  %v4799_v27 = vld [vmem:[%s6131_s5 + $0x20] ss:$8 sps:$4 sm:$0xff]  }
  0xda   : > { %3961 = vmatpush1.bf16.msra.mxu0 %v4788_v20  ;;  %3757 = vmatprep.subr.bf16.mxu1 %v4789_v21  ;;  %v4794_v24 = vld [vmem:[%s6131_s5 + $0x510] ss:$8 sps:$4 sm:$0xff]   ;;  %v4797_v26 = vld [vmem:[%s6131_s5 + $0x524] ss:$8 sps:$4 sm:$0xff]   ;;  %v4800_v28 = vld [vmem:[%s6131_s5 + $0x520] ss:$8 sps:$4 sm:$0xff]  }
  0xdb   : > { %3962 = vmatprep.subr.bf16.mxu0 %v4791_v22  ;;  %v4801_v29 = vld [vmem:[%s6131_s5 + $0x34] ss:$8 sps:$4 sm:$0xff]   ;;  %v4805_v31 = vld [vmem:[%s6131_s5 + $0x30] ss:$8 sps:$4 sm:$0xff]   ;;  %v4807_v33 = vld [vmem:[%s6131_s5 + $0x44] ss:$8 sps:$4 sm:$0xff]  }
  0xdc   : > { %v4803_v30 = vld [vmem:[%s6131_s5 + $0x534] ss:$8 sps:$4 sm:$0xff]   ;;  %v4806_v32 = vld [vmem:[%s6131_s5 + $0x530] ss:$8 sps:$4 sm:$0xff]   ;;  %v4809_v34 = vld [vmem:[%s6131_s5 + $0x544] ss:$8 sps:$4 sm:$0xff]  }
  0xdd   : > { %3758 = vmatpush1.bf16.msra.mxu1 %v4793_v23  ;;  %v4811_v35 = vld [vmem:[%s6131_s5 + $0x40] ss:$8 sps:$4 sm:$0xff]   ;;  %v4813_v37 = vld [vmem:[%s6131_s5 + $0x54] ss:$8 sps:$4 sm:$0xff]   ;;  %v4817_v39 = vld [vmem:[%s6131_s5 + $0x50] ss:$8 sps:$4 sm:$0xff]  }
  0xde   : > { %3963 = vmatpush1.bf16.msra.mxu0 %v4794_v24  ;;  %3759 = vmatprep.subr.bf16.mxu1 %v4795_v25  ;;  %v4812_v36 = vld [vmem:[%s6131_s5 + $0x540] ss:$8 sps:$4 sm:$0xff]   ;;  %v4815_v38 = vld [vmem:[%s6131_s5 + $0x554] ss:$8 sps:$4 sm:$0xff]   ;;  %v4818_v40 = vld [vmem:[%s6131_s5 + $0x550] ss:$8 sps:$4 sm:$0xff]  }
  0xdf   : > { %3964 = vmatprep.subr.bf16.mxu0 %v4797_v26  ;;  %v4819_v41 = vld [vmem:[%s6131_s5 + $0x64] ss:$8 sps:$4 sm:$0xff]   ;;  %v4823_v43 = vld [vmem:[%s6131_s5 + $0x60] ss:$8 sps:$4 sm:$0xff]   ;;  %v4825_v45 = vld [vmem:[%s6131_s5 + $0x74] ss:$8 sps:$4 sm:$0xff]  }
  0xe0   : > { %v4821_v42 = vld [vmem:[%s6131_s5 + $0x564] ss:$8 sps:$4 sm:$0xff]   ;;  %v4824_v44 = vld [vmem:[%s6131_s5 + $0x560] ss:$8 sps:$4 sm:$0xff]   ;;  %v4827_v46 = vld [vmem:[%s6131_s5 + $0x574] ss:$8 sps:$4 sm:$0xff]  }
  0xe1   : > { %3760 = vmatpush1.bf16.msra.mxu1 %v4799_v27  ;;  %v4829_v47 = vld [vmem:[%s6131_s5 + $0x70] ss:$8 sps:$4 sm:$0xff]   ;;  %v4831_v49 = vld [vmem:[%s6131_s5 + $0x84] ss:$8 sps:$4 sm:$0xff]   ;;  %v4835_v51 = vld [vmem:[%s6131_s5 + $0x80] ss:$8 sps:$4 sm:$0xff]  }
  0xe2   : > { %3965 = vmatpush1.bf16.msra.mxu0 %v4800_v28  ;;  %3761 = vmatprep.subr.bf16.mxu1 %v4801_v29  ;;  %v4830_v48 = vld [vmem:[%s6131_s5 + $0x570] ss:$8 sps:$4 sm:$0xff]   ;;  %v4833_v50 = vld [vmem:[%s6131_s5 + $0x584] ss:$8 sps:$4 sm:$0xff]   ;;  %v4836_v52 = vld [vmem:[%s6131_s5 + $0x580] ss:$8 sps:$4 sm:$0xff]  }
  0xe3   : > { %3966 = vmatprep.subr.bf16.mxu0 %v4803_v30  ;;  %v5351_v53 = vmov 1983009808   ;;  %v4837_v56 = vld [vmem:[%s6131_s5 + $0x94] ss:$8 sps:$4 sm:$0xff]   ;;  %v4841_v58 = vld [vmem:[%s6131_s5 + $0x90] ss:$8 sps:$4 sm:$0xff]  }
  0xe4   : > { %v1964_v54 = vunpack.c.l.s4 %v5351_v53  ;;  %v4839_v57 = vld [vmem:[%s6131_s5 + $0x594] ss:$8 sps:$4 sm:$0xff]   ;;  %v6173_v60 = vshrl.u32 %v1966_v55, 7  ;;  %v4842_v61 = vld [vmem:[%s6131_s5 + $0x590] ss:$8 sps:$4 sm:$0xff]   ;;  %v1616_v9 = vld [vmem:[%s6119_s26 + $0x10] sm:$0xff] }
  0xe5   : > { %3762 = vmatpush1.bf16.msra.mxu1 %v4805_v31  ;;  %v4843_v62 = vld [vmem:[%s6131_s5 + $0xa4] ss:$8 sps:$4 sm:$0xff]   ;;  %v4847_v0 = vld [vmem:[%s6131_s5 + $0xa0] ss:$8 sps:$4 sm:$0xff]   ;;  %v4849_v3 = vld [vmem:[%s6131_s5 + $0xb4] ss:$8 sps:$4 sm:$0xff]   ;;  %v1996_v13 = vcombine.high %v1616_v9, %v1616_v9 }
  0xe6   : > { %3967 = vmatpush1.bf16.msra.mxu0 %v4806_v32  ;;  %3763 = vmatprep.subr.bf16.mxu1 %v4807_v33  ;;  %v1965_v59 = vunpack.c.0.s8 %v1964_v54  ;;  %v4845_v63 = vld [vmem:[%s6131_s5 + $0x5a4] ss:$8 sps:$4 sm:$0xff]   ;;  %v4848_v1 = vld [vmem:[%s6131_s5 + $0x5a0] ss:$8 sps:$4 sm:$0xff]   ;;  %v4851_v4 = vld [vmem:[%s6131_s5 + $0x5b4] ss:$8 sps:$4 sm:$0xff]  }
  0xe7   : > { %3968 = vmatprep.subr.bf16.mxu0 %v4809_v34  ;;  %v1614_v5 = vld [vmem:[%s6119_s26] sm:$0xff]  ;;  %v4855_v10 = vld [vmem:[%s6131_s5 + $0xc4] ss:$8 sps:$4 sm:$0xff]   ;;  %v4859_v15 = vld [vmem:[%s6131_s5 + $0xc0] ss:$8 sps:$4 sm:$0xff]   ;;  %p4680_p13 = scmp.ne.s32.totalorder %s5332_s14, 6 }
  0xe8   : > { %v6181_v2 = vsub.s32 %v1965_v59, %v6173_v60  ;;  %v4853_v6 = vld [vmem:[%s6131_s5 + $0xb0] ss:$8 sps:$4 sm:$0xff]   ;;  %v4857_v11 = vld [vmem:[%s6131_s5 + $0x5c4] ss:$8 sps:$4 sm:$0xff]   ;;  %v4860_v16 = vld [vmem:[%s6131_s5 + $0x5c0] ss:$8 sps:$4 sm:$0xff]   ;;  %v1962_v28 = vcombine.high %v1614_v5, %v1614_v5 }
  0xe9   : > { %3764 = vmatpush1.bf16.msra.mxu1 %v4811_v35  ;;  %v4854_v8 = vld [vmem:[%s6131_s5 + $0x5b0] ss:$8 sps:$4 sm:$0xff]   ;;  %v4861_v17 = vld [vmem:[%s6131_s5 + $0xd4] ss:$8 sps:$4 sm:$0xff]   ;;  %v4867_v22 = vld [vmem:[%s6131_s5 + $0xe4] ss:$8 sps:$4 sm:$0xff]  }
  0xea   : > { %3969 = vmatpush1.bf16.msra.mxu0 %v4812_v36  ;;  %3765 = vmatprep.subr.bf16.mxu1 %v4813_v37  ;;  %v1969_v7 = vrot.slane %v1614_v5, %v6181_v2  ;;  %v2010_v14 = vrot.slane %v1996_v13, %v6181_v2  ;;  %v4863_v18 = vld [vmem:[%s6131_s5 + $0x5d4] ss:$8 sps:$4 sm:$0xff]   ;;  %v4865_v20 = vld [vmem:[%s6131_s5 + $0xd0] ss:$8 sps:$4 sm:$0xff]   ;;  %v4869_v23 = vld [vmem:[%s6131_s5 + $0x5e4] ss:$8 sps:$4 sm:$0xff]   ;;  %v6210_v33 = vrot.slane %v1962_v28, %v6181_v2 }
  0xeb   : > { %3970 = vmatprep.subr.bf16.mxu0 %v4815_v38  ;;  %v4866_v21 = vld [vmem:[%s6131_s5 + $0x5d0] ss:$8 sps:$4 sm:$0xff]   ;;  %v4871_v24 = vld [vmem:[%s6131_s5 + $0xe0] ss:$8 sps:$4 sm:$0xff]   ;;  %v4873_v26 = vld [vmem:[%s6131_s5 + $0xf4] ss:$8 sps:$4 sm:$0xff]  }
  0xec   : > { %v1977_v12 = vcombine.high %v1969_v7, %v1969_v7  ;;  %v2012_v19 = vcombine.high %v2010_v14, %v2010_v14  ;;  %v4872_v25 = vld [vmem:[%s6131_s5 + $0x5e0] ss:$8 sps:$4 sm:$0xff]   ;;  %v4875_v27 = vld [vmem:[%s6131_s5 + $0x5f4] ss:$8 sps:$4 sm:$0xff]   ;;  %v4877_v29 = vld [vmem:[%s6131_s5 + $0xf0] ss:$8 sps:$4 sm:$0xff]   ;;  %v1978_v38 = vcombine.high %v6210_v33, %v6210_v33 }
  0xed   : > { %3766 = vmatpush1.bf16.msra.mxu1 %v4817_v39  ;;  %v4878_v30 = vld [vmem:[%s6131_s5 + $0x5f0] ss:$8 sps:$4 sm:$0xff]   ;;  %v4882_v31 = vld [vmem:[%s6131_s5 + $0x104] ss:$8 sps:$4 sm:$0xff]   ;;  %v4880_v34 = vld [vmem:[%s6131_s5 + $0x100] ss:$8 sps:$4 sm:$0xff]  }
  0xee   : > { %3971 = vmatpush1.bf16.msra.mxu0 %v4818_v40  ;;  %3767 = vmatprep.subr.bf16.mxu1 %v4819_v41  ;;  %v4886_v32 = vld [vmem:[%s6131_s5 + $0x604] ss:$8 sps:$4 sm:$0xff]   ;;  %v4884_v35 = vld [vmem:[%s6131_s5 + $0x600] ss:$8 sps:$4 sm:$0xff]   ;;  %v4889_v36 = vld [vmem:[%s6131_s5 + $0x114] ss:$8 sps:$4 sm:$0xff]  }
  0xef   : > { %3972 = vmatprep.subr.bf16.mxu0 %v4821_v42  ;;  %3787 = vmatprep.mubr.bf16.mxu1 %v1977_v12  ;;  %v4892_v37 = vld [vmem:[%s6131_s5 + $0x614] ss:$8 sps:$4 sm:$0xff]   ;;  %v4887_v39 = vld [vmem:[%s6131_s5 + $0x110] ss:$8 sps:$4 sm:$0xff]   ;;  %v4895_v41 = vld [vmem:[%s6131_s5 + $0x124] ss:$8 sps:$4 sm:$0xff]  }
  0xf0   : > { %3992 = vmatprep.mubr.bf16.mxu0 %v2012_v19  ;;  %v4890_v40 = vld [vmem:[%s6131_s5 + $0x610] ss:$8 sps:$4 sm:$0xff]   ;;  %v4898_v42 = vld [vmem:[%s6131_s5 + $0x624] ss:$8 sps:$4 sm:$0xff]   ;;  %v4913_v53 = vld [vmem:[%s6131_s5 + $0x154] ss:$8 sps:$4 sm:$0xff]  }
  0xf1   : > { %3768 = vmatpush1.bf16.msra.mxu1 %v4823_v43  ;;  %v4893_v43 = vld [vmem:[%s6131_s5 + $0x120] ss:$8 sps:$4 sm:$0xff]   ;;  %v4916_v54 = vld [vmem:[%s6131_s5 + $0x654] ss:$8 sps:$4 sm:$0xff]   ;;  %v4911_v55 = vld [vmem:[%s6131_s5 + $0x150] ss:$8 sps:$4 sm:$0xff]  }
  0xf2   : > { %3973 = vmatpush1.bf16.msra.mxu0 %v4824_v44  ;;  %3769 = vmatprep.subr.bf16.mxu1 %v4825_v45  ;;  %v4896_v44 = vld [vmem:[%s6131_s5 + $0x620] ss:$8 sps:$4 sm:$0xff]   ;;  %v4901_v45 = vld [vmem:[%s6131_s5 + $0x134] ss:$8 sps:$4 sm:$0xff]   ;;  %v4926_v5 = vld [vmem:[%s6131_s5 + $0x670] ss:$8 sps:$4 sm:$0xff]  }
  0xf3   : > { %3974 = vmatprep.subr.bf16.mxu0 %v4827_v46  ;;  %v4904_v46 = vld [vmem:[%s6131_s5 + $0x634] ss:$8 sps:$4 sm:$0xff]   ;;  %v4917_v59 = vld [vmem:[%s6131_s5 + $0x160] ss:$8 sps:$4 sm:$0xff]   ;;  %v4935_v12 = vld [vmem:[%s6131_s5 + $0x190] ss:$8 sps:$4 sm:$0xff]  }
  0xf4   : > { %v4932_v9 = vld [vmem:[%s6131_s5 + $0x680] ss:$8 sps:$4 sm:$0xff]   ;;  %v4938_v13 = vld [vmem:[%s6131_s5 + $0x690] ss:$8 sps:$4 sm:$0xff]   ;;  %v4952_v19 = vld [vmem:[%s6131_s5 + $0x6b4] ss:$8 sps:$4 sm:$0xff]  }
  0xf5   : > { %3770 = vmatpush1.bf16.msra.mxu1 %v4829_v47  ;;  %v4899_v47 = vld [vmem:[%s6131_s5 + $0x130] ss:$8 sps:$4 sm:$0xff]  }
  0xf6   : > { %3975 = vmatpush1.bf16.msra.mxu0 %v4830_v48  ;;  %3771 = vmatprep.subr.bf16.mxu1 %v4831_v49  ;;  %v4902_v48 = vld [vmem:[%s6131_s5 + $0x630] ss:$8 sps:$4 sm:$0xff]   ;;  %v4907_v49 = vld [vmem:[%s6131_s5 + $0x144] ss:$8 sps:$4 sm:$0xff]  }
  0xf7   : > { %3976 = vmatprep.subr.bf16.mxu0 %v4833_v50  ;;  %v4910_v50 = vld [vmem:[%s6131_s5 + $0x644] ss:$8 sps:$4 sm:$0xff]   ;;  %v4959_v28 = vld [vmem:[%s6131_s5 + $0x1d0] ss:$8 sps:$4 sm:$0xff]  }
  0xf9   : > { %3772 = vmatpush1.bf16.msra.mxu1 %v4835_v51  ;;  %v4905_v51 = vld [vmem:[%s6131_s5 + $0x140] ss:$8 sps:$4 sm:$0xff]  }
  0xfa   : > { %3977 = vmatpush1.bf16.msra.mxu0 %v4836_v52  ;;  %3773 = vmatprep.subr.bf16.mxu1 %v4837_v56  ;;  %v4908_v52 = vld [vmem:[%s6131_s5 + $0x640] ss:$8 sps:$4 sm:$0xff]   ;;  %v4914_v56 = vld [vmem:[%s6131_s5 + $0x650] ss:$8 sps:$4 sm:$0xff]  }
  0xfb   : > { %3978 = vmatprep.subr.bf16.mxu0 %v4839_v57  ;;  %v4919_v57 = vld [vmem:[%s6131_s5 + $0x164] ss:$8 sps:$4 sm:$0xff]  }
  0xfd   : > { %3774 = vmatpush1.bf16.msra.mxu1 %v4841_v58  ;;  %v4922_v58 = vld [vmem:[%s6131_s5 + $0x664] ss:$8 sps:$4 sm:$0xff]  }
  0xfe   : > { %3979 = vmatpush1.bf16.msra.mxu0 %v4842_v61  ;;  %3775 = vmatprep.subr.bf16.mxu1 %v4843_v62  ;;  %v6240_v61 = vld [vmem:[%s6119_s26 + $0x18] sm:$0xff]  ;;  %v4920_v62 = vld [vmem:[%s6131_s5 + $0x660] ss:$8 sps:$4 sm:$0xff]  }
  0xff   : > { %3980 = vmatprep.subr.bf16.mxu0 %v4845_v63  ;;  %v4925_v63 = vld [vmem:[%s6131_s5 + $0x174] ss:$8 sps:$4 sm:$0xff]  }
 0x101   : > { %3776 = vmatpush1.bf16.msra.mxu1 %v4847_v0  ;;  %v6246_v0 = vrot.slane %v6240_v61, %v6181_v2 }
 0x102   : > { %3981 = vmatpush1.bf16.msra.mxu0 %v4848_v1  ;;  %3777 = vmatprep.subr.bf16.mxu1 %v4849_v3  ;;  %v4928_v1 = vld [vmem:[%s6131_s5 + $0x674] ss:$8 sps:$4 sm:$0xff]  }
 0x103   : > { %3982 = vmatprep.subr.bf16.mxu0 %v4851_v4  ;;  %v2028_v3 = vcombine.high %v6246_v0, %v6246_v0  ;;  %v4923_v4 = vld [vmem:[%s6131_s5 + $0x170] ss:$8 sps:$4 sm:$0xff]  }
 0x105   : > { %3778 = vmatpush1.bf16.msra.mxu1 %v4853_v6  ;;  %v4931_v6 = vld [vmem:[%s6131_s5 + $0x184] ss:$8 sps:$4 sm:$0xff]  }
 0x106   : > { %3983 = vmatpush1.bf16.msra.mxu0 %v4854_v8  ;;  %3779 = vmatprep.subr.bf16.mxu1 %v4855_v10  ;;  %v4929_v8 = vld [vmem:[%s6131_s5 + $0x180] ss:$8 sps:$4 sm:$0xff]   ;;  %v4937_v10 = vld [vmem:[%s6131_s5 + $0x194] ss:$8 sps:$4 sm:$0xff]  }
 0x107   : > { %3984 = vmatprep.subr.bf16.mxu0 %v4857_v11  ;;  %v4940_v11 = vld [vmem:[%s6131_s5 + $0x694] ss:$8 sps:$4 sm:$0xff]  }
 0x109   : > { %3780 = vmatpush1.bf16.msra.mxu1 %v4859_v15  ;;  %v4946_v15 = vld [vmem:[%s6131_s5 + $0x6a4] ss:$8 sps:$4 sm:$0xff]  }
 0x10a   : > { %3985 = vmatpush1.bf16.msra.mxu0 %v4860_v16  ;;  %3781 = vmatprep.subr.bf16.mxu1 %v4861_v17  ;;  %v4941_v16 = vld [vmem:[%s6131_s5 + $0x1a0] ss:$8 sps:$4 sm:$0xff]  }
 0x10b   : > { %3986 = vmatprep.subr.bf16.mxu0 %v4863_v18  ;;  %v4944_v17 = vld [vmem:[%s6131_s5 + $0x6a0] ss:$8 sps:$4 sm:$0xff]   ;;  %v4949_v18 = vld [vmem:[%s6131_s5 + $0x1b4] ss:$8 sps:$4 sm:$0xff]  }
 0x10d   : > { %3782 = vmatpush1.bf16.msra.mxu1 %v4865_v20  ;;  %v4947_v20 = vld [vmem:[%s6131_s5 + $0x1b0] ss:$8 sps:$4 sm:$0xff]  }
 0x10e   : > { %3987 = vmatpush1.bf16.msra.mxu0 %v4866_v21  ;;  %3783 = vmatprep.subr.bf16.mxu1 %v4867_v22  ;;  %v4950_v21 = vld [vmem:[%s6131_s5 + $0x6b0] ss:$8 sps:$4 sm:$0xff]   ;;  %v4955_v22 = vld [vmem:[%s6131_s5 + $0x1c4] ss:$8 sps:$4 sm:$0xff]  }
 0x10f   : > { %3988 = vmatprep.subr.bf16.mxu0 %v4869_v23  ;;  %v4958_v23 = vld [vmem:[%s6131_s5 + $0x6c4] ss:$8 sps:$4 sm:$0xff]  }
 0x111   : > { %3784 = vmatpush1.bf16.msra.mxu1 %v4871_v24  ;;  %v4953_v24 = vld [vmem:[%s6131_s5 + $0x1c0] ss:$8 sps:$4 sm:$0xff]  }
 0x112   : > { %3989 = vmatpush1.bf16.msra.mxu0 %v4872_v25  ;;  %3785 = vmatprep.subr.bf16.mxu1 %v4873_v26  ;;  %v4956_v25 = vld [vmem:[%s6131_s5 + $0x6c0] ss:$8 sps:$4 sm:$0xff]   ;;  %v4961_v26 = vld [vmem:[%s6131_s5 + $0x1d4] ss:$8 sps:$4 sm:$0xff]  }
 0x113   : > { %3990 = vmatprep.subr.bf16.mxu0 %v4875_v27  ;;  %v4964_v27 = vld [vmem:[%s6131_s5 + $0x6d4] ss:$8 sps:$4 sm:$0xff]  }
 0x115   : > { %3786 = vmatpush1.bf16.msra.mxu1 %v4877_v29  ;;  %v4962_v29 = vld [vmem:[%s6131_s5 + $0x6d0] ss:$8 sps:$4 sm:$0xff]  }
 0x116   : > { %3991 = vmatpush1.bf16.msra.mxu0 %v4878_v30  ;;  %3796 = vmatprep.subr.bf16.mxu1 %v4882_v31  ;;  %v4967_v30 = vld [vmem:[%s6131_s5 + $0x1e4] ss:$8 sps:$4 sm:$0xff]  }
 0x117   : > { %4001 = vmatprep.subr.bf16.mxu0 %v4886_v32  ;;  %v4970_v31 = vld [vmem:[%s6131_s5 + $0x6e4] ss:$8 sps:$4 sm:$0xff]   ;;  %v4965_v32 = vld [vmem:[%s6131_s5 + $0x1e0] ss:$8 sps:$4 sm:$0xff]  }
 0x118   : > { %3788 = vmatmul.mubr.bf16.vlgmr.msra.gmra.mrb[0].mxu1 %v1969_v7  ;;  %v4934_v7 = vld [vmem:[%s6131_s5 + $0x684] ss:$8 sps:$4 sm:$0xff]  }
 0x119   : > { %3993 = vmatmul.mubr.bf16.vlgmr.msra.gmra.mrb[0].mxu0 %v2010_v14  ;;  %3797 = vmatpush1.bf16.msra.mxu1 %v4880_v34  ;;  %v4943_v14 = vld [vmem:[%s6131_s5 + $0x1a4] ss:$8 sps:$4 sm:$0xff]   ;;  %v4968_v34 = vld [vmem:[%s6131_s5 + $0x6e0] ss:$8 sps:$4 sm:$0xff]  }
 0x11a   : > { %4002 = vmatpush1.bf16.msra.mxu0 %v4884_v35  ;;  %3798 = vmatprep.subr.bf16.mxu1 %v4889_v36  ;;  %v4973_v35 = vld [vmem:[%s6131_s5 + $0x1f4] ss:$8 sps:$4 sm:$0xff]  }
 0x11b   : > { %4003 = vmatprep.subr.bf16.mxu0 %v4892_v37  ;;  %3828 = vmatprep.mubr.bf16.mxu1 %v1978_v38  ;;  %v4976_v36 = vld [vmem:[%s6131_s5 + $0x6f4] ss:$8 sps:$4 sm:$0xff]   ;;  %v2013_v37 = vcombine.high %v6240_v61, %v6240_v61  ;;  %v4971_v38 = vld [vmem:[%s6131_s5 + $0x1f0] ss:$8 sps:$4 sm:$0xff]   ;;  %v5003_v61 = vld [vmem:[%s6131_s5 + $0x244] ss:$8 sps:$4 sm:$0xff]  }
 0x11c   : > { %4033 = vmatprep.mubr.bf16.mxu0 %v2028_v3  ;;  %v5012_v3 = vld [vmem:[%s6131_s5 + $0x754] ss:$8 sps:$4 sm:$0xff]  }
 0x11d   : > { %3799 = vmatpush1.bf16.msra.mxu1 %v4887_v39  ;;  %v4974_v39 = vld [vmem:[%s6131_s5 + $0x6f0] ss:$8 sps:$4 sm:$0xff]  }
 0x11e   : > { %4004 = vmatpush1.bf16.msra.mxu0 %v4890_v40  ;;  %3800 = vmatprep.subr.bf16.mxu1 %v4895_v41  ;;  %v4979_v40 = vld [vmem:[%s6131_s5 + $0x204] ss:$8 sps:$4 sm:$0xff]  }
 0x11f   : > { %4005 = vmatprep.subr.bf16.mxu0 %v4898_v42  ;;  %v4982_v41 = vld [vmem:[%s6131_s5 + $0x704] ss:$8 sps:$4 sm:$0xff]   ;;  %v6290_v42 = vrot.slane %v2013_v37, %v6181_v2  ;;  %v5055_v37 = vld [vmem:[%s6131_s5 + $0x2d0] ss:$8 sps:$4 sm:$0xff]  }
 0x121   : > { %3801 = vmatpush1.bf16.msra.mxu1 %v4893_v43  ;;  %v4977_v43 = vld [vmem:[%s6131_s5 + $0x200] ss:$8 sps:$4 sm:$0xff]  }
 0x122   : > { %4006 = vmatpush1.bf16.msra.mxu0 %v4896_v44  ;;  %3802 = vmatprep.subr.bf16.mxu1 %v4901_v45  ;;  %v4980_v44 = vld [vmem:[%s6131_s5 + $0x700] ss:$8 sps:$4 sm:$0xff]   ;;  %v4985_v45 = vld [vmem:[%s6131_s5 + $0x214] ss:$8 sps:$4 sm:$0xff]  }
 0x123   : > { %4007 = vmatprep.subr.bf16.mxu0 %v4904_v46  ;;  %v4988_v46 = vld [vmem:[%s6131_s5 + $0x714] ss:$8 sps:$4 sm:$0xff]  }
 0x125   : > { %3803 = vmatpush1.bf16.msra.mxu1 %v4899_v47  ;;  %v6297_v47 = vld [vmem:[%s6119_s26 + $0x8] sm:$0xff] }
 0x126   : > { %4008 = vmatpush1.bf16.msra.mxu0 %v4902_v48  ;;  %3804 = vmatprep.subr.bf16.mxu1 %v4907_v49  ;;  %v6301_v48 = vrot.slane %v6297_v47, %v6181_v2  ;;  %v2029_v49 = vcombine.high %v6290_v42, %v6290_v42 }
 0x127   : > { %4009 = vmatprep.subr.bf16.mxu0 %v4910_v50  ;;  %v4983_v50 = vld [vmem:[%s6131_s5 + $0x210] ss:$8 sps:$4 sm:$0xff]  }
 0x129   : > { %3805 = vmatpush1.bf16.msra.mxu1 %v4905_v51  ;;  %v4986_v51 = vld [vmem:[%s6131_s5 + $0x710] ss:$8 sps:$4 sm:$0xff]  }
 0x12a   : > { %4010 = vmatpush1.bf16.msra.mxu0 %v4908_v52  ;;  %3806 = vmatprep.subr.bf16.mxu1 %v4913_v53  ;;  %v4991_v52 = vld [vmem:[%s6131_s5 + $0x224] ss:$8 sps:$4 sm:$0xff]   ;;  %v1994_v53 = vcombine.high %v6301_v48, %v6301_v48 }
 0x12b   : > { %4011 = vmatprep.subr.bf16.mxu0 %v4916_v54  ;;  %v4994_v54 = vld [vmem:[%s6131_s5 + $0x724] ss:$8 sps:$4 sm:$0xff]  }
 0x12d   : > { %3807 = vmatpush1.bf16.msra.mxu1 %v4911_v55  ;;  %v4992_v55 = vld [vmem:[%s6131_s5 + $0x720] ss:$8 sps:$4 sm:$0xff]  }
 0x12e   : > { %4012 = vmatpush1.bf16.msra.mxu0 %v4914_v56  ;;  %3808 = vmatprep.subr.bf16.mxu1 %v4919_v57  ;;  %v4997_v56 = vld [vmem:[%s6131_s5 + $0x234] ss:$8 sps:$4 sm:$0xff]  }
 0x12f   : > { %4013 = vmatprep.subr.bf16.mxu0 %v4922_v58  ;;  %v5000_v57 = vld [vmem:[%s6131_s5 + $0x734] ss:$8 sps:$4 sm:$0xff]   ;;  %v4995_v58 = vld [vmem:[%s6131_s5 + $0x230] ss:$8 sps:$4 sm:$0xff]  }
 0x131   : > { %3809 = vmatpush1.bf16.msra.mxu1 %v4917_v59  ;;  %v4998_v59 = vld [vmem:[%s6131_s5 + $0x730] ss:$8 sps:$4 sm:$0xff]  }
 0x132   : > { %4014 = vmatpush1.bf16.msra.mxu0 %v4920_v62  ;;  %3810 = vmatprep.subr.bf16.mxu1 %v4925_v63  ;;  %v5006_v62 = vld [vmem:[%s6131_s5 + $0x744] ss:$8 sps:$4 sm:$0xff]   ;;  %v5001_v63 = vld [vmem:[%s6131_s5 + $0x240] ss:$8 sps:$4 sm:$0xff]  }
 0x133   : > { %4015 = vmatprep.subr.bf16.mxu0 %v4928_v1  ;;  %v5009_v1 = vld [vmem:[%s6131_s5 + $0x254] ss:$8 sps:$4 sm:$0xff]  }
 0x135   : > { %3811 = vmatpush1.bf16.msra.mxu1 %v4923_v4  ;;  %v5007_v4 = vld [vmem:[%s6131_s5 + $0x250] ss:$8 sps:$4 sm:$0xff]  }
 0x136   : > { %4016 = vmatpush1.bf16.msra.mxu0 %v4926_v5  ;;  %3812 = vmatprep.subr.bf16.mxu1 %v4931_v6  ;;  %v5010_v5 = vld [vmem:[%s6131_s5 + $0x750] ss:$8 sps:$4 sm:$0xff]   ;;  %v5015_v6 = vld [vmem:[%s6131_s5 + $0x264] ss:$8 sps:$4 sm:$0xff]  }
 0x137   : > { %4017 = vmatprep.subr.bf16.mxu0 %v4934_v7  ;;  %v5018_v7 = vld [vmem:[%s6131_s5 + $0x764] ss:$8 sps:$4 sm:$0xff]  }
 0x139   : > { %3813 = vmatpush1.bf16.msra.mxu1 %v4929_v8  ;;  %v5013_v8 = vld [vmem:[%s6131_s5 + $0x260] ss:$8 sps:$4 sm:$0xff]  }
 0x13a   : > { %4018 = vmatpush1.bf16.msra.mxu0 %v4932_v9  ;;  %3814 = vmatprep.subr.bf16.mxu1 %v4937_v10  ;;  %v5016_v9 = vld [vmem:[%s6131_s5 + $0x760] ss:$8 sps:$4 sm:$0xff]   ;;  %v5021_v10 = vld [vmem:[%s6131_s5 + $0x274] ss:$8 sps:$4 sm:$0xff]  }
 0x13b   : > { %4019 = vmatprep.subr.bf16.mxu0 %v4940_v11  ;;  %v5024_v11 = vld [vmem:[%s6131_s5 + $0x774] ss:$8 sps:$4 sm:$0xff]  }
 0x13d   : > { %3815 = vmatpush1.bf16.msra.mxu1 %v4935_v12  ;;  %v5019_v12 = vld [vmem:[%s6131_s5 + $0x270] ss:$8 sps:$4 sm:$0xff]  }
 0x13e   : > { %4020 = vmatpush1.bf16.msra.mxu0 %v4938_v13  ;;  %3816 = vmatprep.subr.bf16.mxu1 %v4943_v14  ;;  %v5022_v13 = vld [vmem:[%s6131_s5 + $0x770] ss:$8 sps:$4 sm:$0xff]   ;;  %v5027_v14 = vld [vmem:[%s6131_s5 + $0x284] ss:$8 sps:$4 sm:$0xff]  }
 0x13f   : > { %4021 = vmatprep.subr.bf16.mxu0 %v4946_v15  ;;  %v5030_v15 = vld [vmem:[%s6131_s5 + $0x784] ss:$8 sps:$4 sm:$0xff]  }
 0x141   : > { %3817 = vmatpush1.bf16.msra.mxu1 %v4941_v16  ;;  %v5025_v16 = vld [vmem:[%s6131_s5 + $0x280] ss:$8 sps:$4 sm:$0xff]  }
 0x142   : > { %4022 = vmatpush1.bf16.msra.mxu0 %v4944_v17  ;;  %3818 = vmatprep.subr.bf16.mxu1 %v4949_v18  ;;  %v5028_v17 = vld [vmem:[%s6131_s5 + $0x780] ss:$8 sps:$4 sm:$0xff]   ;;  %v5033_v18 = vld [vmem:[%s6131_s5 + $0x294] ss:$8 sps:$4 sm:$0xff]  }
 0x143   : > { %4023 = vmatprep.subr.bf16.mxu0 %v4952_v19  ;;  %v5036_v19 = vld [vmem:[%s6131_s5 + $0x794] ss:$8 sps:$4 sm:$0xff]  }
 0x145   : > { %3819 = vmatpush1.bf16.msra.mxu1 %v4947_v20  ;;  %v5031_v20 = vld [vmem:[%s6131_s5 + $0x290] ss:$8 sps:$4 sm:$0xff]  }
 0x146   : > { %4024 = vmatpush1.bf16.msra.mxu0 %v4950_v21  ;;  %3820 = vmatprep.subr.bf16.mxu1 %v4955_v22  ;;  %v5034_v21 = vld [vmem:[%s6131_s5 + $0x790] ss:$8 sps:$4 sm:$0xff]   ;;  %v5039_v22 = vld [vmem:[%s6131_s5 + $0x2a4] ss:$8 sps:$4 sm:$0xff]  }
 0x147   : > { %4025 = vmatprep.subr.bf16.mxu0 %v4958_v23  ;;  %v5042_v23 = vld [vmem:[%s6131_s5 + $0x7a4] ss:$8 sps:$4 sm:$0xff]  }
 0x149   : > { %3821 = vmatpush1.bf16.msra.mxu1 %v4953_v24  ;;  %v5037_v24 = vld [vmem:[%s6131_s5 + $0x2a0] ss:$8 sps:$4 sm:$0xff]  }
 0x14a   : > { %4026 = vmatpush1.bf16.msra.mxu0 %v4956_v25  ;;  %3822 = vmatprep.subr.bf16.mxu1 %v4961_v26  ;;  %v5040_v25 = vld [vmem:[%s6131_s5 + $0x7a0] ss:$8 sps:$4 sm:$0xff]   ;;  %v5045_v26 = vld [vmem:[%s6131_s5 + $0x2b4] ss:$8 sps:$4 sm:$0xff]  }
 0x14b   : > { %4027 = vmatprep.subr.bf16.mxu0 %v4964_v27  ;;  %v5048_v27 = vld [vmem:[%s6131_s5 + $0x7b4] ss:$8 sps:$4 sm:$0xff]  }
 0x14d   : > { %3823 = vmatpush1.bf16.msra.mxu1 %v4959_v28  ;;  %v5043_v28 = vld [vmem:[%s6131_s5 + $0x2b0] ss:$8 sps:$4 sm:$0xff]  }
 0x14e   : > { %4028 = vmatpush1.bf16.msra.mxu0 %v4962_v29  ;;  %3824 = vmatprep.subr.bf16.mxu1 %v4967_v30  ;;  %v5046_v29 = vld [vmem:[%s6131_s5 + $0x7b0] ss:$8 sps:$4 sm:$0xff]   ;;  %v5051_v30 = vld [vmem:[%s6131_s5 + $0x2c4] ss:$8 sps:$4 sm:$0xff]  }
 0x14f   : > { %4029 = vmatprep.subr.bf16.mxu0 %v4970_v31  ;;  %v5054_v31 = vld [vmem:[%s6131_s5 + $0x7c4] ss:$8 sps:$4 sm:$0xff]  }
 0x151   : > { %3825 = vmatpush1.bf16.msra.mxu1 %v4965_v32  ;;  %v5049_v32 = vld [vmem:[%s6131_s5 + $0x2c0] ss:$8 sps:$4 sm:$0xff]  }
 0x152   : > { %4030 = vmatpush1.bf16.msra.mxu0 %v4968_v34  ;;  %3826 = vmatprep.subr.bf16.mxu1 %v4973_v35  ;;  %v5052_v34 = vld [vmem:[%s6131_s5 + $0x7c0] ss:$8 sps:$4 sm:$0xff]   ;;  %v5057_v35 = vld [vmem:[%s6131_s5 + $0x2d4] ss:$8 sps:$4 sm:$0xff]  }
 0x153   : > { %4031 = vmatprep.subr.bf16.mxu0 %v4976_v36  ;;  %v5060_v36 = vld [vmem:[%s6131_s5 + $0x7d4] ss:$8 sps:$4 sm:$0xff]  }
 0x155   : > { %3827 = vmatpush1.bf16.msra.mxu1 %v4971_v38  ;;  %v5058_v38 = vld [vmem:[%s6131_s5 + $0x7d0] ss:$8 sps:$4 sm:$0xff]  }
 0x156   : > { %4032 = vmatpush1.bf16.msra.mxu0 %v4974_v39  ;;  %3837 = vmatprep.subr.bf16.mxu1 %v4979_v40  ;;  %v5063_v39 = vld [vmem:[%s6131_s5 + $0x2e4] ss:$8 sps:$4 sm:$0xff]  }
 0x157   : > { %4042 = vmatprep.subr.bf16.mxu0 %v4982_v41  ;;  %v5066_v40 = vld [vmem:[%s6131_s5 + $0x7e4] ss:$8 sps:$4 sm:$0xff]   ;;  %v5061_v41 = vld [vmem:[%s6131_s5 + $0x2e0] ss:$8 sps:$4 sm:$0xff]  }
 0x158   : > { %3829 = vmatmul.mubr.bf16.vlgmr.msra.gmra.mrb[0].mxu1 %v6210_v33  ;;  %v4989_v33 = vld [vmem:[%s6131_s5 + $0x220] ss:$8 sps:$4 sm:$0xff]  }
 0x159   : > { %4034 = vmatmul.mubr.bf16.vlgmr.msra.gmra.mrb[0].mxu0 %v6246_v0  ;;  %3838 = vmatpush1.bf16.msra.mxu1 %v4977_v43  ;;  %v5004_v0 = vld [vmem:[%s6131_s5 + $0x740] ss:$8 sps:$4 sm:$0xff]  }
 0x15a   : > { %4043 = vmatpush1.bf16.msra.mxu0 %v4980_v44  ;;  %3839 = vmatprep.subr.bf16.mxu1 %v4985_v45  ;;  %v5064_v43 = vld [vmem:[%s6131_s5 + $0x7e0] ss:$8 sps:$4 sm:$0xff]   ;;  %v5069_v44 = vld [vmem:[%s6131_s5 + $0x2f4] ss:$8 sps:$4 sm:$0xff]  }
 0x15b   : > { %4044 = vmatprep.subr.bf16.mxu0 %v4988_v46  ;;  %3869 = vmatprep.mubr.bf16.mxu1 %v1994_v53  ;;  %v5072_v45 = vld [vmem:[%s6131_s5 + $0x7f4] ss:$8 sps:$4 sm:$0xff]   ;;  %v5067_v46 = vld [vmem:[%s6131_s5 + $0x2f0] ss:$8 sps:$4 sm:$0xff]   ;;  %v5079_v53 = vld [vmem:[%s6131_s5 + $0x804] ss:$8 sps:$4 sm:$0xff]  }
 0x15c   : > { %4074 = vmatprep.mubr.bf16.mxu0 %v2029_v49  ;;  %v1979_v49 = vcombine.high %v6297_v47, %v6297_v47  ;;  %v5073_v47 = vld [vmem:[%s6131_s5 + $0x300] ss:$8 sps:$4 sm:$0xff]  }
 0x15d   : > { %3840 = vmatpush1.bf16.msra.mxu1 %v4983_v50  ;;  %v6369_v50 = vld [vmem:[%s6119_s26 + $0x20] sm:$0xff] }
 0x15e   : > { %4045 = vmatpush1.bf16.msra.mxu0 %v4986_v51  ;;  %3841 = vmatprep.subr.bf16.mxu1 %v4991_v52  ;;  %v5070_v51 = vld [vmem:[%s6131_s5 + $0x7f0] ss:$8 sps:$4 sm:$0xff]   ;;  %v5075_v52 = vld [vmem:[%s6131_s5 + $0x304] ss:$8 sps:$4 sm:$0xff]  }
 0x15f   : > { %4046 = vmatprep.subr.bf16.mxu0 %v4994_v54  ;;  %v6375_v54 = vrot.slane %v1979_v49, %v6181_v2  ;;  %v5155_v49 = vld [vmem:[%s6131_s5 + $0x8d0] ss:$8 sps:$4 sm:$0xff]  }
 0x161   : > { %3842 = vmatpush1.bf16.msra.mxu1 %v4989_v33  ;;  %v6379_v33 = vrot.slane %v6369_v50, %v6181_v2 }
 0x162   : > { %4047 = vmatpush1.bf16.msra.mxu0 %v4992_v55  ;;  %3843 = vmatprep.subr.bf16.mxu1 %v4997_v56  ;;  %v5077_v55 = vld [vmem:[%s6131_s5 + $0x800] ss:$8 sps:$4 sm:$0xff]   ;;  %v5082_v56 = vld [vmem:[%s6131_s5 + $0x314] ss:$8 sps:$4 sm:$0xff]  }
 0x163   : > { %4048 = vmatprep.subr.bf16.mxu0 %v5000_v57  ;;  %v5085_v57 = vld [vmem:[%s6131_s5 + $0x814] ss:$8 sps:$4 sm:$0xff]  }
 0x165   : > { %3844 = vmatpush1.bf16.msra.mxu1 %v4995_v58  ;;  %v1995_v58 = vcombine.high %v6375_v54, %v6375_v54 }
 0x166   : > { %4049 = vmatpush1.bf16.msra.mxu0 %v4998_v59  ;;  %3845 = vmatprep.subr.bf16.mxu1 %v5003_v61  ;;  %v2045_v59 = vcombine.high %v6379_v33, %v6379_v33  ;;  %v5080_v61 = vld [vmem:[%s6131_s5 + $0x310] ss:$8 sps:$4 sm:$0xff]  }
 0x167   : > { %4050 = vmatprep.subr.bf16.mxu0 %v5006_v62  ;;  %v5083_v62 = vld [vmem:[%s6131_s5 + $0x810] ss:$8 sps:$4 sm:$0xff]  }
 0x169   : > { %3846 = vmatpush1.bf16.msra.mxu1 %v5001_v63  ;;  %v5088_v63 = vld [vmem:[%s6131_s5 + $0x324] ss:$8 sps:$4 sm:$0xff]  }
 0x16a   : > { %4051 = vmatpush1.bf16.msra.mxu0 %v5004_v0  ;;  %3847 = vmatprep.subr.bf16.mxu1 %v5009_v1  ;;  %v5091_v0 = vld [vmem:[%s6131_s5 + $0x824] ss:$8 sps:$4 sm:$0xff]   ;;  %v5086_v1 = vld [vmem:[%s6131_s5 + $0x320] ss:$8 sps:$4 sm:$0xff]  }
 0x16b   : > { %4052 = vmatprep.subr.bf16.mxu0 %v5012_v3  ;;  %v5097_v3 = vld [vmem:[%s6131_s5 + $0x834] ss:$8 sps:$4 sm:$0xff]  }
 0x16d   : > { %3848 = vmatpush1.bf16.msra.mxu1 %v5007_v4  ;;  %v5092_v4 = vld [vmem:[%s6131_s5 + $0x330] ss:$8 sps:$4 sm:$0xff]  }
 0x16e   : > { %4053 = vmatpush1.bf16.msra.mxu0 %v5010_v5  ;;  %3849 = vmatprep.subr.bf16.mxu1 %v5015_v6  ;;  %v5095_v5 = vld [vmem:[%s6131_s5 + $0x830] ss:$8 sps:$4 sm:$0xff]   ;;  %v5100_v6 = vld [vmem:[%s6131_s5 + $0x344] ss:$8 sps:$4 sm:$0xff]  }
 0x16f   : > { %4054 = vmatprep.subr.bf16.mxu0 %v5018_v7  ;;  %v5103_v7 = vld [vmem:[%s6131_s5 + $0x844] ss:$8 sps:$4 sm:$0xff]  }
 0x171   : > { %3850 = vmatpush1.bf16.msra.mxu1 %v5013_v8  ;;  %v5098_v8 = vld [vmem:[%s6131_s5 + $0x340] ss:$8 sps:$4 sm:$0xff]  }
 0x172   : > { %4055 = vmatpush1.bf16.msra.mxu0 %v5016_v9  ;;  %3851 = vmatprep.subr.bf16.mxu1 %v5021_v10  ;;  %v5101_v9 = vld [vmem:[%s6131_s5 + $0x840] ss:$8 sps:$4 sm:$0xff]   ;;  %v5106_v10 = vld [vmem:[%s6131_s5 + $0x354] ss:$8 sps:$4 sm:$0xff]  }
 0x173   : > { %4056 = vmatprep.subr.bf16.mxu0 %v5024_v11  ;;  %v5109_v11 = vld [vmem:[%s6131_s5 + $0x854] ss:$8 sps:$4 sm:$0xff]  }
 0x175   : > { %3852 = vmatpush1.bf16.msra.mxu1 %v5019_v12  ;;  %v5104_v12 = vld [vmem:[%s6131_s5 + $0x350] ss:$8 sps:$4 sm:$0xff]  }
 0x176   : > { %4057 = vmatpush1.bf16.msra.mxu0 %v5022_v13  ;;  %3853 = vmatprep.subr.bf16.mxu1 %v5027_v14  ;;  %v5107_v13 = vld [vmem:[%s6131_s5 + $0x850] ss:$8 sps:$4 sm:$0xff]   ;;  %v5112_v14 = vld [vmem:[%s6131_s5 + $0x364] ss:$8 sps:$4 sm:$0xff]  }
 0x177   : > { %4058 = vmatprep.subr.bf16.mxu0 %v5030_v15  ;;  %v5115_v15 = vld [vmem:[%s6131_s5 + $0x864] ss:$8 sps:$4 sm:$0xff]  }
 0x179   : > { %3854 = vmatpush1.bf16.msra.mxu1 %v5025_v16  ;;  %v5110_v16 = vld [vmem:[%s6131_s5 + $0x360] ss:$8 sps:$4 sm:$0xff]  }
 0x17a   : > { %4059 = vmatpush1.bf16.msra.mxu0 %v5028_v17  ;;  %3855 = vmatprep.subr.bf16.mxu1 %v5033_v18  ;;  %v5113_v17 = vld [vmem:[%s6131_s5 + $0x860] ss:$8 sps:$4 sm:$0xff]   ;;  %v5118_v18 = vld [vmem:[%s6131_s5 + $0x374] ss:$8 sps:$4 sm:$0xff]  }
 0x17b   : > { %4060 = vmatprep.subr.bf16.mxu0 %v5036_v19  ;;  %v5121_v19 = vld [vmem:[%s6131_s5 + $0x874] ss:$8 sps:$4 sm:$0xff]  }
 0x17d   : > { %3856 = vmatpush1.bf16.msra.mxu1 %v5031_v20  ;;  %v5116_v20 = vld [vmem:[%s6131_s5 + $0x370] ss:$8 sps:$4 sm:$0xff]  }
 0x17e   : > { %4061 = vmatpush1.bf16.msra.mxu0 %v5034_v21  ;;  %3857 = vmatprep.subr.bf16.mxu1 %v5039_v22  ;;  %v5119_v21 = vld [vmem:[%s6131_s5 + $0x870] ss:$8 sps:$4 sm:$0xff]   ;;  %v5124_v22 = vld [vmem:[%s6131_s5 + $0x384] ss:$8 sps:$4 sm:$0xff]  }
 0x17f   : > { %4062 = vmatprep.subr.bf16.mxu0 %v5042_v23  ;;  %v5127_v23 = vld [vmem:[%s6131_s5 + $0x884] ss:$8 sps:$4 sm:$0xff]  }
 0x181   : > { %3858 = vmatpush1.bf16.msra.mxu1 %v5037_v24  ;;  %v5122_v24 = vld [vmem:[%s6131_s5 + $0x380] ss:$8 sps:$4 sm:$0xff]  }
 0x182   : > { %4063 = vmatpush1.bf16.msra.mxu0 %v5040_v25  ;;  %3859 = vmatprep.subr.bf16.mxu1 %v5045_v26  ;;  %v5125_v25 = vld [vmem:[%s6131_s5 + $0x880] ss:$8 sps:$4 sm:$0xff]   ;;  %v5130_v26 = vld [vmem:[%s6131_s5 + $0x394] ss:$8 sps:$4 sm:$0xff]  }
 0x183   : > { %4064 = vmatprep.subr.bf16.mxu0 %v5048_v27  ;;  %v5133_v27 = vld [vmem:[%s6131_s5 + $0x894] ss:$8 sps:$4 sm:$0xff]  }
 0x185   : > { %3860 = vmatpush1.bf16.msra.mxu1 %v5043_v28  ;;  %v5128_v28 = vld [vmem:[%s6131_s5 + $0x390] ss:$8 sps:$4 sm:$0xff]  }
 0x186   : > { %4065 = vmatpush1.bf16.msra.mxu0 %v5046_v29  ;;  %3861 = vmatprep.subr.bf16.mxu1 %v5051_v30  ;;  %v5131_v29 = vld [vmem:[%s6131_s5 + $0x890] ss:$8 sps:$4 sm:$0xff]   ;;  %v5136_v30 = vld [vmem:[%s6131_s5 + $0x3a4] ss:$8 sps:$4 sm:$0xff]  }
 0x187   : > { %4066 = vmatprep.subr.bf16.mxu0 %v5054_v31  ;;  %v5139_v31 = vld [vmem:[%s6131_s5 + $0x8a4] ss:$8 sps:$4 sm:$0xff]  }
 0x189   : > { %3862 = vmatpush1.bf16.msra.mxu1 %v5049_v32  ;;  %v5134_v32 = vld [vmem:[%s6131_s5 + $0x3a0] ss:$8 sps:$4 sm:$0xff]  }
 0x18a   : > { %4067 = vmatpush1.bf16.msra.mxu0 %v5052_v34  ;;  %3863 = vmatprep.subr.bf16.mxu1 %v5057_v35  ;;  %v5137_v34 = vld [vmem:[%s6131_s5 + $0x8a0] ss:$8 sps:$4 sm:$0xff]   ;;  %v5142_v35 = vld [vmem:[%s6131_s5 + $0x3b4] ss:$8 sps:$4 sm:$0xff]  }
 0x18b   : > { %4068 = vmatprep.subr.bf16.mxu0 %v5060_v36  ;;  %v5145_v36 = vld [vmem:[%s6131_s5 + $0x8b4] ss:$8 sps:$4 sm:$0xff]  }
 0x18d   : > { %3864 = vmatpush1.bf16.msra.mxu1 %v5055_v37  ;;  %v5140_v37 = vld [vmem:[%s6131_s5 + $0x3b0] ss:$8 sps:$4 sm:$0xff]  }
 0x18e   : > { %4069 = vmatpush1.bf16.msra.mxu0 %v5058_v38  ;;  %3865 = vmatprep.subr.bf16.mxu1 %v5063_v39  ;;  %v5143_v38 = vld [vmem:[%s6131_s5 + $0x8b0] ss:$8 sps:$4 sm:$0xff]   ;;  %v5148_v39 = vld [vmem:[%s6131_s5 + $0x3c4] ss:$8 sps:$4 sm:$0xff]  }
 0x18f   : > { %4070 = vmatprep.subr.bf16.mxu0 %v5066_v40  ;;  %v5151_v40 = vld [vmem:[%s6131_s5 + $0x8c4] ss:$8 sps:$4 sm:$0xff]  }
 0x191   : > { %3866 = vmatpush1.bf16.msra.mxu1 %v5061_v41  ;;  %v5146_v41 = vld [vmem:[%s6131_s5 + $0x3c0] ss:$8 sps:$4 sm:$0xff]  }
 0x192   : > { %4071 = vmatpush1.bf16.msra.mxu0 %v5064_v43  ;;  %3867 = vmatprep.subr.bf16.mxu1 %v5069_v44  ;;  %v5149_v43 = vld [vmem:[%s6131_s5 + $0x8c0] ss:$8 sps:$4 sm:$0xff]   ;;  %v5154_v44 = vld [vmem:[%s6131_s5 + $0x3d4] ss:$8 sps:$4 sm:$0xff]  }
 0x193   : > { %4072 = vmatprep.subr.bf16.mxu0 %v5072_v45  ;;  %v5157_v45 = vld [vmem:[%s6131_s5 + $0x8d4] ss:$8 sps:$4 sm:$0xff]  }
 0x195   : > { %3868 = vmatpush1.bf16.msra.mxu1 %v5067_v46  ;;  %v5152_v46 = vld [vmem:[%s6131_s5 + $0x3d0] ss:$8 sps:$4 sm:$0xff]  }
 0x196   : > { %4073 = vmatpush1.bf16.msra.mxu0 %v5070_v51  ;;  %3878 = vmatprep.subr.bf16.mxu1 %v5075_v52  ;;  %v5160_v51 = vld [vmem:[%s6131_s5 + $0x3e4] ss:$8 sps:$4 sm:$0xff]  }
 0x197   : > { %4083 = vmatprep.subr.bf16.mxu0 %v5079_v53  ;;  %v5163_v52 = vld [vmem:[%s6131_s5 + $0x8e4] ss:$8 sps:$4 sm:$0xff]   ;;  %v5158_v53 = vld [vmem:[%s6131_s5 + $0x3e0] ss:$8 sps:$4 sm:$0xff]  }
 0x198   : > { %3870 = vmatmul.mubr.bf16.vlgmr.msra.gmra.mrb[0].mxu1 %v6301_v48  ;;  %v5094_v48 = vld [vmem:[%s6131_s5 + $0x334] ss:$8 sps:$4 sm:$0xff]  }
 0x199   : > { %4075 = vmatmul.mubr.bf16.vlgmr.msra.gmra.mrb[0].mxu0 %v6290_v42  ;;  %3879 = vmatpush1.bf16.msra.mxu1 %v5073_v47  ;;  %v5089_v42 = vld [vmem:[%s6131_s5 + $0x820] ss:$8 sps:$4 sm:$0xff]  }
 0x19a   : > { %4084 = vmatpush1.bf16.msra.mxu0 %v5077_v55  ;;  %3880 = vmatprep.subr.bf16.mxu1 %v5082_v56  ;;  %v5161_v47 = vld [vmem:[%s6131_s5 + $0x8e0] ss:$8 sps:$4 sm:$0xff]   ;;  %v5166_v55 = vld [vmem:[%s6131_s5 + $0x3f4] ss:$8 sps:$4 sm:$0xff]  }
 0x19b   : > { %4085 = vmatprep.subr.bf16.mxu0 %v5085_v57  ;;  %3910 = vmatprep.mubr.bf16.mxu1 %v1995_v58  ;;  %v5169_v56 = vld [vmem:[%s6131_s5 + $0x8f4] ss:$8 sps:$4 sm:$0xff]   ;;  %v2030_v57 = vcombine.high %v6369_v50, %v6369_v50  ;;  %v5164_v58 = vld [vmem:[%s6131_s5 + $0x3f0] ss:$8 sps:$4 sm:$0xff]   ;;  %v5171_v50 = vld [vmem:[%s6131_s5 + $0x400] ss:$8 sps:$4 sm:$0xff]  }
 0x19c   : > { %4115 = vmatprep.mubr.bf16.mxu0 %v2045_v59  ;;  %v5167_v59 = vld [vmem:[%s6131_s5 + $0x8f0] ss:$8 sps:$4 sm:$0xff]  }
 0x19d   : > { %3881 = vmatpush1.bf16.msra.mxu1 %v5080_v61  ;;  %v5173_v61 = vld [vmem:[%s6131_s5 + $0x404] ss:$8 sps:$4 sm:$0xff]  }
 0x19e   : > { %4086 = vmatpush1.bf16.msra.mxu0 %v5083_v62  ;;  %3882 = vmatprep.subr.bf16.mxu1 %v5088_v63  ;;  %v5176_v62 = vld [vmem:[%s6131_s5 + $0x904] ss:$8 sps:$4 sm:$0xff]  }
 0x19f   : > { %4087 = vmatprep.subr.bf16.mxu0 %v5091_v0  ;;  %v6454_v63 = vld.sshfl [vmem:[%s6119_s26 + $0x10] sm:$0xff pattern:$0x76325410]  ;;  %v6457_v0 = vrot.slane %v2030_v57, %v6181_v2  ;;  %v5177_v2 = vld [vmem:[%s6131_s5 + $0x410] ss:$8 sps:$4 sm:$0xff]  }
 0x1a0   : > { %v5257_v57 = vld [vmem:[%s6131_s5 + $0x4e4] ss:$8 sps:$4 sm:$0xff]  }
 0x1a1   : > { %3883 = vmatpush1.bf16.msra.mxu1 %v5086_v1  ;;  %v5174_v1 = vld [vmem:[%s6131_s5 + $0x900] ss:$8 sps:$4 sm:$0xff]  }
 0x1a2   : > { %4088 = vmatpush1.bf16.msra.mxu0 %v5089_v42  ;;  %3884 = vmatprep.subr.bf16.mxu1 %v5094_v48  ;;  %v5179_v42 = vld [vmem:[%s6131_s5 + $0x414] ss:$8 sps:$4 sm:$0xff]  }
 0x1a3   : > { %4089 = vmatprep.subr.bf16.mxu0 %v5097_v3  ;;  %v5182_v48 = vld [vmem:[%s6131_s5 + $0x914] ss:$8 sps:$4 sm:$0xff]   ;;  %v2011_v3 = vcombine.high %v6454_v63, %v6454_v63 }
 0x1a5   : > { %3885 = vmatpush1.bf16.msra.mxu1 %v5092_v4  ;;  %v2046_v4 = vcombine.high %v6457_v0, %v6457_v0 }
 0x1a6   : > { %4090 = vmatpush1.bf16.msra.mxu0 %v5095_v5  ;;  %3886 = vmatprep.subr.bf16.mxu1 %v5100_v6  ;;  %v5180_v5 = vld [vmem:[%s6131_s5 + $0x910] ss:$8 sps:$4 sm:$0xff]   ;;  %v5185_v6 = vld [vmem:[%s6131_s5 + $0x424] ss:$8 sps:$4 sm:$0xff]  }
 0x1a7   : > { %4091 = vmatprep.subr.bf16.mxu0 %v5103_v7  ;;  %v5188_v7 = vld [vmem:[%s6131_s5 + $0x924] ss:$8 sps:$4 sm:$0xff]  }
 0x1a9   : > { %3887 = vmatpush1.bf16.msra.mxu1 %v5098_v8  ;;  %v5191_v8 = vld [vmem:[%s6131_s5 + $0x434] ss:$8 sps:$4 sm:$0xff]  }
 0x1aa   : > { %4092 = vmatpush1.bf16.msra.mxu0 %v5101_v9  ;;  %3888 = vmatprep.subr.bf16.mxu1 %v5106_v10  ;;  %v5194_v9 = vld [vmem:[%s6131_s5 + $0x934] ss:$8 sps:$4 sm:$0xff]   ;;  %v5189_v10 = vld [vmem:[%s6131_s5 + $0x430] ss:$8 sps:$4 sm:$0xff]  }
 0x1ab   : > { %4093 = vmatprep.subr.bf16.mxu0 %v5109_v11  ;;  %v5192_v11 = vld [vmem:[%s6131_s5 + $0x930] ss:$8 sps:$4 sm:$0xff]  }
 0x1ad   : > { %3889 = vmatpush1.bf16.msra.mxu1 %v5104_v12  ;;  %v5197_v12 = vld [vmem:[%s6131_s5 + $0x444] ss:$8 sps:$4 sm:$0xff]  }
 0x1ae   : > { %4094 = vmatpush1.bf16.msra.mxu0 %v5107_v13  ;;  %3890 = vmatprep.subr.bf16.mxu1 %v5112_v14  ;;  %v5200_v13 = vld [vmem:[%s6131_s5 + $0x944] ss:$8 sps:$4 sm:$0xff]   ;;  %v5195_v14 = vld [vmem:[%s6131_s5 + $0x440] ss:$8 sps:$4 sm:$0xff]  }
 0x1af   : > { %4095 = vmatprep.subr.bf16.mxu0 %v5115_v15  ;;  %v5198_v15 = vld [vmem:[%s6131_s5 + $0x940] ss:$8 sps:$4 sm:$0xff]  }
 0x1b1   : > { %3891 = vmatpush1.bf16.msra.mxu1 %v5110_v16  ;;  %v5203_v16 = vld [vmem:[%s6131_s5 + $0x454] ss:$8 sps:$4 sm:$0xff]  }
 0x1b2   : > { %4096 = vmatpush1.bf16.msra.mxu0 %v5113_v17  ;;  %3892 = vmatprep.subr.bf16.mxu1 %v5118_v18  ;;  %v5206_v17 = vld [vmem:[%s6131_s5 + $0x954] ss:$8 sps:$4 sm:$0xff]   ;;  %v5201_v18 = vld [vmem:[%s6131_s5 + $0x450] ss:$8 sps:$4 sm:$0xff]  }
 0x1b3   : > { %4097 = vmatprep.subr.bf16.mxu0 %v5121_v19  ;;  %v5204_v19 = vld [vmem:[%s6131_s5 + $0x950] ss:$8 sps:$4 sm:$0xff]  }
 0x1b5   : > { %3893 = vmatpush1.bf16.msra.mxu1 %v5116_v20  ;;  %v5209_v20 = vld [vmem:[%s6131_s5 + $0x464] ss:$8 sps:$4 sm:$0xff]  }
 0x1b6   : > { %4098 = vmatpush1.bf16.msra.mxu0 %v5119_v21  ;;  %3894 = vmatprep.subr.bf16.mxu1 %v5124_v22  ;;  %v5212_v21 = vld [vmem:[%s6131_s5 + $0x964] ss:$8 sps:$4 sm:$0xff]   ;;  %v5207_v22 = vld [vmem:[%s6131_s5 + $0x460] ss:$8 sps:$4 sm:$0xff]  }
 0x1b7   : > { %4099 = vmatprep.subr.bf16.mxu0 %v5127_v23  ;;  %v5210_v23 = vld [vmem:[%s6131_s5 + $0x960] ss:$8 sps:$4 sm:$0xff]  }
 0x1b9   : > { %3895 = vmatpush1.bf16.msra.mxu1 %v5122_v24  ;;  %v5215_v24 = vld [vmem:[%s6131_s5 + $0x474] ss:$8 sps:$4 sm:$0xff]  }
 0x1ba   : > { %4100 = vmatpush1.bf16.msra.mxu0 %v5125_v25  ;;  %3896 = vmatprep.subr.bf16.mxu1 %v5130_v26  ;;  %v5218_v25 = vld [vmem:[%s6131_s5 + $0x974] ss:$8 sps:$4 sm:$0xff]   ;;  %v5213_v26 = vld [vmem:[%s6131_s5 + $0x470] ss:$8 sps:$4 sm:$0xff]  }
 0x1bb   : > { %4101 = vmatprep.subr.bf16.mxu0 %v5133_v27  ;;  %v5216_v27 = vld [vmem:[%s6131_s5 + $0x970] ss:$8 sps:$4 sm:$0xff]  }
 0x1bd   : > { %3897 = vmatpush1.bf16.msra.mxu1 %v5128_v28  ;;  %v5221_v28 = vld [vmem:[%s6131_s5 + $0x484] ss:$8 sps:$4 sm:$0xff]  }
 0x1be   : > { %4102 = vmatpush1.bf16.msra.mxu0 %v5131_v29  ;;  %3898 = vmatprep.subr.bf16.mxu1 %v5136_v30  ;;  %v5224_v29 = vld [vmem:[%s6131_s5 + $0x984] ss:$8 sps:$4 sm:$0xff]   ;;  %v5219_v30 = vld [vmem:[%s6131_s5 + $0x480] ss:$8 sps:$4 sm:$0xff]  }
 0x1bf   : > { %4103 = vmatprep.subr.bf16.mxu0 %v5139_v31  ;;  %v5222_v31 = vld [vmem:[%s6131_s5 + $0x980] ss:$8 sps:$4 sm:$0xff]  }
 0x1c1   : > { %3899 = vmatpush1.bf16.msra.mxu1 %v5134_v32  ;;  %v5227_v32 = vld [vmem:[%s6131_s5 + $0x494] ss:$8 sps:$4 sm:$0xff]  }
 0x1c2   : > { %4104 = vmatpush1.bf16.msra.mxu0 %v5137_v34  ;;  %3900 = vmatprep.subr.bf16.mxu1 %v5142_v35  ;;  %v5230_v34 = vld [vmem:[%s6131_s5 + $0x994] ss:$8 sps:$4 sm:$0xff]   ;;  %v5225_v35 = vld [vmem:[%s6131_s5 + $0x490] ss:$8 sps:$4 sm:$0xff]  }
 0x1c3   : > { %4105 = vmatprep.subr.bf16.mxu0 %v5145_v36  ;;  %v5228_v36 = vld [vmem:[%s6131_s5 + $0x990] ss:$8 sps:$4 sm:$0xff]  }
 0x1c5   : > { %3901 = vmatpush1.bf16.msra.mxu1 %v5140_v37  ;;  %v5233_v37 = vld [vmem:[%s6131_s5 + $0x4a4] ss:$8 sps:$4 sm:$0xff]  }
 0x1c6   : > { %4106 = vmatpush1.bf16.msra.mxu0 %v5143_v38  ;;  %3902 = vmatprep.subr.bf16.mxu1 %v5148_v39  ;;  %v5236_v38 = vld [vmem:[%s6131_s5 + $0x9a4] ss:$8 sps:$4 sm:$0xff]   ;;  %v5231_v39 = vld [vmem:[%s6131_s5 + $0x4a0] ss:$8 sps:$4 sm:$0xff]  }
 0x1c7   : > { %4107 = vmatprep.subr.bf16.mxu0 %v5151_v40  ;;  %v5234_v40 = vld [vmem:[%s6131_s5 + $0x9a0] ss:$8 sps:$4 sm:$0xff]  }
 0x1c9   : > { %3903 = vmatpush1.bf16.msra.mxu1 %v5146_v41  ;;  %v5239_v41 = vld [vmem:[%s6131_s5 + $0x4b4] ss:$8 sps:$4 sm:$0xff]  }
 0x1ca   : > { %4108 = vmatpush1.bf16.msra.mxu0 %v5149_v43  ;;  %3904 = vmatprep.subr.bf16.mxu1 %v5154_v44  ;;  %v5242_v43 = vld [vmem:[%s6131_s5 + $0x9b4] ss:$8 sps:$4 sm:$0xff]   ;;  %v5237_v44 = vld [vmem:[%s6131_s5 + $0x4b0] ss:$8 sps:$4 sm:$0xff]  }
 0x1cb   : > { %4109 = vmatprep.subr.bf16.mxu0 %v5157_v45  ;;  %v5240_v45 = vld [vmem:[%s6131_s5 + $0x9b0] ss:$8 sps:$4 sm:$0xff]  }
 0x1cd   : > { %3905 = vmatpush1.bf16.msra.mxu1 %v5152_v46  ;;  %v5245_v46 = vld [vmem:[%s6131_s5 + $0x4c4] ss:$8 sps:$4 sm:$0xff]  }
 0x1ce   : > { %4110 = vmatpush1.bf16.msra.mxu0 %v5155_v49  ;;  %3906 = vmatprep.subr.bf16.mxu1 %v5160_v51  ;;  %v5248_v49 = vld [vmem:[%s6131_s5 + $0x9c4] ss:$8 sps:$4 sm:$0xff]   ;;  %v5243_v51 = vld [vmem:[%s6131_s5 + $0x4c0] ss:$8 sps:$4 sm:$0xff]  }
 0x1cf   : > { %4111 = vmatprep.subr.bf16.mxu0 %v5163_v52  ;;  %v5246_v52 = vld [vmem:[%s6131_s5 + $0x9c0] ss:$8 sps:$4 sm:$0xff]  }
 0x1d1   : > { %3907 = vmatpush1.bf16.msra.mxu1 %v5158_v53  ;;  %v5251_v53 = vld [vmem:[%s6131_s5 + $0x4d4] ss:$8 sps:$4 sm:$0xff]  }
 0x1d2   : > { %4112 = vmatpush1.bf16.msra.mxu0 %v5161_v47  ;;  %3908 = vmatprep.subr.bf16.mxu1 %v5166_v55  ;;  %v5254_v47 = vld [vmem:[%s6131_s5 + $0x9d4] ss:$8 sps:$4 sm:$0xff]   ;;  %v5249_v55 = vld [vmem:[%s6131_s5 + $0x4d0] ss:$8 sps:$4 sm:$0xff]  }
 0x1d3   : > { %4113 = vmatprep.subr.bf16.mxu0 %v5169_v56  ;;  %v5252_v56 = vld [vmem:[%s6131_s5 + $0x9d0] ss:$8 sps:$4 sm:$0xff]  }
 0x1d5   : > { %3909 = vmatpush1.bf16.msra.mxu1 %v5164_v58  ;;  %v5260_v58 = vld [vmem:[%s6131_s5 + $0x9e4] ss:$8 sps:$4 sm:$0xff]  }
 0x1d6   : > { %4114 = vmatpush1.bf16.msra.mxu0 %v5167_v59  ;;  %3919 = vmatprep.subr.bf16.mxu1 %v5173_v61  ;;  %v5255_v59 = vld [vmem:[%s6131_s5 + $0x4e0] ss:$8 sps:$4 sm:$0xff]  }
 0x1d7   : > { %4124 = vmatprep.subr.bf16.mxu0 %v5176_v62  ;;  %v5258_v61 = vld [vmem:[%s6131_s5 + $0x9e0] ss:$8 sps:$4 sm:$0xff]   ;;  %v5263_v62 = vld [vmem:[%s6131_s5 + $0x4f4] ss:$8 sps:$4 sm:$0xff]  }
 0x1d8   : > { %3911 = vmatmul.mubr.bf16.vlgmr.msra.gmra.mrb[0].mxu1 %v6375_v54  ;;  %v5183_v54 = vld [vmem:[%s6131_s5 + $0x420] ss:$8 sps:$4 sm:$0xff]  }
 0x1d9   : > { %4116 = vmatmul.mubr.bf16.vlgmr.msra.gmra.mrb[0].mxu0 %v6379_v33  ;;  %3920 = vmatpush1.bf16.msra.mxu1 %v5171_v50  ;;  %v5186_v33 = vld [vmem:[%s6131_s5 + $0x920] ss:$8 sps:$4 sm:$0xff]   ;;  %v5266_v50 = vld [vmem:[%s6131_s5 + $0x9f4] ss:$8 sps:$4 sm:$0xff]  }
 0x1da   : > { %4125 = vmatpush1.bf16.msra.mxu0 %v5174_v1  ;;  %3921 = vmatprep.subr.bf16.mxu1 %v5179_v42  ;;  %v5261_v1 = vld [vmem:[%s6131_s5 + $0x4f0] ss:$8 sps:$4 sm:$0xff]  }
 0x1db   : > { %4126 = vmatprep.subr.bf16.mxu0 %v5182_v48  ;;  %3951 = vmatprep.mubr.bf16.mxu1 %v2011_v3  ;;  %v5264_v42 = vld [vmem:[%s6131_s5 + $0x9f0] ss:$8 sps:$4 sm:$0xff]   ;;  %v5270_v48 = vld [vmem:[%s6131_s5 + $0xa04] ss:$8 sps:$4 sm:$0xff]   ;;  %v5268_v3 = vld [vmem:[%s6131_s5 + $0xa00] ss:$8 sps:$4 sm:$0xff]  }
 0x1dc   : > { %4156 = vmatprep.mubr.bf16.mxu0 %v2046_v4  ;;  %v5273_v4 = vld [vmem:[%s6131_s5 + $0xa14] ss:$8 sps:$4 sm:$0xff]  }
 0x1dd   : > { %3922 = vmatpush1.bf16.msra.mxu1 %v5177_v2  ;;  %v5271_v2 = vld [vmem:[%s6131_s5 + $0xa10] ss:$8 sps:$4 sm:$0xff]  }
 0x1de   : > { %4127 = vmatpush1.bf16.msra.mxu0 %v5180_v5  ;;  %3923 = vmatprep.subr.bf16.mxu1 %v5185_v6  ;;  %v5352_v5 = vmov 0   ;;  %v5276_v6 = vld [vmem:[%s6131_s5 + $0xa24] ss:$8 sps:$4 sm:$0xff]  }
 0x1df   : > { %4128 = vmatprep.subr.bf16.mxu0 %v5188_v7  ;;  %v5274_v7 = vld [vmem:[%s6131_s5 + $0xa20] ss:$8 sps:$4 sm:$0xff]  }
 0x1e1   : > { %3924 = vmatpush1.bf16.msra.mxu1 %v5183_v54  ;;  %v5279_v54 = vld [vmem:[%s6131_s5 + $0xa34] ss:$8 sps:$4 sm:$0xff]  }
 0x1e2   : > { %4129 = vmatpush1.bf16.msra.mxu0 %v5186_v33  ;;  %3925 = vmatprep.subr.bf16.mxu1 %v5191_v8  ;;  %v5280_v33 = vld [vmem:[%s6131_s5 + $0xa40] ss:$8 sps:$4 sm:$0xff]   ;;  %v5285_v8 = vld [vmem:[%s6131_s5 + $0xa54] ss:$8 sps:$4 sm:$0xff]  }
 0x1e3   : > { %4130 = vmatprep.subr.bf16.mxu0 %v5194_v9  ;;  %v5283_v9 = vld [vmem:[%s6131_s5 + $0xa50] ss:$8 sps:$4 sm:$0xff]  }
 0x1e5   : > { %3926 = vmatpush1.bf16.msra.mxu1 %v5189_v10  ;;  %v5288_v10 = vld [vmem:[%s6131_s5 + $0xa64] ss:$8 sps:$4 sm:$0xff]  }
 0x1e6   : > { %4131 = vmatpush1.bf16.msra.mxu0 %v5192_v11  ;;  %3927 = vmatprep.subr.bf16.mxu1 %v5197_v12  ;;  %v5286_v11 = vld [vmem:[%s6131_s5 + $0xa60] ss:$8 sps:$4 sm:$0xff]   ;;  %v5291_v12 = vld [vmem:[%s6131_s5 + $0xa74] ss:$8 sps:$4 sm:$0xff]  }
 0x1e7   : > { %4132 = vmatprep.subr.bf16.mxu0 %v5200_v13  ;;  %v5289_v13 = vld [vmem:[%s6131_s5 + $0xa70] ss:$8 sps:$4 sm:$0xff]  }
 0x1e9   : > { %3928 = vmatpush1.bf16.msra.mxu1 %v5195_v14  ;;  %v4343_v14 = vld.sshfl [vmem:[%s6119_s26 + $0x28] sm:$0x3 pattern:$0x76325410] }
 0x1ea   : > { %4133 = vmatpush1.bf16.msra.mxu0 %v5198_v15  ;;  %3929 = vmatprep.subr.bf16.mxu1 %v5203_v16 }
 0x1eb   : > { %4134 = vmatprep.subr.bf16.mxu0 %v5206_v17 }
 0x1ed   : > { %3930 = vmatpush1.bf16.msra.mxu1 %v5201_v18 }
 0x1ee   : > { %4135 = vmatpush1.bf16.msra.mxu0 %v5204_v19  ;;  %3931 = vmatprep.subr.bf16.mxu1 %v5209_v20 }
 0x1ef   : > { %4136 = vmatprep.subr.bf16.mxu0 %v5212_v21 }
 0x1f1   : > { %3932 = vmatpush1.bf16.msra.mxu1 %v5207_v22 }
 0x1f2   : > { %4137 = vmatpush1.bf16.msra.mxu0 %v5210_v23  ;;  %3933 = vmatprep.subr.bf16.mxu1 %v5215_v24  ;;  %v1613_v24 = vld [vmem:[#allocation2] sm:$0xff] }
 0x1f3   : > { %4138 = vmatprep.subr.bf16.mxu0 %v5218_v25 }
 0x1f5   : > { %3934 = vmatpush1.bf16.msra.mxu1 %v5213_v26 }
 0x1f6   : > { %4139 = vmatpush1.bf16.msra.mxu0 %v5216_v27  ;;  %3935 = vmatprep.subr.bf16.mxu1 %v5221_v28  ;;  %v4217_v28 = vld [vmem:[%s1599_s12] sm:$0x3] (!%p4680_p13) }
 0x1f7   : > { %4140 = vmatprep.subr.bf16.mxu0 %v5224_v29  ;;  %v4221_v29 = vsub.s32 (!%p4680_p13), 0, %v6173_v60 }
 0x1f9   : > { %3936 = vmatpush1.bf16.msra.mxu1 %v5219_v30  ;;  %v4225_v30 = vsub.s32 (!%p4680_p13), 1, %v6173_v60 }
 0x1fa   : > { %4141 = vmatpush1.bf16.msra.mxu0 %v5222_v31  ;;  %3937 = vmatprep.subr.bf16.mxu1 %v5227_v32  ;;  %v4222_v31 = vrot.slane (!%p4680_p13), %v4217_v28, %v4221_v29 }
 0x1fb   : > { %4142 = vmatprep.subr.bf16.mxu0 %v5230_v34  ;;  %v4226_v32 = vrot.slane (!%p4680_p13), %v4217_v28, %v4225_v30 }
 0x1fd   : > { %3938 = vmatpush1.bf16.msra.mxu1 %v5225_v35  ;;  %v4227_v35 = vcombine.low (!%p4680_p13), %v4222_v31, %v4226_v32 }
 0x1fe   : > { %4143 = vmatpush1.bf16.msra.mxu0 %v5228_v36  ;;  %3939 = vmatprep.subr.bf16.mxu1 %v5233_v37 }
 0x1ff   : > { %4144 = vmatprep.subr.bf16.mxu0 %v5236_v38 }
 0x201   : > { %3940 = vmatpush1.bf16.msra.mxu1 %v5231_v39 }
 0x202   : > { %4145 = vmatpush1.bf16.msra.mxu0 %v5234_v40  ;;  %3941 = vmatprep.subr.bf16.mxu1 %v5239_v41 }
 0x203   : > { %4146 = vmatprep.subr.bf16.mxu0 %v5242_v43 }
 0x205   : > { %3942 = vmatpush1.bf16.msra.mxu1 %v5237_v44 }
 0x206   : > { %4147 = vmatpush1.bf16.msra.mxu0 %v5240_v45  ;;  %3943 = vmatprep.subr.bf16.mxu1 %v5245_v46 }
 0x207   : > { %4148 = vmatprep.subr.bf16.mxu0 %v5248_v49 }
 0x209   : > { %3944 = vmatpush1.bf16.msra.mxu1 %v5243_v51 }
 0x20a   : > { %4149 = vmatpush1.bf16.msra.mxu0 %v5246_v52  ;;  %3945 = vmatprep.subr.bf16.mxu1 %v5251_v53 }
 0x20b   : > { %4150 = vmatprep.subr.bf16.mxu0 %v5254_v47 }
 0x20d   : > { %3946 = vmatpush1.bf16.msra.mxu1 %v5249_v55 }
 0x20e   : > { %4151 = vmatpush1.bf16.msra.mxu0 %v5252_v56  ;;  %3947 = vmatprep.subr.bf16.mxu1 %v5257_v57 }
 0x20f   : > { %4152 = vmatprep.subr.bf16.mxu0 %v5260_v58 }
 0x211   : > { %3948 = vmatpush1.bf16.msra.mxu1 %v5255_v59 }
 0x212   : > { %4153 = vmatpush1.bf16.msra.mxu0 %v5258_v61  ;;  %3949 = vmatprep.subr.bf16.mxu1 %v5263_v62 }
 0x213   : > { %4154 = vmatprep.subr.bf16.mxu0 %v5266_v50 }
 0x215   : > { %3950 = vmatpush1.bf16.msra.mxu1 %v5261_v1 }
 0x216   : > { %4155 = vmatpush1.bf16.msra.mxu0 %v5264_v42 }
 0x217   : > { %4165 = vmatprep.subr.bf16.mxu0 %v5270_v48 }
 0x218   : > { %3952 = vmatmul.mubr.bf16.vlgmr.msra.gmra.mrb[0].mxu1 %v6454_v63  ;;  %v5277_v63 = vld [vmem:[%s6131_s5 + $0xa30] ss:$8 sps:$4 sm:$0xff]  }
 0x219   : > { %4157 = vmatmul.mubr.bf16.vlgmr.msra.gmra.mrb[0].mxu0 %v6457_v0  ;;  %v5282_v0 = vld [vmem:[%s6131_s5 + $0xa44] ss:$8 sps:$4 sm:$0xff]  }
 0x21a   : > { %4166 = vmatpush1.bf16.msra.mxu0 %v5268_v3  ;;  %4197 = vmatprep.mubr.bf16.mxu0 %v5352_v5 }
 0x21b   : > { %4167 = vmatprep.subr.bf16.mxu0 %v5273_v4 }
 0x21e   : > { %4168 = vmatpush1.bf16.msra.mxu0 %v5271_v2 }
 0x21f   : > { %4169 = vmatprep.subr.bf16.mxu0 %v5276_v6 }
 0x222   : > { %4170 = vmatpush1.bf16.msra.mxu0 %v5274_v7 }
 0x223   : > { %4171 = vmatprep.subr.bf16.mxu0 %v5279_v54 }
 0x226   : > { %4172 = vmatpush1.bf16.msra.mxu0 %v5277_v63 }
 0x227   : > { %4173 = vmatprep.subr.bf16.mxu0 %v5282_v0 }
 0x22a   : > { %4174 = vmatpush1.bf16.msra.mxu0 %v5280_v33 }
 0x22b   : > { %4175 = vmatprep.subr.bf16.mxu0 %v5285_v8 }
 0x22e   : > { %4176 = vmatpush1.bf16.msra.mxu0 %v5283_v9 }
 0x22f   : > { %4177 = vmatprep.subr.bf16.mxu0 %v5288_v10 }
 0x232   : > { %4178 = vmatpush1.bf16.msra.mxu0 %v5286_v11 }
 0x233   : > { %4179 = vmatprep.subr.bf16.mxu0 %v5291_v12 }
 0x236   : > { %4180 = vmatpush1.bf16.msra.mxu0 %v5289_v13 }
 0x239   : > { %4198 = vmatmul.mubr.bf16.vlgmr.msra.gmra.mrb[0].mxu0 %v4343_v14 }
 0x2eb   : > { %v3953_v15 = vpop.f32.mrb[0].mxu1 }
 0x2ec   : > { %v3955_v16 = vpop.f32.mrb[1].mxu1 }
 0x2ed   : > { %v3957_v17 = vpop.f32.mrb[2].mxu1 }
 0x2ee   : > { %v3958_v18 = vpop.f32.mrb[3].mxu1 }
 0x30c   : > { %v4199_v19 = vpop.f32.mrb[0].mxu0 }
 0x30d   : > { %v4684_v20 = vadd.f32 %v4199_v19, %v3953_v15  ;;  %v4201_v21 = vpop.f32.mrb[1].mxu0 }
 0x30e   : > { %v4685_v22 = vadd.f32 %v4201_v21, %v3955_v16  ;;  %v4203_v23 = vpop.f32.mrb[2].mxu0  ;;  %4215 = sbr.rel (%p4680_p13) target bundleno = 801 (0x321), region = 78 }
 0x30f   : > { %v4204_v25 = vpop.f32.mrb[3].mxu0 }
 0x310   : > { %v4208_v26 = vcombine.low %v4684_v20, %v4685_v22 }
 0x312   : > { %v4210_v27 = vadd.f32 %v4208_v26, %v1613_v24 }
 0x314   : > { %4211 = vst [vmem:[#allocation2] sm:$0xff] %v4210_v27 }
 0x31b   : > { %v4216_v34 = vld [vmem:[#allocation2] sm:$0xff] }
 0x31c   : > { %v4229_v36 = vadd.f32 %v4227_v35, %v4216_v34 }
 0x31e   : > { %v4230_v37 = vmax.f32 %v4229_v36, 0.0 }
 0x320   : > { %4231 = vst [vmem:[%s6129_s4] sm:$0xff] %v4230_v37 }
 0x321 PF: > { %s13_s18 = sadd.s32 1, %s5348_s18   ;;  %s6580_s12 = smov %s5328_s13 }
 0x322   : > { %p10_p0 = scmp.ge.s32.totalorder %s13_s18, 16   ;;  %s6581_s13 = smov %s5424_s25 }
 0x323   : > { %s6582_s14 = smov %s5340_s16  ;;  %s6583_s15 = smov %s5344_s17 }
 0x324   : > { %s6584_s16 = smov %s6587_s19  ;;  %s6585_s17 = smov %s6591_s20 }
 0x325   :  { %12 = sbr.rel (!%p10_p0) target bundleno = 4 (0x4), region = 119 }

</bundles_post_ra>
